<compile_context>
chip_gen: v7x
topology: tpu7x:2x2x1
jax: 0.10.0
libtpu: 0.0.40
codegen_flags: <defaults>
</compile_context>

<pallas_src>
import functools

import jax
import jax.numpy as jnp
from jax.experimental import pallas as pl
from jax.experimental.pallas import tpu as pltpu

CHANNELS = 64
INP = 3
EPS = 1e-5
LANE = 128


def _round_up(x, m):
    return (x + m - 1) // m * m


def _pick_tile(n, candidates):
    for c in candidates:
        if n % c == 0:
            return c
    return n


@functools.lru_cache(maxsize=1)
def _vmem_limit_bytes():
    # Generation-aware scoped-VMEM limit (~60% of physical per-core VMEM).
    try:
        cap = int(pltpu.get_tpu_info().vmem_capacity_bytes)
    except Exception:
        cap = 64 * 1024 * 1024  # conservative (v7x-sized) fallback
    return min(int(cap * 0.6), 112 * 1024 * 1024)


# ----------------------------------------------------------------------------
# Kernel A: conv layers WITHOUT InstanceNorm (conv1 / conv5).
# Single K step: full padded weight slab is one VMEM block.
#   p_ref : (tm, Kp)     bf16 im2col patch tile
#   w_ref : (Kp, Coutp)  bf16 weight slab (constant block index -> loaded once)
#   o_ref : (tm, Coutp)  bf16 output tile
# ----------------------------------------------------------------------------
def _conv_act_kernel(p_ref, w_ref, o_ref, *, act):
    y = jnp.dot(p_ref[...], w_ref[...], preferred_element_type=jnp.float32)
    if act == "leaky":
        y = jnp.where(y >= 0.0, y, 0.2 * y)
    elif act == "sigmoid":
        # exp + approx reciprocal -> EUP slot, VALU stays free.
        y = pl.reciprocal(1.0 + jnp.exp(-y), approx=True)
    o_ref[...] = y.astype(o_ref.dtype)


# ----------------------------------------------------------------------------
# Kernel B: conv layers WITH InstanceNorm (conv2/3/4), LeakyReLU(0.2).
# The whole batch is folded into one MXU block (M = bn*P rows); per-sample
# statistics are computed in the f32 epilogue via a (bn, P, Coutp) reshape
# (two-pass: mean, then centered variance -> numerically stable).
#   p_ref : (1, bn*P, Kp) bf16, w_ref : (Kp, Coutp) bf16, o_ref : (1, bn*P, Coutp) bf16
# ----------------------------------------------------------------------------
def _conv_in_kernel(p_ref, w_ref, o_ref, *, bn, p, eps):
    x = p_ref[0]                                               # (bn*P, Kp) bf16
    y = jnp.dot(x, w_ref[...], preferred_element_type=jnp.float32)
    c = y.shape[-1]
    y = y.reshape(bn, p, c)                                    # per-sample view
    mean = jnp.mean(y, axis=1, keepdims=True)                  # (bn, 1, C)
    cen = y - mean
    var = jnp.mean(cen * cen, axis=1, keepdims=True)           # biased, like PyTorch
    y = cen * jax.lax.rsqrt(var + eps)                         # rsqrt -> EUP slot
    y = jnp.where(y >= 0.0, y, 0.2 * y)                        # LeakyReLU(0.2)
    o_ref[0] = y.reshape(bn * p, c).astype(o_ref.dtype)


# ----------------------------------------------------------------------------
# Glue: im2col with static slicing (XLA), kept entirely in bf16.
# ----------------------------------------------------------------------------
def _im2col(x, kh, kw, stride, pad):
    # x: (N, H, W, C) -> patches (N, OH*OW, kh*kw*C), ordering (kh, kw, C)
    n, h, w, c = x.shape
    xp = jnp.pad(x, ((0, 0), (pad, pad), (pad, pad), (0, 0)))
    oh = (h + 2 * pad - kh) // stride + 1
    ow = (w + 2 * pad - kw) // stride + 1
    cols = []
    for i in range(kh):
        for j in range(kw):
            cols.append(xp[:, i:i + stride * oh:stride, j:j + stride * ow:stride, :])
    patches = jnp.concatenate(cols, axis=-1)          # (N, OH, OW, kh*kw*C)
    return patches.reshape(n, oh * ow, kh * kw * c), oh, ow


def conv_layer(x, weight, *, stride, pad, instance_norm, act):
    """x: (N,H,W,Cin) bf16, weight: (Cout,Cin,kh,kw) f32 (PyTorch layout).

    Returns (N,OH,OW,Cout) bf16."""
    cout, cin, kh, kw = weight.shape
    patches, oh, ow = _im2col(x, kh, kw, stride, pad)  # bf16 (N, P, K)
    n, p, k = patches.shape

    kp = _round_up(k, LANE)            # lane-dense reduction dim (single K block)
    coutp = _round_up(cout, LANE)      # lane-dense output dim

    # (Cout,Cin,kh,kw) -> (kh,kw,Cin,Cout) -> (K,Cout), zero-pad, bf16 for the MXU.
    wm = jnp.transpose(weight, (2, 3, 1, 0)).reshape(k, cout)
    wm = jnp.pad(wm, ((0, kp - k), (0, coutp - cout))).astype(jnp.bfloat16)

    cparams = pltpu.CompilerParams(
        dimension_semantics=("parallel",),
        vmem_limit_bytes=_vmem_limit_bytes())

    if instance_norm:
        # Fold the whole batch into one block when P is sublane-tile aligned
        # (doubles MXU M-occupancy, single grid step); otherwise one sample per step.
        bn = n if p % 8 == 0 else 1
        g = n // bn
        m = bn * p
        patches3 = jnp.pad(patches, ((0, 0), (0, 0), (0, kp - k))).reshape(g, m, kp)
        flops = 2 * n * p * kp * coutp
        bytes_accessed = patches3.size * 2 + wm.size * 2 + g * m * coutp * 2

        out = pl.pallas_call(
            functools.partial(_conv_in_kernel, bn=bn, p=p, eps=EPS),
            out_shape=jax.ShapeDtypeStruct((g, m, coutp), jnp.bfloat16),
            grid_spec=pltpu.PrefetchScalarGridSpec(
                num_scalar_prefetch=0,
                grid=(g,),
                in_specs=[
                    pl.BlockSpec((1, m, kp), lambda i: (i, 0, 0)),
                    pl.BlockSpec((kp, coutp), lambda i: (0, 0)),
                ],
                out_specs=pl.BlockSpec((1, m, coutp), lambda i: (i, 0, 0)),
            ),
            compiler_params=cparams,
            cost_estimate=pl.CostEstimate(flops=int(flops),
                                          transcendentals=int(n * coutp),
                                          bytes_accessed=int(bytes_accessed)),
        )(patches3, wm)
        out = out.reshape(n, p, coutp)[..., :cout]
        return out.reshape(n, oh, ow, cout)

    # ---- no InstanceNorm: fold batch into M, tile M, single K step ----
    m = n * p
    mp = _round_up(m, 8)
    tm = _pick_tile(mp, (1024, 512, 256, 128, 64, 32, 16, 8))
    patches2 = patches.reshape(m, k)
    patches2 = jnp.pad(patches2, ((0, mp - m), (0, kp - k)))
    flops = 2 * mp * kp * coutp
    trans = mp * coutp if act == "sigmoid" else 0
    bytes_accessed = patches2.size * 2 + wm.size * 2 + mp * coutp * 2

    out = pl.pallas_call(
        functools.partial(_conv_act_kernel, act=act),
        out_shape=jax.ShapeDtypeStruct((mp, coutp), jnp.bfloat16),
        grid_spec=pltpu.PrefetchScalarGridSpec(
            num_scalar_prefetch=0,
            grid=(mp // tm,),
            in_specs=[
                pl.BlockSpec((tm, kp), lambda i: (i, 0)),
                pl.BlockSpec((kp, coutp), lambda i: (0, 0)),
            ],
            out_specs=pl.BlockSpec((tm, coutp), lambda i: (i, 0)),
        ),
        compiler_params=cparams,
        cost_estimate=pl.CostEstimate(flops=int(flops),
                                      transcendentals=int(trans),
                                      bytes_accessed=int(bytes_accessed)),
    )(patches2, wm)
    out = out[:m, :cout]
    return out.reshape(n, oh, ow, cout)


# ----------------------------------------------------------------------------
# Discriminator forward (matches the PyTorch module layer-by-layer).
# ----------------------------------------------------------------------------
def init_params(key):
    c = CHANNELS
    shapes = [
        (c,      INP,    4, 4),   # conv1
        (c * 2,  c,      4, 4),   # conv2
        (c * 4,  c * 2,  3, 3),   # conv3
        (c * 8,  c * 4,  3, 3),   # conv4
        (1,      c * 8,  3, 3),   # conv5
    ]
    keys = jax.random.split(key, len(shapes))
    return [0.05 * jax.random.normal(k, s, dtype=jnp.float32)
            for k, s in zip(keys, shapes)]


def discriminator_forward(x_nchw, params):
    # PyTorch NCHW -> NHWC, bf16 once at the boundary (kernels are bf16 in/out).
    x = jnp.transpose(x_nchw, (0, 2, 3, 1)).astype(jnp.bfloat16)
    w1, w2, w3, w4, w5 = params
    x = conv_layer(x, w1, stride=2, pad=1, instance_norm=False, act="leaky")
    x = conv_layer(x, w2, stride=2, pad=1, instance_norm=True,  act="leaky")
    x = conv_layer(x, w3, stride=1, pad=1, instance_norm=True,  act="leaky")
    x = conv_layer(x, w4, stride=1, pad=1, instance_norm=True,  act="leaky")
    x = conv_layer(x, w5, stride=1, pad=1, instance_norm=False, act="sigmoid")
    # Back to PyTorch NCHW output convention, f32 at the API boundary.
    return jnp.transpose(x, (0, 3, 1, 2)).astype(jnp.float32)


# Pure-JAX f32 reference (lax.conv) for a tolerance-based parity check.
def _reference_forward(x_nchw, params):
    x = x_nchw.astype(jnp.float32)

    def conv(x, w, stride):
        return jax.lax.conv_general_dilated(
            x, w, window_strides=(stride, stride), padding=((1, 1), (1, 1)),
            dimension_numbers=("NCHW", "OIHW", "NCHW"),
            precision=jax.lax.Precision.HIGHEST)

    def instnorm(x):
        mean = jnp.mean(x, axis=(2, 3), keepdims=True)
        var = jnp.mean((x - mean) ** 2, axis=(2, 3), keepdims=True)
        return (x - mean) / jnp.sqrt(var + EPS)

    def leaky(x):
        return jnp.where(x >= 0, x, 0.2 * x)

    w1, w2, w3, w4, w5 = params
    x = leaky(conv(x, w1, 2))
    x = leaky(instnorm(conv(x, w2, 2)))
    x = leaky(instnorm(conv(x, w3, 1)))
    x = leaky(instnorm(conv(x, w4, 1)))
    x = jax.nn.sigmoid(conv(x, w5, 1))
    return x


if __name__ == "__main__":
    key = jax.random.PRNGKey(0)
    k_params, k_x = jax.random.split(key)
    params = init_params(k_params)

    # Small input consistent with the module: NCHW (2, 3, 16, 16).
    x = jax.random.normal(k_x, (2, INP, 16, 16), dtype=jnp.float32)

    out = jax.jit(discriminator_forward)(x, params)
    out = jax.block_until_ready(out)

    # Expected shape: 16 -> conv1(s2) 8 -> conv2(s2) 4 -> conv3/4/5(s1) 4
    assert out.shape == (2, 1, 4, 4), out.shape
    assert bool(jnp.all(jnp.isfinite(out)))

    # Tolerance-based parity vs an f32 reference (bf16 inputs/activations on
    # the Pallas path => ~1e-2 level differences are expected).
    ref = _reference_forward(x, params)
    assert bool(jnp.allclose(out, ref, atol=8e-2, rtol=0.0)), \
        float(jnp.max(jnp.abs(out - ref)))

    print("KERNEL_OK")
</pallas_src>

<mosaic_0001>
module attributes {stable_mosaic.version = 11 : i64} {
  func.func @_conv_act_kernel(%arg0: i32, %arg1: memref<128x128xbf16, #tpu.memory_space<vmem>>, %arg2: memref<128x128xbf16, #tpu.memory_space<vmem>>, %arg3: memref<128x128xbf16, #tpu.memory_space<vmem>>) attributes {dimension_semantics = [#tpu.dimension_semantics<parallel>], iteration_bounds = array<i64: 1>, scalar_prefetch = 0 : i64, scratch_operands = 0 : i64, tpu.core_type = #tpu.core_type<tc>, window_params = [{transform_indices = @transform_0, window_bounds = array<i64: 128, 128>}, {pipeline_mode = #tpu.pipeline_mode<synchronous>, transform_indices = @transform_1, window_bounds = array<i64: 128, 128>}, {transform_indices = @transform_2, window_bounds = array<i64: 128, 128>}]} {
    %c0 = arith.constant 0 : index
    %c0_0 = arith.constant 0 : index
    %0 = vector.load %arg1[%c0, %c0_0] : memref<128x128xbf16, #tpu.memory_space<vmem>>, vector<128x128xbf16>
    %c0_1 = arith.constant 0 : index
    %c0_2 = arith.constant 0 : index
    %1 = vector.load %arg2[%c0_1, %c0_2] : memref<128x128xbf16, #tpu.memory_space<vmem>>, vector<128x128xbf16>
    %cst = arith.constant dense<0.000000e+00> : vector<128x128xf32>
    %2 = tpu.matmul %0, %1, %cst {dimension_numbers = #tpu.dot_dimension_numbers<[1], [0], [0], [1], [0, 0, 1, 1], [], []>} : vector<128x128xbf16>, vector<128x128xbf16>, vector<128x128xf32> -> vector<128x128xf32>
    %cst_3 = arith.constant 0.000000e+00 : f32
    %3 = vector.broadcast %cst_3 : f32 to vector<128x128xf32>
    %4 = arith.cmpf oge, %2, %3 : vector<128x128xf32>
    %cst_4 = arith.constant 2.000000e-01 : f32
    %5 = vector.broadcast %cst_4 : f32 to vector<128x128xf32>
    %6 = arith.mulf %5, %2 : vector<128x128xf32>
    %7 = arith.select %4, %2, %6 : vector<128x128xi1>, vector<128x128xf32>
    %8 = arith.truncf %7 : vector<128x128xf32> to vector<128x128xbf16>
    %c0_5 = arith.constant 0 : index
    %c0_6 = arith.constant 0 : index
    %9 = vector.load %arg3[%c0_5, %c0_6] : memref<128x128xbf16, #tpu.memory_space<vmem>>, vector<128x128xbf16>
    tpu.vector_store %arg3[%c0_5, %c0_6], %8 {strides = array<i32>} : memref<128x128xbf16, #tpu.memory_space<vmem>>, vector<128x128xbf16>,
    return
  }
  func.func @transform_0(%arg0: i32) -> (i32, i32) {
    %c0_i32 = arith.constant 0 : i32
    %c0_i32_0 = arith.constant 0 : i32
    return %arg0, %c0_i32 : i32, i32
  }
  func.func @transform_1(%arg0: i32) -> (i32, i32) {
    %c0_i32 = arith.constant 0 : i32
    %c0_i32_0 = arith.constant 0 : i32
    %c0_i32_1 = arith.constant 0 : i32
    return %c0_i32, %c0_i32_0 : i32, i32
  }
  func.func @transform_2(%arg0: i32) -> (i32, i32) {
    %c0_i32 = arith.constant 0 : i32
    %c0_i32_0 = arith.constant 0 : i32
    return %arg0, %c0_i32 : i32, i32
  }
}

module attributes {stable_mosaic.version = 11 : i64} {
  func.func @_conv_in_kernel(%arg0: i32, %arg1: memref<1x32x1024xbf16, #tpu.memory_space<vmem>>, %arg2: memref<1024x128xbf16, #tpu.memory_space<vmem>>, %arg3: memref<1x32x128xbf16, #tpu.memory_space<vmem>>) attributes {dimension_semantics = [#tpu.dimension_semantics<parallel>], iteration_bounds = array<i64: 1>, scalar_prefetch = 0 : i64, scratch_operands = 0 : i64, tpu.core_type = #tpu.core_type<tc>, window_params = [{transform_indices = @transform_0, window_bounds = array<i64: 1, 32, 1024>}, {pipeline_mode = #tpu.pipeline_mode<synchronous>, transform_indices = @transform_1, window_bounds = array<i64: 1024, 128>}, {transform_indices = @transform_2, window_bounds = array<i64: 1, 32, 128>}]} {
    %c0 = arith.constant 0 : index
    %c0_0 = arith.constant 0 : index
    %c0_1 = arith.constant 0 : index
    %0 = vector.load %arg1[%c0, %c0_0, %c0_1] : memref<1x32x1024xbf16, #tpu.memory_space<vmem>>, vector<1x32x1024xbf16>
    %1 = vector.shape_cast %0 : vector<1x32x1024xbf16> to vector<32x1024xbf16>
    %c0_2 = arith.constant 0 : index
    %c0_3 = arith.constant 0 : index
    %2 = vector.load %arg2[%c0_2, %c0_3] : memref<1024x128xbf16, #tpu.memory_space<vmem>>, vector<1024x128xbf16>
    %cst = arith.constant dense<0.000000e+00> : vector<32x128xf32>
    %3 = tpu.matmul %1, %2, %cst {dimension_numbers = #tpu.dot_dimension_numbers<[1], [0], [0], [1], [0, 0, 1, 1], [], []>} : vector<32x1024xbf16>, vector<1024x128xbf16>, vector<32x128xf32> -> vector<32x128xf32>
    %4 = vector.shape_cast %3 : vector<32x128xf32> to vector<2x16x128xf32>
    %cst_4 = arith.constant dense<0.000000e+00> : vector<2x128xf32>
    %5 = vector.multi_reduction <add>, %4, %cst_4 [1] : vector<2x16x128xf32> to vector<2x128xf32>
    %6 = vector.shape_cast %5 : vector<2x128xf32> to vector<2x1x128xf32>
    %cst_5 = arith.constant 1.600000e+01 : f32
    %7 = vector.broadcast %cst_5 : f32 to vector<2x1x128xf32>
    %8 = arith.divf %6, %7 : vector<2x1x128xf32>
    %9 = vector.broadcast %8 : vector<2x1x128xf32> to vector<2x16x128xf32>
    %10 = arith.subf %4, %9 : vector<2x16x128xf32>
    %11 = arith.mulf %10, %10 : vector<2x16x128xf32>
    %cst_6 = arith.constant dense<0.000000e+00> : vector<2x128xf32>
    %12 = vector.multi_reduction <add>, %11, %cst_6 [1] : vector<2x16x128xf32> to vector<2x128xf32>
    %13 = vector.shape_cast %12 : vector<2x128xf32> to vector<2x1x128xf32>
    %cst_7 = arith.constant 1.600000e+01 : f32
    %14 = vector.broadcast %cst_7 : f32 to vector<2x1x128xf32>
    %15 = arith.divf %13, %14 : vector<2x1x128xf32>
    %cst_8 = arith.constant 9.99999974E-6 : f32
    %16 = vector.broadcast %cst_8 : f32 to vector<2x1x128xf32>
    %17 = arith.addf %15, %16 : vector<2x1x128xf32>
    %18 = math.rsqrt %17 : vector<2x1x128xf32>
    %19 = vector.broadcast %18 : vector<2x1x128xf32> to vector<2x16x128xf32>
    %20 = arith.mulf %10, %19 : vector<2x16x128xf32>
    %cst_9 = arith.constant 0.000000e+00 : f32
    %21 = vector.broadcast %cst_9 : f32 to vector<2x16x128xf32>
    %22 = arith.cmpf oge, %20, %21 : vector<2x16x128xf32>
    %cst_10 = arith.constant 2.000000e-01 : f32
    %23 = vector.broadcast %cst_10 : f32 to vector<2x16x128xf32>
    %24 = arith.mulf %23, %20 : vector<2x16x128xf32>
    %25 = arith.select %22, %20, %24 : vector<2x16x128xi1>, vector<2x16x128xf32>
    %26 = vector.shape_cast %25 : vector<2x16x128xf32> to vector<32x128xf32>
    %27 = arith.truncf %26 : vector<32x128xf32> to vector<32x128xbf16>
    %c0_11 = arith.constant 0 : index
    %c0_12 = arith.constant 0 : index
    %c0_13 = arith.constant 0 : index
    %28 = vector.load %arg3[%c0_11, %c0_12, %c0_13] : memref<1x32x128xbf16, #tpu.memory_space<vmem>>, vector<1x32x128xbf16>
    %29 = vector.shape_cast %28 : vector<1x32x128xbf16> to vector<32x128xbf16>
    %30 = vector.shape_cast %27 : vector<32x128xbf16> to vector<1x32x128xbf16>
    tpu.vector_store %arg3[%c0_11, %c0_12, %c0_13], %30 {strides = array<i32>} : memref<1x32x128xbf16, #tpu.memory_space<vmem>>, vector<1x32x128xbf16>,
    return
  }
  func.func @transform_0(%arg0: i32) -> (i32, i32, i32) {
    %c0_i32 = arith.constant 0 : i32
    %c0_i32_0 = arith.constant 0 : i32
    %c0_i32_1 = arith.constant 0 : i32
    return %arg0, %c0_i32, %c0_i32_0 : i32, i32, i32
  }
  func.func @transform_1(%arg0: i32) -> (i32, i32) {
    %c0_i32 = arith.constant 0 : i32
    %c0_i32_0 = arith.constant 0 : i32
    %c0_i32_1 = arith.constant 0 : i32
    return %c0_i32, %c0_i32_0 : i32, i32
  }
  func.func @transform_2(%arg0: i32) -> (i32, i32, i32) {
    %c0_i32 = arith.constant 0 : i32
    %c0_i32_0 = arith.constant 0 : i32
    %c0_i32_1 = arith.constant 0 : i32
    return %arg0, %c0_i32, %c0_i32_0 : i32, i32, i32
  }
}

module attributes {stable_mosaic.version = 11 : i64} {
  func.func @_conv_in_kernel(%arg0: i32, %arg1: memref<1x32x1152xbf16, #tpu.memory_space<vmem>>, %arg2: memref<1152x256xbf16, #tpu.memory_space<vmem>>, %arg3: memref<1x32x256xbf16, #tpu.memory_space<vmem>>) attributes {dimension_semantics = [#tpu.dimension_semantics<parallel>], iteration_bounds = array<i64: 1>, scalar_prefetch = 0 : i64, scratch_operands = 0 : i64, tpu.core_type = #tpu.core_type<tc>, window_params = [{transform_indices = @transform_0, window_bounds = array<i64: 1, 32, 1152>}, {pipeline_mode = #tpu.pipeline_mode<synchronous>, transform_indices = @transform_1, window_bounds = array<i64: 1152, 256>}, {transform_indices = @transform_2, window_bounds = array<i64: 1, 32, 256>}]} {
    %c0 = arith.constant 0 : index
    %c0_0 = arith.constant 0 : index
    %c0_1 = arith.constant 0 : index
    %0 = vector.load %arg1[%c0, %c0_0, %c0_1] : memref<1x32x1152xbf16, #tpu.memory_space<vmem>>, vector<1x32x1152xbf16>
    %1 = vector.shape_cast %0 : vector<1x32x1152xbf16> to vector<32x1152xbf16>
    %c0_2 = arith.constant 0 : index
    %c0_3 = arith.constant 0 : index
    %2 = vector.load %arg2[%c0_2, %c0_3] : memref<1152x256xbf16, #tpu.memory_space<vmem>>, vector<1152x256xbf16>
    %cst = arith.constant dense<0.000000e+00> : vector<32x256xf32>
    %3 = tpu.matmul %1, %2, %cst {dimension_numbers = #tpu.dot_dimension_numbers<[1], [0], [0], [1], [0, 0, 1, 1], [], []>} : vector<32x1152xbf16>, vector<1152x256xbf16>, vector<32x256xf32> -> vector<32x256xf32>
    %4 = vector.shape_cast %3 : vector<32x256xf32> to vector<2x16x256xf32>
    %cst_4 = arith.constant dense<0.000000e+00> : vector<2x256xf32>
    %5 = vector.multi_reduction <add>, %4, %cst_4 [1] : vector<2x16x256xf32> to vector<2x256xf32>
    %6 = vector.shape_cast %5 : vector<2x256xf32> to vector<2x1x256xf32>
    %cst_5 = arith.constant 1.600000e+01 : f32
    %7 = vector.broadcast %cst_5 : f32 to vector<2x1x256xf32>
    %8 = arith.divf %6, %7 : vector<2x1x256xf32>
    %9 = vector.broadcast %8 : vector<2x1x256xf32> to vector<2x16x256xf32>
    %10 = arith.subf %4, %9 : vector<2x16x256xf32>
    %11 = arith.mulf %10, %10 : vector<2x16x256xf32>
    %cst_6 = arith.constant dense<0.000000e+00> : vector<2x256xf32>
    %12 = vector.multi_reduction <add>, %11, %cst_6 [1] : vector<2x16x256xf32> to vector<2x256xf32>
    %13 = vector.shape_cast %12 : vector<2x256xf32> to vector<2x1x256xf32>
    %cst_7 = arith.constant 1.600000e+01 : f32
    %14 = vector.broadcast %cst_7 : f32 to vector<2x1x256xf32>
    %15 = arith.divf %13, %14 : vector<2x1x256xf32>
    %cst_8 = arith.constant 9.99999974E-6 : f32
    %16 = vector.broadcast %cst_8 : f32 to vector<2x1x256xf32>
    %17 = arith.addf %15, %16 : vector<2x1x256xf32>
    %18 = math.rsqrt %17 : vector<2x1x256xf32>
    %19 = vector.broadcast %18 : vector<2x1x256xf32> to vector<2x16x256xf32>
    %20 = arith.mulf %10, %19 : vector<2x16x256xf32>
    %cst_9 = arith.constant 0.000000e+00 : f32
    %21 = vector.broadcast %cst_9 : f32 to vector<2x16x256xf32>
    %22 = arith.cmpf oge, %20, %21 : vector<2x16x256xf32>
    %cst_10 = arith.constant 2.000000e-01 : f32
    %23 = vector.broadcast %cst_10 : f32 to vector<2x16x256xf32>
    %24 = arith.mulf %23, %20 : vector<2x16x256xf32>
    %25 = arith.select %22, %20, %24 : vector<2x16x256xi1>, vector<2x16x256xf32>
    %26 = vector.shape_cast %25 : vector<2x16x256xf32> to vector<32x256xf32>
    %27 = arith.truncf %26 : vector<32x256xf32> to vector<32x256xbf16>
    %c0_11 = arith.constant 0 : index
    %c0_12 = arith.constant 0 : index
    %c0_13 = arith.constant 0 : index
    %28 = vector.load %arg3[%c0_11, %c0_12, %c0_13] : memref<1x32x256xbf16, #tpu.memory_space<vmem>>, vector<1x32x256xbf16>
    %29 = vector.shape_cast %28 : vector<1x32x256xbf16> to vector<32x256xbf16>
    %30 = vector.shape_cast %27 : vector<32x256xbf16> to vector<1x32x256xbf16>
    tpu.vector_store %arg3[%c0_11, %c0_12, %c0_13], %30 {strides = array<i32>} : memref<1x32x256xbf16, #tpu.memory_space<vmem>>, vector<1x32x256xbf16>,
    return
  }
  func.func @transform_0(%arg0: i32) -> (i32, i32, i32) {
    %c0_i32 = arith.constant 0 : i32
    %c0_i32_0 = arith.constant 0 : i32
    %c0_i32_1 = arith.constant 0 : i32
    return %arg0, %c0_i32, %c0_i32_0 : i32, i32, i32
  }
  func.func @transform_1(%arg0: i32) -> (i32, i32) {
    %c0_i32 = arith.constant 0 : i32
    %c0_i32_0 = arith.constant 0 : i32
    %c0_i32_1 = arith.constant 0 : i32
    return %c0_i32, %c0_i32_0 : i32, i32
  }
  func.func @transform_2(%arg0: i32) -> (i32, i32, i32) {
    %c0_i32 = arith.constant 0 : i32
    %c0_i32_0 = arith.constant 0 : i32
    %c0_i32_1 = arith.constant 0 : i32
    return %arg0, %c0_i32, %c0_i32_0 : i32, i32, i32
  }
}

module attributes {stable_mosaic.version = 11 : i64} {
  func.func @_conv_in_kernel(%arg0: i32, %arg1: memref<1x32x2304xbf16, #tpu.memory_space<vmem>>, %arg2: memref<2304x512xbf16, #tpu.memory_space<vmem>>, %arg3: memref<1x32x512xbf16, #tpu.memory_space<vmem>>) attributes {dimension_semantics = [#tpu.dimension_semantics<parallel>], iteration_bounds = array<i64: 1>, scalar_prefetch = 0 : i64, scratch_operands = 0 : i64, tpu.core_type = #tpu.core_type<tc>, window_params = [{transform_indices = @transform_0, window_bounds = array<i64: 1, 32, 2304>}, {pipeline_mode = #tpu.pipeline_mode<synchronous>, transform_indices = @transform_1, window_bounds = array<i64: 2304, 512>}, {transform_indices = @transform_2, window_bounds = array<i64: 1, 32, 512>}]} {
    %c0 = arith.constant 0 : index
    %c0_0 = arith.constant 0 : index
    %c0_1 = arith.constant 0 : index
    %0 = vector.load %arg1[%c0, %c0_0, %c0_1] : memref<1x32x2304xbf16, #tpu.memory_space<vmem>>, vector<1x32x2304xbf16>
    %1 = vector.shape_cast %0 : vector<1x32x2304xbf16> to vector<32x2304xbf16>
    %c0_2 = arith.constant 0 : index
    %c0_3 = arith.constant 0 : index
    %2 = vector.load %arg2[%c0_2, %c0_3] : memref<2304x512xbf16, #tpu.memory_space<vmem>>, vector<2304x512xbf16>
    %cst = arith.constant dense<0.000000e+00> : vector<32x512xf32>
    %3 = tpu.matmul %1, %2, %cst {dimension_numbers = #tpu.dot_dimension_numbers<[1], [0], [0], [1], [0, 0, 1, 1], [], []>} : vector<32x2304xbf16>, vector<2304x512xbf16>, vector<32x512xf32> -> vector<32x512xf32>
    %4 = vector.shape_cast %3 : vector<32x512xf32> to vector<2x16x512xf32>
    %cst_4 = arith.constant dense<0.000000e+00> : vector<2x512xf32>
    %5 = vector.multi_reduction <add>, %4, %cst_4 [1] : vector<2x16x512xf32> to vector<2x512xf32>
    %6 = vector.shape_cast %5 : vector<2x512xf32> to vector<2x1x512xf32>
    %cst_5 = arith.constant 1.600000e+01 : f32
    %7 = vector.broadcast %cst_5 : f32 to vector<2x1x512xf32>
    %8 = arith.divf %6, %7 : vector<2x1x512xf32>
    %9 = vector.broadcast %8 : vector<2x1x512xf32> to vector<2x16x512xf32>
    %10 = arith.subf %4, %9 : vector<2x16x512xf32>
    %11 = arith.mulf %10, %10 : vector<2x16x512xf32>
    %cst_6 = arith.constant dense<0.000000e+00> : vector<2x512xf32>
    %12 = vector.multi_reduction <add>, %11, %cst_6 [1] : vector<2x16x512xf32> to vector<2x512xf32>
    %13 = vector.shape_cast %12 : vector<2x512xf32> to vector<2x1x512xf32>
    %cst_7 = arith.constant 1.600000e+01 : f32
    %14 = vector.broadcast %cst_7 : f32 to vector<2x1x512xf32>
    %15 = arith.divf %13, %14 : vector<2x1x512xf32>
    %cst_8 = arith.constant 9.99999974E-6 : f32
    %16 = vector.broadcast %cst_8 : f32 to vector<2x1x512xf32>
    %17 = arith.addf %15, %16 : vector<2x1x512xf32>
    %18 = math.rsqrt %17 : vector<2x1x512xf32>
    %19 = vector.broadcast %18 : vector<2x1x512xf32> to vector<2x16x512xf32>
    %20 = arith.mulf %10, %19 : vector<2x16x512xf32>
    %cst_9 = arith.constant 0.000000e+00 : f32
    %21 = vector.broadcast %cst_9 : f32 to vector<2x16x512xf32>
    %22 = arith.cmpf oge, %20, %21 : vector<2x16x512xf32>
    %cst_10 = arith.constant 2.000000e-01 : f32
    %23 = vector.broadcast %cst_10 : f32 to vector<2x16x512xf32>
    %24 = arith.mulf %23, %20 : vector<2x16x512xf32>
    %25 = arith.select %22, %20, %24 : vector<2x16x512xi1>, vector<2x16x512xf32>
    %26 = vector.shape_cast %25 : vector<2x16x512xf32> to vector<32x512xf32>
    %27 = arith.truncf %26 : vector<32x512xf32> to vector<32x512xbf16>
    %c0_11 = arith.constant 0 : index
    %c0_12 = arith.constant 0 : index
    %c0_13 = arith.constant 0 : index
    %28 = vector.load %arg3[%c0_11, %c0_12, %c0_13] : memref<1x32x512xbf16, #tpu.memory_space<vmem>>, vector<1x32x512xbf16>
    %29 = vector.shape_cast %28 : vector<1x32x512xbf16> to vector<32x512xbf16>
    %30 = vector.shape_cast %27 : vector<32x512xbf16> to vector<1x32x512xbf16>
    tpu.vector_store %arg3[%c0_11, %c0_12, %c0_13], %30 {strides = array<i32>} : memref<1x32x512xbf16, #tpu.memory_space<vmem>>, vector<1x32x512xbf16>,
    return
  }
  func.func @transform_0(%arg0: i32) -> (i32, i32, i32) {
    %c0_i32 = arith.constant 0 : i32
    %c0_i32_0 = arith.constant 0 : i32
    %c0_i32_1 = arith.constant 0 : i32
    return %arg0, %c0_i32, %c0_i32_0 : i32, i32, i32
  }
  func.func @transform_1(%arg0: i32) -> (i32, i32) {
    %c0_i32 = arith.constant 0 : i32
    %c0_i32_0 = arith.constant 0 : i32
    %c0_i32_1 = arith.constant 0 : i32
    return %c0_i32, %c0_i32_0 : i32, i32
  }
  func.func @transform_2(%arg0: i32) -> (i32, i32, i32) {
    %c0_i32 = arith.constant 0 : i32
    %c0_i32_0 = arith.constant 0 : i32
    %c0_i32_1 = arith.constant 0 : i32
    return %arg0, %c0_i32, %c0_i32_0 : i32, i32, i32
  }
}

module attributes {stable_mosaic.version = 11 : i64} {
  func.func @_conv_act_kernel(%arg0: i32, %arg1: memref<32x4608xbf16, #tpu.memory_space<vmem>>, %arg2: memref<4608x128xbf16, #tpu.memory_space<vmem>>, %arg3: memref<32x128xbf16, #tpu.memory_space<vmem>>) attributes {dimension_semantics = [#tpu.dimension_semantics<parallel>], iteration_bounds = array<i64: 1>, scalar_prefetch = 0 : i64, scratch_operands = 0 : i64, tpu.core_type = #tpu.core_type<tc>, window_params = [{transform_indices = @transform_0, window_bounds = array<i64: 32, 4608>}, {pipeline_mode = #tpu.pipeline_mode<synchronous>, transform_indices = @transform_1, window_bounds = array<i64: 4608, 128>}, {transform_indices = @transform_2, window_bounds = array<i64: 32, 128>}]} {
    %c0 = arith.constant 0 : index
    %c0_0 = arith.constant 0 : index
    %0 = vector.load %arg1[%c0, %c0_0] : memref<32x4608xbf16, #tpu.memory_space<vmem>>, vector<32x4608xbf16>
    %c0_1 = arith.constant 0 : index
    %c0_2 = arith.constant 0 : index
    %1 = vector.load %arg2[%c0_1, %c0_2] : memref<4608x128xbf16, #tpu.memory_space<vmem>>, vector<4608x128xbf16>
    %cst = arith.constant dense<0.000000e+00> : vector<32x128xf32>
    %2 = tpu.matmul %0, %1, %cst {dimension_numbers = #tpu.dot_dimension_numbers<[1], [0], [0], [1], [0, 0, 1, 1], [], []>} : vector<32x4608xbf16>, vector<4608x128xbf16>, vector<32x128xf32> -> vector<32x128xf32>
    %cst_3 = arith.constant 0.000000e+00 : f32
    %3 = vector.broadcast %cst_3 : f32 to vector<32x128xf32>
    %4 = arith.subf %3, %2 : vector<32x128xf32>
    %5 = math.exp %4 : vector<32x128xf32>
    %cst_4 = arith.constant 1.000000e+00 : f32
    %6 = vector.broadcast %cst_4 : f32 to vector<32x128xf32>
    %7 = arith.addf %6, %5 : vector<32x128xf32>
    %8 = tpu.reciprocal %7 {approx = true} : vector<32x128xf32> -> vector<32x128xf32>
    %9 = arith.truncf %8 : vector<32x128xf32> to vector<32x128xbf16>
    %c0_5 = arith.constant 0 : index
    %c0_6 = arith.constant 0 : index
    %10 = vector.load %arg3[%c0_5, %c0_6] : memref<32x128xbf16, #tpu.memory_space<vmem>>, vector<32x128xbf16>
    tpu.vector_store %arg3[%c0_5, %c0_6], %9 {strides = array<i32>} : memref<32x128xbf16, #tpu.memory_space<vmem>>, vector<32x128xbf16>,
    return
  }
  func.func @transform_0(%arg0: i32) -> (i32, i32) {
    %c0_i32 = arith.constant 0 : i32
    %c0_i32_0 = arith.constant 0 : i32
    return %arg0, %c0_i32 : i32, i32
  }
  func.func @transform_1(%arg0: i32) -> (i32, i32) {
    %c0_i32 = arith.constant 0 : i32
    %c0_i32_0 = arith.constant 0 : i32
    %c0_i32_1 = arith.constant 0 : i32
    return %c0_i32, %c0_i32_0 : i32, i32
  }
  func.func @transform_2(%arg0: i32) -> (i32, i32) {
    %c0_i32 = arith.constant 0 : i32
    %c0_i32_0 = arith.constant 0 : i32
    return %arg0, %c0_i32 : i32, i32
  }
}

</mosaic_0001>

<bundles_post_ra>
// kernel: discriminator_forward.5
= control target key start
LH: loop header
LB: loop body
LE: loop exit
PB: predicated region body
PF: predicated region fallthrough
CT: control target
= control target key end

     0   :  { %s632_s1 = inlined_call_operand.vmem [shape: bf16[128,128], index: 1, kind: input, shape index: {}]   ;;  %s633_s0 = inlined_call_operand.vmem [shape: bf16[128,128], index: 0, kind: input, shape index: {}]   ;;  %s634_s2 = inlined_call_operand.vmem [shape: bf16[128,128], index: 2, kind: output, shape index: {}]  }
   0x1   :  { %v528_v0 = vld [vmem:[%s632_s1] sm:$0xff]   ;;  %v529_v1 = vld [vmem:[%s632_s1 + $0x8] sm:$0xff]   ;;  %v530_v2 = vld [vmem:[%s632_s1 + $0x10] sm:$0xff]  }
   0x2   :  { %480 = vmatprep.subr.bf16.mxu0 %v528_v0  ;;  %512 = vmatprep.subr.bf16.mxu1 %v528_v0  ;;  %v531_v3 = vld [vmem:[%s632_s1 + $0x18] sm:$0xff]   ;;  %v536_v4 = vld [vmem:[%s633_s0] sm:$0xff]   ;;  %v533_v7 = vld [vmem:[%s632_s1 + $0x28] sm:$0xff]  }
   0x3   :  { %481 = vmatpush3.bf16.msra.mxu0 %v528_v0  ;;  %520 = vmatpush3.bf16.msra.mxu1 %v528_v0  ;;  %v537_v5 = vld [vmem:[%s633_s0 + $0x20] sm:$0xff]   ;;  %v534_v8 = vld [vmem:[%s632_s1 + $0x30] sm:$0xff]   ;;  %v535_v9 = vld [vmem:[%s632_s1 + $0x38] sm:$0xff]  }
   0x4   :  { %482 = vmatprep.subr.bf16.mxu0 %v529_v1  ;;  %513 = vmatprep.subr.bf16.mxu1 %v529_v1  ;;  %v532_v6 = vld [vmem:[%s632_s1 + $0x20] sm:$0xff]   ;;  %v538_v10 = vld [vmem:[%s633_s0 + $0x8] sm:$0xff]   ;;  %v540_v12 = vld [vmem:[%s633_s0 + $0x10] sm:$0xff]  }
   0x5   :  { %496 = vmatprep.mubr.bf16.mxu0 %v536_v4  ;;  %504 = vmatprep.mubr.bf16.mxu1 %v537_v5  ;;  %v539_v11 = vld [vmem:[%s633_s0 + $0x28] sm:$0xff]   ;;  %v541_v13 = vld [vmem:[%s633_s0 + $0x30] sm:$0xff]   ;;  %v542_v14 = vld [vmem:[%s633_s0 + $0x18] sm:$0xff]  }
   0x6   :  { %v543_v15 = vld [vmem:[%s633_s0 + $0x38] sm:$0xff]  }
   0x7   :  { %483 = vmatpush3.bf16.msra.mxu0 %v529_v1  ;;  %521 = vmatpush3.bf16.msra.mxu1 %v529_v1 }
   0x8   :  { %484 = vmatprep.subr.bf16.mxu0 %v530_v2  ;;  %514 = vmatprep.subr.bf16.mxu1 %v530_v2 }
   0xb   :  { %485 = vmatpush3.bf16.msra.mxu0 %v530_v2  ;;  %522 = vmatpush3.bf16.msra.mxu1 %v530_v2 }
   0xc   :  { %486 = vmatprep.subr.bf16.mxu0 %v531_v3  ;;  %515 = vmatprep.subr.bf16.mxu1 %v531_v3 }
   0xf   :  { %487 = vmatpush3.bf16.msra.mxu0 %v531_v3  ;;  %523 = vmatpush3.bf16.msra.mxu1 %v531_v3 }
  0x10   :  { %488 = vmatprep.subr.bf16.mxu0 %v532_v6  ;;  %516 = vmatprep.subr.bf16.mxu1 %v532_v6 }
  0x13   :  { %489 = vmatpush3.bf16.msra.mxu0 %v532_v6  ;;  %524 = vmatpush3.bf16.msra.mxu1 %v532_v6 }
  0x14   :  { %490 = vmatprep.subr.bf16.mxu0 %v533_v7  ;;  %517 = vmatprep.subr.bf16.mxu1 %v533_v7 }
  0x17   :  { %491 = vmatpush3.bf16.msra.mxu0 %v533_v7  ;;  %525 = vmatpush3.bf16.msra.mxu1 %v533_v7 }
  0x18   :  { %492 = vmatprep.subr.bf16.mxu0 %v534_v8  ;;  %518 = vmatprep.subr.bf16.mxu1 %v534_v8 }
  0x1b   :  { %493 = vmatpush3.bf16.msra.mxu0 %v534_v8  ;;  %526 = vmatpush3.bf16.msra.mxu1 %v534_v8 }
  0x1c   :  { %494 = vmatprep.subr.bf16.mxu0 %v535_v9  ;;  %519 = vmatprep.subr.bf16.mxu1 %v535_v9 }
  0x1f   :  { %495 = vmatpush3.bf16.msra.mxu0 %v535_v9  ;;  %527 = vmatpush3.bf16.msra.mxu1 %v535_v9 }
  0x22   :  { %497 = vmatmul.mubr.bf16.vlgmr.msra.gmra.mrb[0].mxu0 %v538_v10  ;;  %505 = vmatmul.mubr.bf16.vlgmr.msra.gmra.mrb[0].mxu1 %v539_v11 }
  0x23   :  { %500 = vmatprep.mubr.bf16.mxu0 %v540_v12  ;;  %508 = vmatprep.mubr.bf16.mxu1 %v541_v13 }
  0x2a   :  { %501 = vmatmul.mubr.bf16.gmra.mrb[4].mxu0 %v542_v14  ;;  %509 = vmatmul.mubr.bf16.gmra.mrb[4].mxu1 %v543_v15 }
  0xf5   :  { %v498_v16 = vpop.f32.mrb[0].mxu0  ;;  %v506_v17 = vpop.f32.mrb[0].mxu1 }
  0xf6   :  { %vm239_vm0 = vcmp.ge.f32.partialorder %v498_v16, 0.0  ;;  %v255_v18 = vmul.f32 0.2, %v498_v16  ;;  %v263_v19 = vmul.f32 0.2, %v506_v17  ;;  %vm247_vm1 = vcmp.ge.f32.partialorder %v506_v17, 0.0 }
  0xf7   :  { %v174_v20 = vpop.f32.mrb[1].mxu0  ;;  %v206_v21 = vpop.f32.mrb[1].mxu1 }
  0xf8   :  { %v253_v22 = vmul.f32 0.2, %v174_v20  ;;  %v499_v23 = vpop.f32.mrb[2].mxu0  ;;  %v507_v24 = vpop.f32.mrb[2].mxu1  ;;  %v271_v25 = vsel %vm239_vm0, %v498_v16, %v255_v18  ;;  %v261_v26 = vmul.f32 0.2, %v206_v21  ;;  %v279_v28 = vsel %vm247_vm1, %v506_v17, %v263_v19 }
  0xf9   :  { %vm240_vm2 = vcmp.ge.f32.partialorder %v499_v23, 0.0  ;;  %v256_v27 = vmul.f32 0.2, %v499_v23  ;;  %vm237_vm3 = vcmp.ge.f32.partialorder %v174_v20, 0.0  ;;  %vm248_vm4 = vcmp.ge.f32.partialorder %v507_v24, 0.0  ;;  %v177_v30 = vpop.f32.mrb[3].mxu0 }
  0xfa   :  { %v264_v29 = vmul.f32 0.2, %v507_v24  ;;  %v209_v31 = vpop.f32.mrb[3].mxu1  ;;  %vm245_vm5 = vcmp.ge.f32.partialorder %v206_v21, 0.0  ;;  %vm238_vm6 = vcmp.ge.f32.partialorder %v177_v30, 0.0  ;;  %v269_v37 = vsel %vm237_vm3, %v174_v20, %v253_v22 }
  0xfb   :  { %v272_v32 = vsel %vm240_vm2, %v499_v23, %v256_v27  ;;  %v254_v33 = vmul.f32 0.2, %v177_v30  ;;  %vm246_vm7 = vcmp.ge.f32.partialorder %v209_v31, 0.0  ;;  %v262_v36 = vmul.f32 0.2, %v209_v31 }
  0xfc   :  { %v425_v34 = vpack.c.bf16 %v272_v32, %v271_v25  ;;  %v280_v35 = vsel %vm248_vm4, %v507_v24, %v264_v29  ;;  %v277_v42 = vsel %vm245_vm5, %v206_v21, %v261_v26 }
  0xfd   :  { %v445_v38 = vpack.c.bf16 %v280_v35, %v279_v28  ;;  %v270_v39 = vsel %vm238_vm6, %v177_v30, %v254_v33  ;;  %v502_v40 = vpop.f32.mrb[4].mxu0  ;;  %v510_v41 = vpop.f32.mrb[4].mxu1  ;;  %v278_v44 = vsel %vm246_vm7, %v209_v31, %v262_v36 }
  0xfe   :  { %457 = vst [vmem:[%s634_s2 + $0x8] sm:$0xff] %v425_v34   ;;  %v420_v43 = vpack.c.bf16 %v270_v39, %v269_v37  ;;  %v259_v45 = vmul.f32 0.2, %v502_v40  ;;  %v190_v46 = vpop.f32.mrb[5].mxu0  ;;  %v222_v47 = vpop.f32.mrb[5].mxu1  ;;  %v440_v48 = vpack.c.bf16 %v278_v44, %v277_v42  ;;  %vm243_vm8 = vcmp.ge.f32.partialorder %v502_v40, 0.0 }
  0xff   :  { %461 = vst [vmem:[%s634_s2 + $0x28] sm:$0xff] %v445_v38   ;;  %v267_v49 = vmul.f32 0.2, %v510_v41  ;;  %v503_v50 = vpop.f32.mrb[6].mxu0  ;;  %v511_v51 = vpop.f32.mrb[6].mxu1  ;;  %vm251_vm9 = vcmp.ge.f32.partialorder %v510_v41, 0.0 }
 0x100   :  { %421 = vst [vmem:[%s634_s2] sm:$0xff] %v420_v43   ;;  %v257_v52 = vmul.f32 0.2, %v190_v46  ;;  %v265_v53 = vmul.f32 0.2, %v222_v47  ;;  %v193_v54 = vpop.f32.mrb[7].mxu0  ;;  %460 = vst [vmem:[%s634_s2 + $0x20] sm:$0xff] %v440_v48   ;;  %v275_v57 = vsel %vm243_vm8, %v502_v40, %v259_v45 }
 0x101   :  { %vm241_vm10 = vcmp.ge.f32.partialorder %v190_v46, 0.0  ;;  %vm244_vm11 = vcmp.ge.f32.partialorder %v503_v50, 0.0  ;;  %v260_v55 = vmul.f32 0.2, %v503_v50  ;;  %vm252_vm12 = vcmp.ge.f32.partialorder %v511_v51, 0.0  ;;  %v225_v56 = vpop.f32.mrb[7].mxu1 }
 0x102   :  { %vm249_vm13 = vcmp.ge.f32.partialorder %v222_v47, 0.0  ;;  %v268_v58 = vmul.f32 0.2, %v511_v51  ;;  %vm242_vm14 = vcmp.ge.f32.partialorder %v193_v54, 0.0  ;;  %v258_v60 = vmul.f32 0.2, %v193_v54 }
 0x103   :  { %v276_v59 = vsel %vm244_vm11, %v503_v50, %v260_v55  ;;  %vm250_vm15 = vcmp.ge.f32.partialorder %v225_v56, 0.0  ;;  %v266_v61 = vmul.f32 0.2, %v225_v56  ;;  %v283_v62 = vsel %vm251_vm9, %v510_v41, %v267_v49 }
 0x104   :  { %v273_v63 = vsel %vm241_vm10, %v190_v46, %v257_v52  ;;  %v435_v0 = vpack.c.bf16 %v276_v59, %v275_v57  ;;  %v284_v1 = vsel %vm252_vm12, %v511_v51, %v268_v58  ;;  %v281_v2 = vsel %vm249_vm13, %v222_v47, %v265_v53 }
 0x105   :  { %v455_v3 = vpack.c.bf16 %v284_v1, %v283_v62  ;;  %v274_v4 = vsel %vm242_vm14, %v193_v54, %v258_v60  ;;  %v282_v5 = vsel %vm250_vm15, %v225_v56, %v266_v61 }
 0x106   :  { %459 = vst [vmem:[%s634_s2 + $0x18] sm:$0xff] %v435_v0   ;;  %v430_v6 = vpack.c.bf16 %v274_v4, %v273_v63  ;;  %v450_v7 = vpack.c.bf16 %v282_v5, %v281_v2 }
 0x107   :  { %463 = vst [vmem:[%s634_s2 + $0x38] sm:$0xff] %v455_v3  }
 0x108   :  { %458 = vst [vmem:[%s634_s2 + $0x10] sm:$0xff] %v430_v6   ;;  %462 = vst [vmem:[%s634_s2 + $0x30] sm:$0xff] %v450_v7  }

// kernel: discriminator_forward.6
= control target key start
LH: loop header
LB: loop body
LE: loop exit
PB: predicated region body
PF: predicated region fallthrough
CT: control target
= control target key end

     0   :  { %s1441_s1 = inlined_call_operand.vmem [shape: bf16[1024,128], index: 1, kind: input, shape index: {}]   ;;  %s1442_s0 = inlined_call_operand.vmem [shape: bf16[1,32,1024], index: 0, kind: input, shape index: {}]   ;;  %s1443_s2 = inlined_call_operand.vmem [shape: bf16[1,32,128], index: 2, kind: output, shape index: {}]  }
   0x1   :  { %v1112_v0 = vld [vmem:[%s1441_s1 + $0x40] sm:$0xff]   ;;  %v1116_v4 = vld [vmem:[%s1441_s1 + $0x48] sm:$0xff]   ;;  %v1120_v8 = vld [vmem:[%s1441_s1 + $0x50] sm:$0xff]  }
   0x2   :  { %v1113_v1 = vld [vmem:[%s1441_s1 + $0xc0] sm:$0xff]   ;;  %1000 = vmatprep.subr.bf16.mxu0 %v1112_v0  ;;  %v1117_v5 = vld [vmem:[%s1441_s1 + $0xc8] sm:$0xff]   ;;  %v1121_v9 = vld [vmem:[%s1441_s1 + $0xd0] sm:$0xff]  }
   0x3   :  { %v1114_v2 = vld [vmem:[%s1441_s1] sm:$0xff]   ;;  %1028 = vmatprep.subr.bf16.mxu1 %v1113_v1  ;;  %v1118_v6 = vld [vmem:[%s1441_s1 + $0x8] sm:$0xff]   ;;  %v1122_v10 = vld [vmem:[%s1441_s1 + $0x10] sm:$0xff]  }
   0x4   :  { %v1115_v3 = vld [vmem:[%s1441_s1 + $0x80] sm:$0xff]   ;;  %1001 = vmatpush3.bf16.msra.mxu0 %v1114_v2  ;;  %v1119_v7 = vld [vmem:[%s1441_s1 + $0x88] sm:$0xff]   ;;  %v1123_v11 = vld [vmem:[%s1441_s1 + $0x90] sm:$0xff]  }
   0x5   :  { %1029 = vmatpush3.bf16.msra.mxu1 %v1115_v3  ;;  %1002 = vmatprep.subr.bf16.mxu0 %v1116_v4  ;;  %v1124_v12 = vld [vmem:[%s1441_s1 + $0x58] sm:$0xff]   ;;  %v1128_v16 = vld [vmem:[%s1441_s1 + $0x60] sm:$0xff]   ;;  %v1132_v20 = vld [vmem:[%s1441_s1 + $0x68] sm:$0xff]  }
   0x6   :  { %1030 = vmatprep.subr.bf16.mxu1 %v1117_v5  ;;  %v1125_v13 = vld [vmem:[%s1441_s1 + $0xd8] sm:$0xff]   ;;  %v1129_v17 = vld [vmem:[%s1441_s1 + $0xe0] sm:$0xff]   ;;  %v1133_v21 = vld [vmem:[%s1441_s1 + $0xe8] sm:$0xff]  }
   0x7   :  { %v1126_v14 = vld [vmem:[%s1441_s1 + $0x18] sm:$0xff]   ;;  %v1130_v18 = vld [vmem:[%s1441_s1 + $0x20] sm:$0xff]   ;;  %v1134_v22 = vld [vmem:[%s1441_s1 + $0x28] sm:$0xff]  }
   0x8   :  { %1003 = vmatpush3.bf16.msra.mxu0 %v1118_v6  ;;  %v1127_v15 = vld [vmem:[%s1441_s1 + $0x98] sm:$0xff]   ;;  %v1131_v19 = vld [vmem:[%s1441_s1 + $0xa0] sm:$0xff]   ;;  %v1135_v23 = vld [vmem:[%s1441_s1 + $0xa8] sm:$0xff]  }
   0x9   :  { %1031 = vmatpush3.bf16.msra.mxu1 %v1119_v7  ;;  %1004 = vmatprep.subr.bf16.mxu0 %v1120_v8  ;;  %v1136_v24 = vld [vmem:[%s1441_s1 + $0x70] sm:$0xff]   ;;  %v1140_v28 = vld [vmem:[%s1441_s1 + $0x78] sm:$0xff]   ;;  %v12_v32 = vld [vmem:[%s1442_s0] sm:$0xff] }
   0xa   :  { %1032 = vmatprep.subr.bf16.mxu1 %v1121_v9  ;;  %v1137_v25 = vld [vmem:[%s1441_s1 + $0xf0] sm:$0xff]   ;;  %v1141_v29 = vld [vmem:[%s1441_s1 + $0xf8] sm:$0xff]   ;;  %v16_v33 = vld [vmem:[%s1442_s0 + $0x20] sm:$0xff] }
   0xb   :  { %v1138_v26 = vld [vmem:[%s1441_s1 + $0x30] sm:$0xff]   ;;  %v1142_v30 = vld [vmem:[%s1441_s1 + $0x38] sm:$0xff]   ;;  %v13_v34 = vld [vmem:[%s1442_s0 + $0x8] sm:$0xff]  ;;  %v901_v35 = vcombine.low %v12_v32, %v16_v33  ;;  %v902_v36 = vcombine.high %v12_v32, %v16_v33 }
   0xc   :  { %1005 = vmatpush3.bf16.msra.mxu0 %v1122_v10  ;;  %v1139_v27 = vld [vmem:[%s1441_s1 + $0xb0] sm:$0xff]   ;;  %v1143_v31 = vld [vmem:[%s1441_s1 + $0xb8] sm:$0xff]   ;;  %v17_v37 = vld [vmem:[%s1442_s0 + $0x28] sm:$0xff] }
   0xd   :  { %1033 = vmatpush3.bf16.msra.mxu1 %v1123_v11  ;;  %1006 = vmatprep.subr.bf16.mxu0 %v1124_v12  ;;  %v903_v38 = vcombine.low %v13_v34, %v17_v37  ;;  %v904_v39 = vcombine.high %v13_v34, %v17_v37  ;;  %v1144_v40 = vld [vmem:[%s1441_s1 + $0x140] sm:$0xff]   ;;  %v1148_v44 = vld [vmem:[%s1441_s1 + $0x148] sm:$0xff]   ;;  %v1152_v48 = vld [vmem:[%s1441_s1 + $0x150] sm:$0xff]  }
   0xe   :  { %1034 = vmatprep.subr.bf16.mxu1 %v1125_v13  ;;  %652 = vmatprep.mubr.bf16.mxu0 %v902_v36  ;;  %v1145_v41 = vld [vmem:[%s1441_s1 + $0x1c0] sm:$0xff]   ;;  %v1149_v45 = vld [vmem:[%s1441_s1 + $0x1c8] sm:$0xff]   ;;  %v1153_v49 = vld [vmem:[%s1441_s1 + $0x1d0] sm:$0xff]  }
   0xf   :  { %701 = vmatprep.mubr.bf16.mxu1 %v904_v39  ;;  %v1146_v42 = vld [vmem:[%s1441_s1 + $0x100] sm:$0xff]   ;;  %v1150_v46 = vld [vmem:[%s1441_s1 + $0x108] sm:$0xff]   ;;  %v1154_v50 = vld [vmem:[%s1441_s1 + $0x110] sm:$0xff]  }
  0x10   :  { %1007 = vmatpush3.bf16.msra.mxu0 %v1126_v14  ;;  %v1147_v43 = vld [vmem:[%s1441_s1 + $0x180] sm:$0xff]   ;;  %v1151_v47 = vld [vmem:[%s1441_s1 + $0x188] sm:$0xff]   ;;  %v1155_v51 = vld [vmem:[%s1441_s1 + $0x190] sm:$0xff]  }
  0x11   :  { %1035 = vmatpush3.bf16.msra.mxu1 %v1127_v15  ;;  %1008 = vmatprep.subr.bf16.mxu0 %v1128_v16  ;;  %v1156_v52 = vld [vmem:[%s1441_s1 + $0x158] sm:$0xff]   ;;  %v1160_v56 = vld [vmem:[%s1441_s1 + $0x160] sm:$0xff]   ;;  %v21_v63 = vld [vmem:[%s1442_s0 + $0x48] sm:$0xff] }
  0x12   :  { %1036 = vmatprep.subr.bf16.mxu1 %v1129_v17  ;;  %v1157_v53 = vld [vmem:[%s1441_s1 + $0x1d8] sm:$0xff]   ;;  %v1161_v57 = vld [vmem:[%s1441_s1 + $0x1e0] sm:$0xff]   ;;  %v25_v0 = vld [vmem:[%s1442_s0 + $0x68] sm:$0xff] }
  0x13   :  { %v1158_v54 = vld [vmem:[%s1441_s1 + $0x118] sm:$0xff]   ;;  %v1162_v58 = vld [vmem:[%s1441_s1 + $0x120] sm:$0xff]   ;;  %v912_v2 = vcombine.high %v21_v63, %v25_v0  ;;  %v1164_v3 = vld [vmem:[%s1441_s1 + $0x168] sm:$0xff]   ;;  %v911_v4 = vcombine.low %v21_v63, %v25_v0 }
  0x14   :  { %1009 = vmatpush3.bf16.msra.mxu0 %v1130_v18  ;;  %v1159_v55 = vld [vmem:[%s1441_s1 + $0x198] sm:$0xff]   ;;  %v1163_v59 = vld [vmem:[%s1441_s1 + $0x1a0] sm:$0xff]   ;;  %v1165_v5 = vld [vmem:[%s1441_s1 + $0x1e8] sm:$0xff]  }
  0x15   :  { %1037 = vmatpush3.bf16.msra.mxu1 %v1131_v19  ;;  %1010 = vmatprep.subr.bf16.mxu0 %v1132_v20  ;;  %v20_v60 = vld [vmem:[%s1442_s0 + $0x40] sm:$0xff]  ;;  %v1166_v6 = vld [vmem:[%s1441_s1 + $0x128] sm:$0xff]   ;;  %v1168_v8 = vld [vmem:[%s1441_s1 + $0x170] sm:$0xff]  }
  0x16   :  { %1038 = vmatprep.subr.bf16.mxu1 %v1133_v21  ;;  %v24_v61 = vld [vmem:[%s1442_s0 + $0x60] sm:$0xff]  ;;  %v1167_v7 = vld [vmem:[%s1441_s1 + $0x1a8] sm:$0xff]   ;;  %v1169_v9 = vld [vmem:[%s1441_s1 + $0x1f0] sm:$0xff]  }
  0x17   :  { %v910_v62 = vcombine.high %v20_v60, %v24_v61  ;;  %v909_v1 = vcombine.low %v20_v60, %v24_v61  ;;  %v1170_v10 = vld [vmem:[%s1441_s1 + $0x130] sm:$0xff]   ;;  %v1172_v12 = vld [vmem:[%s1441_s1 + $0x178] sm:$0xff]  }
  0x18   :  { %1011 = vmatpush3.bf16.msra.mxu0 %v1134_v22  ;;  %v1171_v11 = vld [vmem:[%s1441_s1 + $0x1b0] sm:$0xff]   ;;  %v1173_v13 = vld [vmem:[%s1441_s1 + $0x1f8] sm:$0xff]  }
  0x19   :  { %1039 = vmatpush3.bf16.msra.mxu1 %v1135_v23  ;;  %1012 = vmatprep.subr.bf16.mxu0 %v1136_v24  ;;  %v1174_v14 = vld [vmem:[%s1441_s1 + $0x138] sm:$0xff]   ;;  %v14_v16 = vld [vmem:[%s1442_s0 + $0x10] sm:$0xff] }
  0x1a   :  { %1040 = vmatprep.subr.bf16.mxu1 %v1137_v25  ;;  %v1175_v15 = vld [vmem:[%s1441_s1 + $0x1b8] sm:$0xff]   ;;  %v18_v17 = vld [vmem:[%s1442_s0 + $0x30] sm:$0xff] }
  0x1b   :  { %v15_v18 = vld [vmem:[%s1442_s0 + $0x18] sm:$0xff]  ;;  %v905_v20 = vcombine.low %v14_v16, %v18_v17  ;;  %v906_v21 = vcombine.high %v14_v16, %v18_v17  ;;  %v22_v24 = vld [vmem:[%s1442_s0 + $0x50] sm:$0xff] }
  0x1c   :  { %1013 = vmatpush3.bf16.msra.mxu0 %v1138_v26  ;;  %v19_v19 = vld [vmem:[%s1442_s0 + $0x38] sm:$0xff]  ;;  %v26_v25 = vld [vmem:[%s1442_s0 + $0x70] sm:$0xff] }
  0x1d   :  { %1041 = vmatpush3.bf16.msra.mxu1 %v1139_v27  ;;  %1014 = vmatprep.subr.bf16.mxu0 %v1140_v28  ;;  %v907_v22 = vcombine.low %v15_v18, %v19_v19  ;;  %v908_v23 = vcombine.high %v15_v18, %v19_v19  ;;  %v23_v26 = vld [vmem:[%s1442_s0 + $0x58] sm:$0xff]  ;;  %v914_v27 = vcombine.high %v22_v24, %v26_v25 }
  0x1e   :  { %1042 = vmatprep.subr.bf16.mxu1 %v1141_v29  ;;  %v27_v28 = vld [vmem:[%s1442_s0 + $0x78] sm:$0xff] }
  0x1f   :  { %v916_v29 = vcombine.high %v23_v26, %v27_v28 }
  0x20   :  { %1015 = vmatpush3.bf16.msra.mxu0 %v1142_v30  ;;  %v913_v30 = vcombine.low %v22_v24, %v26_v25 }
  0x21   :  { %1043 = vmatpush3.bf16.msra.mxu1 %v1143_v31  ;;  %1056 = vmatprep.subr.bf16.mxu0 %v1144_v40  ;;  %v915_v31 = vcombine.low %v23_v26, %v27_v28 }
  0x22   :  { %1084 = vmatprep.subr.bf16.mxu1 %v1145_v41 }
  0x23   :  { %653 = vmatmul.mubr.bf16.vlgmr.msra.gmra.mrb[0].mxu0 %v901_v35 }
  0x24   :  { %702 = vmatmul.mubr.bf16.vlgmr.msra.gmra.mrb[0].mxu1 %v903_v38  ;;  %1057 = vmatpush3.bf16.msra.mxu0 %v1146_v42 }
  0x25   :  { %1085 = vmatpush3.bf16.msra.mxu1 %v1147_v43  ;;  %1058 = vmatprep.subr.bf16.mxu0 %v1148_v44 }
  0x26   :  { %1086 = vmatprep.subr.bf16.mxu1 %v1149_v45  ;;  %660 = vmatprep.mubr.bf16.mxu0 %v910_v62 }
  0x27   :  { %709 = vmatprep.mubr.bf16.mxu1 %v912_v2 }
  0x28   :  { %1059 = vmatpush3.bf16.msra.mxu0 %v1150_v46 }
  0x29   :  { %1087 = vmatpush3.bf16.msra.mxu1 %v1151_v47  ;;  %1060 = vmatprep.subr.bf16.mxu0 %v1152_v48 }
  0x2a   :  { %1088 = vmatprep.subr.bf16.mxu1 %v1153_v49 }
  0x2b   :  { %661 = vmatmul.mubr.bf16.gmra.mrb[4].mxu0 %v909_v1 }
  0x2c   :  { %1061 = vmatpush3.bf16.msra.mxu0 %v1154_v50  ;;  %710 = vmatmul.mubr.bf16.gmra.mrb[4].mxu1 %v911_v4 }
  0x2d   :  { %1089 = vmatpush3.bf16.msra.mxu1 %v1155_v51  ;;  %1062 = vmatprep.subr.bf16.mxu0 %v1156_v52 }
  0x2e   :  { %1090 = vmatprep.subr.bf16.mxu1 %v1157_v53  ;;  %750 = vmatprep.mubr.bf16.mxu0 %v906_v21 }
  0x2f   :  { %799 = vmatprep.mubr.bf16.mxu1 %v908_v23 }
  0x30   :  { %1063 = vmatpush3.bf16.msra.mxu0 %v1158_v54 }
  0x31   :  { %1091 = vmatpush3.bf16.msra.mxu1 %v1159_v55  ;;  %1064 = vmatprep.subr.bf16.mxu0 %v1160_v56 }
  0x32   :  { %1092 = vmatprep.subr.bf16.mxu1 %v1161_v57 }
  0x34   :  { %1065 = vmatpush3.bf16.msra.mxu0 %v1162_v58 }
  0x35   :  { %1093 = vmatpush3.bf16.msra.mxu1 %v1163_v59  ;;  %1066 = vmatprep.subr.bf16.mxu0 %v1164_v3 }
  0x36   :  { %1094 = vmatprep.subr.bf16.mxu1 %v1165_v5 }
  0x38   :  { %1067 = vmatpush3.bf16.msra.mxu0 %v1166_v6 }
  0x39   :  { %1095 = vmatpush3.bf16.msra.mxu1 %v1167_v7  ;;  %1068 = vmatprep.subr.bf16.mxu0 %v1168_v8 }
  0x3a   :  { %1096 = vmatprep.subr.bf16.mxu1 %v1169_v9 }
  0x3c   :  { %1069 = vmatpush3.bf16.msra.mxu0 %v1170_v10 }
  0x3d   :  { %1097 = vmatpush3.bf16.msra.mxu1 %v1171_v11  ;;  %1070 = vmatprep.subr.bf16.mxu0 %v1172_v12 }
  0x3e   :  { %1098 = vmatprep.subr.bf16.mxu1 %v1173_v13 }
  0x40   :  { %1071 = vmatpush3.bf16.msra.mxu0 %v1174_v14 }
  0x41   :  { %1099 = vmatpush3.bf16.msra.mxu1 %v1175_v15 }
  0x43   :  { %751 = vmatmul.mubr.bf16.vlgmr.msra.gmra.mrb[8].mxu0 %v905_v20 }
  0x44   :  { %800 = vmatmul.mubr.bf16.vlgmr.msra.gmra.mrb[8].mxu1 %v907_v22  ;;  %758 = vmatprep.mubr.bf16.mxu0 %v914_v27 }
  0x45   :  { %807 = vmatprep.mubr.bf16.mxu1 %v916_v29 }
  0x4b   :  { %759 = vmatmul.mubr.bf16.gmra.mrb[12].mxu0 %v913_v30 }
  0x4c   :  { %808 = vmatmul.mubr.bf16.gmra.mrb[12].mxu1 %v915_v31 }
  0xf6   :  { %v1016_v32 = vpop.f32.mrb[0].mxu0 }
  0xf7   :  { %v1044_v33 = vpop.f32.mrb[0].mxu1  ;;  %v1017_v34 = vpop.f32.mrb[1].mxu0 }
  0xf8   :  { %v1018_v35 = vadd.f32 %v1017_v34, %v1016_v32  ;;  %v1045_v36 = vpop.f32.mrb[1].mxu1  ;;  %v1019_v37 = vpop.f32.mrb[2].mxu0 }
  0xf9   :  { %v1046_v38 = vadd.f32 %v1045_v36, %v1044_v33  ;;  %v1047_v39 = vpop.f32.mrb[2].mxu1  ;;  %v1020_v40 = vpop.f32.mrb[3].mxu0 }
  0xfa   :  { %v1021_v41 = vadd.f32 %v1020_v40, %v1019_v37  ;;  %v1048_v42 = vpop.f32.mrb[3].mxu1 }
  0xfb   :  { %v704_v43 = vadd.f32 %v1046_v38, %v1018_v35  ;;  %v1049_v44 = vadd.f32 %v1048_v42, %v1047_v39 }
  0xfd   :  { %v707_v45 = vadd.f32 %v1049_v44, %v1021_v41 }
  0xfe   :  { %v1022_v46 = vpop.f32.mrb[4].mxu0 }
  0xff   :  { %v1050_v47 = vpop.f32.mrb[4].mxu1  ;;  %v1023_v48 = vpop.f32.mrb[5].mxu0 }
 0x100   :  { %v1024_v49 = vadd.f32 %v1023_v48, %v1022_v46  ;;  %v1051_v50 = vpop.f32.mrb[5].mxu1  ;;  %v1025_v51 = vpop.f32.mrb[6].mxu0 }
 0x101   :  { %v1052_v52 = vadd.f32 %v1051_v50, %v1050_v47  ;;  %v1053_v53 = vpop.f32.mrb[6].mxu1  ;;  %v1026_v54 = vpop.f32.mrb[7].mxu0 }
 0x102   :  { %v1027_v55 = vadd.f32 %v1026_v54, %v1025_v51  ;;  %v1054_v56 = vpop.f32.mrb[7].mxu1 }
 0x103   :  { %v712_v57 = vadd.f32 %v1052_v52, %v1024_v49  ;;  %v1055_v58 = vadd.f32 %v1054_v56, %v1053_v53 }
 0x105   :  { %v715_v59 = vadd.f32 %v1055_v58, %v1027_v55 }
 0x116   :  { %v1072_v60 = vpop.f32.mrb[8].mxu0 }
 0x117   :  { %v1100_v61 = vpop.f32.mrb[8].mxu1  ;;  %v1073_v62 = vpop.f32.mrb[9].mxu0 }
 0x118   :  { %v1101_v63 = vpop.f32.mrb[9].mxu1  ;;  %v1074_v0 = vadd.f32 %v1073_v62, %v1072_v60  ;;  %v1075_v2 = vpop.f32.mrb[10].mxu0 }
 0x119   :  { %v1102_v1 = vadd.f32 %v1101_v63, %v1100_v61  ;;  %v1103_v3 = vpop.f32.mrb[10].mxu1  ;;  %v1076_v4 = vpop.f32.mrb[11].mxu0 }
 0x11a   :  { %v1104_v5 = vpop.f32.mrb[11].mxu1  ;;  %v753_v6 = vadd.f32 %v1074_v0, %v704_v43  ;;  %v1077_v7 = vadd.f32 %v1076_v4, %v1075_v2 }
 0x11b   :  { %v1105_v8 = vadd.f32 %v1104_v5, %v1103_v3 }
 0x11c   :  { %v802_v9 = vadd.f32 %v1102_v1, %v753_v6  ;;  %v756_v10 = vadd.f32 %v1077_v7, %v707_v45 }
 0x11e   :  { %v805_v11 = vadd.f32 %v1105_v8, %v756_v10  ;;  %v1078_v12 = vpop.f32.mrb[12].mxu0 }
 0x11f   :  { %v1106_v13 = vpop.f32.mrb[12].mxu1  ;;  %v1079_v14 = vpop.f32.mrb[13].mxu0 }
 0x120   :  { %v1107_v15 = vpop.f32.mrb[13].mxu1  ;;  %v816_v16 = vadd.f32 %v805_v11, %v802_v9  ;;  %v1080_v17 = vadd.f32 %v1079_v14, %v1078_v12  ;;  %v1081_v19 = vpop.f32.mrb[14].mxu0 }
 0x121   :  { %v1108_v18 = vadd.f32 %v1107_v15, %v1106_v13  ;;  %v1109_v20 = vpop.f32.mrb[14].mxu1  ;;  %v1082_v21 = vpop.f32.mrb[15].mxu0 }
 0x122   :  { %v1110_v22 = vpop.f32.mrb[15].mxu1  ;;  %v817_v23 = vrot.slane %v816_v16, 4  ;;  %v761_v24 = vadd.f32 %v1080_v17, %v712_v57  ;;  %v1083_v25 = vadd.f32 %v1082_v21, %v1081_v19 }
 0x123   :  { %v1111_v26 = vadd.f32 %v1110_v22, %v1109_v20 }
 0x124   :  { %v818_v27 = vadd.f32 %v817_v23, %v816_v16  ;;  %v810_v28 = vadd.f32 %v1108_v18, %v761_v24  ;;  %v764_v29 = vadd.f32 %v1083_v25, %v715_v59 }
 0x126   :  { %v819_v30 = vrot.slane %v818_v27, 2  ;;  %v813_v31 = vadd.f32 %v1111_v26, %v764_v29 }
 0x128   :  { %v820_v32 = vadd.f32 %v819_v30, %v818_v27  ;;  %v823_v33 = vadd.f32 %v813_v31, %v810_v28 }
 0x12a   :  { %v821_v34 = vrot.slane %v820_v32, 1  ;;  %v824_v35 = vrot.slane %v823_v33, 4 }
 0x12c   :  { %v822_v36 = vadd.f32 %v821_v34, %v820_v32  ;;  %v825_v37 = vadd.f32 %v824_v35, %v823_v33 }
 0x12e   :  { %v831_v38 = vmul.f32 0.0625, %v822_v36  ;;  %v826_v39 = vrot.slane %v825_v37, 2 }
 0x130   :  { %v833_v40 = vsub.f32 %v802_v9, %v831_v38  ;;  %v834_v41 = vsub.f32 %v805_v11, %v831_v38  ;;  %v827_v42 = vadd.f32 %v826_v39, %v825_v37 }
 0x132   :  { %v837_v43 = vmul.f32 %v833_v40, %v833_v40  ;;  %v838_v44 = vmul.f32 %v834_v41, %v834_v41  ;;  %v828_v45 = vrot.slane %v827_v42, 1 }
 0x134   :  { %v841_v46 = vadd.f32 %v838_v44, %v837_v43  ;;  %v829_v47 = vadd.f32 %v828_v45, %v827_v42 }
 0x136   :  { %v842_v48 = vrot.slane %v841_v46, 4  ;;  %v832_v49 = vmul.f32 0.0625, %v829_v47 }
 0x138   :  { %v843_v50 = vadd.f32 %v842_v48, %v841_v46  ;;  %v835_v51 = vsub.f32 %v810_v28, %v832_v49  ;;  %v836_v52 = vsub.f32 %v813_v31, %v832_v49 }
 0x13a   :  { %v844_v53 = vrot.slane %v843_v50, 2  ;;  %v839_v54 = vmul.f32 %v835_v51, %v835_v51  ;;  %v840_v55 = vmul.f32 %v836_v52, %v836_v52 }
 0x13c   :  { %v845_v56 = vadd.f32 %v844_v53, %v843_v50  ;;  %v848_v57 = vadd.f32 %v840_v55, %v839_v54 }
 0x13e   :  { %v846_v58 = vrot.slane %v845_v56, 1  ;;  %v849_v59 = vrot.slane %v848_v57, 4 }
 0x140   :  { %v847_v60 = vadd.f32 %v846_v58, %v845_v56  ;;  %v850_v61 = vadd.f32 %v849_v59, %v848_v57 }
 0x142   :  { %v855_v62 = vmul.f32 0.0625, %v847_v60  ;;  %v851_v63 = vrot.slane %v850_v61, 2 }
 0x144   :  { %v857_v0 = vadd.f32 1e-05, %v855_v62  ;;  %v852_v1 = vadd.f32 %v851_v63, %v850_v61 }
 0x146   :  { %1176 = vrsqrt.f32 %v857_v0  ;;  %v853_v2 = vrot.slane %v852_v1, 1 }
 0x148   :  { %v854_v3 = vadd.f32 %v853_v2, %v852_v1 }
 0x14a   :  { %v856_v4 = vmul.f32 0.0625, %v854_v3 }
 0x14c   :  { %v858_v5 = vadd.f32 1e-05, %v856_v4 }
 0x14e   :  { %1178 = vrsqrt.f32 %v858_v5 }
 0x150   :  { %v1177_v6 = vpop.eup %1176 }
 0x151   :  { %v861_v7 = vmul.f32 %v1177_v6, %v833_v40  ;;  %v862_v8 = vmul.f32 %v1177_v6, %v834_v41 }
 0x153   :  { %vm865_vm0 = vcmp.ge.f32.partialorder %v861_v7, 0.0  ;;  %vm866_vm1 = vcmp.ge.f32.partialorder %v862_v8, 0.0  ;;  %v869_v9 = vmul.f32 0.2, %v861_v7  ;;  %v870_v10 = vmul.f32 0.2, %v862_v8 }
 0x155   :  { %v873_v11 = vsel %vm865_vm0, %v861_v7, %v869_v9  ;;  %v874_v12 = vsel %vm866_vm1, %v862_v8, %v870_v10 }
 0x156   :  { %v992_v13 = vpack.c.bf16 %v874_v12, %v873_v11 }
 0x158   :  { %v1179_v14 = vpop.eup %1178  ;;  %993 = vst [vmem:[%s1443_s2] sm:$0xff] %v992_v13  }
 0x159   :  { %v863_v15 = vmul.f32 %v1179_v14, %v835_v51  ;;  %v864_v16 = vmul.f32 %v1179_v14, %v836_v52 }
 0x15b   :  { %vm867_vm2 = vcmp.ge.f32.partialorder %v863_v15, 0.0  ;;  %vm868_vm3 = vcmp.ge.f32.partialorder %v864_v16, 0.0  ;;  %v871_v17 = vmul.f32 0.2, %v863_v15  ;;  %v872_v18 = vmul.f32 0.2, %v864_v16 }
 0x15d   :  { %v875_v19 = vsel %vm867_vm2, %v863_v15, %v871_v17  ;;  %v876_v20 = vsel %vm868_vm3, %v864_v16, %v872_v18 }
 0x15e   :  { %v997_v21 = vpack.c.bf16 %v876_v20, %v875_v19 }
 0x160   :  { %999 = vst [vmem:[%s1443_s2 + $0x8] sm:$0xff] %v997_v21  }

// kernel: discriminator_forward.7
= control target key start
LH: loop header
LB: loop body
LE: loop exit
PB: predicated region body
PF: predicated region fallthrough
CT: control target
= control target key end

     0   :  { %s2409_s1 = inlined_call_operand.vmem [shape: bf16[1152,256], index: 1, kind: input, shape index: {}]   ;;  %s2410_s0 = inlined_call_operand.vmem [shape: bf16[1,32,1152], index: 0, kind: input, shape index: {}]   ;;  %s2411_s2 = inlined_call_operand.vmem [shape: bf16[1,32,256], index: 2, kind: output, shape index: {}]  }
   0x1   :  { %v1625_v0 = vld [vmem:[%s2409_s1 + $0x4] ss:$8 sps:$4 sm:$0xff]   ;;  %v1629_v2 = vld [vmem:[%s2409_s1] ss:$8 sps:$4 sm:$0xff]   ;;  %v1631_v4 = vld [vmem:[%s2409_s1 + $0x14] ss:$8 sps:$4 sm:$0xff]  }
   0x2   :  { %v1627_v1 = vld [vmem:[%s2409_s1 + $0x204] ss:$8 sps:$4 sm:$0xff]   ;;  %988 = vmatprep.subr.bf16.mxu1 %v1625_v0  ;;  %v1630_v3 = vld [vmem:[%s2409_s1 + $0x200] ss:$8 sps:$4 sm:$0xff]   ;;  %v1633_v5 = vld [vmem:[%s2409_s1 + $0x214] ss:$8 sps:$4 sm:$0xff]  }
   0x3   :  { %1094 = vmatprep.subr.bf16.mxu0 %v1627_v1  ;;  %989 = vmatpush1.bf16.msra.mxu1 %v1629_v2  ;;  %v1635_v6 = vld [vmem:[%s2409_s1 + $0x10] ss:$8 sps:$4 sm:$0xff]   ;;  %v1637_v8 = vld [vmem:[%s2409_s1 + $0x24] ss:$8 sps:$4 sm:$0xff]   ;;  %v1641_v10 = vld [vmem:[%s2409_s1 + $0x20] ss:$8 sps:$4 sm:$0xff]  }
   0x4   :  { %1095 = vmatpush1.bf16.msra.mxu0 %v1630_v3  ;;  %990 = vmatprep.subr.bf16.mxu1 %v1631_v4  ;;  %v1636_v7 = vld [vmem:[%s2409_s1 + $0x210] ss:$8 sps:$4 sm:$0xff]   ;;  %v1639_v9 = vld [vmem:[%s2409_s1 + $0x224] ss:$8 sps:$4 sm:$0xff]   ;;  %v1642_v11 = vld [vmem:[%s2409_s1 + $0x220] ss:$8 sps:$4 sm:$0xff]  }
   0x5   :  { %1096 = vmatprep.subr.bf16.mxu0 %v1633_v5  ;;  %v1643_v12 = vld [vmem:[%s2409_s1 + $0x34] ss:$8 sps:$4 sm:$0xff]   ;;  %v1647_v14 = vld [vmem:[%s2409_s1 + $0x30] ss:$8 sps:$4 sm:$0xff]   ;;  %v1649_v16 = vld [vmem:[%s2409_s1 + $0x44] ss:$8 sps:$4 sm:$0xff]  }
   0x6   :  { %v1645_v13 = vld [vmem:[%s2409_s1 + $0x234] ss:$8 sps:$4 sm:$0xff]   ;;  %v1648_v15 = vld [vmem:[%s2409_s1 + $0x230] ss:$8 sps:$4 sm:$0xff]   ;;  %v1651_v17 = vld [vmem:[%s2409_s1 + $0x244] ss:$8 sps:$4 sm:$0xff]  }
   0x7   :  { %991 = vmatpush1.bf16.msra.mxu1 %v1635_v6  ;;  %v1653_v18 = vld [vmem:[%s2409_s1 + $0x40] ss:$8 sps:$4 sm:$0xff]   ;;  %v1655_v20 = vld [vmem:[%s2409_s1 + $0x54] ss:$8 sps:$4 sm:$0xff]   ;;  %v1659_v22 = vld [vmem:[%s2409_s1 + $0x50] ss:$8 sps:$4 sm:$0xff]  }
   0x8   :  { %1097 = vmatpush1.bf16.msra.mxu0 %v1636_v7  ;;  %992 = vmatprep.subr.bf16.mxu1 %v1637_v8  ;;  %v1654_v19 = vld [vmem:[%s2409_s1 + $0x240] ss:$8 sps:$4 sm:$0xff]   ;;  %v1657_v21 = vld [vmem:[%s2409_s1 + $0x254] ss:$8 sps:$4 sm:$0xff]   ;;  %v1660_v23 = vld [vmem:[%s2409_s1 + $0x250] ss:$8 sps:$4 sm:$0xff]  }
   0x9   :  { %1098 = vmatprep.subr.bf16.mxu0 %v1639_v9  ;;  %v1661_v24 = vld [vmem:[%s2409_s1 + $0x64] ss:$8 sps:$4 sm:$0xff]   ;;  %v1665_v26 = vld [vmem:[%s2409_s1 + $0x60] ss:$8 sps:$4 sm:$0xff]   ;;  %v1667_v28 = vld [vmem:[%s2409_s1 + $0x74] ss:$8 sps:$4 sm:$0xff]  }
   0xa   :  { %v1663_v25 = vld [vmem:[%s2409_s1 + $0x264] ss:$8 sps:$4 sm:$0xff]   ;;  %v1666_v27 = vld [vmem:[%s2409_s1 + $0x260] ss:$8 sps:$4 sm:$0xff]   ;;  %v1669_v29 = vld [vmem:[%s2409_s1 + $0x274] ss:$8 sps:$4 sm:$0xff]  }
   0xb   :  { %993 = vmatpush1.bf16.msra.mxu1 %v1641_v10  ;;  %v1671_v30 = vld [vmem:[%s2409_s1 + $0x70] ss:$8 sps:$4 sm:$0xff]   ;;  %v1673_v32 = vld [vmem:[%s2409_s1 + $0x84] ss:$8 sps:$4 sm:$0xff]   ;;  %v1677_v34 = vld [vmem:[%s2409_s1 + $0x80] ss:$8 sps:$4 sm:$0xff]  }
   0xc   :  { %1099 = vmatpush1.bf16.msra.mxu0 %v1642_v11  ;;  %994 = vmatprep.subr.bf16.mxu1 %v1643_v12  ;;  %v1672_v31 = vld [vmem:[%s2409_s1 + $0x270] ss:$8 sps:$4 sm:$0xff]   ;;  %v1675_v33 = vld [vmem:[%s2409_s1 + $0x284] ss:$8 sps:$4 sm:$0xff]   ;;  %v1678_v35 = vld [vmem:[%s2409_s1 + $0x280] ss:$8 sps:$4 sm:$0xff]  }
   0xd   :  { %1100 = vmatprep.subr.bf16.mxu0 %v1645_v13  ;;  %v1679_v36 = vld [vmem:[%s2409_s1 + $0x94] ss:$8 sps:$4 sm:$0xff]   ;;  %v1683_v38 = vld [vmem:[%s2409_s1 + $0x90] ss:$8 sps:$4 sm:$0xff]   ;;  %v1685_v40 = vld [vmem:[%s2409_s1 + $0xa4] ss:$8 sps:$4 sm:$0xff]  }
   0xe   :  { %v1681_v37 = vld [vmem:[%s2409_s1 + $0x294] ss:$8 sps:$4 sm:$0xff]   ;;  %v1684_v39 = vld [vmem:[%s2409_s1 + $0x290] ss:$8 sps:$4 sm:$0xff]   ;;  %v1687_v41 = vld [vmem:[%s2409_s1 + $0x2a4] ss:$8 sps:$4 sm:$0xff]  }
   0xf   :  { %995 = vmatpush1.bf16.msra.mxu1 %v1647_v14  ;;  %v1689_v42 = vld [vmem:[%s2409_s1 + $0xa0] ss:$8 sps:$4 sm:$0xff]   ;;  %v1691_v44 = vld [vmem:[%s2409_s1 + $0xb4] ss:$8 sps:$4 sm:$0xff]   ;;  %v1695_v46 = vld [vmem:[%s2409_s1 + $0xb0] ss:$8 sps:$4 sm:$0xff]  }
  0x10   :  { %1101 = vmatpush1.bf16.msra.mxu0 %v1648_v15  ;;  %996 = vmatprep.subr.bf16.mxu1 %v1649_v16  ;;  %v1690_v43 = vld [vmem:[%s2409_s1 + $0x2a0] ss:$8 sps:$4 sm:$0xff]   ;;  %v1693_v45 = vld [vmem:[%s2409_s1 + $0x2b4] ss:$8 sps:$4 sm:$0xff]   ;;  %v1696_v47 = vld [vmem:[%s2409_s1 + $0x2b0] ss:$8 sps:$4 sm:$0xff]  }
  0x11   :  { %1102 = vmatprep.subr.bf16.mxu0 %v1651_v17  ;;  %v1723_v48 = vld [vmem:[%s2410_s0 + $0x4] ss:$36 sps:$4 sm:$0xff]   ;;  %v1729_v51 = vld [vmem:[%s2410_s0 + $0x14] ss:$36 sps:$4 sm:$0xff]  }
  0x12   :  { %v1697_v49 = vld [vmem:[%s2409_s1 + $0xc4] ss:$8 sps:$4 sm:$0xff]   ;;  %1020 = vmatprep.mubr.bf16.mxu1 %v1723_v48  ;;  %v1701_v52 = vld [vmem:[%s2409_s1 + $0xc0] ss:$8 sps:$4 sm:$0xff]   ;;  %v1703_v54 = vld [vmem:[%s2409_s1 + $0xd4] ss:$8 sps:$4 sm:$0xff]   ;;  %1126 = vmatprep.mubr.bf16.mxu0 %v1729_v51 }
  0x13   :  { %997 = vmatpush1.bf16.msra.mxu1 %v1653_v18  ;;  %v1699_v50 = vld [vmem:[%s2409_s1 + $0x2c4] ss:$8 sps:$4 sm:$0xff]   ;;  %v1702_v53 = vld [vmem:[%s2409_s1 + $0x2c0] ss:$8 sps:$4 sm:$0xff]   ;;  %v1705_v55 = vld [vmem:[%s2409_s1 + $0x2d4] ss:$8 sps:$4 sm:$0xff]  }
  0x14   :  { %1103 = vmatpush1.bf16.msra.mxu0 %v1654_v19  ;;  %998 = vmatprep.subr.bf16.mxu1 %v1655_v20  ;;  %v1707_v56 = vld [vmem:[%s2409_s1 + $0xd0] ss:$8 sps:$4 sm:$0xff]   ;;  %v1709_v58 = vld [vmem:[%s2409_s1 + $0xe4] ss:$8 sps:$4 sm:$0xff]   ;;  %v1713_v60 = vld [vmem:[%s2409_s1 + $0xe0] ss:$8 sps:$4 sm:$0xff]  }
  0x15   :  { %1104 = vmatprep.subr.bf16.mxu0 %v1657_v21  ;;  %v1708_v57 = vld [vmem:[%s2409_s1 + $0x2d0] ss:$8 sps:$4 sm:$0xff]   ;;  %v1711_v59 = vld [vmem:[%s2409_s1 + $0x2e4] ss:$8 sps:$4 sm:$0xff]   ;;  %v1714_v61 = vld [vmem:[%s2409_s1 + $0x2e0] ss:$8 sps:$4 sm:$0xff]  }
  0x16   :  { %v1715_v62 = vld [vmem:[%s2409_s1 + $0xf4] ss:$8 sps:$4 sm:$0xff]   ;;  %v1719_v0 = vld [vmem:[%s2409_s1 + $0xf0] ss:$8 sps:$4 sm:$0xff]   ;;  %v1726_v2 = vld [vmem:[%s2409_s1 + $0x104] ss:$8 sps:$4 sm:$0xff]  }
  0x17   :  { %999 = vmatpush1.bf16.msra.mxu1 %v1659_v22  ;;  %v1717_v63 = vld [vmem:[%s2409_s1 + $0x2f4] ss:$8 sps:$4 sm:$0xff]   ;;  %v1720_v1 = vld [vmem:[%s2409_s1 + $0x2f0] ss:$8 sps:$4 sm:$0xff]   ;;  %v1732_v3 = vld [vmem:[%s2409_s1 + $0x304] ss:$8 sps:$4 sm:$0xff]  }
  0x18   :  { %1105 = vmatpush1.bf16.msra.mxu0 %v1660_v23  ;;  %1000 = vmatprep.subr.bf16.mxu1 %v1661_v24  ;;  %v1721_v4 = vld [vmem:[%s2410_s0] ss:$36 sps:$4 sm:$0xff]   ;;  %v1727_v6 = vld [vmem:[%s2410_s0 + $0x10] ss:$36 sps:$4 sm:$0xff]  }
  0x19   :  { %1106 = vmatprep.subr.bf16.mxu0 %v1663_v25  ;;  %v1724_v5 = vld [vmem:[%s2409_s1 + $0x100] ss:$8 sps:$4 sm:$0xff]   ;;  %v1735_v8 = vld [vmem:[%s2409_s1 + $0x114] ss:$8 sps:$4 sm:$0xff]   ;;  %v1733_v10 = vld [vmem:[%s2409_s1 + $0x110] ss:$8 sps:$4 sm:$0xff]  }
  0x1a   :  { %v1730_v7 = vld [vmem:[%s2409_s1 + $0x300] ss:$8 sps:$4 sm:$0xff]   ;;  %v1738_v9 = vld [vmem:[%s2409_s1 + $0x314] ss:$8 sps:$4 sm:$0xff]   ;;  %v1736_v11 = vld [vmem:[%s2409_s1 + $0x310] ss:$8 sps:$4 sm:$0xff]  }
  0x1b   :  { %1001 = vmatpush1.bf16.msra.mxu1 %v1665_v26  ;;  %v1741_v12 = vld [vmem:[%s2409_s1 + $0x124] ss:$8 sps:$4 sm:$0xff]   ;;  %v1739_v14 = vld [vmem:[%s2409_s1 + $0x120] ss:$8 sps:$4 sm:$0xff]   ;;  %v1747_v16 = vld [vmem:[%s2409_s1 + $0x134] ss:$8 sps:$4 sm:$0xff]  }
  0x1c   :  { %1107 = vmatpush1.bf16.msra.mxu0 %v1666_v27  ;;  %1002 = vmatprep.subr.bf16.mxu1 %v1667_v28  ;;  %v1744_v13 = vld [vmem:[%s2409_s1 + $0x324] ss:$8 sps:$4 sm:$0xff]   ;;  %v1742_v15 = vld [vmem:[%s2409_s1 + $0x320] ss:$8 sps:$4 sm:$0xff]   ;;  %v1750_v17 = vld [vmem:[%s2409_s1 + $0x334] ss:$8 sps:$4 sm:$0xff]  }
  0x1d   :  { %1108 = vmatprep.subr.bf16.mxu0 %v1669_v29  ;;  %v1745_v18 = vld [vmem:[%s2409_s1 + $0x130] ss:$8 sps:$4 sm:$0xff]   ;;  %v1753_v20 = vld [vmem:[%s2409_s1 + $0x144] ss:$8 sps:$4 sm:$0xff]   ;;  %v1751_v22 = vld [vmem:[%s2409_s1 + $0x140] ss:$8 sps:$4 sm:$0xff]  }
  0x1e   :  { %v1748_v19 = vld [vmem:[%s2409_s1 + $0x330] ss:$8 sps:$4 sm:$0xff]   ;;  %v1756_v21 = vld [vmem:[%s2409_s1 + $0x344] ss:$8 sps:$4 sm:$0xff]   ;;  %v1754_v23 = vld [vmem:[%s2409_s1 + $0x340] ss:$8 sps:$4 sm:$0xff]  }
  0x1f   :  { %1003 = vmatpush1.bf16.msra.mxu1 %v1671_v30  ;;  %v1759_v24 = vld [vmem:[%s2409_s1 + $0x154] ss:$8 sps:$4 sm:$0xff]   ;;  %v1757_v26 = vld [vmem:[%s2409_s1 + $0x150] ss:$8 sps:$4 sm:$0xff]   ;;  %v1765_v28 = vld [vmem:[%s2409_s1 + $0x164] ss:$8 sps:$4 sm:$0xff]  }
  0x20   :  { %1109 = vmatpush1.bf16.msra.mxu0 %v1672_v31  ;;  %1004 = vmatprep.subr.bf16.mxu1 %v1673_v32  ;;  %v1762_v25 = vld [vmem:[%s2409_s1 + $0x354] ss:$8 sps:$4 sm:$0xff]   ;;  %v1760_v27 = vld [vmem:[%s2409_s1 + $0x350] ss:$8 sps:$4 sm:$0xff]   ;;  %v1815_v31 = vld [vmem:[%s2410_s0 + $0x48] ss:$36 sps:$4 sm:$0xff]  }
  0x21   :  { %1110 = vmatprep.subr.bf16.mxu0 %v1675_v33  ;;  %v1811_v29 = vld [vmem:[%s2410_s0 + $0x4c] ss:$36 sps:$4 sm:$0xff]   ;;  %v1813_v30 = vld [vmem:[%s2410_s0 + $0x5c] ss:$36 sps:$4 sm:$0xff]  }
  0x22   :  { %v1768_v32 = vld [vmem:[%s2409_s1 + $0x364] ss:$8 sps:$4 sm:$0xff]   ;;  %v1819_v33 = vld [vmem:[%s2410_s0 + $0x58] ss:$36 sps:$4 sm:$0xff]  }
  0x23   :  { %1005 = vmatpush1.bf16.msra.mxu1 %v1677_v34  ;;  %v1763_v34 = vld [vmem:[%s2409_s1 + $0x160] ss:$8 sps:$4 sm:$0xff]   ;;  %v1781_v48 = vld [vmem:[%s2409_s1 + $0x190] ss:$8 sps:$4 sm:$0xff]   ;;  %v1792_v51 = vld [vmem:[%s2409_s1 + $0x3a4] ss:$8 sps:$4 sm:$0xff]  }
  0x24   :  { %1111 = vmatpush1.bf16.msra.mxu0 %v1678_v35  ;;  %1006 = vmatprep.subr.bf16.mxu1 %v1679_v36  ;;  %v1766_v35 = vld [vmem:[%s2409_s1 + $0x360] ss:$8 sps:$4 sm:$0xff]   ;;  %v1771_v36 = vld [vmem:[%s2409_s1 + $0x174] ss:$8 sps:$4 sm:$0xff]  }
  0x25   :  { %1112 = vmatprep.subr.bf16.mxu0 %v1681_v37  ;;  %v1774_v37 = vld [vmem:[%s2409_s1 + $0x374] ss:$8 sps:$4 sm:$0xff]  }
  0x27   :  { %1007 = vmatpush1.bf16.msra.mxu1 %v1683_v38  ;;  %v1769_v38 = vld [vmem:[%s2409_s1 + $0x170] ss:$8 sps:$4 sm:$0xff]  }
  0x28   :  { %1113 = vmatpush1.bf16.msra.mxu0 %v1684_v39  ;;  %1008 = vmatprep.subr.bf16.mxu1 %v1685_v40  ;;  %v1772_v39 = vld [vmem:[%s2409_s1 + $0x370] ss:$8 sps:$4 sm:$0xff]   ;;  %v1777_v40 = vld [vmem:[%s2409_s1 + $0x184] ss:$8 sps:$4 sm:$0xff]  }
  0x29   :  { %1114 = vmatprep.subr.bf16.mxu0 %v1687_v41  ;;  %v1831_v41 = vld [vmem:[%s2410_s0 + $0xc] ss:$36 sps:$4 sm:$0xff]  }
  0x2b   :  { %1009 = vmatpush1.bf16.msra.mxu1 %v1689_v42  ;;  %v1780_v42 = vld [vmem:[%s2409_s1 + $0x384] ss:$8 sps:$4 sm:$0xff]  }
  0x2c   :  { %1115 = vmatpush1.bf16.msra.mxu0 %v1690_v43  ;;  %1010 = vmatprep.subr.bf16.mxu1 %v1691_v44  ;;  %v1834_v43 = vld [vmem:[%s2410_s0 + $0x1c] ss:$36 sps:$4 sm:$0xff]  }
  0x2d   :  { %1116 = vmatprep.subr.bf16.mxu0 %v1693_v45  ;;  %v1775_v44 = vld [vmem:[%s2409_s1 + $0x180] ss:$8 sps:$4 sm:$0xff]  }
  0x2e   :  { %v1778_v45 = vld [vmem:[%s2409_s1 + $0x380] ss:$8 sps:$4 sm:$0xff]  }
  0x2f   :  { %1011 = vmatpush1.bf16.msra.mxu1 %v1695_v46  ;;  %v1783_v46 = vld [vmem:[%s2409_s1 + $0x194] ss:$8 sps:$4 sm:$0xff]  }
  0x30   :  { %1117 = vmatpush1.bf16.msra.mxu0 %v1696_v47  ;;  %1012 = vmatprep.subr.bf16.mxu1 %v1697_v49  ;;  %v1786_v47 = vld [vmem:[%s2409_s1 + $0x394] ss:$8 sps:$4 sm:$0xff]   ;;  %v1784_v49 = vld [vmem:[%s2409_s1 + $0x390] ss:$8 sps:$4 sm:$0xff]  }
  0x31   :  { %1118 = vmatprep.subr.bf16.mxu0 %v1699_v50  ;;  %v1789_v50 = vld [vmem:[%s2409_s1 + $0x1a4] ss:$8 sps:$4 sm:$0xff]  }
  0x33   :  { %1013 = vmatpush1.bf16.msra.mxu1 %v1701_v52  ;;  %v1787_v52 = vld [vmem:[%s2409_s1 + $0x1a0] ss:$8 sps:$4 sm:$0xff]  }
  0x34   :  { %1119 = vmatpush1.bf16.msra.mxu0 %v1702_v53  ;;  %1014 = vmatprep.subr.bf16.mxu1 %v1703_v54  ;;  %v1790_v53 = vld [vmem:[%s2409_s1 + $0x3a0] ss:$8 sps:$4 sm:$0xff]   ;;  %v1795_v54 = vld [vmem:[%s2409_s1 + $0x1b4] ss:$8 sps:$4 sm:$0xff]  }
  0x35   :  { %1120 = vmatprep.subr.bf16.mxu0 %v1705_v55  ;;  %v1798_v55 = vld [vmem:[%s2409_s1 + $0x3b4] ss:$8 sps:$4 sm:$0xff]  }
  0x37   :  { %1015 = vmatpush1.bf16.msra.mxu1 %v1707_v56  ;;  %v1793_v56 = vld [vmem:[%s2409_s1 + $0x1b0] ss:$8 sps:$4 sm:$0xff]  }
  0x38   :  { %1121 = vmatpush1.bf16.msra.mxu0 %v1708_v57  ;;  %1016 = vmatprep.subr.bf16.mxu1 %v1709_v58  ;;  %v1796_v57 = vld [vmem:[%s2409_s1 + $0x3b0] ss:$8 sps:$4 sm:$0xff]   ;;  %v1801_v58 = vld [vmem:[%s2409_s1 + $0x1c4] ss:$8 sps:$4 sm:$0xff]  }
  0x39   :  { %1122 = vmatprep.subr.bf16.mxu0 %v1711_v59  ;;  %v1804_v59 = vld [vmem:[%s2409_s1 + $0x3c4] ss:$8 sps:$4 sm:$0xff]  }
  0x3b   :  { %1017 = vmatpush1.bf16.msra.mxu1 %v1713_v60  ;;  %v1799_v60 = vld [vmem:[%s2409_s1 + $0x1c0] ss:$8 sps:$4 sm:$0xff]  }
  0x3c   :  { %1123 = vmatpush1.bf16.msra.mxu0 %v1714_v61  ;;  %1018 = vmatprep.subr.bf16.mxu1 %v1715_v62  ;;  %v1802_v61 = vld [vmem:[%s2409_s1 + $0x3c0] ss:$8 sps:$4 sm:$0xff]   ;;  %v1807_v62 = vld [vmem:[%s2409_s1 + $0x1d4] ss:$8 sps:$4 sm:$0xff]  }
  0x3d   :  { %1124 = vmatprep.subr.bf16.mxu0 %v1717_v63  ;;  %v1810_v63 = vld [vmem:[%s2409_s1 + $0x3d4] ss:$8 sps:$4 sm:$0xff]  }
  0x3f   :  { %1019 = vmatpush1.bf16.msra.mxu1 %v1719_v0  ;;  %v1805_v0 = vld [vmem:[%s2409_s1 + $0x1d0] ss:$8 sps:$4 sm:$0xff]  }
  0x40   :  { %1125 = vmatpush1.bf16.msra.mxu0 %v1720_v1  ;;  %1041 = vmatprep.subr.bf16.mxu1 %v1726_v2  ;;  %v1808_v1 = vld [vmem:[%s2409_s1 + $0x3d0] ss:$8 sps:$4 sm:$0xff]   ;;  %v1818_v2 = vld [vmem:[%s2409_s1 + $0x1e4] ss:$8 sps:$4 sm:$0xff]  }
  0x41   :  { %1147 = vmatprep.subr.bf16.mxu0 %v1732_v3  ;;  %v1822_v3 = vld [vmem:[%s2409_s1 + $0x3e4] ss:$8 sps:$4 sm:$0xff]  }
  0x42   :  { %1021 = vmatmul.mubr.bf16.vlgmr.msra.gmra.mrb[0].mxu1 %v1721_v4  ;;  %v1816_v4 = vld [vmem:[%s2409_s1 + $0x1e0] ss:$8 sps:$4 sm:$0xff]  }
  0x43   :  { %1127 = vmatmul.mubr.bf16.vlgmr.msra.gmra.mrb[0].mxu0 %v1727_v6  ;;  %1042 = vmatpush1.bf16.msra.mxu1 %v1724_v5  ;;  %v1820_v5 = vld [vmem:[%s2409_s1 + $0x3e0] ss:$8 sps:$4 sm:$0xff]   ;;  %v1825_v6 = vld [vmem:[%s2409_s1 + $0x1f4] ss:$8 sps:$4 sm:$0xff]  }
  0x44   :  { %1148 = vmatpush1.bf16.msra.mxu0 %v1730_v7  ;;  %1043 = vmatprep.subr.bf16.mxu1 %v1735_v8  ;;  %v1828_v7 = vld [vmem:[%s2409_s1 + $0x3f4] ss:$8 sps:$4 sm:$0xff]   ;;  %v1823_v8 = vld [vmem:[%s2409_s1 + $0x1f0] ss:$8 sps:$4 sm:$0xff]  }
  0x45   :  { %1149 = vmatprep.subr.bf16.mxu0 %v1738_v9  ;;  %1030 = vmatprep.mubr.bf16.mxu1 %v1811_v29  ;;  %v1826_v9 = vld [vmem:[%s2409_s1 + $0x3f0] ss:$8 sps:$4 sm:$0xff]   ;;  %v1861_v29 = vld [vmem:[%s2409_s1 + $0x464] ss:$8 sps:$4 sm:$0xff]  }
  0x46   :  { %1136 = vmatprep.mubr.bf16.mxu0 %v1813_v30  ;;  %v1859_v30 = vld [vmem:[%s2409_s1 + $0x460] ss:$8 sps:$4 sm:$0xff]  }
  0x47   :  { %1044 = vmatpush1.bf16.msra.mxu1 %v1733_v10  ;;  %v1837_v10 = vld [vmem:[%s2409_s1 + $0x404] ss:$8 sps:$4 sm:$0xff]  }
  0x48   :  { %1150 = vmatpush1.bf16.msra.mxu0 %v1736_v11  ;;  %1045 = vmatprep.subr.bf16.mxu1 %v1741_v12  ;;  %v1829_v11 = vld [vmem:[%s2410_s0 + $0x8] ss:$36 sps:$4 sm:$0xff]   ;;  %v1832_v12 = vld [vmem:[%s2410_s0 + $0x18] ss:$36 sps:$4 sm:$0xff]  }
  0x49   :  { %1151 = vmatprep.subr.bf16.mxu0 %v1744_v13  ;;  %v1835_v13 = vld [vmem:[%s2409_s1 + $0x400] ss:$8 sps:$4 sm:$0xff]  }
  0x4a   :  { %1031 = vmatmul.mubr.bf16.gmra.mrb[4].mxu1 %v1815_v31  ;;  %v1864_v31 = vld [vmem:[%s2409_s1 + $0x474] ss:$8 sps:$4 sm:$0xff]  }
  0x4b   :  { %1046 = vmatpush1.bf16.msra.mxu1 %v1739_v14  ;;  %1137 = vmatmul.mubr.bf16.gmra.mrb[4].mxu0 %v1819_v33  ;;  %v1840_v14 = vld [vmem:[%s2409_s1 + $0x414] ss:$8 sps:$4 sm:$0xff]   ;;  %v1865_v33 = vld [vmem:[%s2410_s0 + $0x20] ss:$36 sps:$4 sm:$0xff]  }
  0x4c   :  { %1152 = vmatpush1.bf16.msra.mxu0 %v1742_v15  ;;  %1047 = vmatprep.subr.bf16.mxu1 %v1747_v16  ;;  %v1841_v15 = vld [vmem:[%s2410_s0 + $0x54] ss:$36 sps:$4 sm:$0xff]   ;;  %v1843_v16 = vld [vmem:[%s2410_s0 + $0x64] ss:$36 sps:$4 sm:$0xff]  }
  0x4d   :  { %1153 = vmatprep.subr.bf16.mxu0 %v1750_v17  ;;  %1073 = vmatprep.mubr.bf16.mxu1 %v1831_v41  ;;  %v1838_v17 = vld [vmem:[%s2409_s1 + $0x410] ss:$8 sps:$4 sm:$0xff]  }
  0x4e   :  { %1179 = vmatprep.mubr.bf16.mxu0 %v1834_v43 }
  0x4f   :  { %1048 = vmatpush1.bf16.msra.mxu1 %v1745_v18  ;;  %v1849_v18 = vld [vmem:[%s2409_s1 + $0x424] ss:$8 sps:$4 sm:$0xff]  }
  0x50   :  { %1154 = vmatpush1.bf16.msra.mxu0 %v1748_v19  ;;  %1049 = vmatprep.subr.bf16.mxu1 %v1753_v20  ;;  %v1845_v19 = vld [vmem:[%s2410_s0 + $0x50] ss:$36 sps:$4 sm:$0xff]   ;;  %v1846_v20 = vld [vmem:[%s2410_s0 + $0x60] ss:$36 sps:$4 sm:$0xff]  }
  0x51   :  { %1155 = vmatprep.subr.bf16.mxu0 %v1756_v21  ;;  %v1847_v21 = vld [vmem:[%s2409_s1 + $0x420] ss:$8 sps:$4 sm:$0xff]  }
  0x53   :  { %1050 = vmatpush1.bf16.msra.mxu1 %v1751_v22  ;;  %v1852_v22 = vld [vmem:[%s2409_s1 + $0x434] ss:$8 sps:$4 sm:$0xff]  }
  0x54   :  { %1156 = vmatpush1.bf16.msra.mxu0 %v1754_v23  ;;  %1051 = vmatprep.subr.bf16.mxu1 %v1759_v24  ;;  %v1850_v23 = vld [vmem:[%s2409_s1 + $0x430] ss:$8 sps:$4 sm:$0xff]   ;;  %v1855_v24 = vld [vmem:[%s2409_s1 + $0x444] ss:$8 sps:$4 sm:$0xff]  }
  0x55   :  { %1157 = vmatprep.subr.bf16.mxu0 %v1762_v25  ;;  %v1875_v25 = vmov 0  }
  0x57   :  { %1052 = vmatpush1.bf16.msra.mxu1 %v1757_v26  ;;  %v1853_v26 = vld [vmem:[%s2409_s1 + $0x440] ss:$8 sps:$4 sm:$0xff]  }
  0x58   :  { %1158 = vmatpush1.bf16.msra.mxu0 %v1760_v27  ;;  %1053 = vmatprep.subr.bf16.mxu1 %v1765_v28  ;;  %v1858_v27 = vld [vmem:[%s2409_s1 + $0x454] ss:$8 sps:$4 sm:$0xff]   ;;  %v1856_v28 = vld [vmem:[%s2409_s1 + $0x450] ss:$8 sps:$4 sm:$0xff]  }
  0x59   :  { %1159 = vmatprep.subr.bf16.mxu0 %v1768_v32  ;;  %v1862_v32 = vld [vmem:[%s2409_s1 + $0x470] ss:$8 sps:$4 sm:$0xff]  }
  0x5b   :  { %1054 = vmatpush1.bf16.msra.mxu1 %v1763_v34  ;;  %v1866_v34 = vld [vmem:[%s2410_s0 + $0x68] ss:$36 sps:$4 sm:$0xff]  }
  0x5c   :  { %1160 = vmatpush1.bf16.msra.mxu0 %v1766_v35  ;;  %1055 = vmatprep.subr.bf16.mxu1 %v1771_v36 }
  0x5d   :  { %1161 = vmatprep.subr.bf16.mxu0 %v1774_v37 }
  0x5f   :  { %1056 = vmatpush1.bf16.msra.mxu1 %v1769_v38 }
  0x60   :  { %1162 = vmatpush1.bf16.msra.mxu0 %v1772_v39  ;;  %1057 = vmatprep.subr.bf16.mxu1 %v1777_v40 }
  0x61   :  { %1163 = vmatprep.subr.bf16.mxu0 %v1780_v42 }
  0x63   :  { %1058 = vmatpush1.bf16.msra.mxu1 %v1775_v44 }
  0x64   :  { %1164 = vmatpush1.bf16.msra.mxu0 %v1778_v45  ;;  %1059 = vmatprep.subr.bf16.mxu1 %v1783_v46 }
  0x65   :  { %1165 = vmatprep.subr.bf16.mxu0 %v1786_v47 }
  0x67   :  { %1060 = vmatpush1.bf16.msra.mxu1 %v1781_v48 }
  0x68   :  { %1166 = vmatpush1.bf16.msra.mxu0 %v1784_v49  ;;  %1061 = vmatprep.subr.bf16.mxu1 %v1789_v50 }
  0x69   :  { %1167 = vmatprep.subr.bf16.mxu0 %v1792_v51 }
  0x6b   :  { %1062 = vmatpush1.bf16.msra.mxu1 %v1787_v52 }
  0x6c   :  { %1168 = vmatpush1.bf16.msra.mxu0 %v1790_v53  ;;  %1063 = vmatprep.subr.bf16.mxu1 %v1795_v54 }
  0x6d   :  { %1169 = vmatprep.subr.bf16.mxu0 %v1798_v55 }
  0x6f   :  { %1064 = vmatpush1.bf16.msra.mxu1 %v1793_v56 }
  0x70   :  { %1170 = vmatpush1.bf16.msra.mxu0 %v1796_v57  ;;  %1065 = vmatprep.subr.bf16.mxu1 %v1801_v58 }
  0x71   :  { %1171 = vmatprep.subr.bf16.mxu0 %v1804_v59 }
  0x73   :  { %1066 = vmatpush1.bf16.msra.mxu1 %v1799_v60 }
  0x74   :  { %1172 = vmatpush1.bf16.msra.mxu0 %v1802_v61  ;;  %1067 = vmatprep.subr.bf16.mxu1 %v1807_v62 }
  0x75   :  { %1173 = vmatprep.subr.bf16.mxu0 %v1810_v63 }
  0x77   :  { %1068 = vmatpush1.bf16.msra.mxu1 %v1805_v0 }
  0x78   :  { %1174 = vmatpush1.bf16.msra.mxu0 %v1808_v1  ;;  %1069 = vmatprep.subr.bf16.mxu1 %v1818_v2 }
  0x79   :  { %1175 = vmatprep.subr.bf16.mxu0 %v1822_v3 }
  0x7b   :  { %1070 = vmatpush1.bf16.msra.mxu1 %v1816_v4 }
  0x7c   :  { %1176 = vmatpush1.bf16.msra.mxu0 %v1820_v5  ;;  %1071 = vmatprep.subr.bf16.mxu1 %v1825_v6 }
  0x7d   :  { %1177 = vmatprep.subr.bf16.mxu0 %v1828_v7 }
  0x7f   :  { %1072 = vmatpush1.bf16.msra.mxu1 %v1823_v8 }
  0x80   :  { %1178 = vmatpush1.bf16.msra.mxu0 %v1826_v9  ;;  %1576 = vmatprep.subr.bf16.mxu1 %v1837_v10 }
  0x81   :  { %1200 = vmatprep.subr.bf16.mxu0 %v1837_v10 }
  0x82   :  { %1074 = vmatmul.mubr.bf16.vlgmr.msra.gmra.mrb[0].mxu1 %v1829_v11 }
  0x83   :  { %1180 = vmatmul.mubr.bf16.vlgmr.msra.gmra.mrb[0].mxu0 %v1832_v12  ;;  %1584 = vmatpush1.bf16.msra.mxu1 %v1835_v13 }
  0x84   :  { %1201 = vmatpush1.bf16.msra.mxu0 %v1835_v13  ;;  %1577 = vmatprep.subr.bf16.mxu1 %v1840_v14 }
  0x85   :  { %1202 = vmatprep.subr.bf16.mxu0 %v1840_v14  ;;  %1083 = vmatprep.mubr.bf16.mxu1 %v1841_v15 }
  0x86   :  { %1189 = vmatprep.mubr.bf16.mxu0 %v1843_v16 }
  0x87   :  { %1585 = vmatpush1.bf16.msra.mxu1 %v1838_v17 }
  0x88   :  { %1203 = vmatpush1.bf16.msra.mxu0 %v1838_v17  ;;  %1578 = vmatprep.subr.bf16.mxu1 %v1849_v18 }
  0x89   :  { %1204 = vmatprep.subr.bf16.mxu0 %v1849_v18 }
  0x8a   :  { %1084 = vmatmul.mubr.bf16.gmra.mrb[4].mxu1 %v1845_v19 }
  0x8b   :  { %1190 = vmatmul.mubr.bf16.gmra.mrb[4].mxu0 %v1846_v20  ;;  %1586 = vmatpush1.bf16.msra.mxu1 %v1847_v21 }
  0x8c   :  { %1205 = vmatpush1.bf16.msra.mxu0 %v1847_v21  ;;  %1579 = vmatprep.subr.bf16.mxu1 %v1852_v22 }
  0x8d   :  { %1206 = vmatprep.subr.bf16.mxu0 %v1852_v22  ;;  %1232 = vmatprep.mubr.bf16.mxu0 %v1875_v25 }
  0x8e   :  { %1242 = vmatprep.mubr.bf16.mxu1 %v1875_v25 }
  0x8f   :  { %1587 = vmatpush1.bf16.msra.mxu1 %v1850_v23 }
  0x90   :  { %1207 = vmatpush1.bf16.msra.mxu0 %v1850_v23  ;;  %1580 = vmatprep.subr.bf16.mxu1 %v1855_v24 }
  0x91   :  { %1208 = vmatprep.subr.bf16.mxu0 %v1855_v24 }
  0x93   :  { %1588 = vmatpush1.bf16.msra.mxu1 %v1853_v26 }
  0x94   :  { %1209 = vmatpush1.bf16.msra.mxu0 %v1853_v26  ;;  %1581 = vmatprep.subr.bf16.mxu1 %v1858_v27 }
  0x95   :  { %1210 = vmatprep.subr.bf16.mxu0 %v1858_v27 }
  0x97   :  { %1589 = vmatpush1.bf16.msra.mxu1 %v1856_v28 }
  0x98   :  { %1211 = vmatpush1.bf16.msra.mxu0 %v1856_v28  ;;  %1582 = vmatprep.subr.bf16.mxu1 %v1861_v29 }
  0x99   :  { %1212 = vmatprep.subr.bf16.mxu0 %v1861_v29 }
  0x9b   :  { %1590 = vmatpush1.bf16.msra.mxu1 %v1859_v30 }
  0x9c   :  { %1213 = vmatpush1.bf16.msra.mxu0 %v1859_v30  ;;  %1583 = vmatprep.subr.bf16.mxu1 %v1864_v31 }
  0x9d   :  { %1214 = vmatprep.subr.bf16.mxu0 %v1864_v31 }
  0x9f   :  { %1591 = vmatpush1.bf16.msra.mxu1 %v1862_v32 }
  0xa0   :  { %1215 = vmatpush1.bf16.msra.mxu0 %v1862_v32 }
  0xa2   :  { %1243 = vmatmul.mubr.bf16.vlgmr.msra.gmra.mrb[8].mxu1 %v1866_v34 }
  0xa3   :  { %1233 = vmatmul.mubr.bf16.vlgmr.msra.gmra.mrb[0].mxu0 %v1865_v33 }
 0x155   :  { %v1075_v35 = vpop.f32.mrb[0].mxu1 }
 0x156   :  { %v1077_v36 = vpop.f32.mrb[1].mxu1 }
 0x157   :  { %v1079_v37 = vpop.f32.mrb[2].mxu1 }
 0x158   :  { %v1081_v38 = vpop.f32.mrb[3].mxu1 }
 0x15d   :  { %v1085_v39 = vpop.f32.mrb[4].mxu1 }
 0x15e   :  { %v1191_v40 = vpop.f32.mrb[4].mxu0  ;;  %v1087_v42 = vpop.f32.mrb[5].mxu1 }
 0x15f   :  { %v1596_v41 = vadd.f32 %v1191_v40, %v1085_v39  ;;  %v1193_v43 = vpop.f32.mrb[5].mxu0  ;;  %v1089_v45 = vpop.f32.mrb[6].mxu1 }
 0x160   :  { %v1598_v44 = vadd.f32 %v1193_v43, %v1087_v42  ;;  %v1195_v46 = vpop.f32.mrb[6].mxu0  ;;  %v1091_v48 = vpop.f32.mrb[7].mxu1 }
 0x161   :  { %v1600_v47 = vadd.f32 %v1195_v46, %v1089_v45  ;;  %v1197_v49 = vpop.f32.mrb[7].mxu0 }
 0x162   :  { %v1602_v50 = vadd.f32 %v1197_v49, %v1091_v48 }
 0x175   :  { %v1244_v52 = vpop.f32.mrb[8].mxu1 }
 0x176   :  { %v1234_v51 = vpop.f32.mrb[0].mxu0  ;;  %v1597_v54 = vadd.f32 %v1596_v41, %v1244_v52  ;;  %v1246_v56 = vpop.f32.mrb[9].mxu1 }
 0x177   :  { %v1592_v53 = vadd.f32 %v1234_v51, %v1075_v35  ;;  %v1236_v55 = vpop.f32.mrb[1].mxu0  ;;  %v1599_v58 = vadd.f32 %v1598_v44, %v1246_v56  ;;  %v1248_v60 = vpop.f32.mrb[10].mxu1 }
 0x178   :  { %v1593_v57 = vadd.f32 %v1236_v55, %v1077_v36  ;;  %v1238_v59 = vpop.f32.mrb[2].mxu0  ;;  %v1601_v62 = vadd.f32 %v1600_v47, %v1248_v60  ;;  %v1250_v0 = vpop.f32.mrb[11].mxu1 }
 0x179   :  { %v1594_v61 = vadd.f32 %v1238_v59, %v1079_v37  ;;  %v1240_v63 = vpop.f32.mrb[3].mxu0  ;;  %v1603_v2 = vadd.f32 %v1602_v50, %v1250_v0 }
 0x17a   :  { %v1595_v1 = vadd.f32 %v1240_v63, %v1081_v38  ;;  %v1267_v4 = vadd.f32 %v1601_v62, %v1597_v54 }
 0x17b   :  { %v1253_v3 = vadd.f32 %v1594_v61, %v1592_v53  ;;  %v1274_v6 = vadd.f32 %v1603_v2, %v1599_v58 }
 0x17c   :  { %v1260_v5 = vadd.f32 %v1595_v1, %v1593_v57  ;;  %v1268_v8 = vrot.slane %v1267_v4, 4 }
 0x17d   :  { %v1254_v7 = vrot.slane %v1253_v3, 4  ;;  %v1275_v10 = vrot.slane %v1274_v6, 4 }
 0x17e   :  { %v1261_v9 = vrot.slane %v1260_v5, 4  ;;  %v1269_v12 = vadd.f32 %v1268_v8, %v1267_v4 }
 0x17f   :  { %v1255_v11 = vadd.f32 %v1254_v7, %v1253_v3  ;;  %v1276_v14 = vadd.f32 %v1275_v10, %v1274_v6 }
 0x180   :  { %v1262_v13 = vadd.f32 %v1261_v9, %v1260_v5  ;;  %v1270_v16 = vrot.slane %v1269_v12, 2 }
 0x181   :  { %v1256_v15 = vrot.slane %v1255_v11, 2  ;;  %v1277_v18 = vrot.slane %v1276_v14, 2 }
 0x182   :  { %v1263_v17 = vrot.slane %v1262_v13, 2  ;;  %v1271_v20 = vadd.f32 %v1270_v16, %v1269_v12 }
 0x183   :  { %v1257_v19 = vadd.f32 %v1256_v15, %v1255_v11  ;;  %v1278_v22 = vadd.f32 %v1277_v18, %v1276_v14 }
 0x184   :  { %v1264_v21 = vadd.f32 %v1263_v17, %v1262_v13  ;;  %v1272_v24 = vrot.slane %v1271_v20, 1 }
 0x185   :  { %v1258_v23 = vrot.slane %v1257_v19, 1  ;;  %v1279_v26 = vrot.slane %v1278_v22, 1 }
 0x186   :  { %v1265_v25 = vrot.slane %v1264_v21, 1  ;;  %v1273_v28 = vadd.f32 %v1272_v24, %v1271_v20 }
 0x187   :  { %v1259_v27 = vadd.f32 %v1258_v23, %v1257_v19  ;;  %v1280_v30 = vadd.f32 %v1279_v26, %v1278_v22 }
 0x188   :  { %v1266_v29 = vadd.f32 %v1265_v25, %v1264_v21  ;;  %v1284_v32 = vmul.f32 0.0625, %v1273_v28 }
 0x189   :  { %v1282_v31 = vmul.f32 0.0625, %v1259_v27  ;;  %v1285_v34 = vmul.f32 0.0625, %v1280_v30 }
 0x18a   :  { %v1283_v33 = vmul.f32 0.0625, %v1266_v29  ;;  %v1290_v37 = vsub.f32 %v1597_v54, %v1284_v32  ;;  %v1292_v38 = vsub.f32 %v1601_v62, %v1284_v32 }
 0x18b   :  { %v1286_v35 = vsub.f32 %v1592_v53, %v1282_v31  ;;  %v1288_v36 = vsub.f32 %v1594_v61, %v1282_v31  ;;  %v2381_v41 = vsub.f32 %v1599_v58, %v1285_v34  ;;  %v2383_v42 = vsub.f32 %v1603_v2, %v1285_v34 }
 0x18c   :  { %v2377_v39 = vsub.f32 %v1593_v57, %v1283_v33  ;;  %v2379_v40 = vsub.f32 %v1595_v1, %v1283_v33  ;;  %v1298_v45 = vmul.f32 %v1290_v37, %v1290_v37  ;;  %v1300_v46 = vmul.f32 %v1292_v38, %v1292_v38 }
 0x18d   :  { %v1294_v43 = vmul.f32 %v1286_v35, %v1286_v35  ;;  %v1296_v44 = vmul.f32 %v1288_v36, %v1288_v36  ;;  %v1299_v49 = vmul.f32 %v2381_v41, %v2381_v41  ;;  %v1301_v50 = vmul.f32 %v2383_v42, %v2383_v42 }
 0x18e   :  { %v1295_v47 = vmul.f32 %v2377_v39, %v2377_v39  ;;  %v1297_v48 = vmul.f32 %v2379_v40, %v2379_v40  ;;  %v1316_v52 = vadd.f32 %v1300_v46, %v1298_v45 }
 0x18f   :  { %v1302_v51 = vadd.f32 %v1296_v44, %v1294_v43  ;;  %v1323_v54 = vadd.f32 %v1301_v50, %v1299_v49 }
 0x190   :  { %v1309_v53 = vadd.f32 %v1297_v48, %v1295_v47  ;;  %v1317_v56 = vrot.slane %v1316_v52, 4 }
 0x191   :  { %v1303_v55 = vrot.slane %v1302_v51, 4  ;;  %v1324_v58 = vrot.slane %v1323_v54, 4 }
 0x192   :  { %v1310_v57 = vrot.slane %v1309_v53, 4  ;;  %v1318_v60 = vadd.f32 %v1317_v56, %v1316_v52 }
 0x193   :  { %v1304_v59 = vadd.f32 %v1303_v55, %v1302_v51  ;;  %v1325_v62 = vadd.f32 %v1324_v58, %v1323_v54 }
 0x194   :  { %v1311_v61 = vadd.f32 %v1310_v57, %v1309_v53  ;;  %v1319_v0 = vrot.slane %v1318_v60, 2 }
 0x195   :  { %v1305_v63 = vrot.slane %v1304_v59, 2  ;;  %v1326_v2 = vrot.slane %v1325_v62, 2 }
 0x196   :  { %v1312_v1 = vrot.slane %v1311_v61, 2  ;;  %v1320_v4 = vadd.f32 %v1319_v0, %v1318_v60 }
 0x197   :  { %v1306_v3 = vadd.f32 %v1305_v63, %v1304_v59  ;;  %v1327_v6 = vadd.f32 %v1326_v2, %v1325_v62 }
 0x198   :  { %v1313_v5 = vadd.f32 %v1312_v1, %v1311_v61  ;;  %v1321_v8 = vrot.slane %v1320_v4, 1 }
 0x199   :  { %v1307_v7 = vrot.slane %v1306_v3, 1  ;;  %v1328_v10 = vrot.slane %v1327_v6, 1 }
 0x19a   :  { %v1314_v9 = vrot.slane %v1313_v5, 1  ;;  %v1322_v12 = vadd.f32 %v1321_v8, %v1320_v4 }
 0x19b   :  { %v1308_v11 = vadd.f32 %v1307_v7, %v1306_v3  ;;  %v1329_v14 = vadd.f32 %v1328_v10, %v1327_v6 }
 0x19c   :  { %v1315_v13 = vadd.f32 %v1314_v9, %v1313_v5  ;;  %v1332_v16 = vmul.f32 0.0625, %v1322_v12 }
 0x19d   :  { %v1330_v15 = vmul.f32 0.0625, %v1308_v11  ;;  %v1333_v18 = vmul.f32 0.0625, %v1329_v14 }
 0x19e   :  { %v1331_v17 = vmul.f32 0.0625, %v1315_v13  ;;  %v1336_v20 = vadd.f32 1e-05, %v1332_v16 }
 0x19f   :  { %v1334_v19 = vadd.f32 1e-05, %v1330_v15  ;;  %v1337_v22 = vadd.f32 1e-05, %v1333_v18 }
 0x1a0   :  { %v1335_v21 = vadd.f32 1e-05, %v1331_v17 }
 0x1a1   :  { %1867 = vrsqrt.f32 %v1334_v19 }
 0x1a2   :  { %1869 = vrsqrt.f32 %v1336_v20 }
 0x1a3   :  { %1871 = vrsqrt.f32 %v1335_v21 }
 0x1a4   :  { %1873 = vrsqrt.f32 %v1337_v22 }
 0x1ab   :  { %v1868_v23 = vpop.eup %1867 }
 0x1ac   :  { %v1870_v24 = vpop.eup %1869  ;;  %v1342_v25 = vmul.f32 %v1868_v23, %v1286_v35  ;;  %v1344_v26 = vmul.f32 %v1868_v23, %v1288_v36 }
 0x1ad   :  { %v1872_v27 = vpop.eup %1871  ;;  %v1346_v28 = vmul.f32 %v1870_v24, %v1290_v37  ;;  %v1348_v29 = vmul.f32 %v1870_v24, %v1292_v38 }
 0x1ae   :  { %v1874_v30 = vpop.eup %1873  ;;  %vm1350_vm0 = vcmp.ge.f32.partialorder %v1342_v25, 0.0  ;;  %vm1352_vm1 = vcmp.ge.f32.partialorder %v1344_v26, 0.0  ;;  %v1358_v31 = vmul.f32 0.2, %v1342_v25  ;;  %v1360_v32 = vmul.f32 0.2, %v1344_v26 }
 0x1af   :  { %vm1354_vm2 = vcmp.ge.f32.partialorder %v1346_v28, 0.0  ;;  %vm1356_vm3 = vcmp.ge.f32.partialorder %v1348_v29, 0.0  ;;  %v1362_v33 = vmul.f32 0.2, %v1346_v28  ;;  %v1364_v34 = vmul.f32 0.2, %v1348_v29 }
 0x1b0   :  { %v1366_v43 = vsel %vm1350_vm0, %v1342_v25, %v1358_v31  ;;  %v1368_v44 = vsel %vm1352_vm1, %v1344_v26, %v1360_v32  ;;  %v1343_v45 = vmul.f32 %v1872_v27, %v2377_v39  ;;  %v1345_v46 = vmul.f32 %v1872_v27, %v2379_v40 }
 0x1b1   :  { %v1370_v35 = vsel %vm1354_vm2, %v1346_v28, %v1362_v33  ;;  %v1372_v36 = vsel %vm1356_vm3, %v1348_v29, %v1364_v34  ;;  %v1347_v37 = vmul.f32 %v1874_v30, %v2381_v41  ;;  %v1349_v38 = vmul.f32 %v1874_v30, %v2383_v42 }
 0x1b2   :  { %vm1351_vm4 = vcmp.ge.f32.partialorder %v1343_v45, 0.0  ;;  %vm1353_vm5 = vcmp.ge.f32.partialorder %v1345_v46, 0.0  ;;  %v1359_v47 = vmul.f32 0.2, %v1343_v45  ;;  %v1361_v48 = vmul.f32 0.2, %v1345_v46 }
 0x1b3   :  { %vm1355_vm6 = vcmp.ge.f32.partialorder %v1347_v37, 0.0  ;;  %vm1357_vm7 = vcmp.ge.f32.partialorder %v1349_v38, 0.0  ;;  %v1363_v49 = vmul.f32 0.2, %v1347_v37  ;;  %v1365_v50 = vmul.f32 0.2, %v1349_v38 }
 0x1b4   :  { %v1367_v51 = vsel %vm1351_vm4, %v1343_v45, %v1359_v47  ;;  %v1369_v52 = vsel %vm1353_vm5, %v1345_v46, %v1361_v48 }
 0x1b5   :  { %v1572_v53 = vpack.c.bf16 %v1367_v51, %v1366_v43  ;;  %v1573_v39 = vpack.c.bf16 %v1369_v52, %v1368_v44  ;;  %v1371_v54 = vsel %vm1355_vm6, %v1347_v37, %v1363_v49  ;;  %v1373_v40 = vsel %vm1357_vm7, %v1349_v38, %v1365_v50 }
 0x1b6   :  { %v1574_v55 = vpack.c.bf16 %v1371_v54, %v1370_v35  ;;  %v1575_v56 = vpack.c.bf16 %v1373_v40, %v1372_v36 }
 0x1b7   :  { %1398 = vst [vmem:[%s2411_s2] sm:$0xff] %v1572_v53  ;;  %1399 = vst [vmem:[%s2411_s2 + $0x8] sm:$0xff] %v1573_v39 }
 0x1b8   :  { %1400 = vst [vmem:[%s2411_s2 + $0x10] sm:$0xff] %v1574_v55  ;;  %1401 = vst [vmem:[%s2411_s2 + $0x18] sm:$0xff] %v1575_v56 }

// kernel: discriminator_forward.8
= control target key start
LH: loop header
LB: loop body
LE: loop exit
PB: predicated region body
PF: predicated region fallthrough
CT: control target
= control target key end

     0   :  { %s8631_s1 = inlined_call_operand.vmem [shape: bf16[2304,512], index: 1, kind: input, shape index: {}]   ;;  %s8632_s0 = inlined_call_operand.vmem [shape: bf16[1,32,2304], index: 0, kind: input, shape index: {}]   ;;  %s8633_s2 = inlined_call_operand.vmem [shape: bf16[1,32,512], index: 2, kind: output, shape index: {}]  }
   0x1   :  { %v5694_v0 = vld [vmem:[%s8631_s1 + $0x4] ss:$16 sps:$4 sm:$0xff]   ;;  %v5696_v1 = vld [vmem:[%s8631_s1 + $0xc] ss:$16 sps:$4 sm:$0xff]   ;;  %v5698_v2 = vld [vmem:[%s8631_s1] ss:$16 sps:$4 sm:$0xff]  }
   0x2   :  { %3683 = vmatprep.subr.bf16.mxu0 %v5694_v0  ;;  %v5699_v3 = vld [vmem:[%s8631_s1 + $0x8] ss:$16 sps:$4 sm:$0xff]   ;;  %4160 = vmatprep.subr.bf16.mxu1 %v5696_v1  ;;  %v5700_v4 = vld [vmem:[%s8631_s1 + $0x24] ss:$16 sps:$4 sm:$0xff]   ;;  %v5702_v5 = vld [vmem:[%s8631_s1 + $0x2c] ss:$16 sps:$4 sm:$0xff]  }
   0x3   :  { %3684 = vmatpush1.bf16.msra.mxu0 %v5698_v2  ;;  %4161 = vmatpush1.bf16.msra.mxu1 %v5699_v3  ;;  %v5704_v6 = vld [vmem:[%s8631_s1 + $0x20] ss:$16 sps:$4 sm:$0xff]   ;;  %v5705_v7 = vld [vmem:[%s8631_s1 + $0x28] ss:$16 sps:$4 sm:$0xff]   ;;  %v5706_v8 = vld [vmem:[%s8631_s1 + $0x44] ss:$16 sps:$4 sm:$0xff]  }
   0x4   :  { %3685 = vmatprep.subr.bf16.mxu0 %v5700_v4  ;;  %4162 = vmatprep.subr.bf16.mxu1 %v5702_v5  ;;  %v5708_v9 = vld [vmem:[%s8631_s1 + $0x4c] ss:$16 sps:$4 sm:$0xff]   ;;  %v5710_v10 = vld [vmem:[%s8631_s1 + $0x40] ss:$16 sps:$4 sm:$0xff]   ;;  %v5711_v11 = vld [vmem:[%s8631_s1 + $0x48] ss:$16 sps:$4 sm:$0xff]  }
   0x5   :  { %v5712_v12 = vld [vmem:[%s8631_s1 + $0x64] ss:$16 sps:$4 sm:$0xff]   ;;  %v5714_v13 = vld [vmem:[%s8631_s1 + $0x6c] ss:$16 sps:$4 sm:$0xff]   ;;  %v5716_v14 = vld [vmem:[%s8631_s1 + $0x60] ss:$16 sps:$4 sm:$0xff]  }
   0x6   :  { %v5717_v15 = vld [vmem:[%s8631_s1 + $0x68] ss:$16 sps:$4 sm:$0xff]   ;;  %v5718_v16 = vld [vmem:[%s8631_s1 + $0x84] ss:$16 sps:$4 sm:$0xff]   ;;  %v5720_v17 = vld [vmem:[%s8631_s1 + $0x8c] ss:$16 sps:$4 sm:$0xff]  }
   0x7   :  { %3686 = vmatpush1.bf16.msra.mxu0 %v5704_v6  ;;  %4163 = vmatpush1.bf16.msra.mxu1 %v5705_v7  ;;  %v5722_v18 = vld [vmem:[%s8631_s1 + $0x80] ss:$16 sps:$4 sm:$0xff]   ;;  %v5723_v19 = vld [vmem:[%s8631_s1 + $0x88] ss:$16 sps:$4 sm:$0xff]   ;;  %v5724_v20 = vld [vmem:[%s8631_s1 + $0xa4] ss:$16 sps:$4 sm:$0xff]  }
   0x8   :  { %3687 = vmatprep.subr.bf16.mxu0 %v5706_v8  ;;  %4164 = vmatprep.subr.bf16.mxu1 %v5708_v9  ;;  %v5726_v21 = vld [vmem:[%s8631_s1 + $0xac] ss:$16 sps:$4 sm:$0xff]   ;;  %v5728_v22 = vld [vmem:[%s8631_s1 + $0xa0] ss:$16 sps:$4 sm:$0xff]   ;;  %v5729_v23 = vld [vmem:[%s8631_s1 + $0xa8] ss:$16 sps:$4 sm:$0xff]  }
   0x9   :  { %v5730_v24 = vld [vmem:[%s8631_s1 + $0xc4] ss:$16 sps:$4 sm:$0xff]   ;;  %v5732_v25 = vld [vmem:[%s8631_s1 + $0xcc] ss:$16 sps:$4 sm:$0xff]   ;;  %v5734_v26 = vld [vmem:[%s8631_s1 + $0xc0] ss:$16 sps:$4 sm:$0xff]  }
   0xa   :  { %v5735_v27 = vld [vmem:[%s8631_s1 + $0xc8] ss:$16 sps:$4 sm:$0xff]   ;;  %v5736_v28 = vld [vmem:[%s8631_s1 + $0xe4] ss:$16 sps:$4 sm:$0xff]   ;;  %v5738_v29 = vld [vmem:[%s8631_s1 + $0xec] ss:$16 sps:$4 sm:$0xff]  }
   0xb   :  { %3688 = vmatpush1.bf16.msra.mxu0 %v5710_v10  ;;  %4165 = vmatpush1.bf16.msra.mxu1 %v5711_v11  ;;  %v5740_v30 = vld [vmem:[%s8631_s1 + $0xe0] ss:$16 sps:$4 sm:$0xff]   ;;  %v5741_v31 = vld [vmem:[%s8631_s1 + $0xe8] ss:$16 sps:$4 sm:$0xff]   ;;  %v5742_v32 = vld [vmem:[%s8631_s1 + $0x104] ss:$16 sps:$4 sm:$0xff]  }
   0xc   :  { %3689 = vmatprep.subr.bf16.mxu0 %v5712_v12  ;;  %4166 = vmatprep.subr.bf16.mxu1 %v5714_v13  ;;  %v5744_v33 = vld [vmem:[%s8631_s1 + $0x10c] ss:$16 sps:$4 sm:$0xff]   ;;  %v5746_v34 = vld [vmem:[%s8631_s1 + $0x100] ss:$16 sps:$4 sm:$0xff]   ;;  %v5747_v35 = vld [vmem:[%s8631_s1 + $0x108] ss:$16 sps:$4 sm:$0xff]  }
   0xd   :  { %v5748_v36 = vld [vmem:[%s8631_s1 + $0x124] ss:$16 sps:$4 sm:$0xff]   ;;  %v5750_v37 = vld [vmem:[%s8631_s1 + $0x12c] ss:$16 sps:$4 sm:$0xff]   ;;  %v5752_v38 = vld [vmem:[%s8631_s1 + $0x120] ss:$16 sps:$4 sm:$0xff]  }
   0xe   :  { %v5753_v39 = vld [vmem:[%s8631_s1 + $0x128] ss:$16 sps:$4 sm:$0xff]   ;;  %v5754_v40 = vld [vmem:[%s8631_s1 + $0x144] ss:$16 sps:$4 sm:$0xff]   ;;  %v5756_v41 = vld [vmem:[%s8631_s1 + $0x14c] ss:$16 sps:$4 sm:$0xff]  }
   0xf   :  { %3690 = vmatpush1.bf16.msra.mxu0 %v5716_v14  ;;  %4167 = vmatpush1.bf16.msra.mxu1 %v5717_v15  ;;  %v5758_v42 = vld [vmem:[%s8631_s1 + $0x140] ss:$16 sps:$4 sm:$0xff]   ;;  %v5759_v43 = vld [vmem:[%s8631_s1 + $0x148] ss:$16 sps:$4 sm:$0xff]   ;;  %v5760_v44 = vld [vmem:[%s8631_s1 + $0x164] ss:$16 sps:$4 sm:$0xff]  }
  0x10   :  { %3691 = vmatprep.subr.bf16.mxu0 %v5718_v16  ;;  %4168 = vmatprep.subr.bf16.mxu1 %v5720_v17  ;;  %v5762_v45 = vld [vmem:[%s8631_s1 + $0x16c] ss:$16 sps:$4 sm:$0xff]   ;;  %v5764_v46 = vld [vmem:[%s8631_s1 + $0x160] ss:$16 sps:$4 sm:$0xff]   ;;  %v5765_v47 = vld [vmem:[%s8631_s1 + $0x168] ss:$16 sps:$4 sm:$0xff]  }
  0x11   :  { %v5792_v48 = vld [vmem:[%s8632_s0 + $0x4] ss:$72 sps:$4 sm:$0xff]   ;;  %v5770_v51 = vld [vmem:[%s8631_s1 + $0x180] ss:$16 sps:$4 sm:$0xff]   ;;  %v5771_v52 = vld [vmem:[%s8631_s1 + $0x188] ss:$16 sps:$4 sm:$0xff]  }
  0x12   :  { %v5766_v49 = vld [vmem:[%s8631_s1 + $0x184] ss:$16 sps:$4 sm:$0xff]   ;;  %v5768_v50 = vld [vmem:[%s8631_s1 + $0x18c] ss:$16 sps:$4 sm:$0xff]   ;;  %3715 = vmatprep.mubr.bf16.mxu0 %v5792_v48  ;;  %4192 = vmatprep.mubr.bf16.mxu1 %v5792_v48  ;;  %v5776_v55 = vld [vmem:[%s8631_s1 + $0x1a0] ss:$16 sps:$4 sm:$0xff]  }
  0x13   :  { %3692 = vmatpush1.bf16.msra.mxu0 %v5722_v18  ;;  %4169 = vmatpush1.bf16.msra.mxu1 %v5723_v19  ;;  %v5772_v53 = vld [vmem:[%s8631_s1 + $0x1a4] ss:$16 sps:$4 sm:$0xff]   ;;  %v5774_v54 = vld [vmem:[%s8631_s1 + $0x1ac] ss:$16 sps:$4 sm:$0xff]   ;;  %v5777_v56 = vld [vmem:[%s8631_s1 + $0x1a8] ss:$16 sps:$4 sm:$0xff]  }
  0x14   :  { %3693 = vmatprep.subr.bf16.mxu0 %v5724_v20  ;;  %4170 = vmatprep.subr.bf16.mxu1 %v5726_v21  ;;  %v5778_v57 = vld [vmem:[%s8631_s1 + $0x1c4] ss:$16 sps:$4 sm:$0xff]   ;;  %v5780_v58 = vld [vmem:[%s8631_s1 + $0x1cc] ss:$16 sps:$4 sm:$0xff]   ;;  %v5782_v59 = vld [vmem:[%s8631_s1 + $0x1c0] ss:$16 sps:$4 sm:$0xff]  }
  0x15   :  { %v5783_v60 = vld [vmem:[%s8631_s1 + $0x1c8] ss:$16 sps:$4 sm:$0xff]   ;;  %v5784_v61 = vld [vmem:[%s8631_s1 + $0x1e4] ss:$16 sps:$4 sm:$0xff]   ;;  %v5786_v62 = vld [vmem:[%s8631_s1 + $0x1ec] ss:$16 sps:$4 sm:$0xff]  }
  0x16   :  { %v5788_v63 = vld [vmem:[%s8631_s1 + $0x1e0] ss:$16 sps:$4 sm:$0xff]   ;;  %v5789_v0 = vld [vmem:[%s8631_s1 + $0x1e8] ss:$16 sps:$4 sm:$0xff]   ;;  %v5795_v1 = vld [vmem:[%s8631_s1 + $0x204] ss:$16 sps:$4 sm:$0xff]  }
  0x17   :  { %3694 = vmatpush1.bf16.msra.mxu0 %v5728_v22  ;;  %4171 = vmatpush1.bf16.msra.mxu1 %v5729_v23  ;;  %v5798_v2 = vld [vmem:[%s8631_s1 + $0x20c] ss:$16 sps:$4 sm:$0xff]   ;;  %v5790_v3 = vld [vmem:[%s8632_s0] ss:$72 sps:$4 sm:$0xff]   ;;  %v5801_v6 = vld [vmem:[%s8631_s1 + $0x224] ss:$16 sps:$4 sm:$0xff]  }
  0x18   :  { %3695 = vmatprep.subr.bf16.mxu0 %v5730_v24  ;;  %4172 = vmatprep.subr.bf16.mxu1 %v5732_v25  ;;  %v5793_v4 = vld [vmem:[%s8631_s1 + $0x200] ss:$16 sps:$4 sm:$0xff]   ;;  %v5796_v5 = vld [vmem:[%s8631_s1 + $0x208] ss:$16 sps:$4 sm:$0xff]   ;;  %v5804_v7 = vld [vmem:[%s8631_s1 + $0x22c] ss:$16 sps:$4 sm:$0xff]  }
  0x19   :  { %v5799_v8 = vld [vmem:[%s8631_s1 + $0x220] ss:$16 sps:$4 sm:$0xff]   ;;  %v5802_v9 = vld [vmem:[%s8631_s1 + $0x228] ss:$16 sps:$4 sm:$0xff]   ;;  %v5807_v10 = vld [vmem:[%s8631_s1 + $0x244] ss:$16 sps:$4 sm:$0xff]  }
  0x1a   :  { %v5810_v11 = vld [vmem:[%s8631_s1 + $0x24c] ss:$16 sps:$4 sm:$0xff]   ;;  %v5805_v12 = vld [vmem:[%s8631_s1 + $0x240] ss:$16 sps:$4 sm:$0xff]   ;;  %v5808_v13 = vld [vmem:[%s8631_s1 + $0x248] ss:$16 sps:$4 sm:$0xff]  }
  0x1b   :  { %3696 = vmatpush1.bf16.msra.mxu0 %v5734_v26  ;;  %4173 = vmatpush1.bf16.msra.mxu1 %v5735_v27  ;;  %v5813_v14 = vld [vmem:[%s8631_s1 + $0x264] ss:$16 sps:$4 sm:$0xff]   ;;  %v5816_v15 = vld [vmem:[%s8631_s1 + $0x26c] ss:$16 sps:$4 sm:$0xff]   ;;  %v5811_v16 = vld [vmem:[%s8631_s1 + $0x260] ss:$16 sps:$4 sm:$0xff]  }
  0x1c   :  { %3697 = vmatprep.subr.bf16.mxu0 %v5736_v28  ;;  %4174 = vmatprep.subr.bf16.mxu1 %v5738_v29  ;;  %v5814_v17 = vld [vmem:[%s8631_s1 + $0x268] ss:$16 sps:$4 sm:$0xff]   ;;  %v5819_v18 = vld [vmem:[%s8631_s1 + $0x284] ss:$16 sps:$4 sm:$0xff]   ;;  %v5822_v19 = vld [vmem:[%s8631_s1 + $0x28c] ss:$16 sps:$4 sm:$0xff]  }
  0x1d   :  { %v5817_v20 = vld [vmem:[%s8631_s1 + $0x280] ss:$16 sps:$4 sm:$0xff]   ;;  %v5820_v21 = vld [vmem:[%s8631_s1 + $0x288] ss:$16 sps:$4 sm:$0xff]   ;;  %v5825_v22 = vld [vmem:[%s8631_s1 + $0x2a4] ss:$16 sps:$4 sm:$0xff]  }
  0x1e   :  { %v5828_v23 = vld [vmem:[%s8631_s1 + $0x2ac] ss:$16 sps:$4 sm:$0xff]   ;;  %v5823_v25 = vld [vmem:[%s8631_s1 + $0x2a0] ss:$16 sps:$4 sm:$0xff]   ;;  %v5826_v26 = vld [vmem:[%s8631_s1 + $0x2a8] ss:$16 sps:$4 sm:$0xff]  }
  0x1f   :  { %3698 = vmatpush1.bf16.msra.mxu0 %v5740_v30  ;;  %4175 = vmatpush1.bf16.msra.mxu1 %v5741_v31  ;;  %v5877_v24 = vld [vmem:[%s8632_s0 + $0x94] ss:$72 sps:$4 sm:$0xff]   ;;  %v5885_v29 = vld [vmem:[%s8632_s0 + $0x90] ss:$72 sps:$4 sm:$0xff]  }
  0x20   :  { %3699 = vmatprep.subr.bf16.mxu0 %v5742_v32  ;;  %4176 = vmatprep.subr.bf16.mxu1 %v5744_v33  ;;  %v5831_v27 = vld [vmem:[%s8631_s1 + $0x2c4] ss:$16 sps:$4 sm:$0xff]   ;;  %v5834_v28 = vld [vmem:[%s8631_s1 + $0x2cc] ss:$16 sps:$4 sm:$0xff]   ;;  %v5829_v30 = vld [vmem:[%s8631_s1 + $0x2c0] ss:$16 sps:$4 sm:$0xff]  }
  0x21   :  { %v5832_v31 = vld [vmem:[%s8631_s1 + $0x2c8] ss:$16 sps:$4 sm:$0xff]   ;;  %v5837_v32 = vld [vmem:[%s8631_s1 + $0x2e4] ss:$16 sps:$4 sm:$0xff]   ;;  %v5840_v33 = vld [vmem:[%s8631_s1 + $0x2ec] ss:$16 sps:$4 sm:$0xff]  }
  0x22   :  { %v5856_v48 = vld [vmem:[%s8631_s1 + $0x348] ss:$16 sps:$4 sm:$0xff]  }
  0x23   :  { %3700 = vmatpush1.bf16.msra.mxu0 %v5746_v34  ;;  %4177 = vmatpush1.bf16.msra.mxu1 %v5747_v35  ;;  %v5894_v34 = vld [vmem:[%s8632_s0 + $0xc] ss:$72 sps:$4 sm:$0xff]   ;;  %v5835_v35 = vld [vmem:[%s8631_s1 + $0x2e0] ss:$16 sps:$4 sm:$0xff]  }
  0x24   :  { %3701 = vmatprep.subr.bf16.mxu0 %v5748_v36  ;;  %4178 = vmatprep.subr.bf16.mxu1 %v5750_v37  ;;  %v5838_v36 = vld [vmem:[%s8631_s1 + $0x2e8] ss:$16 sps:$4 sm:$0xff]   ;;  %v5843_v37 = vld [vmem:[%s8631_s1 + $0x304] ss:$16 sps:$4 sm:$0xff]  }
  0x27   :  { %3702 = vmatpush1.bf16.msra.mxu0 %v5752_v38  ;;  %4179 = vmatpush1.bf16.msra.mxu1 %v5753_v39  ;;  %v5846_v38 = vld [vmem:[%s8631_s1 + $0x30c] ss:$16 sps:$4 sm:$0xff]   ;;  %v5841_v39 = vld [vmem:[%s8631_s1 + $0x300] ss:$16 sps:$4 sm:$0xff]  }
  0x28   :  { %3703 = vmatprep.subr.bf16.mxu0 %v5754_v40  ;;  %4180 = vmatprep.subr.bf16.mxu1 %v5756_v41  ;;  %v5844_v40 = vld [vmem:[%s8631_s1 + $0x308] ss:$16 sps:$4 sm:$0xff]   ;;  %v5849_v41 = vld [vmem:[%s8631_s1 + $0x324] ss:$16 sps:$4 sm:$0xff]  }
  0x2b   :  { %3704 = vmatpush1.bf16.msra.mxu0 %v5758_v42  ;;  %4181 = vmatpush1.bf16.msra.mxu1 %v5759_v43  ;;  %v5852_v42 = vld [vmem:[%s8631_s1 + $0x32c] ss:$16 sps:$4 sm:$0xff]   ;;  %v5847_v43 = vld [vmem:[%s8631_s1 + $0x320] ss:$16 sps:$4 sm:$0xff]  }
  0x2c   :  { %3705 = vmatprep.subr.bf16.mxu0 %v5760_v44  ;;  %4182 = vmatprep.subr.bf16.mxu1 %v5762_v45  ;;  %v5850_v44 = vld [vmem:[%s8631_s1 + $0x328] ss:$16 sps:$4 sm:$0xff]   ;;  %v5855_v45 = vld [vmem:[%s8631_s1 + $0x344] ss:$16 sps:$4 sm:$0xff]  }
  0x2f   :  { %3706 = vmatpush1.bf16.msra.mxu0 %v5764_v46  ;;  %4183 = vmatpush1.bf16.msra.mxu1 %v5765_v47  ;;  %v5858_v46 = vld [vmem:[%s8631_s1 + $0x34c] ss:$16 sps:$4 sm:$0xff]   ;;  %v5853_v47 = vld [vmem:[%s8631_s1 + $0x340] ss:$16 sps:$4 sm:$0xff]  }
  0x30   :  { %3707 = vmatprep.subr.bf16.mxu0 %v5766_v49  ;;  %4184 = vmatprep.subr.bf16.mxu1 %v5768_v50  ;;  %v5861_v49 = vld [vmem:[%s8631_s1 + $0x364] ss:$16 sps:$4 sm:$0xff]   ;;  %v5864_v50 = vld [vmem:[%s8631_s1 + $0x36c] ss:$16 sps:$4 sm:$0xff]  }
  0x33   :  { %3708 = vmatpush1.bf16.msra.mxu0 %v5770_v51  ;;  %4185 = vmatpush1.bf16.msra.mxu1 %v5771_v52  ;;  %v5859_v51 = vld [vmem:[%s8631_s1 + $0x360] ss:$16 sps:$4 sm:$0xff]   ;;  %v5862_v52 = vld [vmem:[%s8631_s1 + $0x368] ss:$16 sps:$4 sm:$0xff]  }
  0x34   :  { %3709 = vmatprep.subr.bf16.mxu0 %v5772_v53  ;;  %4186 = vmatprep.subr.bf16.mxu1 %v5774_v54  ;;  %v5867_v53 = vld [vmem:[%s8631_s1 + $0x384] ss:$16 sps:$4 sm:$0xff]   ;;  %v5870_v54 = vld [vmem:[%s8631_s1 + $0x38c] ss:$16 sps:$4 sm:$0xff]  }
  0x37   :  { %3710 = vmatpush1.bf16.msra.mxu0 %v5776_v55  ;;  %4187 = vmatpush1.bf16.msra.mxu1 %v5777_v56  ;;  %v5865_v55 = vld [vmem:[%s8631_s1 + $0x380] ss:$16 sps:$4 sm:$0xff]   ;;  %v5868_v56 = vld [vmem:[%s8631_s1 + $0x388] ss:$16 sps:$4 sm:$0xff]  }
  0x38   :  { %3711 = vmatprep.subr.bf16.mxu0 %v5778_v57  ;;  %4188 = vmatprep.subr.bf16.mxu1 %v5780_v58  ;;  %v5873_v57 = vld [vmem:[%s8631_s1 + $0x3a4] ss:$16 sps:$4 sm:$0xff]   ;;  %v5876_v58 = vld [vmem:[%s8631_s1 + $0x3ac] ss:$16 sps:$4 sm:$0xff]  }
  0x3b   :  { %3712 = vmatpush1.bf16.msra.mxu0 %v5782_v59  ;;  %4189 = vmatpush1.bf16.msra.mxu1 %v5783_v60  ;;  %v5871_v59 = vld [vmem:[%s8631_s1 + $0x3a0] ss:$16 sps:$4 sm:$0xff]   ;;  %v5874_v60 = vld [vmem:[%s8631_s1 + $0x3a8] ss:$16 sps:$4 sm:$0xff]  }
  0x3c   :  { %3713 = vmatprep.subr.bf16.mxu0 %v5784_v61  ;;  %4190 = vmatprep.subr.bf16.mxu1 %v5786_v62  ;;  %v5881_v61 = vld [vmem:[%s8631_s1 + $0x3c4] ss:$16 sps:$4 sm:$0xff]   ;;  %v5884_v62 = vld [vmem:[%s8631_s1 + $0x3cc] ss:$16 sps:$4 sm:$0xff]  }
  0x3f   :  { %3714 = vmatpush1.bf16.msra.mxu0 %v5788_v63  ;;  %4191 = vmatpush1.bf16.msra.mxu1 %v5789_v0  ;;  %v5879_v63 = vld [vmem:[%s8631_s1 + $0x3c0] ss:$16 sps:$4 sm:$0xff]   ;;  %v5882_v0 = vld [vmem:[%s8631_s1 + $0x3c8] ss:$16 sps:$4 sm:$0xff]  }
  0x40   :  { %3736 = vmatprep.subr.bf16.mxu0 %v5795_v1  ;;  %4213 = vmatprep.subr.bf16.mxu1 %v5798_v2  ;;  %v5888_v1 = vld [vmem:[%s8631_s1 + $0x3e4] ss:$16 sps:$4 sm:$0xff]   ;;  %v5891_v2 = vld [vmem:[%s8631_s1 + $0x3ec] ss:$16 sps:$4 sm:$0xff]  }
  0x42   :  { %3716 = vmatmul.mubr.bf16.vlgmr.msra.gmra.mrb[0].mxu0 %v5790_v3  ;;  %4193 = vmatmul.mubr.bf16.vlgmr.msra.gmra.mrb[0].mxu1 %v5790_v3  ;;  %v5886_v3 = vld [vmem:[%s8631_s1 + $0x3e0] ss:$16 sps:$4 sm:$0xff]  }
  0x43   :  { %3737 = vmatpush1.bf16.msra.mxu0 %v5793_v4  ;;  %4214 = vmatpush1.bf16.msra.mxu1 %v5796_v5  ;;  %v5889_v4 = vld [vmem:[%s8631_s1 + $0x3e8] ss:$16 sps:$4 sm:$0xff]   ;;  %v5897_v5 = vld [vmem:[%s8631_s1 + $0x404] ss:$16 sps:$4 sm:$0xff]  }
  0x44   :  { %3738 = vmatprep.subr.bf16.mxu0 %v5801_v6  ;;  %4215 = vmatprep.subr.bf16.mxu1 %v5804_v7  ;;  %v5900_v6 = vld [vmem:[%s8631_s1 + $0x40c] ss:$16 sps:$4 sm:$0xff]   ;;  %v5892_v7 = vld [vmem:[%s8632_s0 + $0x8] ss:$72 sps:$4 sm:$0xff]  }
  0x45   :  { %3725 = vmatprep.mubr.bf16.mxu0 %v5877_v24  ;;  %4202 = vmatprep.mubr.bf16.mxu1 %v5877_v24  ;;  %v5916_v24 = vld [vmem:[%s8631_s1 + $0x468] ss:$16 sps:$4 sm:$0xff]  }
  0x47   :  { %3739 = vmatpush1.bf16.msra.mxu0 %v5799_v8  ;;  %4216 = vmatpush1.bf16.msra.mxu1 %v5802_v9  ;;  %v5895_v8 = vld [vmem:[%s8631_s1 + $0x400] ss:$16 sps:$4 sm:$0xff]   ;;  %v5898_v9 = vld [vmem:[%s8631_s1 + $0x408] ss:$16 sps:$4 sm:$0xff]  }
  0x48   :  { %3740 = vmatprep.subr.bf16.mxu0 %v5807_v10  ;;  %4217 = vmatprep.subr.bf16.mxu1 %v5810_v11  ;;  %v5903_v10 = vld [vmem:[%s8631_s1 + $0x424] ss:$16 sps:$4 sm:$0xff]   ;;  %v5906_v11 = vld [vmem:[%s8631_s1 + $0x42c] ss:$16 sps:$4 sm:$0xff]  }
  0x4a   :  { %3726 = vmatmul.mubr.bf16.gmra.mrb[4].mxu0 %v5885_v29  ;;  %4203 = vmatmul.mubr.bf16.gmra.mrb[4].mxu1 %v5885_v29  ;;  %v5927_v29 = vld [vmem:[%s8631_s1 + $0x4a4] ss:$16 sps:$4 sm:$0xff]  }
  0x4b   :  { %3741 = vmatpush1.bf16.msra.mxu0 %v5805_v12  ;;  %4218 = vmatpush1.bf16.msra.mxu1 %v5808_v13  ;;  %v5979_v12 = vld [vmem:[%s8632_s0 + $0x9c] ss:$72 sps:$4 sm:$0xff]   ;;  %v5901_v13 = vld [vmem:[%s8631_s1 + $0x420] ss:$16 sps:$4 sm:$0xff]  }
  0x4c   :  { %3742 = vmatprep.subr.bf16.mxu0 %v5813_v14  ;;  %4219 = vmatprep.subr.bf16.mxu1 %v5816_v15  ;;  %v5904_v14 = vld [vmem:[%s8631_s1 + $0x428] ss:$16 sps:$4 sm:$0xff]   ;;  %v5909_v15 = vld [vmem:[%s8631_s1 + $0x444] ss:$16 sps:$4 sm:$0xff]  }
  0x4d   :  { %3768 = vmatprep.mubr.bf16.mxu0 %v5894_v34  ;;  %4245 = vmatprep.mubr.bf16.mxu1 %v5894_v34  ;;  %v5936_v34 = vld [vmem:[%s8631_s1 + $0x4cc] ss:$16 sps:$4 sm:$0xff]  }
  0x4f   :  { %3743 = vmatpush1.bf16.msra.mxu0 %v5811_v16  ;;  %4220 = vmatpush1.bf16.msra.mxu1 %v5814_v17  ;;  %v5912_v16 = vld [vmem:[%s8631_s1 + $0x44c] ss:$16 sps:$4 sm:$0xff]   ;;  %v5907_v17 = vld [vmem:[%s8631_s1 + $0x440] ss:$16 sps:$4 sm:$0xff]  }
  0x50   :  { %3744 = vmatprep.subr.bf16.mxu0 %v5819_v18  ;;  %4221 = vmatprep.subr.bf16.mxu1 %v5822_v19  ;;  %v5910_v18 = vld [vmem:[%s8631_s1 + $0x448] ss:$16 sps:$4 sm:$0xff]  }
  0x51   :  { %v5987_v19 = vld [vmem:[%s8632_s0 + $0x98] ss:$72 sps:$4 sm:$0xff]  }
  0x53   :  { %3745 = vmatpush1.bf16.msra.mxu0 %v5817_v20  ;;  %4222 = vmatpush1.bf16.msra.mxu1 %v5820_v21  ;;  %v5915_v20 = vld [vmem:[%s8631_s1 + $0x464] ss:$16 sps:$4 sm:$0xff]   ;;  %v5918_v21 = vld [vmem:[%s8631_s1 + $0x46c] ss:$16 sps:$4 sm:$0xff]  }
  0x54   :  { %3746 = vmatprep.subr.bf16.mxu0 %v5825_v22  ;;  %4223 = vmatprep.subr.bf16.mxu1 %v5828_v23  ;;  %v5996_v22 = vld [vmem:[%s8632_s0 + $0x14] ss:$72 sps:$4 sm:$0xff]   ;;  %v5913_v23 = vld [vmem:[%s8631_s1 + $0x460] ss:$16 sps:$4 sm:$0xff]  }
  0x57   :  { %3747 = vmatpush1.bf16.msra.mxu0 %v5823_v25  ;;  %4224 = vmatpush1.bf16.msra.mxu1 %v5826_v26  ;;  %v5921_v25 = vld [vmem:[%s8631_s1 + $0x484] ss:$16 sps:$4 sm:$0xff]   ;;  %v5924_v26 = vld [vmem:[%s8631_s1 + $0x48c] ss:$16 sps:$4 sm:$0xff]  }
  0x58   :  { %3748 = vmatprep.subr.bf16.mxu0 %v5831_v27  ;;  %4225 = vmatprep.subr.bf16.mxu1 %v5834_v28  ;;  %v5919_v27 = vld [vmem:[%s8631_s1 + $0x480] ss:$16 sps:$4 sm:$0xff]   ;;  %v5922_v28 = vld [vmem:[%s8631_s1 + $0x488] ss:$16 sps:$4 sm:$0xff]  }
  0x5b   :  { %3749 = vmatpush1.bf16.msra.mxu0 %v5829_v30  ;;  %4226 = vmatpush1.bf16.msra.mxu1 %v5832_v31  ;;  %v5930_v30 = vld [vmem:[%s8631_s1 + $0x4ac] ss:$16 sps:$4 sm:$0xff]   ;;  %v5925_v31 = vld [vmem:[%s8631_s1 + $0x4a0] ss:$16 sps:$4 sm:$0xff]  }
  0x5c   :  { %3750 = vmatprep.subr.bf16.mxu0 %v5837_v32  ;;  %4227 = vmatprep.subr.bf16.mxu1 %v5840_v33  ;;  %v5928_v32 = vld [vmem:[%s8631_s1 + $0x4a8] ss:$16 sps:$4 sm:$0xff]   ;;  %v5933_v33 = vld [vmem:[%s8631_s1 + $0x4c4] ss:$16 sps:$4 sm:$0xff]  }
  0x5f   :  { %3751 = vmatpush1.bf16.msra.mxu0 %v5835_v35  ;;  %4228 = vmatpush1.bf16.msra.mxu1 %v5838_v36  ;;  %v5931_v35 = vld [vmem:[%s8631_s1 + $0x4c0] ss:$16 sps:$4 sm:$0xff]   ;;  %v5934_v36 = vld [vmem:[%s8631_s1 + $0x4c8] ss:$16 sps:$4 sm:$0xff]  }
  0x60   :  { %3752 = vmatprep.subr.bf16.mxu0 %v5843_v37  ;;  %4229 = vmatprep.subr.bf16.mxu1 %v5846_v38  ;;  %v5939_v37 = vld [vmem:[%s8631_s1 + $0x4e4] ss:$16 sps:$4 sm:$0xff]   ;;  %v5942_v38 = vld [vmem:[%s8631_s1 + $0x4ec] ss:$16 sps:$4 sm:$0xff]  }
  0x63   :  { %3753 = vmatpush1.bf16.msra.mxu0 %v5841_v39  ;;  %4230 = vmatpush1.bf16.msra.mxu1 %v5844_v40  ;;  %v5937_v39 = vld [vmem:[%s8631_s1 + $0x4e0] ss:$16 sps:$4 sm:$0xff]   ;;  %v5940_v40 = vld [vmem:[%s8631_s1 + $0x4e8] ss:$16 sps:$4 sm:$0xff]  }
  0x64   :  { %3754 = vmatprep.subr.bf16.mxu0 %v5849_v41  ;;  %4231 = vmatprep.subr.bf16.mxu1 %v5852_v42  ;;  %v5945_v41 = vld [vmem:[%s8631_s1 + $0x504] ss:$16 sps:$4 sm:$0xff]   ;;  %v5948_v42 = vld [vmem:[%s8631_s1 + $0x50c] ss:$16 sps:$4 sm:$0xff]  }
  0x67   :  { %3755 = vmatpush1.bf16.msra.mxu0 %v5847_v43  ;;  %4232 = vmatpush1.bf16.msra.mxu1 %v5850_v44  ;;  %v5943_v43 = vld [vmem:[%s8631_s1 + $0x500] ss:$16 sps:$4 sm:$0xff]   ;;  %v5946_v44 = vld [vmem:[%s8631_s1 + $0x508] ss:$16 sps:$4 sm:$0xff]  }
  0x68   :  { %3756 = vmatprep.subr.bf16.mxu0 %v5855_v45  ;;  %4233 = vmatprep.subr.bf16.mxu1 %v5858_v46  ;;  %v5951_v45 = vld [vmem:[%s8631_s1 + $0x524] ss:$16 sps:$4 sm:$0xff]   ;;  %v5954_v46 = vld [vmem:[%s8631_s1 + $0x52c] ss:$16 sps:$4 sm:$0xff]  }
  0x6b   :  { %3757 = vmatpush1.bf16.msra.mxu0 %v5853_v47  ;;  %4234 = vmatpush1.bf16.msra.mxu1 %v5856_v48  ;;  %v5949_v47 = vld [vmem:[%s8631_s1 + $0x520] ss:$16 sps:$4 sm:$0xff]   ;;  %v5952_v48 = vld [vmem:[%s8631_s1 + $0x528] ss:$16 sps:$4 sm:$0xff]  }
  0x6c   :  { %3758 = vmatprep.subr.bf16.mxu0 %v5861_v49  ;;  %4235 = vmatprep.subr.bf16.mxu1 %v5864_v50  ;;  %v5957_v49 = vld [vmem:[%s8631_s1 + $0x544] ss:$16 sps:$4 sm:$0xff]   ;;  %v5960_v50 = vld [vmem:[%s8631_s1 + $0x54c] ss:$16 sps:$4 sm:$0xff]  }
  0x6f   :  { %3759 = vmatpush1.bf16.msra.mxu0 %v5859_v51  ;;  %4236 = vmatpush1.bf16.msra.mxu1 %v5862_v52  ;;  %v5955_v51 = vld [vmem:[%s8631_s1 + $0x540] ss:$16 sps:$4 sm:$0xff]   ;;  %v5958_v52 = vld [vmem:[%s8631_s1 + $0x548] ss:$16 sps:$4 sm:$0xff]  }
  0x70   :  { %3760 = vmatprep.subr.bf16.mxu0 %v5867_v53  ;;  %4237 = vmatprep.subr.bf16.mxu1 %v5870_v54  ;;  %v5963_v53 = vld [vmem:[%s8631_s1 + $0x564] ss:$16 sps:$4 sm:$0xff]   ;;  %v5966_v54 = vld [vmem:[%s8631_s1 + $0x56c] ss:$16 sps:$4 sm:$0xff]  }
  0x73   :  { %3761 = vmatpush1.bf16.msra.mxu0 %v5865_v55  ;;  %4238 = vmatpush1.bf16.msra.mxu1 %v5868_v56  ;;  %v5961_v55 = vld [vmem:[%s8631_s1 + $0x560] ss:$16 sps:$4 sm:$0xff]   ;;  %v5964_v56 = vld [vmem:[%s8631_s1 + $0x568] ss:$16 sps:$4 sm:$0xff]  }
  0x74   :  { %3762 = vmatprep.subr.bf16.mxu0 %v5873_v57  ;;  %4239 = vmatprep.subr.bf16.mxu1 %v5876_v58  ;;  %v5969_v57 = vld [vmem:[%s8631_s1 + $0x584] ss:$16 sps:$4 sm:$0xff]   ;;  %v5972_v58 = vld [vmem:[%s8631_s1 + $0x58c] ss:$16 sps:$4 sm:$0xff]  }
  0x77   :  { %3763 = vmatpush1.bf16.msra.mxu0 %v5871_v59  ;;  %4240 = vmatpush1.bf16.msra.mxu1 %v5874_v60  ;;  %v5967_v59 = vld [vmem:[%s8631_s1 + $0x580] ss:$16 sps:$4 sm:$0xff]   ;;  %v5970_v60 = vld [vmem:[%s8631_s1 + $0x588] ss:$16 sps:$4 sm:$0xff]  }
  0x78   :  { %3764 = vmatprep.subr.bf16.mxu0 %v5881_v61  ;;  %4241 = vmatprep.subr.bf16.mxu1 %v5884_v62  ;;  %v5975_v61 = vld [vmem:[%s8631_s1 + $0x5a4] ss:$16 sps:$4 sm:$0xff]   ;;  %v5978_v62 = vld [vmem:[%s8631_s1 + $0x5ac] ss:$16 sps:$4 sm:$0xff]  }
  0x7b   :  { %3765 = vmatpush1.bf16.msra.mxu0 %v5879_v63  ;;  %4242 = vmatpush1.bf16.msra.mxu1 %v5882_v0  ;;  %v5973_v63 = vld [vmem:[%s8631_s1 + $0x5a0] ss:$16 sps:$4 sm:$0xff]   ;;  %v5976_v0 = vld [vmem:[%s8631_s1 + $0x5a8] ss:$16 sps:$4 sm:$0xff]  }
  0x7c   :  { %3766 = vmatprep.subr.bf16.mxu0 %v5888_v1  ;;  %4243 = vmatprep.subr.bf16.mxu1 %v5891_v2  ;;  %v5983_v1 = vld [vmem:[%s8631_s1 + $0x5c4] ss:$16 sps:$4 sm:$0xff]   ;;  %v5986_v2 = vld [vmem:[%s8631_s1 + $0x5cc] ss:$16 sps:$4 sm:$0xff]  }
  0x7f   :  { %3767 = vmatpush1.bf16.msra.mxu0 %v5886_v3  ;;  %4244 = vmatpush1.bf16.msra.mxu1 %v5889_v4  ;;  %v5981_v3 = vld [vmem:[%s8631_s1 + $0x5c0] ss:$16 sps:$4 sm:$0xff]   ;;  %v5984_v4 = vld [vmem:[%s8631_s1 + $0x5c8] ss:$16 sps:$4 sm:$0xff]  }
  0x80   :  { %3789 = vmatprep.subr.bf16.mxu0 %v5897_v5  ;;  %4266 = vmatprep.subr.bf16.mxu1 %v5900_v6  ;;  %v5990_v5 = vld [vmem:[%s8631_s1 + $0x5e4] ss:$16 sps:$4 sm:$0xff]   ;;  %v5993_v6 = vld [vmem:[%s8631_s1 + $0x5ec] ss:$16 sps:$4 sm:$0xff]  }
  0x82   :  { %3769 = vmatmul.mubr.bf16.vlgmr.msra.gmra.mrb[0].mxu0 %v5892_v7  ;;  %4246 = vmatmul.mubr.bf16.vlgmr.msra.gmra.mrb[0].mxu1 %v5892_v7  ;;  %v5988_v7 = vld [vmem:[%s8631_s1 + $0x5e0] ss:$16 sps:$4 sm:$0xff]  }
  0x83   :  { %3790 = vmatpush1.bf16.msra.mxu0 %v5895_v8  ;;  %4267 = vmatpush1.bf16.msra.mxu1 %v5898_v9  ;;  %v5991_v8 = vld [vmem:[%s8631_s1 + $0x5e8] ss:$16 sps:$4 sm:$0xff]   ;;  %v5999_v9 = vld [vmem:[%s8631_s1 + $0x604] ss:$16 sps:$4 sm:$0xff]  }
  0x84   :  { %3791 = vmatprep.subr.bf16.mxu0 %v5903_v10  ;;  %4268 = vmatprep.subr.bf16.mxu1 %v5906_v11  ;;  %v6002_v10 = vld [vmem:[%s8631_s1 + $0x60c] ss:$16 sps:$4 sm:$0xff]   ;;  %v5994_v11 = vld [vmem:[%s8632_s0 + $0x10] ss:$72 sps:$4 sm:$0xff]  }
  0x85   :  { %3778 = vmatprep.mubr.bf16.mxu0 %v5979_v12  ;;  %4255 = vmatprep.mubr.bf16.mxu1 %v5979_v12  ;;  %v5997_v12 = vld [vmem:[%s8631_s1 + $0x600] ss:$16 sps:$4 sm:$0xff]  }
  0x87   :  { %3792 = vmatpush1.bf16.msra.mxu0 %v5901_v13  ;;  %4269 = vmatpush1.bf16.msra.mxu1 %v5904_v14  ;;  %v6000_v13 = vld [vmem:[%s8631_s1 + $0x608] ss:$16 sps:$4 sm:$0xff]   ;;  %v6005_v14 = vld [vmem:[%s8631_s1 + $0x624] ss:$16 sps:$4 sm:$0xff]  }
  0x88   :  { %3793 = vmatprep.subr.bf16.mxu0 %v5909_v15  ;;  %4270 = vmatprep.subr.bf16.mxu1 %v5912_v16  ;;  %v6008_v15 = vld [vmem:[%s8631_s1 + $0x62c] ss:$16 sps:$4 sm:$0xff]  }
  0x89   :  { %v6081_v16 = vld [vmem:[%s8632_s0 + $0xa4] ss:$72 sps:$4 sm:$0xff]  }
  0x8a   :  { %3779 = vmatmul.mubr.bf16.gmra.mrb[4].mxu0 %v5987_v19  ;;  %4256 = vmatmul.mubr.bf16.gmra.mrb[4].mxu1 %v5987_v19  ;;  %v6011_v19 = vld [vmem:[%s8631_s1 + $0x644] ss:$16 sps:$4 sm:$0xff]  }
  0x8b   :  { %3794 = vmatpush1.bf16.msra.mxu0 %v5907_v17  ;;  %4271 = vmatpush1.bf16.msra.mxu1 %v5910_v18  ;;  %v6003_v17 = vld [vmem:[%s8631_s1 + $0x620] ss:$16 sps:$4 sm:$0xff]   ;;  %v6006_v18 = vld [vmem:[%s8631_s1 + $0x628] ss:$16 sps:$4 sm:$0xff]  }
  0x8c   :  { %3795 = vmatprep.subr.bf16.mxu0 %v5915_v20  ;;  %4272 = vmatprep.subr.bf16.mxu1 %v5918_v21  ;;  %v6014_v20 = vld [vmem:[%s8631_s1 + $0x64c] ss:$16 sps:$4 sm:$0xff]   ;;  %v6009_v21 = vld [vmem:[%s8631_s1 + $0x640] ss:$16 sps:$4 sm:$0xff]  }
  0x8d   :  { %3821 = vmatprep.mubr.bf16.mxu0 %v5996_v22  ;;  %4298 = vmatprep.mubr.bf16.mxu1 %v5996_v22  ;;  %v6012_v22 = vld [vmem:[%s8631_s1 + $0x648] ss:$16 sps:$4 sm:$0xff]  }
  0x8f   :  { %3796 = vmatpush1.bf16.msra.mxu0 %v5913_v23  ;;  %4273 = vmatpush1.bf16.msra.mxu1 %v5916_v24  ;;  %v6089_v23 = vld [vmem:[%s8632_s0 + $0xa0] ss:$72 sps:$4 sm:$0xff]   ;;  %v6017_v24 = vld [vmem:[%s8631_s1 + $0x664] ss:$16 sps:$4 sm:$0xff]  }
  0x90   :  { %3797 = vmatprep.subr.bf16.mxu0 %v5921_v25  ;;  %4274 = vmatprep.subr.bf16.mxu1 %v5924_v26  ;;  %v6020_v25 = vld [vmem:[%s8631_s1 + $0x66c] ss:$16 sps:$4 sm:$0xff]  }
  0x91   :  { %v6098_v26 = vld [vmem:[%s8632_s0 + $0x1c] ss:$72 sps:$4 sm:$0xff]  }
  0x93   :  { %3798 = vmatpush1.bf16.msra.mxu0 %v5919_v27  ;;  %4275 = vmatpush1.bf16.msra.mxu1 %v5922_v28  ;;  %v6015_v27 = vld [vmem:[%s8631_s1 + $0x660] ss:$16 sps:$4 sm:$0xff]   ;;  %v6018_v28 = vld [vmem:[%s8631_s1 + $0x668] ss:$16 sps:$4 sm:$0xff]  }
  0x94   :  { %3799 = vmatprep.subr.bf16.mxu0 %v5927_v29  ;;  %4276 = vmatprep.subr.bf16.mxu1 %v5930_v30  ;;  %v6023_v29 = vld [vmem:[%s8631_s1 + $0x684] ss:$16 sps:$4 sm:$0xff]   ;;  %v6026_v30 = vld [vmem:[%s8631_s1 + $0x68c] ss:$16 sps:$4 sm:$0xff]  }
  0x97   :  { %3800 = vmatpush1.bf16.msra.mxu0 %v5925_v31  ;;  %4277 = vmatpush1.bf16.msra.mxu1 %v5928_v32  ;;  %v6021_v31 = vld [vmem:[%s8631_s1 + $0x680] ss:$16 sps:$4 sm:$0xff]   ;;  %v6024_v32 = vld [vmem:[%s8631_s1 + $0x688] ss:$16 sps:$4 sm:$0xff]  }
  0x98   :  { %3801 = vmatprep.subr.bf16.mxu0 %v5933_v33  ;;  %4278 = vmatprep.subr.bf16.mxu1 %v5936_v34  ;;  %v6029_v33 = vld [vmem:[%s8631_s1 + $0x6a4] ss:$16 sps:$4 sm:$0xff]   ;;  %v6032_v34 = vld [vmem:[%s8631_s1 + $0x6ac] ss:$16 sps:$4 sm:$0xff]  }
  0x9b   :  { %3802 = vmatpush1.bf16.msra.mxu0 %v5931_v35  ;;  %4279 = vmatpush1.bf16.msra.mxu1 %v5934_v36  ;;  %v6027_v35 = vld [vmem:[%s8631_s1 + $0x6a0] ss:$16 sps:$4 sm:$0xff]   ;;  %v6030_v36 = vld [vmem:[%s8631_s1 + $0x6a8] ss:$16 sps:$4 sm:$0xff]  }
  0x9c   :  { %3803 = vmatprep.subr.bf16.mxu0 %v5939_v37  ;;  %4280 = vmatprep.subr.bf16.mxu1 %v5942_v38  ;;  %v6035_v37 = vld [vmem:[%s8631_s1 + $0x6c4] ss:$16 sps:$4 sm:$0xff]   ;;  %v6038_v38 = vld [vmem:[%s8631_s1 + $0x6cc] ss:$16 sps:$4 sm:$0xff]  }
  0x9f   :  { %3804 = vmatpush1.bf16.msra.mxu0 %v5937_v39  ;;  %4281 = vmatpush1.bf16.msra.mxu1 %v5940_v40  ;;  %v6033_v39 = vld [vmem:[%s8631_s1 + $0x6c0] ss:$16 sps:$4 sm:$0xff]   ;;  %v6036_v40 = vld [vmem:[%s8631_s1 + $0x6c8] ss:$16 sps:$4 sm:$0xff]  }
  0xa0   :  { %3805 = vmatprep.subr.bf16.mxu0 %v5945_v41  ;;  %4282 = vmatprep.subr.bf16.mxu1 %v5948_v42  ;;  %v6041_v41 = vld [vmem:[%s8631_s1 + $0x6e4] ss:$16 sps:$4 sm:$0xff]   ;;  %v6044_v42 = vld [vmem:[%s8631_s1 + $0x6ec] ss:$16 sps:$4 sm:$0xff]  }
  0xa3   :  { %3806 = vmatpush1.bf16.msra.mxu0 %v5943_v43  ;;  %4283 = vmatpush1.bf16.msra.mxu1 %v5946_v44  ;;  %v6039_v43 = vld [vmem:[%s8631_s1 + $0x6e0] ss:$16 sps:$4 sm:$0xff]   ;;  %v6042_v44 = vld [vmem:[%s8631_s1 + $0x6e8] ss:$16 sps:$4 sm:$0xff]  }
  0xa4   :  { %3807 = vmatprep.subr.bf16.mxu0 %v5951_v45  ;;  %4284 = vmatprep.subr.bf16.mxu1 %v5954_v46  ;;  %v6047_v45 = vld [vmem:[%s8631_s1 + $0x704] ss:$16 sps:$4 sm:$0xff]   ;;  %v6050_v46 = vld [vmem:[%s8631_s1 + $0x70c] ss:$16 sps:$4 sm:$0xff]  }
  0xa7   :  { %3808 = vmatpush1.bf16.msra.mxu0 %v5949_v47  ;;  %4285 = vmatpush1.bf16.msra.mxu1 %v5952_v48  ;;  %v6045_v47 = vld [vmem:[%s8631_s1 + $0x700] ss:$16 sps:$4 sm:$0xff]   ;;  %v6048_v48 = vld [vmem:[%s8631_s1 + $0x708] ss:$16 sps:$4 sm:$0xff]  }
  0xa8   :  { %3809 = vmatprep.subr.bf16.mxu0 %v5957_v49  ;;  %4286 = vmatprep.subr.bf16.mxu1 %v5960_v50  ;;  %v6053_v49 = vld [vmem:[%s8631_s1 + $0x724] ss:$16 sps:$4 sm:$0xff]   ;;  %v6056_v50 = vld [vmem:[%s8631_s1 + $0x72c] ss:$16 sps:$4 sm:$0xff]  }
  0xab   :  { %3810 = vmatpush1.bf16.msra.mxu0 %v5955_v51  ;;  %4287 = vmatpush1.bf16.msra.mxu1 %v5958_v52  ;;  %v6051_v51 = vld [vmem:[%s8631_s1 + $0x720] ss:$16 sps:$4 sm:$0xff]   ;;  %v6054_v52 = vld [vmem:[%s8631_s1 + $0x728] ss:$16 sps:$4 sm:$0xff]  }
  0xac   :  { %3811 = vmatprep.subr.bf16.mxu0 %v5963_v53  ;;  %4288 = vmatprep.subr.bf16.mxu1 %v5966_v54  ;;  %v6059_v53 = vld [vmem:[%s8631_s1 + $0x744] ss:$16 sps:$4 sm:$0xff]   ;;  %v6062_v54 = vld [vmem:[%s8631_s1 + $0x74c] ss:$16 sps:$4 sm:$0xff]  }
  0xaf   :  { %3812 = vmatpush1.bf16.msra.mxu0 %v5961_v55  ;;  %4289 = vmatpush1.bf16.msra.mxu1 %v5964_v56  ;;  %v6057_v55 = vld [vmem:[%s8631_s1 + $0x740] ss:$16 sps:$4 sm:$0xff]   ;;  %v6060_v56 = vld [vmem:[%s8631_s1 + $0x748] ss:$16 sps:$4 sm:$0xff]  }
  0xb0   :  { %3813 = vmatprep.subr.bf16.mxu0 %v5969_v57  ;;  %4290 = vmatprep.subr.bf16.mxu1 %v5972_v58  ;;  %v6065_v57 = vld [vmem:[%s8631_s1 + $0x764] ss:$16 sps:$4 sm:$0xff]   ;;  %v6068_v58 = vld [vmem:[%s8631_s1 + $0x76c] ss:$16 sps:$4 sm:$0xff]  }
  0xb3   :  { %3814 = vmatpush1.bf16.msra.mxu0 %v5967_v59  ;;  %4291 = vmatpush1.bf16.msra.mxu1 %v5970_v60  ;;  %v6063_v59 = vld [vmem:[%s8631_s1 + $0x760] ss:$16 sps:$4 sm:$0xff]   ;;  %v6066_v60 = vld [vmem:[%s8631_s1 + $0x768] ss:$16 sps:$4 sm:$0xff]  }
  0xb4   :  { %3815 = vmatprep.subr.bf16.mxu0 %v5975_v61  ;;  %4292 = vmatprep.subr.bf16.mxu1 %v5978_v62  ;;  %v6071_v61 = vld [vmem:[%s8631_s1 + $0x784] ss:$16 sps:$4 sm:$0xff]   ;;  %v6074_v62 = vld [vmem:[%s8631_s1 + $0x78c] ss:$16 sps:$4 sm:$0xff]  }
  0xb7   :  { %3816 = vmatpush1.bf16.msra.mxu0 %v5973_v63  ;;  %4293 = vmatpush1.bf16.msra.mxu1 %v5976_v0  ;;  %v6069_v63 = vld [vmem:[%s8631_s1 + $0x780] ss:$16 sps:$4 sm:$0xff]   ;;  %v6072_v0 = vld [vmem:[%s8631_s1 + $0x788] ss:$16 sps:$4 sm:$0xff]  }
  0xb8   :  { %3817 = vmatprep.subr.bf16.mxu0 %v5983_v1  ;;  %4294 = vmatprep.subr.bf16.mxu1 %v5986_v2  ;;  %v6077_v1 = vld [vmem:[%s8631_s1 + $0x7a4] ss:$16 sps:$4 sm:$0xff]   ;;  %v6080_v2 = vld [vmem:[%s8631_s1 + $0x7ac] ss:$16 sps:$4 sm:$0xff]  }
  0xbb   :  { %3818 = vmatpush1.bf16.msra.mxu0 %v5981_v3  ;;  %4295 = vmatpush1.bf16.msra.mxu1 %v5984_v4  ;;  %v6075_v3 = vld [vmem:[%s8631_s1 + $0x7a0] ss:$16 sps:$4 sm:$0xff]   ;;  %v6078_v4 = vld [vmem:[%s8631_s1 + $0x7a8] ss:$16 sps:$4 sm:$0xff]  }
  0xbc   :  { %3819 = vmatprep.subr.bf16.mxu0 %v5990_v5  ;;  %4296 = vmatprep.subr.bf16.mxu1 %v5993_v6  ;;  %v6085_v5 = vld [vmem:[%s8631_s1 + $0x7c4] ss:$16 sps:$4 sm:$0xff]   ;;  %v6088_v6 = vld [vmem:[%s8631_s1 + $0x7cc] ss:$16 sps:$4 sm:$0xff]  }
  0xbf   :  { %3820 = vmatpush1.bf16.msra.mxu0 %v5988_v7  ;;  %4297 = vmatpush1.bf16.msra.mxu1 %v5991_v8  ;;  %v6083_v7 = vld [vmem:[%s8631_s1 + $0x7c0] ss:$16 sps:$4 sm:$0xff]   ;;  %v6086_v8 = vld [vmem:[%s8631_s1 + $0x7c8] ss:$16 sps:$4 sm:$0xff]  }
  0xc0   :  { %3842 = vmatprep.subr.bf16.mxu0 %v5999_v9  ;;  %4319 = vmatprep.subr.bf16.mxu1 %v6002_v10  ;;  %v6092_v9 = vld [vmem:[%s8631_s1 + $0x7e4] ss:$16 sps:$4 sm:$0xff]   ;;  %v6095_v10 = vld [vmem:[%s8631_s1 + $0x7ec] ss:$16 sps:$4 sm:$0xff]  }
  0xc2   :  { %3822 = vmatmul.mubr.bf16.vlgmr.msra.gmra.mrb[0].mxu0 %v5994_v11  ;;  %4299 = vmatmul.mubr.bf16.vlgmr.msra.gmra.mrb[0].mxu1 %v5994_v11  ;;  %v6090_v11 = vld [vmem:[%s8631_s1 + $0x7e0] ss:$16 sps:$4 sm:$0xff]  }
  0xc3   :  { %3843 = vmatpush1.bf16.msra.mxu0 %v5997_v12  ;;  %4320 = vmatpush1.bf16.msra.mxu1 %v6000_v13  ;;  %v6093_v12 = vld [vmem:[%s8631_s1 + $0x7e8] ss:$16 sps:$4 sm:$0xff]   ;;  %v6101_v13 = vld [vmem:[%s8631_s1 + $0x804] ss:$16 sps:$4 sm:$0xff]  }
  0xc4   :  { %3844 = vmatprep.subr.bf16.mxu0 %v6005_v14  ;;  %4321 = vmatprep.subr.bf16.mxu1 %v6008_v15  ;;  %v6104_v14 = vld [vmem:[%s8631_s1 + $0x80c] ss:$16 sps:$4 sm:$0xff]   ;;  %v6096_v15 = vld [vmem:[%s8632_s0 + $0x18] ss:$72 sps:$4 sm:$0xff]  }
  0xc5   :  { %3831 = vmatprep.mubr.bf16.mxu0 %v6081_v16  ;;  %4308 = vmatprep.mubr.bf16.mxu1 %v6081_v16  ;;  %v6099_v16 = vld [vmem:[%s8631_s1 + $0x800] ss:$16 sps:$4 sm:$0xff]  }
  0xc7   :  { %3845 = vmatpush1.bf16.msra.mxu0 %v6003_v17  ;;  %4322 = vmatpush1.bf16.msra.mxu1 %v6006_v18  ;;  %v6102_v17 = vld [vmem:[%s8631_s1 + $0x808] ss:$16 sps:$4 sm:$0xff]   ;;  %v6107_v18 = vld [vmem:[%s8631_s1 + $0x824] ss:$16 sps:$4 sm:$0xff]  }
  0xc8   :  { %3846 = vmatprep.subr.bf16.mxu0 %v6011_v19  ;;  %4323 = vmatprep.subr.bf16.mxu1 %v6014_v20  ;;  %v6110_v19 = vld [vmem:[%s8631_s1 + $0x82c] ss:$16 sps:$4 sm:$0xff]  }
  0xc9   :  { %v6183_v20 = vld [vmem:[%s8632_s0 + $0xac] ss:$72 sps:$4 sm:$0xff]  }
  0xca   :  { %3832 = vmatmul.mubr.bf16.gmra.mrb[4].mxu0 %v6089_v23  ;;  %4309 = vmatmul.mubr.bf16.gmra.mrb[4].mxu1 %v6089_v23  ;;  %v6113_v23 = vld [vmem:[%s8631_s1 + $0x844] ss:$16 sps:$4 sm:$0xff]  }
  0xcb   :  { %3847 = vmatpush1.bf16.msra.mxu0 %v6009_v21  ;;  %4324 = vmatpush1.bf16.msra.mxu1 %v6012_v22  ;;  %v6105_v21 = vld [vmem:[%s8631_s1 + $0x820] ss:$16 sps:$4 sm:$0xff]   ;;  %v6108_v22 = vld [vmem:[%s8631_s1 + $0x828] ss:$16 sps:$4 sm:$0xff]  }
  0xcc   :  { %3848 = vmatprep.subr.bf16.mxu0 %v6017_v24  ;;  %4325 = vmatprep.subr.bf16.mxu1 %v6020_v25  ;;  %v6116_v24 = vld [vmem:[%s8631_s1 + $0x84c] ss:$16 sps:$4 sm:$0xff]   ;;  %v6111_v25 = vld [vmem:[%s8631_s1 + $0x840] ss:$16 sps:$4 sm:$0xff]  }
  0xcd   :  { %3874 = vmatprep.mubr.bf16.mxu0 %v6098_v26  ;;  %4351 = vmatprep.mubr.bf16.mxu1 %v6098_v26  ;;  %v6191_v26 = vld [vmem:[%s8632_s0 + $0xa8] ss:$72 sps:$4 sm:$0xff]  }
  0xcf   :  { %3849 = vmatpush1.bf16.msra.mxu0 %v6015_v27  ;;  %4326 = vmatpush1.bf16.msra.mxu1 %v6018_v28  ;;  %v6114_v27 = vld [vmem:[%s8631_s1 + $0x848] ss:$16 sps:$4 sm:$0xff]   ;;  %v6119_v28 = vld [vmem:[%s8631_s1 + $0x864] ss:$16 sps:$4 sm:$0xff]  }
  0xd0   :  { %3850 = vmatprep.subr.bf16.mxu0 %v6023_v29  ;;  %4327 = vmatprep.subr.bf16.mxu1 %v6026_v30  ;;  %v6122_v29 = vld [vmem:[%s8631_s1 + $0x86c] ss:$16 sps:$4 sm:$0xff]  }
  0xd1   :  { %v6200_v30 = vld [vmem:[%s8632_s0 + $0x24] ss:$72 sps:$4 sm:$0xff]  }
  0xd3   :  { %3851 = vmatpush1.bf16.msra.mxu0 %v6021_v31  ;;  %4328 = vmatpush1.bf16.msra.mxu1 %v6024_v32  ;;  %v6117_v31 = vld [vmem:[%s8631_s1 + $0x860] ss:$16 sps:$4 sm:$0xff]   ;;  %v6120_v32 = vld [vmem:[%s8631_s1 + $0x868] ss:$16 sps:$4 sm:$0xff]  }
  0xd4   :  { %3852 = vmatprep.subr.bf16.mxu0 %v6029_v33  ;;  %4329 = vmatprep.subr.bf16.mxu1 %v6032_v34  ;;  %v6125_v33 = vld [vmem:[%s8631_s1 + $0x884] ss:$16 sps:$4 sm:$0xff]   ;;  %v6128_v34 = vld [vmem:[%s8631_s1 + $0x88c] ss:$16 sps:$4 sm:$0xff]  }
  0xd7   :  { %3853 = vmatpush1.bf16.msra.mxu0 %v6027_v35  ;;  %4330 = vmatpush1.bf16.msra.mxu1 %v6030_v36  ;;  %v6123_v35 = vld [vmem:[%s8631_s1 + $0x880] ss:$16 sps:$4 sm:$0xff]   ;;  %v6126_v36 = vld [vmem:[%s8631_s1 + $0x888] ss:$16 sps:$4 sm:$0xff]  }
  0xd8   :  { %3854 = vmatprep.subr.bf16.mxu0 %v6035_v37  ;;  %4331 = vmatprep.subr.bf16.mxu1 %v6038_v38  ;;  %v6131_v37 = vld [vmem:[%s8631_s1 + $0x8a4] ss:$16 sps:$4 sm:$0xff]   ;;  %v6134_v38 = vld [vmem:[%s8631_s1 + $0x8ac] ss:$16 sps:$4 sm:$0xff]  }
  0xdb   :  { %3855 = vmatpush1.bf16.msra.mxu0 %v6033_v39  ;;  %4332 = vmatpush1.bf16.msra.mxu1 %v6036_v40  ;;  %v6129_v39 = vld [vmem:[%s8631_s1 + $0x8a0] ss:$16 sps:$4 sm:$0xff]   ;;  %v6132_v40 = vld [vmem:[%s8631_s1 + $0x8a8] ss:$16 sps:$4 sm:$0xff]  }
  0xdc   :  { %3856 = vmatprep.subr.bf16.mxu0 %v6041_v41  ;;  %4333 = vmatprep.subr.bf16.mxu1 %v6044_v42  ;;  %v6137_v41 = vld [vmem:[%s8631_s1 + $0x8c4] ss:$16 sps:$4 sm:$0xff]   ;;  %v6140_v42 = vld [vmem:[%s8631_s1 + $0x8cc] ss:$16 sps:$4 sm:$0xff]  }
  0xdf   :  { %3857 = vmatpush1.bf16.msra.mxu0 %v6039_v43  ;;  %4334 = vmatpush1.bf16.msra.mxu1 %v6042_v44  ;;  %v6135_v43 = vld [vmem:[%s8631_s1 + $0x8c0] ss:$16 sps:$4 sm:$0xff]   ;;  %v6138_v44 = vld [vmem:[%s8631_s1 + $0x8c8] ss:$16 sps:$4 sm:$0xff]  }
  0xe0   :  { %3858 = vmatprep.subr.bf16.mxu0 %v6047_v45  ;;  %4335 = vmatprep.subr.bf16.mxu1 %v6050_v46  ;;  %v6143_v45 = vld [vmem:[%s8631_s1 + $0x8e4] ss:$16 sps:$4 sm:$0xff]   ;;  %v6146_v46 = vld [vmem:[%s8631_s1 + $0x8ec] ss:$16 sps:$4 sm:$0xff]  }
  0xe3   :  { %3859 = vmatpush1.bf16.msra.mxu0 %v6045_v47  ;;  %4336 = vmatpush1.bf16.msra.mxu1 %v6048_v48  ;;  %v6141_v47 = vld [vmem:[%s8631_s1 + $0x8e0] ss:$16 sps:$4 sm:$0xff]   ;;  %v6144_v48 = vld [vmem:[%s8631_s1 + $0x8e8] ss:$16 sps:$4 sm:$0xff]  }
  0xe4   :  { %3860 = vmatprep.subr.bf16.mxu0 %v6053_v49  ;;  %4337 = vmatprep.subr.bf16.mxu1 %v6056_v50  ;;  %v6149_v49 = vld [vmem:[%s8631_s1 + $0x904] ss:$16 sps:$4 sm:$0xff]   ;;  %v6152_v50 = vld [vmem:[%s8631_s1 + $0x90c] ss:$16 sps:$4 sm:$0xff]  }
  0xe7   :  { %3861 = vmatpush1.bf16.msra.mxu0 %v6051_v51  ;;  %4338 = vmatpush1.bf16.msra.mxu1 %v6054_v52  ;;  %v6147_v51 = vld [vmem:[%s8631_s1 + $0x900] ss:$16 sps:$4 sm:$0xff]   ;;  %v6150_v52 = vld [vmem:[%s8631_s1 + $0x908] ss:$16 sps:$4 sm:$0xff]  }
  0xe8   :  { %3862 = vmatprep.subr.bf16.mxu0 %v6059_v53  ;;  %4339 = vmatprep.subr.bf16.mxu1 %v6062_v54  ;;  %v6155_v53 = vld [vmem:[%s8631_s1 + $0x924] ss:$16 sps:$4 sm:$0xff]   ;;  %v6158_v54 = vld [vmem:[%s8631_s1 + $0x92c] ss:$16 sps:$4 sm:$0xff]  }
  0xeb   :  { %3863 = vmatpush1.bf16.msra.mxu0 %v6057_v55  ;;  %4340 = vmatpush1.bf16.msra.mxu1 %v6060_v56  ;;  %v6153_v55 = vld [vmem:[%s8631_s1 + $0x920] ss:$16 sps:$4 sm:$0xff]   ;;  %v6156_v56 = vld [vmem:[%s8631_s1 + $0x928] ss:$16 sps:$4 sm:$0xff]  }
  0xec   :  { %3864 = vmatprep.subr.bf16.mxu0 %v6065_v57  ;;  %4341 = vmatprep.subr.bf16.mxu1 %v6068_v58  ;;  %v6161_v57 = vld [vmem:[%s8631_s1 + $0x944] ss:$16 sps:$4 sm:$0xff]   ;;  %v6164_v58 = vld [vmem:[%s8631_s1 + $0x94c] ss:$16 sps:$4 sm:$0xff]  }
  0xef   :  { %3865 = vmatpush1.bf16.msra.mxu0 %v6063_v59  ;;  %4342 = vmatpush1.bf16.msra.mxu1 %v6066_v60  ;;  %v6159_v59 = vld [vmem:[%s8631_s1 + $0x940] ss:$16 sps:$4 sm:$0xff]   ;;  %v6162_v60 = vld [vmem:[%s8631_s1 + $0x948] ss:$16 sps:$4 sm:$0xff]  }
  0xf0   :  { %3866 = vmatprep.subr.bf16.mxu0 %v6071_v61  ;;  %4343 = vmatprep.subr.bf16.mxu1 %v6074_v62  ;;  %v6167_v61 = vld [vmem:[%s8631_s1 + $0x964] ss:$16 sps:$4 sm:$0xff]   ;;  %v6170_v62 = vld [vmem:[%s8631_s1 + $0x96c] ss:$16 sps:$4 sm:$0xff]  }
  0xf3   :  { %3867 = vmatpush1.bf16.msra.mxu0 %v6069_v63  ;;  %4344 = vmatpush1.bf16.msra.mxu1 %v6072_v0  ;;  %v6165_v63 = vld [vmem:[%s8631_s1 + $0x960] ss:$16 sps:$4 sm:$0xff]   ;;  %v6168_v0 = vld [vmem:[%s8631_s1 + $0x968] ss:$16 sps:$4 sm:$0xff]  }
  0xf4   :  { %3868 = vmatprep.subr.bf16.mxu0 %v6077_v1  ;;  %4345 = vmatprep.subr.bf16.mxu1 %v6080_v2  ;;  %v6173_v1 = vld [vmem:[%s8631_s1 + $0x984] ss:$16 sps:$4 sm:$0xff]   ;;  %v6176_v2 = vld [vmem:[%s8631_s1 + $0x98c] ss:$16 sps:$4 sm:$0xff]  }
  0xf7   :  { %3869 = vmatpush1.bf16.msra.mxu0 %v6075_v3  ;;  %4346 = vmatpush1.bf16.msra.mxu1 %v6078_v4  ;;  %v6171_v3 = vld [vmem:[%s8631_s1 + $0x980] ss:$16 sps:$4 sm:$0xff]   ;;  %v6174_v4 = vld [vmem:[%s8631_s1 + $0x988] ss:$16 sps:$4 sm:$0xff]  }
  0xf8   :  { %3870 = vmatprep.subr.bf16.mxu0 %v6085_v5  ;;  %4347 = vmatprep.subr.bf16.mxu1 %v6088_v6  ;;  %v6179_v5 = vld [vmem:[%s8631_s1 + $0x9a4] ss:$16 sps:$4 sm:$0xff]   ;;  %v6182_v6 = vld [vmem:[%s8631_s1 + $0x9ac] ss:$16 sps:$4 sm:$0xff]  }
  0xfb   :  { %3871 = vmatpush1.bf16.msra.mxu0 %v6083_v7  ;;  %4348 = vmatpush1.bf16.msra.mxu1 %v6086_v8  ;;  %v6177_v7 = vld [vmem:[%s8631_s1 + $0x9a0] ss:$16 sps:$4 sm:$0xff]   ;;  %v6180_v8 = vld [vmem:[%s8631_s1 + $0x9a8] ss:$16 sps:$4 sm:$0xff]  }
  0xfc   :  { %3872 = vmatprep.subr.bf16.mxu0 %v6092_v9  ;;  %4349 = vmatprep.subr.bf16.mxu1 %v6095_v10  ;;  %v6187_v9 = vld [vmem:[%s8631_s1 + $0x9c4] ss:$16 sps:$4 sm:$0xff]   ;;  %v6190_v10 = vld [vmem:[%s8631_s1 + $0x9cc] ss:$16 sps:$4 sm:$0xff]  }
  0xff   :  { %3873 = vmatpush1.bf16.msra.mxu0 %v6090_v11  ;;  %4350 = vmatpush1.bf16.msra.mxu1 %v6093_v12  ;;  %v6185_v11 = vld [vmem:[%s8631_s1 + $0x9c0] ss:$16 sps:$4 sm:$0xff]   ;;  %v6188_v12 = vld [vmem:[%s8631_s1 + $0x9c8] ss:$16 sps:$4 sm:$0xff]  }
 0x100   :  { %3895 = vmatprep.subr.bf16.mxu0 %v6101_v13  ;;  %4372 = vmatprep.subr.bf16.mxu1 %v6104_v14  ;;  %v6194_v13 = vld [vmem:[%s8631_s1 + $0x9e4] ss:$16 sps:$4 sm:$0xff]   ;;  %v6197_v14 = vld [vmem:[%s8631_s1 + $0x9ec] ss:$16 sps:$4 sm:$0xff]  }
 0x102   :  { %3875 = vmatmul.mubr.bf16.vlgmr.msra.gmra.mrb[0].mxu0 %v6096_v15  ;;  %4352 = vmatmul.mubr.bf16.vlgmr.msra.gmra.mrb[0].mxu1 %v6096_v15  ;;  %v6192_v15 = vld [vmem:[%s8631_s1 + $0x9e0] ss:$16 sps:$4 sm:$0xff]  }
 0x103   :  { %3896 = vmatpush1.bf16.msra.mxu0 %v6099_v16  ;;  %4373 = vmatpush1.bf16.msra.mxu1 %v6102_v17  ;;  %v6195_v16 = vld [vmem:[%s8631_s1 + $0x9e8] ss:$16 sps:$4 sm:$0xff]  }
 0x104   :  { %3897 = vmatprep.subr.bf16.mxu0 %v6107_v18  ;;  %4374 = vmatprep.subr.bf16.mxu1 %v6110_v19  ;;  %v6198_v17 = vld [vmem:[%s8632_s0 + $0x20] ss:$72 sps:$4 sm:$0xff]   ;;  %v6203_v18 = vld [vmem:[%s8631_s1 + $0xa04] ss:$16 sps:$4 sm:$0xff]   ;;  %v6206_v19 = vld [vmem:[%s8631_s1 + $0xa0c] ss:$16 sps:$4 sm:$0xff]  }
 0x105   :  { %3884 = vmatprep.mubr.bf16.mxu0 %v6183_v20  ;;  %4361 = vmatprep.mubr.bf16.mxu1 %v6183_v20  ;;  %v6201_v20 = vld [vmem:[%s8631_s1 + $0xa00] ss:$16 sps:$4 sm:$0xff]  }
 0x107   :  { %3898 = vmatpush1.bf16.msra.mxu0 %v6105_v21  ;;  %4375 = vmatpush1.bf16.msra.mxu1 %v6108_v22  ;;  %v6204_v21 = vld [vmem:[%s8631_s1 + $0xa08] ss:$16 sps:$4 sm:$0xff]   ;;  %v6209_v22 = vld [vmem:[%s8631_s1 + $0xa24] ss:$16 sps:$4 sm:$0xff]  }
 0x108   :  { %3899 = vmatprep.subr.bf16.mxu0 %v6113_v23  ;;  %4376 = vmatprep.subr.bf16.mxu1 %v6116_v24  ;;  %v6212_v23 = vld [vmem:[%s8631_s1 + $0xa2c] ss:$16 sps:$4 sm:$0xff]  }
 0x109   :  { %v6285_v24 = vld [vmem:[%s8632_s0 + $0xb4] ss:$72 sps:$4 sm:$0xff]  }
 0x10a   :  { %3885 = vmatmul.mubr.bf16.gmra.mrb[4].mxu0 %v6191_v26  ;;  %4362 = vmatmul.mubr.bf16.gmra.mrb[4].mxu1 %v6191_v26  ;;  %v6210_v26 = vld [vmem:[%s8631_s1 + $0xa28] ss:$16 sps:$4 sm:$0xff]  }
 0x10b   :  { %3900 = vmatpush1.bf16.msra.mxu0 %v6111_v25  ;;  %4377 = vmatpush1.bf16.msra.mxu1 %v6114_v27  ;;  %v6207_v25 = vld [vmem:[%s8631_s1 + $0xa20] ss:$16 sps:$4 sm:$0xff]   ;;  %v6215_v27 = vld [vmem:[%s8631_s1 + $0xa44] ss:$16 sps:$4 sm:$0xff]  }
 0x10c   :  { %3901 = vmatprep.subr.bf16.mxu0 %v6119_v28  ;;  %4378 = vmatprep.subr.bf16.mxu1 %v6122_v29  ;;  %v6218_v28 = vld [vmem:[%s8631_s1 + $0xa4c] ss:$16 sps:$4 sm:$0xff]   ;;  %v6293_v29 = vld [vmem:[%s8632_s0 + $0xb0] ss:$72 sps:$4 sm:$0xff]  }
 0x10d   :  { %3927 = vmatprep.mubr.bf16.mxu0 %v6200_v30  ;;  %4404 = vmatprep.mubr.bf16.mxu1 %v6200_v30  ;;  %v6213_v30 = vld [vmem:[%s8631_s1 + $0xa40] ss:$16 sps:$4 sm:$0xff]  }
 0x10f   :  { %3902 = vmatpush1.bf16.msra.mxu0 %v6117_v31  ;;  %4379 = vmatpush1.bf16.msra.mxu1 %v6120_v32  ;;  %v6216_v31 = vld [vmem:[%s8631_s1 + $0xa48] ss:$16 sps:$4 sm:$0xff]   ;;  %v6221_v32 = vld [vmem:[%s8631_s1 + $0xa64] ss:$16 sps:$4 sm:$0xff]  }
 0x110   :  { %3903 = vmatprep.subr.bf16.mxu0 %v6125_v33  ;;  %4380 = vmatprep.subr.bf16.mxu1 %v6128_v34  ;;  %v6224_v33 = vld [vmem:[%s8631_s1 + $0xa6c] ss:$16 sps:$4 sm:$0xff]  }
 0x111   :  { %v6302_v34 = vld [vmem:[%s8632_s0 + $0x2c] ss:$72 sps:$4 sm:$0xff]  }
 0x113   :  { %3904 = vmatpush1.bf16.msra.mxu0 %v6123_v35  ;;  %4381 = vmatpush1.bf16.msra.mxu1 %v6126_v36  ;;  %v6219_v35 = vld [vmem:[%s8631_s1 + $0xa60] ss:$16 sps:$4 sm:$0xff]   ;;  %v6222_v36 = vld [vmem:[%s8631_s1 + $0xa68] ss:$16 sps:$4 sm:$0xff]  }
 0x114   :  { %3905 = vmatprep.subr.bf16.mxu0 %v6131_v37  ;;  %4382 = vmatprep.subr.bf16.mxu1 %v6134_v38  ;;  %v6227_v37 = vld [vmem:[%s8631_s1 + $0xa84] ss:$16 sps:$4 sm:$0xff]   ;;  %v6230_v38 = vld [vmem:[%s8631_s1 + $0xa8c] ss:$16 sps:$4 sm:$0xff]  }
 0x117   :  { %3906 = vmatpush1.bf16.msra.mxu0 %v6129_v39  ;;  %4383 = vmatpush1.bf16.msra.mxu1 %v6132_v40  ;;  %v6225_v39 = vld [vmem:[%s8631_s1 + $0xa80] ss:$16 sps:$4 sm:$0xff]   ;;  %v6228_v40 = vld [vmem:[%s8631_s1 + $0xa88] ss:$16 sps:$4 sm:$0xff]  }
 0x118   :  { %3907 = vmatprep.subr.bf16.mxu0 %v6137_v41  ;;  %4384 = vmatprep.subr.bf16.mxu1 %v6140_v42  ;;  %v6233_v41 = vld [vmem:[%s8631_s1 + $0xaa4] ss:$16 sps:$4 sm:$0xff]   ;;  %v6236_v42 = vld [vmem:[%s8631_s1 + $0xaac] ss:$16 sps:$4 sm:$0xff]  }
 0x11b   :  { %3908 = vmatpush1.bf16.msra.mxu0 %v6135_v43  ;;  %4385 = vmatpush1.bf16.msra.mxu1 %v6138_v44  ;;  %v6231_v43 = vld [vmem:[%s8631_s1 + $0xaa0] ss:$16 sps:$4 sm:$0xff]   ;;  %v6234_v44 = vld [vmem:[%s8631_s1 + $0xaa8] ss:$16 sps:$4 sm:$0xff]  }
 0x11c   :  { %3909 = vmatprep.subr.bf16.mxu0 %v6143_v45  ;;  %4386 = vmatprep.subr.bf16.mxu1 %v6146_v46  ;;  %v6239_v45 = vld [vmem:[%s8631_s1 + $0xac4] ss:$16 sps:$4 sm:$0xff]   ;;  %v6242_v46 = vld [vmem:[%s8631_s1 + $0xacc] ss:$16 sps:$4 sm:$0xff]  }
 0x11f   :  { %3910 = vmatpush1.bf16.msra.mxu0 %v6141_v47  ;;  %4387 = vmatpush1.bf16.msra.mxu1 %v6144_v48  ;;  %v6237_v47 = vld [vmem:[%s8631_s1 + $0xac0] ss:$16 sps:$4 sm:$0xff]   ;;  %v6240_v48 = vld [vmem:[%s8631_s1 + $0xac8] ss:$16 sps:$4 sm:$0xff]  }
 0x120   :  { %3911 = vmatprep.subr.bf16.mxu0 %v6149_v49  ;;  %4388 = vmatprep.subr.bf16.mxu1 %v6152_v50  ;;  %v6245_v49 = vld [vmem:[%s8631_s1 + $0xae4] ss:$16 sps:$4 sm:$0xff]   ;;  %v6248_v50 = vld [vmem:[%s8631_s1 + $0xaec] ss:$16 sps:$4 sm:$0xff]  }
 0x123   :  { %3912 = vmatpush1.bf16.msra.mxu0 %v6147_v51  ;;  %4389 = vmatpush1.bf16.msra.mxu1 %v6150_v52  ;;  %v6243_v51 = vld [vmem:[%s8631_s1 + $0xae0] ss:$16 sps:$4 sm:$0xff]   ;;  %v6246_v52 = vld [vmem:[%s8631_s1 + $0xae8] ss:$16 sps:$4 sm:$0xff]  }
 0x124   :  { %3913 = vmatprep.subr.bf16.mxu0 %v6155_v53  ;;  %4390 = vmatprep.subr.bf16.mxu1 %v6158_v54  ;;  %v6251_v53 = vld [vmem:[%s8631_s1 + $0xb04] ss:$16 sps:$4 sm:$0xff]   ;;  %v6254_v54 = vld [vmem:[%s8631_s1 + $0xb0c] ss:$16 sps:$4 sm:$0xff]  }
 0x127   :  { %3914 = vmatpush1.bf16.msra.mxu0 %v6153_v55  ;;  %4391 = vmatpush1.bf16.msra.mxu1 %v6156_v56  ;;  %v6249_v55 = vld [vmem:[%s8631_s1 + $0xb00] ss:$16 sps:$4 sm:$0xff]   ;;  %v6252_v56 = vld [vmem:[%s8631_s1 + $0xb08] ss:$16 sps:$4 sm:$0xff]  }
 0x128   :  { %3915 = vmatprep.subr.bf16.mxu0 %v6161_v57  ;;  %4392 = vmatprep.subr.bf16.mxu1 %v6164_v58  ;;  %v6257_v57 = vld [vmem:[%s8631_s1 + $0xb24] ss:$16 sps:$4 sm:$0xff]   ;;  %v6260_v58 = vld [vmem:[%s8631_s1 + $0xb2c] ss:$16 sps:$4 sm:$0xff]  }
 0x12b   :  { %3916 = vmatpush1.bf16.msra.mxu0 %v6159_v59  ;;  %4393 = vmatpush1.bf16.msra.mxu1 %v6162_v60  ;;  %v6255_v59 = vld [vmem:[%s8631_s1 + $0xb20] ss:$16 sps:$4 sm:$0xff]   ;;  %v6258_v60 = vld [vmem:[%s8631_s1 + $0xb28] ss:$16 sps:$4 sm:$0xff]  }
 0x12c   :  { %3917 = vmatprep.subr.bf16.mxu0 %v6167_v61  ;;  %4394 = vmatprep.subr.bf16.mxu1 %v6170_v62  ;;  %v6263_v61 = vld [vmem:[%s8631_s1 + $0xb44] ss:$16 sps:$4 sm:$0xff]   ;;  %v6266_v62 = vld [vmem:[%s8631_s1 + $0xb4c] ss:$16 sps:$4 sm:$0xff]  }
 0x12f   :  { %3918 = vmatpush1.bf16.msra.mxu0 %v6165_v63  ;;  %4395 = vmatpush1.bf16.msra.mxu1 %v6168_v0  ;;  %v6261_v63 = vld [vmem:[%s8631_s1 + $0xb40] ss:$16 sps:$4 sm:$0xff]   ;;  %v6264_v0 = vld [vmem:[%s8631_s1 + $0xb48] ss:$16 sps:$4 sm:$0xff]  }
 0x130   :  { %3919 = vmatprep.subr.bf16.mxu0 %v6173_v1  ;;  %4396 = vmatprep.subr.bf16.mxu1 %v6176_v2  ;;  %v6269_v1 = vld [vmem:[%s8631_s1 + $0xb64] ss:$16 sps:$4 sm:$0xff]   ;;  %v6272_v2 = vld [vmem:[%s8631_s1 + $0xb6c] ss:$16 sps:$4 sm:$0xff]  }
 0x133   :  { %3920 = vmatpush1.bf16.msra.mxu0 %v6171_v3  ;;  %4397 = vmatpush1.bf16.msra.mxu1 %v6174_v4  ;;  %v6267_v3 = vld [vmem:[%s8631_s1 + $0xb60] ss:$16 sps:$4 sm:$0xff]   ;;  %v6270_v4 = vld [vmem:[%s8631_s1 + $0xb68] ss:$16 sps:$4 sm:$0xff]  }
 0x134   :  { %3921 = vmatprep.subr.bf16.mxu0 %v6179_v5  ;;  %4398 = vmatprep.subr.bf16.mxu1 %v6182_v6  ;;  %v6275_v5 = vld [vmem:[%s8631_s1 + $0xb84] ss:$16 sps:$4 sm:$0xff]   ;;  %v6278_v6 = vld [vmem:[%s8631_s1 + $0xb8c] ss:$16 sps:$4 sm:$0xff]  }
 0x137   :  { %3922 = vmatpush1.bf16.msra.mxu0 %v6177_v7  ;;  %4399 = vmatpush1.bf16.msra.mxu1 %v6180_v8  ;;  %v6273_v7 = vld [vmem:[%s8631_s1 + $0xb80] ss:$16 sps:$4 sm:$0xff]   ;;  %v6276_v8 = vld [vmem:[%s8631_s1 + $0xb88] ss:$16 sps:$4 sm:$0xff]  }
 0x138   :  { %3923 = vmatprep.subr.bf16.mxu0 %v6187_v9  ;;  %4400 = vmatprep.subr.bf16.mxu1 %v6190_v10  ;;  %v6281_v9 = vld [vmem:[%s8631_s1 + $0xba4] ss:$16 sps:$4 sm:$0xff]   ;;  %v6284_v10 = vld [vmem:[%s8631_s1 + $0xbac] ss:$16 sps:$4 sm:$0xff]  }
 0x13b   :  { %3924 = vmatpush1.bf16.msra.mxu0 %v6185_v11  ;;  %4401 = vmatpush1.bf16.msra.mxu1 %v6188_v12  ;;  %v6279_v11 = vld [vmem:[%s8631_s1 + $0xba0] ss:$16 sps:$4 sm:$0xff]   ;;  %v6282_v12 = vld [vmem:[%s8631_s1 + $0xba8] ss:$16 sps:$4 sm:$0xff]  }
 0x13c   :  { %3925 = vmatprep.subr.bf16.mxu0 %v6194_v13  ;;  %4402 = vmatprep.subr.bf16.mxu1 %v6197_v14  ;;  %v6289_v13 = vld [vmem:[%s8631_s1 + $0xbc4] ss:$16 sps:$4 sm:$0xff]   ;;  %v6292_v14 = vld [vmem:[%s8631_s1 + $0xbcc] ss:$16 sps:$4 sm:$0xff]  }
 0x13f   :  { %3926 = vmatpush1.bf16.msra.mxu0 %v6192_v15  ;;  %4403 = vmatpush1.bf16.msra.mxu1 %v6195_v16  ;;  %v6287_v15 = vld [vmem:[%s8631_s1 + $0xbc0] ss:$16 sps:$4 sm:$0xff]   ;;  %v6290_v16 = vld [vmem:[%s8631_s1 + $0xbc8] ss:$16 sps:$4 sm:$0xff]  }
 0x140   :  { %3948 = vmatprep.subr.bf16.mxu0 %v6203_v18  ;;  %4425 = vmatprep.subr.bf16.mxu1 %v6206_v19  ;;  %v6299_v18 = vld [vmem:[%s8631_s1 + $0xbec] ss:$16 sps:$4 sm:$0xff]   ;;  %v6294_v19 = vld [vmem:[%s8631_s1 + $0xbe0] ss:$16 sps:$4 sm:$0xff]  }
 0x142   :  { %3928 = vmatmul.mubr.bf16.vlgmr.msra.gmra.mrb[0].mxu0 %v6198_v17  ;;  %4405 = vmatmul.mubr.bf16.vlgmr.msra.gmra.mrb[0].mxu1 %v6198_v17  ;;  %v6296_v17 = vld [vmem:[%s8631_s1 + $0xbe4] ss:$16 sps:$4 sm:$0xff]  }
 0x143   :  { %3949 = vmatpush1.bf16.msra.mxu0 %v6201_v20  ;;  %4426 = vmatpush1.bf16.msra.mxu1 %v6204_v21  ;;  %v6297_v20 = vld [vmem:[%s8631_s1 + $0xbe8] ss:$16 sps:$4 sm:$0xff]  }
 0x144   :  { %3950 = vmatprep.subr.bf16.mxu0 %v6209_v22  ;;  %4427 = vmatprep.subr.bf16.mxu1 %v6212_v23  ;;  %v6300_v21 = vld [vmem:[%s8632_s0 + $0x28] ss:$72 sps:$4 sm:$0xff]   ;;  %v6305_v22 = vld [vmem:[%s8631_s1 + $0xc04] ss:$16 sps:$4 sm:$0xff]   ;;  %v6308_v23 = vld [vmem:[%s8631_s1 + $0xc0c] ss:$16 sps:$4 sm:$0xff]  }
 0x145   :  { %3937 = vmatprep.mubr.bf16.mxu0 %v6285_v24  ;;  %4414 = vmatprep.mubr.bf16.mxu1 %v6285_v24  ;;  %v6303_v24 = vld [vmem:[%s8631_s1 + $0xc00] ss:$16 sps:$4 sm:$0xff]  }
 0x147   :  { %3951 = vmatpush1.bf16.msra.mxu0 %v6207_v25  ;;  %4428 = vmatpush1.bf16.msra.mxu1 %v6210_v26  ;;  %v6306_v25 = vld [vmem:[%s8631_s1 + $0xc08] ss:$16 sps:$4 sm:$0xff]   ;;  %v6311_v26 = vld [vmem:[%s8631_s1 + $0xc24] ss:$16 sps:$4 sm:$0xff]  }
 0x148   :  { %3952 = vmatprep.subr.bf16.mxu0 %v6215_v27  ;;  %4429 = vmatprep.subr.bf16.mxu1 %v6218_v28  ;;  %v6314_v27 = vld [vmem:[%s8631_s1 + $0xc2c] ss:$16 sps:$4 sm:$0xff]  }
 0x149   :  { %v6387_v28 = vld [vmem:[%s8632_s0 + $0xbc] ss:$72 sps:$4 sm:$0xff]  }
 0x14a   :  { %3938 = vmatmul.mubr.bf16.gmra.mrb[4].mxu0 %v6293_v29  ;;  %4415 = vmatmul.mubr.bf16.gmra.mrb[4].mxu1 %v6293_v29  ;;  %v6309_v29 = vld [vmem:[%s8631_s1 + $0xc20] ss:$16 sps:$4 sm:$0xff]  }
 0x14b   :  { %3953 = vmatpush1.bf16.msra.mxu0 %v6213_v30  ;;  %4430 = vmatpush1.bf16.msra.mxu1 %v6216_v31  ;;  %v6312_v30 = vld [vmem:[%s8631_s1 + $0xc28] ss:$16 sps:$4 sm:$0xff]   ;;  %v6317_v31 = vld [vmem:[%s8631_s1 + $0xc44] ss:$16 sps:$4 sm:$0xff]  }
 0x14c   :  { %3954 = vmatprep.subr.bf16.mxu0 %v6221_v32  ;;  %4431 = vmatprep.subr.bf16.mxu1 %v6224_v33  ;;  %v6320_v32 = vld [vmem:[%s8631_s1 + $0xc4c] ss:$16 sps:$4 sm:$0xff]   ;;  %v6395_v33 = vld [vmem:[%s8632_s0 + $0xb8] ss:$72 sps:$4 sm:$0xff]  }
 0x14d   :  { %3980 = vmatprep.mubr.bf16.mxu0 %v6302_v34  ;;  %4457 = vmatprep.mubr.bf16.mxu1 %v6302_v34  ;;  %v6315_v34 = vld [vmem:[%s8631_s1 + $0xc40] ss:$16 sps:$4 sm:$0xff]  }
 0x14f   :  { %3955 = vmatpush1.bf16.msra.mxu0 %v6219_v35  ;;  %4432 = vmatpush1.bf16.msra.mxu1 %v6222_v36  ;;  %v6318_v35 = vld [vmem:[%s8631_s1 + $0xc48] ss:$16 sps:$4 sm:$0xff]   ;;  %v6323_v36 = vld [vmem:[%s8631_s1 + $0xc64] ss:$16 sps:$4 sm:$0xff]  }
 0x150   :  { %3956 = vmatprep.subr.bf16.mxu0 %v6227_v37  ;;  %4433 = vmatprep.subr.bf16.mxu1 %v6230_v38  ;;  %v6326_v37 = vld [vmem:[%s8631_s1 + $0xc6c] ss:$16 sps:$4 sm:$0xff]  }
 0x151   :  { %v6404_v38 = vld [vmem:[%s8632_s0 + $0x34] ss:$72 sps:$4 sm:$0xff]  }
 0x153   :  { %3957 = vmatpush1.bf16.msra.mxu0 %v6225_v39  ;;  %4434 = vmatpush1.bf16.msra.mxu1 %v6228_v40  ;;  %v6321_v39 = vld [vmem:[%s8631_s1 + $0xc60] ss:$16 sps:$4 sm:$0xff]   ;;  %v6324_v40 = vld [vmem:[%s8631_s1 + $0xc68] ss:$16 sps:$4 sm:$0xff]  }
 0x154   :  { %3958 = vmatprep.subr.bf16.mxu0 %v6233_v41  ;;  %4435 = vmatprep.subr.bf16.mxu1 %v6236_v42  ;;  %v6329_v41 = vld [vmem:[%s8631_s1 + $0xc84] ss:$16 sps:$4 sm:$0xff]   ;;  %v6332_v42 = vld [vmem:[%s8631_s1 + $0xc8c] ss:$16 sps:$4 sm:$0xff]  }
 0x157   :  { %3959 = vmatpush1.bf16.msra.mxu0 %v6231_v43  ;;  %4436 = vmatpush1.bf16.msra.mxu1 %v6234_v44  ;;  %v6327_v43 = vld [vmem:[%s8631_s1 + $0xc80] ss:$16 sps:$4 sm:$0xff]   ;;  %v6330_v44 = vld [vmem:[%s8631_s1 + $0xc88] ss:$16 sps:$4 sm:$0xff]  }
 0x158   :  { %3960 = vmatprep.subr.bf16.mxu0 %v6239_v45  ;;  %4437 = vmatprep.subr.bf16.mxu1 %v6242_v46  ;;  %v6335_v45 = vld [vmem:[%s8631_s1 + $0xca4] ss:$16 sps:$4 sm:$0xff]   ;;  %v6338_v46 = vld [vmem:[%s8631_s1 + $0xcac] ss:$16 sps:$4 sm:$0xff]  }
 0x15b   :  { %3961 = vmatpush1.bf16.msra.mxu0 %v6237_v47  ;;  %4438 = vmatpush1.bf16.msra.mxu1 %v6240_v48  ;;  %v6333_v47 = vld [vmem:[%s8631_s1 + $0xca0] ss:$16 sps:$4 sm:$0xff]   ;;  %v6336_v48 = vld [vmem:[%s8631_s1 + $0xca8] ss:$16 sps:$4 sm:$0xff]  }
 0x15c   :  { %3962 = vmatprep.subr.bf16.mxu0 %v6245_v49  ;;  %4439 = vmatprep.subr.bf16.mxu1 %v6248_v50  ;;  %v6341_v49 = vld [vmem:[%s8631_s1 + $0xcc4] ss:$16 sps:$4 sm:$0xff]   ;;  %v6344_v50 = vld [vmem:[%s8631_s1 + $0xccc] ss:$16 sps:$4 sm:$0xff]  }
 0x15f   :  { %3963 = vmatpush1.bf16.msra.mxu0 %v6243_v51  ;;  %4440 = vmatpush1.bf16.msra.mxu1 %v6246_v52  ;;  %v6339_v51 = vld [vmem:[%s8631_s1 + $0xcc0] ss:$16 sps:$4 sm:$0xff]   ;;  %v6342_v52 = vld [vmem:[%s8631_s1 + $0xcc8] ss:$16 sps:$4 sm:$0xff]  }
 0x160   :  { %3964 = vmatprep.subr.bf16.mxu0 %v6251_v53  ;;  %4441 = vmatprep.subr.bf16.mxu1 %v6254_v54  ;;  %v6347_v53 = vld [vmem:[%s8631_s1 + $0xce4] ss:$16 sps:$4 sm:$0xff]   ;;  %v6350_v54 = vld [vmem:[%s8631_s1 + $0xcec] ss:$16 sps:$4 sm:$0xff]  }
 0x163   :  { %3965 = vmatpush1.bf16.msra.mxu0 %v6249_v55  ;;  %4442 = vmatpush1.bf16.msra.mxu1 %v6252_v56  ;;  %v6345_v55 = vld [vmem:[%s8631_s1 + $0xce0] ss:$16 sps:$4 sm:$0xff]   ;;  %v6348_v56 = vld [vmem:[%s8631_s1 + $0xce8] ss:$16 sps:$4 sm:$0xff]  }
 0x164   :  { %3966 = vmatprep.subr.bf16.mxu0 %v6257_v57  ;;  %4443 = vmatprep.subr.bf16.mxu1 %v6260_v58  ;;  %v6353_v57 = vld [vmem:[%s8631_s1 + $0xd04] ss:$16 sps:$4 sm:$0xff]   ;;  %v6356_v58 = vld [vmem:[%s8631_s1 + $0xd0c] ss:$16 sps:$4 sm:$0xff]  }
 0x167   :  { %3967 = vmatpush1.bf16.msra.mxu0 %v6255_v59  ;;  %4444 = vmatpush1.bf16.msra.mxu1 %v6258_v60  ;;  %v6351_v59 = vld [vmem:[%s8631_s1 + $0xd00] ss:$16 sps:$4 sm:$0xff]   ;;  %v6354_v60 = vld [vmem:[%s8631_s1 + $0xd08] ss:$16 sps:$4 sm:$0xff]  }
 0x168   :  { %3968 = vmatprep.subr.bf16.mxu0 %v6263_v61  ;;  %4445 = vmatprep.subr.bf16.mxu1 %v6266_v62  ;;  %v6359_v61 = vld [vmem:[%s8631_s1 + $0xd24] ss:$16 sps:$4 sm:$0xff]   ;;  %v6362_v62 = vld [vmem:[%s8631_s1 + $0xd2c] ss:$16 sps:$4 sm:$0xff]  }
 0x16b   :  { %3969 = vmatpush1.bf16.msra.mxu0 %v6261_v63  ;;  %4446 = vmatpush1.bf16.msra.mxu1 %v6264_v0  ;;  %v6357_v63 = vld [vmem:[%s8631_s1 + $0xd20] ss:$16 sps:$4 sm:$0xff]   ;;  %v6360_v0 = vld [vmem:[%s8631_s1 + $0xd28] ss:$16 sps:$4 sm:$0xff]  }
 0x16c   :  { %3970 = vmatprep.subr.bf16.mxu0 %v6269_v1  ;;  %4447 = vmatprep.subr.bf16.mxu1 %v6272_v2  ;;  %v6365_v1 = vld [vmem:[%s8631_s1 + $0xd44] ss:$16 sps:$4 sm:$0xff]   ;;  %v6368_v2 = vld [vmem:[%s8631_s1 + $0xd4c] ss:$16 sps:$4 sm:$0xff]  }
 0x16f   :  { %3971 = vmatpush1.bf16.msra.mxu0 %v6267_v3  ;;  %4448 = vmatpush1.bf16.msra.mxu1 %v6270_v4  ;;  %v6363_v3 = vld [vmem:[%s8631_s1 + $0xd40] ss:$16 sps:$4 sm:$0xff]   ;;  %v6366_v4 = vld [vmem:[%s8631_s1 + $0xd48] ss:$16 sps:$4 sm:$0xff]  }
 0x170   :  { %3972 = vmatprep.subr.bf16.mxu0 %v6275_v5  ;;  %4449 = vmatprep.subr.bf16.mxu1 %v6278_v6  ;;  %v6371_v5 = vld [vmem:[%s8631_s1 + $0xd64] ss:$16 sps:$4 sm:$0xff]   ;;  %v6374_v6 = vld [vmem:[%s8631_s1 + $0xd6c] ss:$16 sps:$4 sm:$0xff]  }
 0x173   :  { %3973 = vmatpush1.bf16.msra.mxu0 %v6273_v7  ;;  %4450 = vmatpush1.bf16.msra.mxu1 %v6276_v8  ;;  %v6369_v7 = vld [vmem:[%s8631_s1 + $0xd60] ss:$16 sps:$4 sm:$0xff]   ;;  %v6372_v8 = vld [vmem:[%s8631_s1 + $0xd68] ss:$16 sps:$4 sm:$0xff]  }
 0x174   :  { %3974 = vmatprep.subr.bf16.mxu0 %v6281_v9  ;;  %4451 = vmatprep.subr.bf16.mxu1 %v6284_v10  ;;  %v6377_v9 = vld [vmem:[%s8631_s1 + $0xd84] ss:$16 sps:$4 sm:$0xff]   ;;  %v6380_v10 = vld [vmem:[%s8631_s1 + $0xd8c] ss:$16 sps:$4 sm:$0xff]  }
 0x177   :  { %3975 = vmatpush1.bf16.msra.mxu0 %v6279_v11  ;;  %4452 = vmatpush1.bf16.msra.mxu1 %v6282_v12  ;;  %v6375_v11 = vld [vmem:[%s8631_s1 + $0xd80] ss:$16 sps:$4 sm:$0xff]   ;;  %v6378_v12 = vld [vmem:[%s8631_s1 + $0xd88] ss:$16 sps:$4 sm:$0xff]  }
 0x178   :  { %3976 = vmatprep.subr.bf16.mxu0 %v6289_v13  ;;  %4453 = vmatprep.subr.bf16.mxu1 %v6292_v14  ;;  %v6383_v13 = vld [vmem:[%s8631_s1 + $0xda4] ss:$16 sps:$4 sm:$0xff]   ;;  %v6386_v14 = vld [vmem:[%s8631_s1 + $0xdac] ss:$16 sps:$4 sm:$0xff]  }
 0x17b   :  { %3977 = vmatpush1.bf16.msra.mxu0 %v6287_v15  ;;  %4454 = vmatpush1.bf16.msra.mxu1 %v6290_v16  ;;  %v6381_v15 = vld [vmem:[%s8631_s1 + $0xda0] ss:$16 sps:$4 sm:$0xff]   ;;  %v6384_v16 = vld [vmem:[%s8631_s1 + $0xda8] ss:$16 sps:$4 sm:$0xff]  }
 0x17c   :  { %3978 = vmatprep.subr.bf16.mxu0 %v6296_v17  ;;  %4455 = vmatprep.subr.bf16.mxu1 %v6299_v18  ;;  %v6391_v17 = vld [vmem:[%s8631_s1 + $0xdc4] ss:$16 sps:$4 sm:$0xff]   ;;  %v6394_v18 = vld [vmem:[%s8631_s1 + $0xdcc] ss:$16 sps:$4 sm:$0xff]  }
 0x17f   :  { %3979 = vmatpush1.bf16.msra.mxu0 %v6294_v19  ;;  %4456 = vmatpush1.bf16.msra.mxu1 %v6297_v20  ;;  %v6389_v19 = vld [vmem:[%s8631_s1 + $0xdc0] ss:$16 sps:$4 sm:$0xff]   ;;  %v6392_v20 = vld [vmem:[%s8631_s1 + $0xdc8] ss:$16 sps:$4 sm:$0xff]  }
 0x180   :  { %4001 = vmatprep.subr.bf16.mxu0 %v6305_v22  ;;  %4478 = vmatprep.subr.bf16.mxu1 %v6308_v23  ;;  %v6401_v22 = vld [vmem:[%s8631_s1 + $0xdec] ss:$16 sps:$4 sm:$0xff]   ;;  %v6396_v23 = vld [vmem:[%s8631_s1 + $0xde0] ss:$16 sps:$4 sm:$0xff]  }
 0x182   :  { %3981 = vmatmul.mubr.bf16.vlgmr.msra.gmra.mrb[0].mxu0 %v6300_v21  ;;  %4458 = vmatmul.mubr.bf16.vlgmr.msra.gmra.mrb[0].mxu1 %v6300_v21  ;;  %v6398_v21 = vld [vmem:[%s8631_s1 + $0xde4] ss:$16 sps:$4 sm:$0xff]  }
 0x183   :  { %4002 = vmatpush1.bf16.msra.mxu0 %v6303_v24  ;;  %4479 = vmatpush1.bf16.msra.mxu1 %v6306_v25  ;;  %v6399_v24 = vld [vmem:[%s8631_s1 + $0xde8] ss:$16 sps:$4 sm:$0xff]   ;;  %v6407_v25 = vld [vmem:[%s8631_s1 + $0xe04] ss:$16 sps:$4 sm:$0xff]  }
 0x184   :  { %4003 = vmatprep.subr.bf16.mxu0 %v6311_v26  ;;  %4480 = vmatprep.subr.bf16.mxu1 %v6314_v27  ;;  %v6410_v26 = vld [vmem:[%s8631_s1 + $0xe0c] ss:$16 sps:$4 sm:$0xff]   ;;  %v6402_v27 = vld [vmem:[%s8632_s0 + $0x30] ss:$72 sps:$4 sm:$0xff]  }
 0x185   :  { %3990 = vmatprep.mubr.bf16.mxu0 %v6387_v28  ;;  %4467 = vmatprep.mubr.bf16.mxu1 %v6387_v28  ;;  %v6405_v28 = vld [vmem:[%s8631_s1 + $0xe00] ss:$16 sps:$4 sm:$0xff]  }
 0x187   :  { %4004 = vmatpush1.bf16.msra.mxu0 %v6309_v29  ;;  %4481 = vmatpush1.bf16.msra.mxu1 %v6312_v30  ;;  %v6408_v29 = vld [vmem:[%s8631_s1 + $0xe08] ss:$16 sps:$4 sm:$0xff]   ;;  %v6413_v30 = vld [vmem:[%s8631_s1 + $0xe24] ss:$16 sps:$4 sm:$0xff]  }
 0x188   :  { %4005 = vmatprep.subr.bf16.mxu0 %v6317_v31  ;;  %4482 = vmatprep.subr.bf16.mxu1 %v6320_v32  ;;  %v6416_v31 = vld [vmem:[%s8631_s1 + $0xe2c] ss:$16 sps:$4 sm:$0xff]  }
 0x189   :  { %v6489_v32 = vld [vmem:[%s8632_s0 + $0xc4] ss:$72 sps:$4 sm:$0xff]  }
 0x18a   :  { %3991 = vmatmul.mubr.bf16.gmra.mrb[4].mxu0 %v6395_v33  ;;  %4468 = vmatmul.mubr.bf16.gmra.mrb[4].mxu1 %v6395_v33  ;;  %v6411_v33 = vld [vmem:[%s8631_s1 + $0xe20] ss:$16 sps:$4 sm:$0xff]  }
 0x18b   :  { %4006 = vmatpush1.bf16.msra.mxu0 %v6315_v34  ;;  %4483 = vmatpush1.bf16.msra.mxu1 %v6318_v35  ;;  %v6414_v34 = vld [vmem:[%s8631_s1 + $0xe28] ss:$16 sps:$4 sm:$0xff]   ;;  %v6419_v35 = vld [vmem:[%s8631_s1 + $0xe44] ss:$16 sps:$4 sm:$0xff]  }
 0x18c   :  { %4007 = vmatprep.subr.bf16.mxu0 %v6323_v36  ;;  %4484 = vmatprep.subr.bf16.mxu1 %v6326_v37  ;;  %v6422_v36 = vld [vmem:[%s8631_s1 + $0xe4c] ss:$16 sps:$4 sm:$0xff]   ;;  %v6497_v37 = vld [vmem:[%s8632_s0 + $0xc0] ss:$72 sps:$4 sm:$0xff]  }
 0x18d   :  { %4033 = vmatprep.mubr.bf16.mxu0 %v6404_v38  ;;  %4510 = vmatprep.mubr.bf16.mxu1 %v6404_v38  ;;  %v6417_v38 = vld [vmem:[%s8631_s1 + $0xe40] ss:$16 sps:$4 sm:$0xff]  }
 0x18f   :  { %4008 = vmatpush1.bf16.msra.mxu0 %v6321_v39  ;;  %4485 = vmatpush1.bf16.msra.mxu1 %v6324_v40  ;;  %v6420_v39 = vld [vmem:[%s8631_s1 + $0xe48] ss:$16 sps:$4 sm:$0xff]   ;;  %v6425_v40 = vld [vmem:[%s8631_s1 + $0xe64] ss:$16 sps:$4 sm:$0xff]  }
 0x190   :  { %4009 = vmatprep.subr.bf16.mxu0 %v6329_v41  ;;  %4486 = vmatprep.subr.bf16.mxu1 %v6332_v42  ;;  %v6428_v41 = vld [vmem:[%s8631_s1 + $0xe6c] ss:$16 sps:$4 sm:$0xff]  }
 0x191   :  { %v6506_v42 = vld [vmem:[%s8632_s0 + $0x3c] ss:$72 sps:$4 sm:$0xff]  }
 0x193   :  { %4010 = vmatpush1.bf16.msra.mxu0 %v6327_v43  ;;  %4487 = vmatpush1.bf16.msra.mxu1 %v6330_v44  ;;  %v6423_v43 = vld [vmem:[%s8631_s1 + $0xe60] ss:$16 sps:$4 sm:$0xff]   ;;  %v6426_v44 = vld [vmem:[%s8631_s1 + $0xe68] ss:$16 sps:$4 sm:$0xff]  }
 0x194   :  { %4011 = vmatprep.subr.bf16.mxu0 %v6335_v45  ;;  %4488 = vmatprep.subr.bf16.mxu1 %v6338_v46  ;;  %v6431_v45 = vld [vmem:[%s8631_s1 + $0xe84] ss:$16 sps:$4 sm:$0xff]   ;;  %v6434_v46 = vld [vmem:[%s8631_s1 + $0xe8c] ss:$16 sps:$4 sm:$0xff]  }
 0x197   :  { %4012 = vmatpush1.bf16.msra.mxu0 %v6333_v47  ;;  %4489 = vmatpush1.bf16.msra.mxu1 %v6336_v48  ;;  %v6429_v47 = vld [vmem:[%s8631_s1 + $0xe80] ss:$16 sps:$4 sm:$0xff]   ;;  %v6432_v48 = vld [vmem:[%s8631_s1 + $0xe88] ss:$16 sps:$4 sm:$0xff]  }
 0x198   :  { %4013 = vmatprep.subr.bf16.mxu0 %v6341_v49  ;;  %4490 = vmatprep.subr.bf16.mxu1 %v6344_v50  ;;  %v6437_v49 = vld [vmem:[%s8631_s1 + $0xea4] ss:$16 sps:$4 sm:$0xff]   ;;  %v6440_v50 = vld [vmem:[%s8631_s1 + $0xeac] ss:$16 sps:$4 sm:$0xff]  }
 0x19b   :  { %4014 = vmatpush1.bf16.msra.mxu0 %v6339_v51  ;;  %4491 = vmatpush1.bf16.msra.mxu1 %v6342_v52  ;;  %v6435_v51 = vld [vmem:[%s8631_s1 + $0xea0] ss:$16 sps:$4 sm:$0xff]   ;;  %v6438_v52 = vld [vmem:[%s8631_s1 + $0xea8] ss:$16 sps:$4 sm:$0xff]  }
 0x19c   :  { %4015 = vmatprep.subr.bf16.mxu0 %v6347_v53  ;;  %4492 = vmatprep.subr.bf16.mxu1 %v6350_v54  ;;  %v6443_v53 = vld [vmem:[%s8631_s1 + $0xec4] ss:$16 sps:$4 sm:$0xff]   ;;  %v6446_v54 = vld [vmem:[%s8631_s1 + $0xecc] ss:$16 sps:$4 sm:$0xff]  }
 0x19f   :  { %4016 = vmatpush1.bf16.msra.mxu0 %v6345_v55  ;;  %4493 = vmatpush1.bf16.msra.mxu1 %v6348_v56  ;;  %v6441_v55 = vld [vmem:[%s8631_s1 + $0xec0] ss:$16 sps:$4 sm:$0xff]   ;;  %v6444_v56 = vld [vmem:[%s8631_s1 + $0xec8] ss:$16 sps:$4 sm:$0xff]  }
 0x1a0   :  { %4017 = vmatprep.subr.bf16.mxu0 %v6353_v57  ;;  %4494 = vmatprep.subr.bf16.mxu1 %v6356_v58  ;;  %v6449_v57 = vld [vmem:[%s8631_s1 + $0xee4] ss:$16 sps:$4 sm:$0xff]   ;;  %v6452_v58 = vld [vmem:[%s8631_s1 + $0xeec] ss:$16 sps:$4 sm:$0xff]  }
 0x1a3   :  { %4018 = vmatpush1.bf16.msra.mxu0 %v6351_v59  ;;  %4495 = vmatpush1.bf16.msra.mxu1 %v6354_v60  ;;  %v6447_v59 = vld [vmem:[%s8631_s1 + $0xee0] ss:$16 sps:$4 sm:$0xff]   ;;  %v6450_v60 = vld [vmem:[%s8631_s1 + $0xee8] ss:$16 sps:$4 sm:$0xff]  }
 0x1a4   :  { %4019 = vmatprep.subr.bf16.mxu0 %v6359_v61  ;;  %4496 = vmatprep.subr.bf16.mxu1 %v6362_v62  ;;  %v6455_v61 = vld [vmem:[%s8631_s1 + $0xf04] ss:$16 sps:$4 sm:$0xff]   ;;  %v6458_v62 = vld [vmem:[%s8631_s1 + $0xf0c] ss:$16 sps:$4 sm:$0xff]  }
 0x1a7   :  { %4020 = vmatpush1.bf16.msra.mxu0 %v6357_v63  ;;  %4497 = vmatpush1.bf16.msra.mxu1 %v6360_v0  ;;  %v6453_v63 = vld [vmem:[%s8631_s1 + $0xf00] ss:$16 sps:$4 sm:$0xff]   ;;  %v6456_v0 = vld [vmem:[%s8631_s1 + $0xf08] ss:$16 sps:$4 sm:$0xff]  }
 0x1a8   :  { %4021 = vmatprep.subr.bf16.mxu0 %v6365_v1  ;;  %4498 = vmatprep.subr.bf16.mxu1 %v6368_v2  ;;  %v6461_v1 = vld [vmem:[%s8631_s1 + $0xf24] ss:$16 sps:$4 sm:$0xff]   ;;  %v6464_v2 = vld [vmem:[%s8631_s1 + $0xf2c] ss:$16 sps:$4 sm:$0xff]  }
 0x1ab   :  { %4022 = vmatpush1.bf16.msra.mxu0 %v6363_v3  ;;  %4499 = vmatpush1.bf16.msra.mxu1 %v6366_v4  ;;  %v6459_v3 = vld [vmem:[%s8631_s1 + $0xf20] ss:$16 sps:$4 sm:$0xff]   ;;  %v6462_v4 = vld [vmem:[%s8631_s1 + $0xf28] ss:$16 sps:$4 sm:$0xff]  }
 0x1ac   :  { %4023 = vmatprep.subr.bf16.mxu0 %v6371_v5  ;;  %4500 = vmatprep.subr.bf16.mxu1 %v6374_v6  ;;  %v6467_v5 = vld [vmem:[%s8631_s1 + $0xf44] ss:$16 sps:$4 sm:$0xff]   ;;  %v6470_v6 = vld [vmem:[%s8631_s1 + $0xf4c] ss:$16 sps:$4 sm:$0xff]  }
 0x1af   :  { %4024 = vmatpush1.bf16.msra.mxu0 %v6369_v7  ;;  %4501 = vmatpush1.bf16.msra.mxu1 %v6372_v8  ;;  %v6465_v7 = vld [vmem:[%s8631_s1 + $0xf40] ss:$16 sps:$4 sm:$0xff]   ;;  %v6468_v8 = vld [vmem:[%s8631_s1 + $0xf48] ss:$16 sps:$4 sm:$0xff]  }
 0x1b0   :  { %4025 = vmatprep.subr.bf16.mxu0 %v6377_v9  ;;  %4502 = vmatprep.subr.bf16.mxu1 %v6380_v10  ;;  %v6473_v9 = vld [vmem:[%s8631_s1 + $0xf64] ss:$16 sps:$4 sm:$0xff]   ;;  %v6476_v10 = vld [vmem:[%s8631_s1 + $0xf6c] ss:$16 sps:$4 sm:$0xff]  }
 0x1b3   :  { %4026 = vmatpush1.bf16.msra.mxu0 %v6375_v11  ;;  %4503 = vmatpush1.bf16.msra.mxu1 %v6378_v12  ;;  %v6471_v11 = vld [vmem:[%s8631_s1 + $0xf60] ss:$16 sps:$4 sm:$0xff]   ;;  %v6474_v12 = vld [vmem:[%s8631_s1 + $0xf68] ss:$16 sps:$4 sm:$0xff]  }
 0x1b4   :  { %4027 = vmatprep.subr.bf16.mxu0 %v6383_v13  ;;  %4504 = vmatprep.subr.bf16.mxu1 %v6386_v14  ;;  %v6479_v13 = vld [vmem:[%s8631_s1 + $0xf84] ss:$16 sps:$4 sm:$0xff]   ;;  %v6482_v14 = vld [vmem:[%s8631_s1 + $0xf8c] ss:$16 sps:$4 sm:$0xff]  }
 0x1b7   :  { %4028 = vmatpush1.bf16.msra.mxu0 %v6381_v15  ;;  %4505 = vmatpush1.bf16.msra.mxu1 %v6384_v16  ;;  %v6477_v15 = vld [vmem:[%s8631_s1 + $0xf80] ss:$16 sps:$4 sm:$0xff]   ;;  %v6480_v16 = vld [vmem:[%s8631_s1 + $0xf88] ss:$16 sps:$4 sm:$0xff]  }
 0x1b8   :  { %4029 = vmatprep.subr.bf16.mxu0 %v6391_v17  ;;  %4506 = vmatprep.subr.bf16.mxu1 %v6394_v18  ;;  %v6485_v17 = vld [vmem:[%s8631_s1 + $0xfa4] ss:$16 sps:$4 sm:$0xff]   ;;  %v6488_v18 = vld [vmem:[%s8631_s1 + $0xfac] ss:$16 sps:$4 sm:$0xff]  }
 0x1bb   :  { %4030 = vmatpush1.bf16.msra.mxu0 %v6389_v19  ;;  %4507 = vmatpush1.bf16.msra.mxu1 %v6392_v20  ;;  %v6483_v19 = vld [vmem:[%s8631_s1 + $0xfa0] ss:$16 sps:$4 sm:$0xff]   ;;  %v6486_v20 = vld [vmem:[%s8631_s1 + $0xfa8] ss:$16 sps:$4 sm:$0xff]  }
 0x1bc   :  { %4031 = vmatprep.subr.bf16.mxu0 %v6398_v21  ;;  %4508 = vmatprep.subr.bf16.mxu1 %v6401_v22  ;;  %v6493_v21 = vld [vmem:[%s8631_s1 + $0xfc4] ss:$16 sps:$4 sm:$0xff]   ;;  %v6496_v22 = vld [vmem:[%s8631_s1 + $0xfcc] ss:$16 sps:$4 sm:$0xff]  }
 0x1bf   :  { %4032 = vmatpush1.bf16.msra.mxu0 %v6396_v23  ;;  %4509 = vmatpush1.bf16.msra.mxu1 %v6399_v24  ;;  %v6491_v23 = vld [vmem:[%s8631_s1 + $0xfc0] ss:$16 sps:$4 sm:$0xff]   ;;  %v6494_v24 = vld [vmem:[%s8631_s1 + $0xfc8] ss:$16 sps:$4 sm:$0xff]  }
 0x1c0   :  { %4054 = vmatprep.subr.bf16.mxu0 %v6407_v25  ;;  %4531 = vmatprep.subr.bf16.mxu1 %v6410_v26  ;;  %v6500_v25 = vld [vmem:[%s8631_s1 + $0xfe4] ss:$16 sps:$4 sm:$0xff]   ;;  %v6503_v26 = vld [vmem:[%s8631_s1 + $0xfec] ss:$16 sps:$4 sm:$0xff]  }
 0x1c2   :  { %4034 = vmatmul.mubr.bf16.vlgmr.msra.gmra.mrb[0].mxu0 %v6402_v27  ;;  %4511 = vmatmul.mubr.bf16.vlgmr.msra.gmra.mrb[0].mxu1 %v6402_v27  ;;  %v6498_v27 = vld [vmem:[%s8631_s1 + $0xfe0] ss:$16 sps:$4 sm:$0xff]  }
 0x1c3   :  { %4055 = vmatpush1.bf16.msra.mxu0 %v6405_v28  ;;  %4532 = vmatpush1.bf16.msra.mxu1 %v6408_v29  ;;  %v6501_v28 = vld [vmem:[%s8631_s1 + $0xfe8] ss:$16 sps:$4 sm:$0xff]   ;;  %v6509_v29 = vld [vmem:[%s8631_s1 + $0x1004] ss:$16 sps:$4 sm:$0xff]  }
 0x1c4   :  { %4056 = vmatprep.subr.bf16.mxu0 %v6413_v30  ;;  %4533 = vmatprep.subr.bf16.mxu1 %v6416_v31  ;;  %v6512_v30 = vld [vmem:[%s8631_s1 + $0x100c] ss:$16 sps:$4 sm:$0xff]   ;;  %v6504_v31 = vld [vmem:[%s8632_s0 + $0x38] ss:$72 sps:$4 sm:$0xff]  }
 0x1c5   :  { %4043 = vmatprep.mubr.bf16.mxu0 %v6489_v32  ;;  %4520 = vmatprep.mubr.bf16.mxu1 %v6489_v32  ;;  %v6507_v32 = vld [vmem:[%s8631_s1 + $0x1000] ss:$16 sps:$4 sm:$0xff]  }
 0x1c7   :  { %4057 = vmatpush1.bf16.msra.mxu0 %v6411_v33  ;;  %4534 = vmatpush1.bf16.msra.mxu1 %v6414_v34  ;;  %v6510_v33 = vld [vmem:[%s8631_s1 + $0x1008] ss:$16 sps:$4 sm:$0xff]   ;;  %v6515_v34 = vld [vmem:[%s8631_s1 + $0x1024] ss:$16 sps:$4 sm:$0xff]  }
 0x1c8   :  { %4058 = vmatprep.subr.bf16.mxu0 %v6419_v35  ;;  %4535 = vmatprep.subr.bf16.mxu1 %v6422_v36  ;;  %v6518_v35 = vld [vmem:[%s8631_s1 + $0x102c] ss:$16 sps:$4 sm:$0xff]  }
 0x1c9   :  { %v6591_v36 = vld [vmem:[%s8632_s0 + $0xcc] ss:$72 sps:$4 sm:$0xff]  }
 0x1ca   :  { %4044 = vmatmul.mubr.bf16.gmra.mrb[4].mxu0 %v6497_v37  ;;  %4521 = vmatmul.mubr.bf16.gmra.mrb[4].mxu1 %v6497_v37  ;;  %v6513_v37 = vld [vmem:[%s8631_s1 + $0x1020] ss:$16 sps:$4 sm:$0xff]  }
 0x1cb   :  { %4059 = vmatpush1.bf16.msra.mxu0 %v6417_v38  ;;  %4536 = vmatpush1.bf16.msra.mxu1 %v6420_v39  ;;  %v6516_v38 = vld [vmem:[%s8631_s1 + $0x1028] ss:$16 sps:$4 sm:$0xff]   ;;  %v6521_v39 = vld [vmem:[%s8631_s1 + $0x1044] ss:$16 sps:$4 sm:$0xff]  }
 0x1cc   :  { %4060 = vmatprep.subr.bf16.mxu0 %v6425_v40  ;;  %4537 = vmatprep.subr.bf16.mxu1 %v6428_v41  ;;  %v6524_v40 = vld [vmem:[%s8631_s1 + $0x104c] ss:$16 sps:$4 sm:$0xff]   ;;  %v6593_v41 = vld [vmem:[%s8632_s0 + $0xc8] ss:$72 sps:$4 sm:$0xff]  }
 0x1cd   :  { %4086 = vmatprep.mubr.bf16.mxu0 %v6506_v42  ;;  %4563 = vmatprep.mubr.bf16.mxu1 %v6506_v42  ;;  %v6519_v42 = vld [vmem:[%s8631_s1 + $0x1040] ss:$16 sps:$4 sm:$0xff]  }
 0x1cf   :  { %4061 = vmatpush1.bf16.msra.mxu0 %v6423_v43  ;;  %4538 = vmatpush1.bf16.msra.mxu1 %v6426_v44  ;;  %v6522_v43 = vld [vmem:[%s8631_s1 + $0x1048] ss:$16 sps:$4 sm:$0xff]   ;;  %v6527_v44 = vld [vmem:[%s8631_s1 + $0x1064] ss:$16 sps:$4 sm:$0xff]  }
 0x1d0   :  { %4062 = vmatprep.subr.bf16.mxu0 %v6431_v45  ;;  %4539 = vmatprep.subr.bf16.mxu1 %v6434_v46  ;;  %v6530_v45 = vld [vmem:[%s8631_s1 + $0x106c] ss:$16 sps:$4 sm:$0xff]  }
 0x1d1   :  { %v6608_v46 = vld [vmem:[%s8632_s0 + $0x44] ss:$72 sps:$4 sm:$0xff]  }
 0x1d3   :  { %4063 = vmatpush1.bf16.msra.mxu0 %v6429_v47  ;;  %4540 = vmatpush1.bf16.msra.mxu1 %v6432_v48  ;;  %v6525_v47 = vld [vmem:[%s8631_s1 + $0x1060] ss:$16 sps:$4 sm:$0xff]   ;;  %v6528_v48 = vld [vmem:[%s8631_s1 + $0x1068] ss:$16 sps:$4 sm:$0xff]  }
 0x1d4   :  { %4064 = vmatprep.subr.bf16.mxu0 %v6437_v49  ;;  %4541 = vmatprep.subr.bf16.mxu1 %v6440_v50  ;;  %v6533_v49 = vld [vmem:[%s8631_s1 + $0x1084] ss:$16 sps:$4 sm:$0xff]   ;;  %v6536_v50 = vld [vmem:[%s8631_s1 + $0x108c] ss:$16 sps:$4 sm:$0xff]  }
 0x1d7   :  { %4065 = vmatpush1.bf16.msra.mxu0 %v6435_v51  ;;  %4542 = vmatpush1.bf16.msra.mxu1 %v6438_v52  ;;  %v6531_v51 = vld [vmem:[%s8631_s1 + $0x1080] ss:$16 sps:$4 sm:$0xff]   ;;  %v6534_v52 = vld [vmem:[%s8631_s1 + $0x1088] ss:$16 sps:$4 sm:$0xff]  }
 0x1d8   :  { %4066 = vmatprep.subr.bf16.mxu0 %v6443_v53  ;;  %4543 = vmatprep.subr.bf16.mxu1 %v6446_v54  ;;  %v6539_v53 = vld [vmem:[%s8631_s1 + $0x10a4] ss:$16 sps:$4 sm:$0xff]   ;;  %v6542_v54 = vld [vmem:[%s8631_s1 + $0x10ac] ss:$16 sps:$4 sm:$0xff]  }
 0x1db   :  { %4067 = vmatpush1.bf16.msra.mxu0 %v6441_v55  ;;  %4544 = vmatpush1.bf16.msra.mxu1 %v6444_v56  ;;  %v6537_v55 = vld [vmem:[%s8631_s1 + $0x10a0] ss:$16 sps:$4 sm:$0xff]   ;;  %v6540_v56 = vld [vmem:[%s8631_s1 + $0x10a8] ss:$16 sps:$4 sm:$0xff]  }
 0x1dc   :  { %4068 = vmatprep.subr.bf16.mxu0 %v6449_v57  ;;  %4545 = vmatprep.subr.bf16.mxu1 %v6452_v58  ;;  %v6545_v57 = vld [vmem:[%s8631_s1 + $0x10c4] ss:$16 sps:$4 sm:$0xff]   ;;  %v6548_v58 = vld [vmem:[%s8631_s1 + $0x10cc] ss:$16 sps:$4 sm:$0xff]  }
 0x1df   :  { %4069 = vmatpush1.bf16.msra.mxu0 %v6447_v59  ;;  %4546 = vmatpush1.bf16.msra.mxu1 %v6450_v60  ;;  %v6543_v59 = vld [vmem:[%s8631_s1 + $0x10c0] ss:$16 sps:$4 sm:$0xff]   ;;  %v6546_v60 = vld [vmem:[%s8631_s1 + $0x10c8] ss:$16 sps:$4 sm:$0xff]  }
 0x1e0   :  { %4070 = vmatprep.subr.bf16.mxu0 %v6455_v61  ;;  %4547 = vmatprep.subr.bf16.mxu1 %v6458_v62  ;;  %v6551_v61 = vld [vmem:[%s8631_s1 + $0x10e4] ss:$16 sps:$4 sm:$0xff]   ;;  %v6554_v62 = vld [vmem:[%s8631_s1 + $0x10ec] ss:$16 sps:$4 sm:$0xff]  }
 0x1e3   :  { %4071 = vmatpush1.bf16.msra.mxu0 %v6453_v63  ;;  %4548 = vmatpush1.bf16.msra.mxu1 %v6456_v0  ;;  %v6549_v63 = vld [vmem:[%s8631_s1 + $0x10e0] ss:$16 sps:$4 sm:$0xff]   ;;  %v6552_v0 = vld [vmem:[%s8631_s1 + $0x10e8] ss:$16 sps:$4 sm:$0xff]  }
 0x1e4   :  { %4072 = vmatprep.subr.bf16.mxu0 %v6461_v1  ;;  %4549 = vmatprep.subr.bf16.mxu1 %v6464_v2  ;;  %v6557_v1 = vld [vmem:[%s8631_s1 + $0x1104] ss:$16 sps:$4 sm:$0xff]   ;;  %v6560_v2 = vld [vmem:[%s8631_s1 + $0x110c] ss:$16 sps:$4 sm:$0xff]  }
 0x1e7   :  { %4073 = vmatpush1.bf16.msra.mxu0 %v6459_v3  ;;  %4550 = vmatpush1.bf16.msra.mxu1 %v6462_v4  ;;  %v6555_v3 = vld [vmem:[%s8631_s1 + $0x1100] ss:$16 sps:$4 sm:$0xff]   ;;  %v6558_v4 = vld [vmem:[%s8631_s1 + $0x1108] ss:$16 sps:$4 sm:$0xff]  }
 0x1e8   :  { %4074 = vmatprep.subr.bf16.mxu0 %v6467_v5  ;;  %4551 = vmatprep.subr.bf16.mxu1 %v6470_v6  ;;  %v6563_v5 = vld [vmem:[%s8631_s1 + $0x1124] ss:$16 sps:$4 sm:$0xff]   ;;  %v6566_v6 = vld [vmem:[%s8631_s1 + $0x112c] ss:$16 sps:$4 sm:$0xff]  }
 0x1eb   :  { %4075 = vmatpush1.bf16.msra.mxu0 %v6465_v7  ;;  %4552 = vmatpush1.bf16.msra.mxu1 %v6468_v8  ;;  %v6561_v7 = vld [vmem:[%s8631_s1 + $0x1120] ss:$16 sps:$4 sm:$0xff]   ;;  %v6564_v8 = vld [vmem:[%s8631_s1 + $0x1128] ss:$16 sps:$4 sm:$0xff]  }
 0x1ec   :  { %4076 = vmatprep.subr.bf16.mxu0 %v6473_v9  ;;  %4553 = vmatprep.subr.bf16.mxu1 %v6476_v10  ;;  %v6569_v9 = vld [vmem:[%s8631_s1 + $0x1144] ss:$16 sps:$4 sm:$0xff]   ;;  %v6572_v10 = vld [vmem:[%s8631_s1 + $0x114c] ss:$16 sps:$4 sm:$0xff]  }
 0x1ef   :  { %4077 = vmatpush1.bf16.msra.mxu0 %v6471_v11  ;;  %4554 = vmatpush1.bf16.msra.mxu1 %v6474_v12  ;;  %v6567_v11 = vld [vmem:[%s8631_s1 + $0x1140] ss:$16 sps:$4 sm:$0xff]   ;;  %v6570_v12 = vld [vmem:[%s8631_s1 + $0x1148] ss:$16 sps:$4 sm:$0xff]  }
 0x1f0   :  { %4078 = vmatprep.subr.bf16.mxu0 %v6479_v13  ;;  %4555 = vmatprep.subr.bf16.mxu1 %v6482_v14  ;;  %v6575_v13 = vld [vmem:[%s8631_s1 + $0x1164] ss:$16 sps:$4 sm:$0xff]   ;;  %v6578_v14 = vld [vmem:[%s8631_s1 + $0x116c] ss:$16 sps:$4 sm:$0xff]  }
 0x1f3   :  { %4079 = vmatpush1.bf16.msra.mxu0 %v6477_v15  ;;  %4556 = vmatpush1.bf16.msra.mxu1 %v6480_v16  ;;  %v6573_v15 = vld [vmem:[%s8631_s1 + $0x1160] ss:$16 sps:$4 sm:$0xff]   ;;  %v6576_v16 = vld [vmem:[%s8631_s1 + $0x1168] ss:$16 sps:$4 sm:$0xff]  }
 0x1f4   :  { %4080 = vmatprep.subr.bf16.mxu0 %v6485_v17  ;;  %4557 = vmatprep.subr.bf16.mxu1 %v6488_v18  ;;  %v6581_v17 = vld [vmem:[%s8631_s1 + $0x1184] ss:$16 sps:$4 sm:$0xff]   ;;  %v6584_v18 = vld [vmem:[%s8631_s1 + $0x118c] ss:$16 sps:$4 sm:$0xff]  }
 0x1f7   :  { %4081 = vmatpush1.bf16.msra.mxu0 %v6483_v19  ;;  %4558 = vmatpush1.bf16.msra.mxu1 %v6486_v20  ;;  %v6579_v19 = vld [vmem:[%s8631_s1 + $0x1180] ss:$16 sps:$4 sm:$0xff]   ;;  %v6582_v20 = vld [vmem:[%s8631_s1 + $0x1188] ss:$16 sps:$4 sm:$0xff]  }
 0x1f8   :  { %4082 = vmatprep.subr.bf16.mxu0 %v6493_v21  ;;  %4559 = vmatprep.subr.bf16.mxu1 %v6496_v22  ;;  %v6587_v21 = vld [vmem:[%s8631_s1 + $0x11a4] ss:$16 sps:$4 sm:$0xff]   ;;  %v6590_v22 = vld [vmem:[%s8631_s1 + $0x11ac] ss:$16 sps:$4 sm:$0xff]  }
 0x1fb   :  { %4083 = vmatpush1.bf16.msra.mxu0 %v6491_v23  ;;  %4560 = vmatpush1.bf16.msra.mxu1 %v6494_v24  ;;  %v6585_v23 = vld [vmem:[%s8631_s1 + $0x11a0] ss:$16 sps:$4 sm:$0xff]   ;;  %v6588_v24 = vld [vmem:[%s8631_s1 + $0x11a8] ss:$16 sps:$4 sm:$0xff]  }
 0x1fc   :  { %4084 = vmatprep.subr.bf16.mxu0 %v6500_v25  ;;  %4561 = vmatprep.subr.bf16.mxu1 %v6503_v26  ;;  %v6596_v25 = vld [vmem:[%s8631_s1 + $0x11c4] ss:$16 sps:$4 sm:$0xff]   ;;  %v6599_v26 = vld [vmem:[%s8631_s1 + $0x11cc] ss:$16 sps:$4 sm:$0xff]  }
 0x1ff   :  { %4085 = vmatpush1.bf16.msra.mxu0 %v6498_v27  ;;  %4562 = vmatpush1.bf16.msra.mxu1 %v6501_v28  ;;  %v6594_v27 = vld [vmem:[%s8631_s1 + $0x11c0] ss:$16 sps:$4 sm:$0xff]   ;;  %v6597_v28 = vld [vmem:[%s8631_s1 + $0x11c8] ss:$16 sps:$4 sm:$0xff]  }
 0x200   :  { %4107 = vmatprep.subr.bf16.mxu0 %v6509_v29  ;;  %4584 = vmatprep.subr.bf16.mxu1 %v6512_v30  ;;  %v6602_v29 = vld [vmem:[%s8631_s1 + $0x11e4] ss:$16 sps:$4 sm:$0xff]   ;;  %v6605_v30 = vld [vmem:[%s8631_s1 + $0x11ec] ss:$16 sps:$4 sm:$0xff]  }
 0x202   :  { %4087 = vmatmul.mubr.bf16.vlgmr.msra.gmra.mrb[0].mxu0 %v6504_v31  ;;  %4564 = vmatmul.mubr.bf16.vlgmr.msra.gmra.mrb[0].mxu1 %v6504_v31  ;;  %v6600_v31 = vld [vmem:[%s8631_s1 + $0x11e0] ss:$16 sps:$4 sm:$0xff]  }
 0x203   :  { %4108 = vmatpush1.bf16.msra.mxu0 %v6507_v32  ;;  %4585 = vmatpush1.bf16.msra.mxu1 %v6510_v33  ;;  %v6603_v32 = vld [vmem:[%s8631_s1 + $0x11e8] ss:$16 sps:$4 sm:$0xff]  }
 0x204   :  { %4109 = vmatprep.subr.bf16.mxu0 %v6515_v34  ;;  %4586 = vmatprep.subr.bf16.mxu1 %v6518_v35  ;;  %v6606_v33 = vld [vmem:[%s8632_s0 + $0x40] ss:$72 sps:$4 sm:$0xff]   ;;  %v6609_v34 = vld [vmem:[%s8632_s0 + $0xd4] ss:$72 sps:$4 sm:$0xff]   ;;  %v6611_v35 = vld [vmem:[%s8632_s0 + $0xd0] ss:$72 sps:$4 sm:$0xff]  }
 0x205   :  { %4096 = vmatprep.mubr.bf16.mxu0 %v6591_v36  ;;  %4573 = vmatprep.mubr.bf16.mxu1 %v6591_v36 }
 0x207   :  { %4110 = vmatpush1.bf16.msra.mxu0 %v6513_v37  ;;  %4587 = vmatpush1.bf16.msra.mxu1 %v6516_v38 }
 0x208   :  { %4111 = vmatprep.subr.bf16.mxu0 %v6521_v39  ;;  %4588 = vmatprep.subr.bf16.mxu1 %v6524_v40 }
 0x20a   :  { %4097 = vmatmul.mubr.bf16.gmra.mrb[4].mxu0 %v6593_v41  ;;  %4574 = vmatmul.mubr.bf16.gmra.mrb[4].mxu1 %v6593_v41 }
 0x20b   :  { %4112 = vmatpush1.bf16.msra.mxu0 %v6519_v42  ;;  %4589 = vmatpush1.bf16.msra.mxu1 %v6522_v43 }
 0x20c   :  { %4113 = vmatprep.subr.bf16.mxu0 %v6527_v44  ;;  %4590 = vmatprep.subr.bf16.mxu1 %v6530_v45 }
 0x20d   :  { %4139 = vmatprep.mubr.bf16.mxu0 %v6608_v46  ;;  %4616 = vmatprep.mubr.bf16.mxu1 %v6608_v46 }
 0x20f   :  { %4114 = vmatpush1.bf16.msra.mxu0 %v6525_v47  ;;  %4591 = vmatpush1.bf16.msra.mxu1 %v6528_v48 }
 0x210   :  { %4115 = vmatprep.subr.bf16.mxu0 %v6533_v49  ;;  %4592 = vmatprep.subr.bf16.mxu1 %v6536_v50 }
 0x213   :  { %4116 = vmatpush1.bf16.msra.mxu0 %v6531_v51  ;;  %4593 = vmatpush1.bf16.msra.mxu1 %v6534_v52 }
 0x214   :  { %4117 = vmatprep.subr.bf16.mxu0 %v6539_v53  ;;  %4594 = vmatprep.subr.bf16.mxu1 %v6542_v54 }
 0x217   :  { %4118 = vmatpush1.bf16.msra.mxu0 %v6537_v55  ;;  %4595 = vmatpush1.bf16.msra.mxu1 %v6540_v56 }
 0x218   :  { %4119 = vmatprep.subr.bf16.mxu0 %v6545_v57  ;;  %4596 = vmatprep.subr.bf16.mxu1 %v6548_v58 }
 0x21b   :  { %4120 = vmatpush1.bf16.msra.mxu0 %v6543_v59  ;;  %4597 = vmatpush1.bf16.msra.mxu1 %v6546_v60 }
 0x21c   :  { %4121 = vmatprep.subr.bf16.mxu0 %v6551_v61  ;;  %4598 = vmatprep.subr.bf16.mxu1 %v6554_v62 }
 0x21f   :  { %4122 = vmatpush1.bf16.msra.mxu0 %v6549_v63  ;;  %4599 = vmatpush1.bf16.msra.mxu1 %v6552_v0 }
 0x220   :  { %4123 = vmatprep.subr.bf16.mxu0 %v6557_v1  ;;  %4600 = vmatprep.subr.bf16.mxu1 %v6560_v2 }
 0x223   :  { %4124 = vmatpush1.bf16.msra.mxu0 %v6555_v3  ;;  %4601 = vmatpush1.bf16.msra.mxu1 %v6558_v4 }
 0x224   :  { %4125 = vmatprep.subr.bf16.mxu0 %v6563_v5  ;;  %4602 = vmatprep.subr.bf16.mxu1 %v6566_v6 }
 0x227   :  { %4126 = vmatpush1.bf16.msra.mxu0 %v6561_v7  ;;  %4603 = vmatpush1.bf16.msra.mxu1 %v6564_v8 }
 0x228   :  { %4127 = vmatprep.subr.bf16.mxu0 %v6569_v9  ;;  %4604 = vmatprep.subr.bf16.mxu1 %v6572_v10 }
 0x22b   :  { %4128 = vmatpush1.bf16.msra.mxu0 %v6567_v11  ;;  %4605 = vmatpush1.bf16.msra.mxu1 %v6570_v12 }
 0x22c   :  { %4129 = vmatprep.subr.bf16.mxu0 %v6575_v13  ;;  %4606 = vmatprep.subr.bf16.mxu1 %v6578_v14 }
 0x22f   :  { %4130 = vmatpush1.bf16.msra.mxu0 %v6573_v15  ;;  %4607 = vmatpush1.bf16.msra.mxu1 %v6576_v16 }
 0x230   :  { %4131 = vmatprep.subr.bf16.mxu0 %v6581_v17  ;;  %4608 = vmatprep.subr.bf16.mxu1 %v6584_v18 }
 0x233   :  { %4132 = vmatpush1.bf16.msra.mxu0 %v6579_v19  ;;  %4609 = vmatpush1.bf16.msra.mxu1 %v6582_v20 }
 0x234   :  { %4133 = vmatprep.subr.bf16.mxu0 %v6587_v21  ;;  %4610 = vmatprep.subr.bf16.mxu1 %v6590_v22 }
 0x237   :  { %4134 = vmatpush1.bf16.msra.mxu0 %v6585_v23  ;;  %4611 = vmatpush1.bf16.msra.mxu1 %v6588_v24 }
 0x238   :  { %4135 = vmatprep.subr.bf16.mxu0 %v6596_v25  ;;  %4612 = vmatprep.subr.bf16.mxu1 %v6599_v26 }
 0x23b   :  { %4136 = vmatpush1.bf16.msra.mxu0 %v6594_v27  ;;  %4613 = vmatpush1.bf16.msra.mxu1 %v6597_v28 }
 0x23c   :  { %4137 = vmatprep.subr.bf16.mxu0 %v6602_v29  ;;  %4614 = vmatprep.subr.bf16.mxu1 %v6605_v30 }
 0x23f   :  { %4138 = vmatpush1.bf16.msra.mxu0 %v6600_v31  ;;  %4615 = vmatpush1.bf16.msra.mxu1 %v6603_v32 }
 0x242   :  { %4140 = vmatmul.mubr.bf16.vlgmr.msra.gmra.mrb[0].mxu0 %v6606_v33  ;;  %4617 = vmatmul.mubr.bf16.vlgmr.msra.gmra.mrb[0].mxu1 %v6606_v33 }
 0x243   :  { %4149 = vmatprep.mubr.bf16.mxu0 %v6609_v34  ;;  %4626 = vmatprep.mubr.bf16.mxu1 %v6609_v34 }
 0x24a   :  { %4150 = vmatmul.mubr.bf16.gmra.mrb[4].mxu0 %v6611_v35  ;;  %4627 = vmatmul.mubr.bf16.gmra.mrb[4].mxu1 %v6611_v35 }
 0x315   :  { %v8479_v36 = vpop.f32.mrb[0].mxu0  ;;  %v8481_v37 = vpop.f32.mrb[0].mxu1 }
 0x316   :  { %v8483_v38 = vpop.f32.mrb[1].mxu0  ;;  %v8485_v39 = vpop.f32.mrb[1].mxu1 }
 0x317   :  { %v4145_v40 = vpop.f32.mrb[2].mxu0  ;;  %v4622_v41 = vpop.f32.mrb[2].mxu1 }
 0x318   :  { %v4637_v42 = vadd.f32 %v4145_v40, %v8479_v36  ;;  %v4651_v43 = vadd.f32 %v4622_v41, %v8481_v37  ;;  %v4147_v44 = vpop.f32.mrb[3].mxu0  ;;  %v4624_v45 = vpop.f32.mrb[3].mxu1 }
 0x319   :  { %v4644_v46 = vadd.f32 %v4147_v44, %v8483_v38  ;;  %v4658_v47 = vadd.f32 %v4624_v45, %v8485_v39 }
 0x31a   :  { %v4638_v48 = vrot.slane %v4637_v42, 4  ;;  %v4652_v49 = vrot.slane %v4651_v43, 4 }
 0x31b   :  { %v4645_v50 = vrot.slane %v4644_v46, 4  ;;  %v4659_v51 = vrot.slane %v4658_v47, 4 }
 0x31c   :  { %v4639_v52 = vadd.f32 %v4638_v48, %v4637_v42  ;;  %v4653_v53 = vadd.f32 %v4652_v49, %v4651_v43 }
 0x31d   :  { %v4646_v54 = vadd.f32 %v4645_v50, %v4644_v46  ;;  %v4660_v55 = vadd.f32 %v4659_v51, %v4658_v47  ;;  %v8491_v56 = vpop.f32.mrb[4].mxu0  ;;  %v8493_v57 = vpop.f32.mrb[4].mxu1 }
 0x31e   :  { %v4640_v58 = vrot.slane %v4639_v52, 2  ;;  %v4654_v59 = vrot.slane %v4653_v53, 2  ;;  %v8495_v60 = vpop.f32.mrb[5].mxu0  ;;  %v8497_v61 = vpop.f32.mrb[5].mxu1 }
 0x31f   :  { %v4647_v62 = vrot.slane %v4646_v54, 2  ;;  %v4661_v63 = vrot.slane %v4660_v55, 2  ;;  %v8499_v0 = vpop.f32.mrb[6].mxu0  ;;  %v8501_v1 = vpop.f32.mrb[6].mxu1 }
 0x320   :  { %v4641_v2 = vadd.f32 %v4640_v58, %v4639_v52  ;;  %v4655_v3 = vadd.f32 %v4654_v59, %v4653_v53  ;;  %v4665_v4 = vadd.f32 %v8499_v0, %v8491_v56  ;;  %v4679_v5 = vadd.f32 %v8501_v1, %v8493_v57  ;;  %v8507_v6 = vpop.f32.mrb[7].mxu0  ;;  %v8509_v7 = vpop.f32.mrb[7].mxu1 }
 0x321   :  { %v4648_v8 = vadd.f32 %v4647_v62, %v4646_v54  ;;  %v4662_v9 = vadd.f32 %v4661_v63, %v4660_v55  ;;  %v4672_v10 = vadd.f32 %v8507_v6, %v8495_v60  ;;  %v4686_v11 = vadd.f32 %v8509_v7, %v8497_v61 }
 0x322   :  { %v4642_v12 = vrot.slane %v4641_v2, 1  ;;  %v4656_v13 = vrot.slane %v4655_v3, 1  ;;  %v4666_v14 = vrot.slane %v4665_v4, 4  ;;  %v4680_v15 = vrot.slane %v4679_v5, 4 }
 0x323   :  { %v4649_v16 = vrot.slane %v4648_v8, 1  ;;  %v4663_v17 = vrot.slane %v4662_v9, 1  ;;  %v4673_v18 = vrot.slane %v4672_v10, 4  ;;  %v4687_v19 = vrot.slane %v4686_v11, 4 }
 0x324   :  { %v4643_v20 = vadd.f32 %v4642_v12, %v4641_v2  ;;  %v4657_v21 = vadd.f32 %v4656_v13, %v4655_v3  ;;  %v4667_v22 = vadd.f32 %v4666_v14, %v4665_v4  ;;  %v4681_v23 = vadd.f32 %v4680_v15, %v4679_v5 }
 0x325   :  { %v4650_v24 = vadd.f32 %v4649_v16, %v4648_v8  ;;  %v4664_v25 = vadd.f32 %v4663_v17, %v4662_v9  ;;  %v4674_v26 = vadd.f32 %v4673_v18, %v4672_v10  ;;  %v4688_v27 = vadd.f32 %v4687_v19, %v4686_v11 }
 0x326   :  { %v4694_v28 = vmul.f32 0.0625, %v4643_v20  ;;  %v4696_v29 = vmul.f32 0.0625, %v4657_v21  ;;  %v4668_v30 = vrot.slane %v4667_v22, 2  ;;  %v4682_v31 = vrot.slane %v4681_v23, 2 }
 0x327   :  { %v4695_v32 = vmul.f32 0.0625, %v4650_v24  ;;  %v4697_v33 = vmul.f32 0.0625, %v4664_v25  ;;  %v4675_v34 = vrot.slane %v4674_v26, 2  ;;  %v4689_v35 = vrot.slane %v4688_v27, 2 }
 0x328   :  { %v8516_v42 = vsub.f32 %v8479_v36, %v4694_v28  ;;  %v8518_v43 = vsub.f32 %v4145_v40, %v4694_v28  ;;  %v8521_v46 = vsub.f32 %v8481_v37, %v4696_v29  ;;  %v8523_v47 = vsub.f32 %v4622_v41, %v4696_v29 }
 0x329   :  { %v8526_v48 = vsub.f32 %v8483_v38, %v4695_v32  ;;  %v8528_v49 = vsub.f32 %v4147_v44, %v4695_v32  ;;  %v8531_v50 = vsub.f32 %v8485_v39, %v4697_v33  ;;  %v8533_v51 = vsub.f32 %v4624_v45, %v4697_v33 }
 0x32a   :  { %v4718_v36 = vmul.f32 %v8516_v42, %v8516_v42  ;;  %v4722_v40 = vmul.f32 %v8518_v43, %v8518_v43  ;;  %v4720_v37 = vmul.f32 %v8521_v46, %v8521_v46  ;;  %v4724_v38 = vmul.f32 %v8523_v47, %v8523_v47 }
 0x32b   :  { %v4719_v41 = vmul.f32 %v8526_v48, %v8526_v48  ;;  %v4723_v39 = vmul.f32 %v8528_v49, %v8528_v49  ;;  %v4721_v44 = vmul.f32 %v8531_v50, %v8531_v50  ;;  %v4725_v45 = vmul.f32 %v8533_v51, %v8533_v51 }
 0x32c   :  { %v4734_v52 = vadd.f32 %v4722_v40, %v4718_v36  ;;  %v4748_v53 = vadd.f32 %v4724_v38, %v4720_v37  ;;  %v4669_v54 = vadd.f32 %v4668_v30, %v4667_v22  ;;  %v4683_v55 = vadd.f32 %v4682_v31, %v4681_v23 }
 0x32d   :  { %v4741_v58 = vadd.f32 %v4723_v39, %v4719_v41  ;;  %v4755_v59 = vadd.f32 %v4725_v45, %v4721_v44  ;;  %v4676_v62 = vadd.f32 %v4675_v34, %v4674_v26  ;;  %v4690_v63 = vadd.f32 %v4689_v35, %v4688_v27 }
 0x32e   :  { %v4735_v2 = vrot.slane %v4734_v52, 4  ;;  %v4749_v3 = vrot.slane %v4748_v53, 4  ;;  %v4670_v4 = vrot.slane %v4669_v54, 1  ;;  %v4684_v5 = vrot.slane %v4683_v55, 1 }
 0x32f   :  { %v4742_v8 = vrot.slane %v4741_v58, 4  ;;  %v4756_v9 = vrot.slane %v4755_v59, 4  ;;  %v4677_v10 = vrot.slane %v4676_v62, 1  ;;  %v4691_v11 = vrot.slane %v4690_v63, 1 }
 0x330   :  { %v4736_v12 = vadd.f32 %v4735_v2, %v4734_v52  ;;  %v4750_v13 = vadd.f32 %v4749_v3, %v4748_v53  ;;  %v4671_v14 = vadd.f32 %v4670_v4, %v4669_v54  ;;  %v4685_v15 = vadd.f32 %v4684_v5, %v4683_v55 }
 0x331   :  { %v4743_v16 = vadd.f32 %v4742_v8, %v4741_v58  ;;  %v4757_v17 = vadd.f32 %v4756_v9, %v4755_v59  ;;  %v4678_v18 = vadd.f32 %v4677_v10, %v4676_v62  ;;  %v4692_v19 = vadd.f32 %v4691_v11, %v4690_v63 }
 0x332   :  { %v4737_v20 = vrot.slane %v4736_v12, 2  ;;  %v4751_v21 = vrot.slane %v4750_v13, 2  ;;  %v4698_v22 = vmul.f32 0.0625, %v4671_v14  ;;  %v4700_v23 = vmul.f32 0.0625, %v4685_v15 }
 0x333   :  { %v4744_v24 = vrot.slane %v4743_v16, 2  ;;  %v4758_v25 = vrot.slane %v4757_v17, 2  ;;  %v4699_v26 = vmul.f32 0.0625, %v4678_v18  ;;  %v4701_v27 = vmul.f32 0.0625, %v4692_v19 }
 0x334   :  { %v4738_v28 = vadd.f32 %v4737_v20, %v4736_v12  ;;  %v4752_v29 = vadd.f32 %v4751_v21, %v4750_v13  ;;  %v8552_v30 = vsub.f32 %v8491_v56, %v4698_v22  ;;  %v8555_v31 = vsub.f32 %v8499_v0, %v4698_v22 }
 0x335   :  { %v4745_v32 = vadd.f32 %v4744_v24, %v4743_v16  ;;  %v4759_v33 = vadd.f32 %v4758_v25, %v4757_v17  ;;  %v8558_v34 = vsub.f32 %v8493_v57, %v4700_v23  ;;  %v8561_v35 = vsub.f32 %v8501_v1, %v4700_v23 }
 0x336   :  { %v4739_v36 = vrot.slane %v4738_v28, 1  ;;  %v4753_v40 = vrot.slane %v4752_v29, 1  ;;  %v4726_v37 = vmul.f32 %v8552_v30, %v8552_v30  ;;  %v4730_v56 = vmul.f32 %v8555_v31, %v8555_v31 }
 0x337   :  { %v4746_v38 = vrot.slane %v4745_v32, 1  ;;  %v4760_v41 = vrot.slane %v4759_v33, 1  ;;  %v4728_v0 = vmul.f32 %v8558_v34, %v8558_v34  ;;  %v4732_v57 = vmul.f32 %v8561_v35, %v8561_v35 }
 0x338   :  { %v4740_v39 = vadd.f32 %v4739_v36, %v4738_v28  ;;  %v4754_v44 = vadd.f32 %v4753_v40, %v4752_v29  ;;  %v4762_v1 = vadd.f32 %v4730_v56, %v4726_v37  ;;  %v8572_v45 = vsub.f32 %v8495_v60, %v4699_v26 }
 0x339   :  { %v4747_v52 = vadd.f32 %v4746_v38, %v4745_v32  ;;  %v4761_v53 = vadd.f32 %v4760_v41, %v4759_v33  ;;  %v4776_v54 = vadd.f32 %v4732_v57, %v4728_v0  ;;  %v8575_v55 = vsub.f32 %v8507_v6, %v4699_v26 }
 0x33a   :  { %v4790_v58 = vmul.f32 0.0625, %v4740_v39  ;;  %v4792_v59 = vmul.f32 0.0625, %v4754_v44  ;;  %v4763_v62 = vrot.slane %v4762_v1, 4  ;;  %v4727_v63 = vmul.f32 %v8572_v45, %v8572_v45 }
 0x33b   :  { %v4791_v2 = vmul.f32 0.0625, %v4747_v52  ;;  %v4793_v3 = vmul.f32 0.0625, %v4761_v53  ;;  %v4777_v4 = vrot.slane %v4776_v54, 4  ;;  %v4731_v5 = vmul.f32 %v8575_v55, %v8575_v55 }
 0x33c   :  { %v4798_v60 = vadd.f32 1e-05, %v4790_v58  ;;  %v4800_v8 = vadd.f32 1e-05, %v4792_v59  ;;  %v4764_v9 = vadd.f32 %v4763_v62, %v4762_v1  ;;  %v8582_v10 = vsub.f32 %v8497_v61, %v4701_v27 }
 0x33d   :  { %v4799_v6 = vadd.f32 1e-05, %v4791_v2  ;;  %v4801_v11 = vadd.f32 1e-05, %v4793_v3  ;;  %v4778_v12 = vadd.f32 %v4777_v4, %v4776_v54  ;;  %v4769_v13 = vadd.f32 %v4731_v5, %v4727_v63 }
 0x33e   :  { %6612 = vrsqrt.f32 %v4798_v60  ;;  %v4765_v14 = vrot.slane %v4764_v9, 2  ;;  %v8585_v15 = vsub.f32 %v8509_v7, %v4701_v27  ;;  %v4729_v16 = vmul.f32 %v8582_v10, %v8582_v10 }
 0x33f   :  { %6614 = vrsqrt.f32 %v4800_v8  ;;  %v4779_v17 = vrot.slane %v4778_v12, 2  ;;  %v4770_v18 = vrot.slane %v4769_v13, 4 }
 0x340   :  { %6616 = vrsqrt.f32 %v4799_v6  ;;  %v4766_v19 = vadd.f32 %v4765_v14, %v4764_v9  ;;  %v4733_v61 = vmul.f32 %v8585_v15, %v8585_v15 }
 0x341   :  { %6618 = vrsqrt.f32 %v4801_v11  ;;  %v4780_v20 = vadd.f32 %v4779_v17, %v4778_v12  ;;  %v4771_v21 = vadd.f32 %v4770_v18, %v4769_v13 }
 0x342   :  { %v4767_v22 = vrot.slane %v4766_v19, 1  ;;  %v4783_v23 = vadd.f32 %v4733_v61, %v4729_v16 }
 0x343   :  { %v4781_v24 = vrot.slane %v4780_v20, 1  ;;  %v4772_v25 = vrot.slane %v4771_v21, 2 }
 0x344   :  { %v4768_v7 = vadd.f32 %v4767_v22, %v4766_v19  ;;  %v4784_v26 = vrot.slane %v4783_v23, 4 }
 0x345   :  { %v4782_v27 = vadd.f32 %v4781_v24, %v4780_v20  ;;  %v4773_v28 = vadd.f32 %v4772_v25, %v4771_v21 }
 0x346   :  { %v4794_v29 = vmul.f32 0.0625, %v4768_v7  ;;  %v4785_v32 = vadd.f32 %v4784_v26, %v4783_v23 }
 0x347   :  { %v4796_v33 = vmul.f32 0.0625, %v4782_v27  ;;  %v4774_v36 = vrot.slane %v4773_v28, 1 }
 0x348   :  { %v6613_v40 = vpop.eup %6612  ;;  %v4802_v37 = vadd.f32 1e-05, %v4794_v29  ;;  %v4786_v56 = vrot.slane %v4785_v32, 2 }
 0x349   :  { %v6615_v38 = vpop.eup %6614  ;;  %v4814_v41 = vmul.f32 %v6613_v40, %v8516_v42  ;;  %v4818_v0 = vmul.f32 %v6613_v40, %v8518_v43  ;;  %v4804_v57 = vadd.f32 1e-05, %v4796_v33  ;;  %v4775_v39 = vadd.f32 %v4774_v36, %v4773_v28 }
 0x34a   :  { %v6617_v44 = vpop.eup %6616  ;;  %v4816_v1 = vmul.f32 %v6615_v38, %v8521_v46  ;;  %v4820_v52 = vmul.f32 %v6615_v38, %v8523_v47  ;;  %6620 = vrsqrt.f32 %v4802_v37  ;;  %v4787_v53 = vadd.f32 %v4786_v56, %v4785_v32 }
 0x34b   :  { %v6619_v54 = vpop.eup %6618  ;;  %vm4830_vm0 = vcmp.ge.f32.partialorder %v4814_v41, 0.0  ;;  %vm4834_vm1 = vcmp.ge.f32.partialorder %v4818_v0, 0.0  ;;  %v4846_v58 = vmul.f32 0.2, %v4814_v41  ;;  %v4850_v59 = vmul.f32 0.2, %v4818_v0 }
 0x34c   :  { %vm4832_vm2 = vcmp.ge.f32.partialorder %v4816_v1, 0.0  ;;  %vm4836_vm3 = vcmp.ge.f32.partialorder %v4820_v52, 0.0  ;;  %v4848_v62 = vmul.f32 0.2, %v4816_v1  ;;  %v4852_v42 = vmul.f32 0.2, %v4820_v52 }
 0x34d   :  { %v4862_v63 = vsel %vm4830_vm0, %v4814_v41, %v4846_v58  ;;  %v4866_v43 = vsel %vm4834_vm1, %v4818_v0, %v4850_v59  ;;  %v4815_v2 = vmul.f32 %v6617_v44, %v8526_v48  ;;  %v4819_v3 = vmul.f32 %v6617_v44, %v8528_v49 }
 0x34e   :  { %v4864_v46 = vsel %vm4832_vm2, %v4816_v1, %v4848_v62  ;;  %v4868_v4 = vsel %vm4836_vm3, %v4820_v52, %v4852_v42  ;;  %v4817_v47 = vmul.f32 %v6619_v54, %v8531_v50  ;;  %v4821_v5 = vmul.f32 %v6619_v54, %v8533_v51 }
 0x34f   :  { %vm4831_vm4 = vcmp.ge.f32.partialorder %v4815_v2, 0.0  ;;  %vm4835_vm5 = vcmp.ge.f32.partialorder %v4819_v3, 0.0  ;;  %v4847_v60 = vmul.f32 0.2, %v4815_v2  ;;  %v4851_v8 = vmul.f32 0.2, %v4819_v3 }
 0x350   :  { %vm4833_vm6 = vcmp.ge.f32.partialorder %v4817_v47, 0.0  ;;  %vm4837_vm7 = vcmp.ge.f32.partialorder %v4821_v5, 0.0  ;;  %v4849_v9 = vmul.f32 0.2, %v4817_v47  ;;  %v4853_v6 = vmul.f32 0.2, %v4821_v5 }
 0x351   :  { %v4863_v11 = vsel %vm4831_vm4, %v4815_v2, %v4847_v60  ;;  %v4867_v12 = vsel %vm4835_vm5, %v4819_v3, %v4851_v8  ;;  %6622 = vrsqrt.f32 %v4804_v57  ;;  %v4795_v48 = vmul.f32 0.0625, %v4775_v39 }
 0x352   :  { %v5558_v13 = vpack.c.bf16 %v4863_v11, %v4862_v63  ;;  %v5560_v49 = vpack.c.bf16 %v4867_v12, %v4866_v43  ;;  %v4865_v14 = vsel %vm4833_vm6, %v4817_v47, %v4849_v9  ;;  %v4869_v16 = vsel %vm4837_vm7, %v4821_v5, %v4853_v6 }
 0x353   :  { %v5559_v17 = vpack.c.bf16 %v4865_v14, %v4864_v46  ;;  %v5561_v50 = vpack.c.bf16 %v4869_v16, %v4868_v4  ;;  %v4803_v18 = vadd.f32 1e-05, %v4795_v48  ;;  %v4788_v51 = vrot.slane %v4787_v53, 1 }
 0x354   :  { %v6621_v19 = vpop.eup %6620  ;;  %4926 = vst [vmem:[%s8633_s2] sm:$0xff] %v5558_v13  ;;  %4928 = vst [vmem:[%s8633_s2 + $0x10] sm:$0xff] %v5560_v49 }
 0x355   :  { %4927 = vst [vmem:[%s8633_s2 + $0x8] sm:$0xff] %v5559_v17  ;;  %4929 = vst [vmem:[%s8633_s2 + $0x18] sm:$0xff] %v5561_v50  ;;  %v4822_v61 = vmul.f32 %v6621_v19, %v8552_v30  ;;  %v4826_v20 = vmul.f32 %v6621_v19, %v8555_v31  ;;  %6624 = vrsqrt.f32 %v4803_v18  ;;  %v4789_v21 = vadd.f32 %v4788_v51, %v4787_v53 }
 0x357   :  { %v4797_v22 = vmul.f32 0.0625, %v4789_v21  ;;  %v4854_v26 = vmul.f32 0.2, %v4822_v61  ;;  %v4858_v27 = vmul.f32 0.2, %v4826_v20  ;;  %vm4838_vm8 = vcmp.ge.f32.partialorder %v4822_v61, 0.0 }
 0x358   :  { %vm4842_vm9 = vcmp.ge.f32.partialorder %v4826_v20, 0.0 }
 0x359   :  { %v4805_v23 = vadd.f32 1e-05, %v4797_v22  ;;  %v4870_v31 = vsel %vm4838_vm8, %v4822_v61, %v4854_v26  ;;  %v4874_v32 = vsel %vm4842_vm9, %v4826_v20, %v4858_v27 }
 0x35b   :  { %v6623_v24 = vpop.eup %6622  ;;  %6626 = vrsqrt.f32 %v4805_v23 }
 0x35c   :  { %v4824_v25 = vmul.f32 %v6623_v24, %v8558_v34  ;;  %v4828_v7 = vmul.f32 %v6623_v24, %v8561_v35 }
 0x35e   :  { %v4856_v40 = vmul.f32 0.2, %v4824_v25  ;;  %v4860_v34 = vmul.f32 0.2, %v4828_v7  ;;  %vm4840_vm12 = vcmp.ge.f32.partialorder %v4824_v25, 0.0  ;;  %vm4844_vm13 = vcmp.ge.f32.partialorder %v4828_v7, 0.0 }
 0x35f   :  { %v6625_v28 = vpop.eup %6624 }
 0x360   :  { %v4823_v29 = vmul.f32 %v6625_v28, %v8572_v45  ;;  %v4827_v30 = vmul.f32 %v6625_v28, %v8575_v55  ;;  %v4872_v0 = vsel %vm4840_vm12, %v4824_v25, %v4856_v40  ;;  %v4876_v57 = vsel %vm4844_vm13, %v4828_v7, %v4860_v34 }
 0x362   :  { %vm4839_vm10 = vcmp.ge.f32.partialorder %v4823_v29, 0.0  ;;  %vm4843_vm11 = vcmp.ge.f32.partialorder %v4827_v30, 0.0  ;;  %v4855_v33 = vmul.f32 0.2, %v4823_v29  ;;  %v4859_v36 = vmul.f32 0.2, %v4827_v30 }
 0x364   :  { %v4871_v37 = vsel %vm4839_vm10, %v4823_v29, %v4855_v33  ;;  %v4875_v35 = vsel %vm4843_vm11, %v4827_v30, %v4859_v36 }
 0x365   :  { %v5562_v56 = vpack.c.bf16 %v4871_v37, %v4870_v31  ;;  %v5564_v38 = vpack.c.bf16 %v4875_v35, %v4874_v32  ;;  %v6627_v41 = vpop.eup %6626 }
 0x366   :  { %v4825_v45 = vmul.f32 %v6627_v41, %v8582_v10  ;;  %v4829_v55 = vmul.f32 %v6627_v41, %v8585_v15 }
 0x367   :  { %4930 = vst [vmem:[%s8633_s2 + $0x20] sm:$0xff] %v5562_v56  ;;  %4932 = vst [vmem:[%s8633_s2 + $0x30] sm:$0xff] %v5564_v38 }
 0x368   :  { %vm4841_vm14 = vcmp.ge.f32.partialorder %v4825_v45, 0.0  ;;  %vm4845_vm15 = vcmp.ge.f32.partialorder %v4829_v55, 0.0  ;;  %v4857_v39 = vmul.f32 0.2, %v4825_v45  ;;  %v4861_v44 = vmul.f32 0.2, %v4829_v55 }
 0x36a   :  { %v4873_v1 = vsel %vm4841_vm14, %v4825_v45, %v4857_v39  ;;  %v4877_v52 = vsel %vm4845_vm15, %v4829_v55, %v4861_v44 }
 0x36b   :  { %v5563_v53 = vpack.c.bf16 %v4873_v1, %v4872_v0  ;;  %v5565_v54 = vpack.c.bf16 %v4877_v52, %v4876_v57 }
 0x36d   :  { %4931 = vst [vmem:[%s8633_s2 + $0x28] sm:$0xff] %v5563_v53  ;;  %4933 = vst [vmem:[%s8633_s2 + $0x38] sm:$0xff] %v5565_v54 }

// kernel: discriminator_forward.9
= control target key start
LH: loop header
LB: loop body
LE: loop exit
PB: predicated region body
PF: predicated region fallthrough
CT: control target
= control target key end

     0   :  { %s6091_s1 = inlined_call_operand.vmem [shape: bf16[4608,128], index: 1, kind: input, shape index: {}]   ;;  %s6092_s0 = inlined_call_operand.vmem [shape: bf16[32,4608], index: 0, kind: input, shape index: {}]   ;;  %s6093_s2 = inlined_call_operand.vmem [shape: bf16[32,128], index: 2, kind: output, shape index: {}]  }
   0x1   :  { %v4557_v0 = vld [vmem:[%s6091_s1 + $0x40] sm:$0xff]   ;;  %v4561_v4 = vld [vmem:[%s6091_s1 + $0x48] sm:$0xff]   ;;  %v4565_v8 = vld [vmem:[%s6091_s1 + $0x50] sm:$0xff]  }
   0x2   :  { %v4558_v1 = vld [vmem:[%s6091_s1 + $0xc0] sm:$0xff]   ;;  %4053 = vmatprep.subr.bf16.mxu0 %v4557_v0  ;;  %v4562_v5 = vld [vmem:[%s6091_s1 + $0xc8] sm:$0xff]   ;;  %v4566_v9 = vld [vmem:[%s6091_s1 + $0xd0] sm:$0xff]  }
   0x3   :  { %v4559_v2 = vld [vmem:[%s6091_s1] sm:$0xff]   ;;  %4081 = vmatprep.subr.bf16.mxu1 %v4558_v1  ;;  %v4563_v6 = vld [vmem:[%s6091_s1 + $0x8] sm:$0xff]   ;;  %v4567_v10 = vld [vmem:[%s6091_s1 + $0x10] sm:$0xff]  }
   0x4   :  { %v4560_v3 = vld [vmem:[%s6091_s1 + $0x80] sm:$0xff]   ;;  %4054 = vmatpush3.bf16.msra.mxu0 %v4559_v2  ;;  %v4564_v7 = vld [vmem:[%s6091_s1 + $0x88] sm:$0xff]   ;;  %v4568_v11 = vld [vmem:[%s6091_s1 + $0x90] sm:$0xff]  }
   0x5   :  { %4082 = vmatpush3.bf16.msra.mxu1 %v4560_v3  ;;  %4055 = vmatprep.subr.bf16.mxu0 %v4561_v4  ;;  %v4569_v12 = vld [vmem:[%s6091_s1 + $0x58] sm:$0xff]   ;;  %v4573_v16 = vld [vmem:[%s6091_s1 + $0x60] sm:$0xff]   ;;  %v4577_v20 = vld [vmem:[%s6091_s1 + $0x68] sm:$0xff]  }
   0x6   :  { %4083 = vmatprep.subr.bf16.mxu1 %v4562_v5  ;;  %v4570_v13 = vld [vmem:[%s6091_s1 + $0xd8] sm:$0xff]   ;;  %v4574_v17 = vld [vmem:[%s6091_s1 + $0xe0] sm:$0xff]   ;;  %v4578_v21 = vld [vmem:[%s6091_s1 + $0xe8] sm:$0xff]  }
   0x7   :  { %v4571_v14 = vld [vmem:[%s6091_s1 + $0x18] sm:$0xff]   ;;  %v4575_v18 = vld [vmem:[%s6091_s1 + $0x20] sm:$0xff]   ;;  %v4579_v22 = vld [vmem:[%s6091_s1 + $0x28] sm:$0xff]  }
   0x8   :  { %4056 = vmatpush3.bf16.msra.mxu0 %v4563_v6  ;;  %v4572_v15 = vld [vmem:[%s6091_s1 + $0x98] sm:$0xff]   ;;  %v4576_v19 = vld [vmem:[%s6091_s1 + $0xa0] sm:$0xff]   ;;  %v4580_v23 = vld [vmem:[%s6091_s1 + $0xa8] sm:$0xff]  }
   0x9   :  { %4084 = vmatpush3.bf16.msra.mxu1 %v4564_v7  ;;  %4057 = vmatprep.subr.bf16.mxu0 %v4565_v8  ;;  %v4581_v24 = vld [vmem:[%s6091_s1 + $0x70] sm:$0xff]   ;;  %v4585_v28 = vld [vmem:[%s6091_s1 + $0x78] sm:$0xff]   ;;  %v4595_v36 = vld [vmem:[%s6091_s1 + $0x140] sm:$0xff]  }
   0xa   :  { %4085 = vmatprep.subr.bf16.mxu1 %v4566_v9  ;;  %v4582_v25 = vld [vmem:[%s6091_s1 + $0xf0] sm:$0xff]   ;;  %v4586_v29 = vld [vmem:[%s6091_s1 + $0xf8] sm:$0xff]   ;;  %v4596_v37 = vld [vmem:[%s6091_s1 + $0x1c0] sm:$0xff]  }
   0xb   :  { %v4583_v26 = vld [vmem:[%s6091_s1 + $0x30] sm:$0xff]   ;;  %v4587_v30 = vld [vmem:[%s6091_s1 + $0x38] sm:$0xff]   ;;  %v4597_v38 = vld [vmem:[%s6091_s1 + $0x100] sm:$0xff]  }
   0xc   :  { %4058 = vmatpush3.bf16.msra.mxu0 %v4567_v10  ;;  %v4584_v27 = vld [vmem:[%s6091_s1 + $0xb0] sm:$0xff]   ;;  %v4588_v31 = vld [vmem:[%s6091_s1 + $0xb8] sm:$0xff]   ;;  %v4598_v39 = vld [vmem:[%s6091_s1 + $0x180] sm:$0xff]  }
   0xd   :  { %4086 = vmatpush3.bf16.msra.mxu1 %v4568_v11  ;;  %4059 = vmatprep.subr.bf16.mxu0 %v4569_v12  ;;  %v4589_v32 = vld [vmem:[%s6092_s0] ss:$144 sps:$4 sm:$0xff]   ;;  %v4591_v33 = vld [vmem:[%s6092_s0 + $0x4] ss:$144 sps:$4 sm:$0xff]   ;;  %v4592_v34 = vld [vmem:[%s6092_s0 + $0x8] ss:$144 sps:$4 sm:$0xff]  }
   0xe   :  { %4087 = vmatprep.subr.bf16.mxu1 %v4570_v13  ;;  %v4594_v35 = vld [vmem:[%s6092_s0 + $0xc] ss:$144 sps:$4 sm:$0xff]   ;;  %2780 = vmatprep.mubr.bf16.mxu0 %v4591_v33  ;;  %v4603_v44 = vld [vmem:[%s6091_s1 + $0x150] sm:$0xff]   ;;  %v4611_v52 = vld [vmem:[%s6091_s1 + $0x160] sm:$0xff]  }
   0xf   :  { %2829 = vmatprep.mubr.bf16.mxu1 %v4594_v35  ;;  %v4599_v40 = vld [vmem:[%s6091_s1 + $0x148] sm:$0xff]   ;;  %v4604_v45 = vld [vmem:[%s6091_s1 + $0x1d0] sm:$0xff]   ;;  %v4607_v48 = vld [vmem:[%s6091_s1 + $0x158] sm:$0xff]  }
  0x10   :  { %4060 = vmatpush3.bf16.msra.mxu0 %v4571_v14  ;;  %v4600_v41 = vld [vmem:[%s6091_s1 + $0x1c8] sm:$0xff]   ;;  %v4605_v46 = vld [vmem:[%s6091_s1 + $0x110] sm:$0xff]   ;;  %v4608_v49 = vld [vmem:[%s6091_s1 + $0x1d8] sm:$0xff]  }
  0x11   :  { %4088 = vmatpush3.bf16.msra.mxu1 %v4572_v15  ;;  %4061 = vmatprep.subr.bf16.mxu0 %v4573_v16  ;;  %v4601_v42 = vld [vmem:[%s6091_s1 + $0x108] sm:$0xff]   ;;  %v4606_v47 = vld [vmem:[%s6091_s1 + $0x190] sm:$0xff]   ;;  %v4609_v50 = vld [vmem:[%s6091_s1 + $0x118] sm:$0xff]  }
  0x12   :  { %4089 = vmatprep.subr.bf16.mxu1 %v4574_v17  ;;  %v4602_v43 = vld [vmem:[%s6091_s1 + $0x188] sm:$0xff]   ;;  %v4610_v51 = vld [vmem:[%s6091_s1 + $0x198] sm:$0xff]   ;;  %v4612_v53 = vld [vmem:[%s6091_s1 + $0x1e0] sm:$0xff]  }
  0x13   :  { %v4613_v54 = vld [vmem:[%s6091_s1 + $0x120] sm:$0xff]   ;;  %v4615_v56 = vld [vmem:[%s6091_s1 + $0x168] sm:$0xff]   ;;  %v4625_v0 = vld [vmem:[%s6091_s1 + $0x170] sm:$0xff]  }
  0x14   :  { %4062 = vmatpush3.bf16.msra.mxu0 %v4575_v18  ;;  %v4614_v55 = vld [vmem:[%s6091_s1 + $0x1a0] sm:$0xff]   ;;  %v4616_v57 = vld [vmem:[%s6091_s1 + $0x1e8] sm:$0xff]   ;;  %v4626_v1 = vld [vmem:[%s6091_s1 + $0x1f0] sm:$0xff]  }
  0x15   :  { %4090 = vmatpush3.bf16.msra.mxu1 %v4576_v19  ;;  %4063 = vmatprep.subr.bf16.mxu0 %v4577_v20  ;;  %v4617_v58 = vld [vmem:[%s6092_s0 + $0x124] ss:$144 sps:$4 sm:$0xff]   ;;  %v4619_v59 = vld [vmem:[%s6092_s0 + $0x12c] ss:$144 sps:$4 sm:$0xff]   ;;  %v4623_v62 = vld [vmem:[%s6092_s0 + $0x120] ss:$144 sps:$4 sm:$0xff]  }
  0x16   :  { %4091 = vmatprep.subr.bf16.mxu1 %v4578_v21  ;;  %v4621_v60 = vld [vmem:[%s6091_s1 + $0x128] sm:$0xff]   ;;  %v4627_v2 = vld [vmem:[%s6091_s1 + $0x130] sm:$0xff]   ;;  %v4629_v4 = vld [vmem:[%s6091_s1 + $0x178] sm:$0xff]  }
  0x17   :  { %v4622_v61 = vld [vmem:[%s6091_s1 + $0x1a8] sm:$0xff]   ;;  %v4628_v3 = vld [vmem:[%s6091_s1 + $0x1b0] sm:$0xff]   ;;  %v4630_v5 = vld [vmem:[%s6091_s1 + $0x1f8] sm:$0xff]  }
  0x18   :  { %4064 = vmatpush3.bf16.msra.mxu0 %v4579_v22  ;;  %v4624_v63 = vld [vmem:[%s6092_s0 + $0x128] ss:$144 sps:$4 sm:$0xff]   ;;  %v4633_v8 = vld [vmem:[%s6092_s0 + $0x10] ss:$144 sps:$4 sm:$0xff]   ;;  %v4635_v9 = vld [vmem:[%s6092_s0 + $0x14] ss:$144 sps:$4 sm:$0xff]  }
  0x19   :  { %4092 = vmatpush3.bf16.msra.mxu1 %v4580_v23  ;;  %4065 = vmatprep.subr.bf16.mxu0 %v4581_v24  ;;  %v4631_v6 = vld [vmem:[%s6091_s1 + $0x138] sm:$0xff]   ;;  %v4639_v12 = vld [vmem:[%s6091_s1 + $0x240] sm:$0xff]   ;;  %v4643_v16 = vld [vmem:[%s6091_s1 + $0x248] sm:$0xff]  }
  0x1a   :  { %4093 = vmatprep.subr.bf16.mxu1 %v4582_v25  ;;  %v4632_v7 = vld [vmem:[%s6091_s1 + $0x1b8] sm:$0xff]   ;;  %v4640_v13 = vld [vmem:[%s6091_s1 + $0x2c0] sm:$0xff]   ;;  %v4644_v17 = vld [vmem:[%s6091_s1 + $0x2c8] sm:$0xff]  }
  0x1b   :  { %v4636_v10 = vld [vmem:[%s6092_s0 + $0x18] ss:$144 sps:$4 sm:$0xff]   ;;  %v4638_v11 = vld [vmem:[%s6092_s0 + $0x1c] ss:$144 sps:$4 sm:$0xff]   ;;  %v4641_v14 = vld [vmem:[%s6091_s1 + $0x200] sm:$0xff]  }
  0x1c   :  { %4066 = vmatpush3.bf16.msra.mxu0 %v4583_v26  ;;  %v4642_v15 = vld [vmem:[%s6091_s1 + $0x280] sm:$0xff]   ;;  %v4645_v18 = vld [vmem:[%s6091_s1 + $0x208] sm:$0xff]   ;;  %v4650_v22 = vld [vmem:[%s6091_s1 + $0x250] sm:$0xff]  }
  0x1d   :  { %4094 = vmatpush3.bf16.msra.mxu1 %v4584_v27  ;;  %4067 = vmatprep.subr.bf16.mxu0 %v4585_v28  ;;  %v4646_v19 = vld [vmem:[%s6091_s1 + $0x288] sm:$0xff]   ;;  %v4647_v20 = vld [vmem:[%s6092_s0 + $0x134] ss:$144 sps:$4 sm:$0xff]   ;;  %v4649_v21 = vld [vmem:[%s6092_s0 + $0x130] ss:$144 sps:$4 sm:$0xff]  }
  0x1e   :  { %4095 = vmatprep.subr.bf16.mxu1 %v4586_v29  ;;  %v4651_v23 = vld [vmem:[%s6091_s1 + $0x2d0] sm:$0xff]   ;;  %v4652_v24 = vld [vmem:[%s6092_s0 + $0x13c] ss:$144 sps:$4 sm:$0xff]   ;;  %v4656_v27 = vld [vmem:[%s6092_s0 + $0x138] ss:$144 sps:$4 sm:$0xff]  }
  0x1f   :  { %v4654_v25 = vld [vmem:[%s6091_s1 + $0x210] sm:$0xff]   ;;  %v4657_v28 = vld [vmem:[%s6091_s1 + $0x258] sm:$0xff]   ;;  %v4662_v33 = vld [vmem:[%s6091_s1 + $0x2e0] sm:$0xff]  }
  0x20   :  { %4068 = vmatpush3.bf16.msra.mxu0 %v4587_v30  ;;  %v4655_v26 = vld [vmem:[%s6091_s1 + $0x290] sm:$0xff]   ;;  %v4658_v29 = vld [vmem:[%s6091_s1 + $0x2d8] sm:$0xff]   ;;  %v4664_v35 = vld [vmem:[%s6091_s1 + $0x2a0] sm:$0xff]  }
  0x21   :  { %4096 = vmatpush3.bf16.msra.mxu1 %v4588_v31  ;;  %4109 = vmatprep.subr.bf16.mxu0 %v4595_v36  ;;  %v4659_v30 = vld [vmem:[%s6091_s1 + $0x218] sm:$0xff]   ;;  %v4665_v36 = vld [vmem:[%s6091_s1 + $0x268] sm:$0xff]  }
  0x22   :  { %4137 = vmatprep.subr.bf16.mxu1 %v4596_v37  ;;  %v4660_v31 = vld [vmem:[%s6091_s1 + $0x298] sm:$0xff]   ;;  %v4666_v37 = vld [vmem:[%s6091_s1 + $0x2e8] sm:$0xff]  }
  0x23   :  { %2781 = vmatmul.mubr.bf16.vlgmr.msra.gmra.mrb[0].mxu0 %v4589_v32  ;;  %v4661_v32 = vld [vmem:[%s6091_s1 + $0x260] sm:$0xff]  }
  0x24   :  { %2830 = vmatmul.mubr.bf16.vlgmr.msra.gmra.mrb[0].mxu1 %v4592_v34  ;;  %4110 = vmatpush3.bf16.msra.mxu0 %v4597_v38  ;;  %v4663_v34 = vld [vmem:[%s6091_s1 + $0x220] sm:$0xff]   ;;  %v4667_v38 = vld [vmem:[%s6091_s1 + $0x228] sm:$0xff]  }
  0x25   :  { %4138 = vmatpush3.bf16.msra.mxu1 %v4598_v39  ;;  %4111 = vmatprep.subr.bf16.mxu0 %v4599_v40  ;;  %v4668_v39 = vld [vmem:[%s6091_s1 + $0x2a8] sm:$0xff]   ;;  %v4669_v40 = vld [vmem:[%s6091_s1 + $0x270] sm:$0xff]  }
  0x26   :  { %4139 = vmatprep.subr.bf16.mxu1 %v4600_v41  ;;  %2788 = vmatprep.mubr.bf16.mxu0 %v4617_v58  ;;  %v4670_v41 = vld [vmem:[%s6091_s1 + $0x2f0] sm:$0xff]   ;;  %v4689_v58 = vld [vmem:[%s6091_s1 + $0x308] sm:$0xff]  }
  0x27   :  { %2837 = vmatprep.mubr.bf16.mxu1 %v4619_v59  ;;  %v4690_v59 = vld [vmem:[%s6091_s1 + $0x388] sm:$0xff]  }
  0x28   :  { %4112 = vmatpush3.bf16.msra.mxu0 %v4601_v42  ;;  %v4671_v42 = vld [vmem:[%s6091_s1 + $0x230] sm:$0xff]  }
  0x29   :  { %4140 = vmatpush3.bf16.msra.mxu1 %v4602_v43  ;;  %4113 = vmatprep.subr.bf16.mxu0 %v4603_v44  ;;  %v4672_v43 = vld [vmem:[%s6091_s1 + $0x2b0] sm:$0xff]   ;;  %v4673_v44 = vld [vmem:[%s6091_s1 + $0x278] sm:$0xff]  }
  0x2a   :  { %4141 = vmatprep.subr.bf16.mxu1 %v4604_v45  ;;  %v4674_v45 = vld [vmem:[%s6091_s1 + $0x2f8] sm:$0xff]  }
  0x2b   :  { %2789 = vmatmul.mubr.bf16.gmra.mrb[4].mxu0 %v4623_v62  ;;  %v4694_v62 = vld [vmem:[%s6091_s1 + $0x350] sm:$0xff]  }
  0x2c   :  { %4114 = vmatpush3.bf16.msra.mxu0 %v4605_v46  ;;  %2838 = vmatmul.mubr.bf16.gmra.mrb[4].mxu1 %v4624_v63  ;;  %v4675_v46 = vld [vmem:[%s6091_s1 + $0x238] sm:$0xff]   ;;  %v4695_v63 = vld [vmem:[%s6091_s1 + $0x3d0] sm:$0xff]  }
  0x2d   :  { %4142 = vmatpush3.bf16.msra.mxu1 %v4606_v47  ;;  %4115 = vmatprep.subr.bf16.mxu0 %v4607_v48  ;;  %v4676_v47 = vld [vmem:[%s6091_s1 + $0x2b8] sm:$0xff]   ;;  %v4677_v48 = vld [vmem:[%s6092_s0 + $0x20] ss:$144 sps:$4 sm:$0xff]  }
  0x2e   :  { %4143 = vmatprep.subr.bf16.mxu1 %v4608_v49  ;;  %2878 = vmatprep.mubr.bf16.mxu0 %v4635_v9  ;;  %v4679_v49 = vld [vmem:[%s6092_s0 + $0x24] ss:$144 sps:$4 sm:$0xff]  }
  0x2f   :  { %2927 = vmatprep.mubr.bf16.mxu1 %v4638_v11  ;;  %v4706_v9 = vld [vmem:[%s6091_s1 + $0x3e0] sm:$0xff]  }
  0x30   :  { %4116 = vmatpush3.bf16.msra.mxu0 %v4609_v50  ;;  %v4680_v50 = vld [vmem:[%s6092_s0 + $0x28] ss:$144 sps:$4 sm:$0xff]   ;;  %v4708_v11 = vld [vmem:[%s6091_s1 + $0x3a0] sm:$0xff]  }
  0x31   :  { %4144 = vmatpush3.bf16.msra.mxu1 %v4610_v51  ;;  %4117 = vmatprep.subr.bf16.mxu0 %v4611_v52  ;;  %v4682_v51 = vld [vmem:[%s6092_s0 + $0x2c] ss:$144 sps:$4 sm:$0xff]   ;;  %v4683_v52 = vld [vmem:[%s6091_s1 + $0x340] sm:$0xff]  }
  0x32   :  { %4145 = vmatprep.subr.bf16.mxu1 %v4612_v53  ;;  %v4684_v53 = vld [vmem:[%s6091_s1 + $0x3c0] sm:$0xff]  }
  0x34   :  { %4118 = vmatpush3.bf16.msra.mxu0 %v4613_v54  ;;  %v4685_v54 = vld [vmem:[%s6091_s1 + $0x300] sm:$0xff]  }
  0x35   :  { %4146 = vmatpush3.bf16.msra.mxu1 %v4614_v55  ;;  %4119 = vmatprep.subr.bf16.mxu0 %v4615_v56  ;;  %v4686_v55 = vld [vmem:[%s6091_s1 + $0x380] sm:$0xff]   ;;  %v4687_v56 = vld [vmem:[%s6091_s1 + $0x348] sm:$0xff]  }
  0x36   :  { %4147 = vmatprep.subr.bf16.mxu1 %v4616_v57  ;;  %v4688_v57 = vld [vmem:[%s6091_s1 + $0x3c8] sm:$0xff]  }
  0x38   :  { %4120 = vmatpush3.bf16.msra.mxu0 %v4621_v60  ;;  %v4691_v60 = vld [vmem:[%s6092_s0 + $0x144] ss:$144 sps:$4 sm:$0xff]  }
  0x39   :  { %4148 = vmatpush3.bf16.msra.mxu1 %v4622_v61  ;;  %4121 = vmatprep.subr.bf16.mxu0 %v4625_v0  ;;  %v4693_v61 = vld [vmem:[%s6092_s0 + $0x140] ss:$144 sps:$4 sm:$0xff]   ;;  %v4696_v0 = vld [vmem:[%s6092_s0 + $0x14c] ss:$144 sps:$4 sm:$0xff]  }
  0x3a   :  { %4149 = vmatprep.subr.bf16.mxu1 %v4626_v1  ;;  %v4698_v1 = vld [vmem:[%s6091_s1 + $0x310] sm:$0xff]  }
  0x3c   :  { %4122 = vmatpush3.bf16.msra.mxu0 %v4627_v2  ;;  %v4699_v2 = vld [vmem:[%s6091_s1 + $0x390] sm:$0xff]  }
  0x3d   :  { %4150 = vmatpush3.bf16.msra.mxu1 %v4628_v3  ;;  %4123 = vmatprep.subr.bf16.mxu0 %v4629_v4  ;;  %v4700_v3 = vld [vmem:[%s6092_s0 + $0x148] ss:$144 sps:$4 sm:$0xff]  }
  0x3e   :  { %4151 = vmatprep.subr.bf16.mxu1 %v4630_v5  ;;  %v4701_v4 = vld [vmem:[%s6091_s1 + $0x358] sm:$0xff]  }
  0x3f   :  { %v4702_v5 = vld [vmem:[%s6091_s1 + $0x3d8] sm:$0xff]  }
  0x40   :  { %4124 = vmatpush3.bf16.msra.mxu0 %v4631_v6  ;;  %v4703_v6 = vld [vmem:[%s6091_s1 + $0x318] sm:$0xff]  }
  0x41   :  { %4152 = vmatpush3.bf16.msra.mxu1 %v4632_v7  ;;  %4165 = vmatprep.subr.bf16.mxu0 %v4639_v12  ;;  %v4704_v7 = vld [vmem:[%s6091_s1 + $0x398] sm:$0xff]   ;;  %v4709_v12 = vld [vmem:[%s6091_s1 + $0x368] sm:$0xff]  }
  0x42   :  { %4193 = vmatprep.subr.bf16.mxu1 %v4640_v13  ;;  %v4710_v13 = vld [vmem:[%s6091_s1 + $0x3e8] sm:$0xff]  }
  0x43   :  { %2879 = vmatmul.mubr.bf16.vlgmr.msra.gmra.mrb[8].mxu0 %v4633_v8  ;;  %v4705_v8 = vld [vmem:[%s6091_s1 + $0x360] sm:$0xff]  }
  0x44   :  { %2928 = vmatmul.mubr.bf16.vlgmr.msra.gmra.mrb[8].mxu1 %v4636_v10  ;;  %4166 = vmatpush3.bf16.msra.mxu0 %v4641_v14  ;;  %v4707_v10 = vld [vmem:[%s6091_s1 + $0x320] sm:$0xff]   ;;  %v4711_v14 = vld [vmem:[%s6091_s1 + $0x328] sm:$0xff]  }
  0x45   :  { %4194 = vmatpush3.bf16.msra.mxu1 %v4642_v15  ;;  %4167 = vmatprep.subr.bf16.mxu0 %v4643_v16  ;;  %v4712_v15 = vld [vmem:[%s6091_s1 + $0x3a8] sm:$0xff]   ;;  %v4713_v16 = vld [vmem:[%s6091_s1 + $0x370] sm:$0xff]  }
  0x46   :  { %4195 = vmatprep.subr.bf16.mxu1 %v4644_v17  ;;  %2886 = vmatprep.mubr.bf16.mxu0 %v4647_v20  ;;  %v4714_v17 = vld [vmem:[%s6091_s1 + $0x3f0] sm:$0xff]   ;;  %v4717_v20 = vld [vmem:[%s6091_s1 + $0x378] sm:$0xff]  }
  0x47   :  { %2935 = vmatprep.mubr.bf16.mxu1 %v4652_v24  ;;  %v4721_v24 = vld [vmem:[%s6092_s0 + $0x30] ss:$144 sps:$4 sm:$0xff]  }
  0x48   :  { %4168 = vmatpush3.bf16.msra.mxu0 %v4645_v18  ;;  %v4715_v18 = vld [vmem:[%s6091_s1 + $0x330] sm:$0xff]  }
  0x49   :  { %4196 = vmatpush3.bf16.msra.mxu1 %v4646_v19  ;;  %4169 = vmatprep.subr.bf16.mxu0 %v4650_v22  ;;  %v4716_v19 = vld [vmem:[%s6091_s1 + $0x3b0] sm:$0xff]   ;;  %v4719_v22 = vld [vmem:[%s6091_s1 + $0x338] sm:$0xff]  }
  0x4a   :  { %4197 = vmatprep.subr.bf16.mxu1 %v4651_v23  ;;  %v4720_v23 = vld [vmem:[%s6091_s1 + $0x3b8] sm:$0xff]  }
  0x4b   :  { %2887 = vmatmul.mubr.bf16.gmra.mrb[12].mxu0 %v4649_v21  ;;  %v4718_v21 = vld [vmem:[%s6091_s1 + $0x3f8] sm:$0xff]  }
  0x4c   :  { %4170 = vmatpush3.bf16.msra.mxu0 %v4654_v25  ;;  %2936 = vmatmul.mubr.bf16.gmra.mrb[12].mxu1 %v4656_v27  ;;  %v4723_v25 = vld [vmem:[%s6092_s0 + $0x34] ss:$144 sps:$4 sm:$0xff]   ;;  %v4726_v27 = vld [vmem:[%s6092_s0 + $0x3c] ss:$144 sps:$4 sm:$0xff]  }
  0x4d   :  { %4198 = vmatpush3.bf16.msra.mxu1 %v4655_v26  ;;  %4171 = vmatprep.subr.bf16.mxu0 %v4657_v28  ;;  %v4724_v26 = vld [vmem:[%s6092_s0 + $0x38] ss:$144 sps:$4 sm:$0xff]   ;;  %v4727_v28 = vld [vmem:[%s6091_s1 + $0x440] sm:$0xff]  }
  0x4e   :  { %4199 = vmatprep.subr.bf16.mxu1 %v4658_v29  ;;  %2976 = vmatprep.mubr.bf16.mxu0 %v4679_v49  ;;  %v4728_v29 = vld [vmem:[%s6091_s1 + $0x4c0] sm:$0xff]  }
  0x4f   :  { %3025 = vmatprep.mubr.bf16.mxu1 %v4682_v51  ;;  %v4750_v49 = vld [vmem:[%s6091_s1 + $0x4e0] sm:$0xff]  }
  0x50   :  { %4172 = vmatpush3.bf16.msra.mxu0 %v4659_v30  ;;  %v4729_v30 = vld [vmem:[%s6091_s1 + $0x400] sm:$0xff]  }
  0x51   :  { %4200 = vmatpush3.bf16.msra.mxu1 %v4660_v31  ;;  %4173 = vmatprep.subr.bf16.mxu0 %v4661_v32  ;;  %v4730_v31 = vld [vmem:[%s6091_s1 + $0x480] sm:$0xff]   ;;  %v4731_v32 = vld [vmem:[%s6091_s1 + $0x448] sm:$0xff]  }
  0x52   :  { %4201 = vmatprep.subr.bf16.mxu1 %v4662_v33  ;;  %v4732_v33 = vld [vmem:[%s6091_s1 + $0x4c8] sm:$0xff]   ;;  %v4752_v51 = vld [vmem:[%s6091_s1 + $0x4a0] sm:$0xff]  }
  0x54   :  { %4174 = vmatpush3.bf16.msra.mxu0 %v4663_v34  ;;  %v4733_v34 = vld [vmem:[%s6091_s1 + $0x408] sm:$0xff]  }
  0x55   :  { %4202 = vmatpush3.bf16.msra.mxu1 %v4664_v35  ;;  %4175 = vmatprep.subr.bf16.mxu0 %v4665_v36  ;;  %v4734_v35 = vld [vmem:[%s6091_s1 + $0x488] sm:$0xff]   ;;  %v4735_v36 = vld [vmem:[%s6092_s0 + $0x154] ss:$144 sps:$4 sm:$0xff]  }
  0x56   :  { %4203 = vmatprep.subr.bf16.mxu1 %v4666_v37  ;;  %v4737_v37 = vld [vmem:[%s6092_s0 + $0x150] ss:$144 sps:$4 sm:$0xff]  }
  0x58   :  { %4176 = vmatpush3.bf16.msra.mxu0 %v4667_v38  ;;  %v4738_v38 = vld [vmem:[%s6091_s1 + $0x450] sm:$0xff]  }
  0x59   :  { %4204 = vmatpush3.bf16.msra.mxu1 %v4668_v39  ;;  %4177 = vmatprep.subr.bf16.mxu0 %v4669_v40  ;;  %v4739_v39 = vld [vmem:[%s6091_s1 + $0x4d0] sm:$0xff]   ;;  %v4740_v40 = vld [vmem:[%s6092_s0 + $0x15c] ss:$144 sps:$4 sm:$0xff]  }
  0x5a   :  { %4205 = vmatprep.subr.bf16.mxu1 %v4670_v41  ;;  %v4742_v41 = vld [vmem:[%s6091_s1 + $0x410] sm:$0xff]  }
  0x5c   :  { %4178 = vmatpush3.bf16.msra.mxu0 %v4671_v42  ;;  %v4743_v42 = vld [vmem:[%s6091_s1 + $0x490] sm:$0xff]  }
  0x5d   :  { %4206 = vmatpush3.bf16.msra.mxu1 %v4672_v43  ;;  %4179 = vmatprep.subr.bf16.mxu0 %v4673_v44  ;;  %v4744_v43 = vld [vmem:[%s6092_s0 + $0x158] ss:$144 sps:$4 sm:$0xff]  }
  0x5e   :  { %4207 = vmatprep.subr.bf16.mxu1 %v4674_v45  ;;  %v4745_v44 = vld [vmem:[%s6091_s1 + $0x458] sm:$0xff]  }
  0x5f   :  { %v4746_v45 = vld [vmem:[%s6091_s1 + $0x4d8] sm:$0xff]  }
  0x60   :  { %4180 = vmatpush3.bf16.msra.mxu0 %v4675_v46  ;;  %v4747_v46 = vld [vmem:[%s6091_s1 + $0x418] sm:$0xff]  }
  0x61   :  { %4208 = vmatpush3.bf16.msra.mxu1 %v4676_v47  ;;  %4221 = vmatprep.subr.bf16.mxu0 %v4683_v52  ;;  %v4748_v47 = vld [vmem:[%s6091_s1 + $0x498] sm:$0xff]   ;;  %v4753_v52 = vld [vmem:[%s6091_s1 + $0x468] sm:$0xff]  }
  0x62   :  { %4249 = vmatprep.subr.bf16.mxu1 %v4684_v53  ;;  %v4754_v53 = vld [vmem:[%s6091_s1 + $0x4e8] sm:$0xff]  }
  0x63   :  { %2977 = vmatmul.mubr.bf16.vlgmr.msra.gmra.mrb[16].mxu0 %v4677_v48  ;;  %v4749_v48 = vld [vmem:[%s6091_s1 + $0x460] sm:$0xff]  }
  0x64   :  { %3026 = vmatmul.mubr.bf16.vlgmr.msra.gmra.mrb[16].mxu1 %v4680_v50  ;;  %4222 = vmatpush3.bf16.msra.mxu0 %v4685_v54  ;;  %v4751_v50 = vld [vmem:[%s6091_s1 + $0x420] sm:$0xff]   ;;  %v4755_v54 = vld [vmem:[%s6091_s1 + $0x428] sm:$0xff]  }
  0x65   :  { %4250 = vmatpush3.bf16.msra.mxu1 %v4686_v55  ;;  %4223 = vmatprep.subr.bf16.mxu0 %v4687_v56  ;;  %v4756_v55 = vld [vmem:[%s6091_s1 + $0x4a8] sm:$0xff]   ;;  %v4757_v56 = vld [vmem:[%s6091_s1 + $0x470] sm:$0xff]  }
  0x66   :  { %4251 = vmatprep.subr.bf16.mxu1 %v4688_v57  ;;  %2984 = vmatprep.mubr.bf16.mxu0 %v4691_v60  ;;  %v4758_v57 = vld [vmem:[%s6091_s1 + $0x4f0] sm:$0xff]   ;;  %v4761_v60 = vld [vmem:[%s6091_s1 + $0x478] sm:$0xff]  }
  0x67   :  { %3033 = vmatprep.mubr.bf16.mxu1 %v4696_v0  ;;  %v4765_v0 = vld [vmem:[%s6092_s0 + $0x40] ss:$144 sps:$4 sm:$0xff]  }
  0x68   :  { %4224 = vmatpush3.bf16.msra.mxu0 %v4689_v58  ;;  %v4759_v58 = vld [vmem:[%s6091_s1 + $0x430] sm:$0xff]  }
  0x69   :  { %4252 = vmatpush3.bf16.msra.mxu1 %v4690_v59  ;;  %4225 = vmatprep.subr.bf16.mxu0 %v4694_v62  ;;  %v4760_v59 = vld [vmem:[%s6091_s1 + $0x4b0] sm:$0xff]   ;;  %v4763_v62 = vld [vmem:[%s6091_s1 + $0x438] sm:$0xff]  }
  0x6a   :  { %4253 = vmatprep.subr.bf16.mxu1 %v4695_v63  ;;  %v4764_v63 = vld [vmem:[%s6091_s1 + $0x4b8] sm:$0xff]  }
  0x6b   :  { %2985 = vmatmul.mubr.bf16.gmra.mrb[20].mxu0 %v4693_v61  ;;  %v4762_v61 = vld [vmem:[%s6091_s1 + $0x4f8] sm:$0xff]  }
  0x6c   :  { %4226 = vmatpush3.bf16.msra.mxu0 %v4698_v1  ;;  %3034 = vmatmul.mubr.bf16.gmra.mrb[20].mxu1 %v4700_v3  ;;  %v4767_v1 = vld [vmem:[%s6092_s0 + $0x44] ss:$144 sps:$4 sm:$0xff]   ;;  %v4770_v3 = vld [vmem:[%s6092_s0 + $0x4c] ss:$144 sps:$4 sm:$0xff]  }
  0x6d   :  { %4254 = vmatpush3.bf16.msra.mxu1 %v4699_v2  ;;  %4227 = vmatprep.subr.bf16.mxu0 %v4701_v4  ;;  %v4768_v2 = vld [vmem:[%s6092_s0 + $0x48] ss:$144 sps:$4 sm:$0xff]   ;;  %v4771_v4 = vld [vmem:[%s6091_s1 + $0x540] sm:$0xff]  }
  0x6e   :  { %4255 = vmatprep.subr.bf16.mxu1 %v4702_v5  ;;  %3074 = vmatprep.mubr.bf16.mxu0 %v4723_v25  ;;  %v4772_v5 = vld [vmem:[%s6091_s1 + $0x5c0] sm:$0xff]  }
  0x6f   :  { %3123 = vmatprep.mubr.bf16.mxu1 %v4726_v27  ;;  %v4794_v25 = vld [vmem:[%s6091_s1 + $0x5e0] sm:$0xff]  }
  0x70   :  { %4228 = vmatpush3.bf16.msra.mxu0 %v4703_v6  ;;  %v4773_v6 = vld [vmem:[%s6091_s1 + $0x500] sm:$0xff]  }
  0x71   :  { %4256 = vmatpush3.bf16.msra.mxu1 %v4704_v7  ;;  %4229 = vmatprep.subr.bf16.mxu0 %v4705_v8  ;;  %v4774_v7 = vld [vmem:[%s6091_s1 + $0x580] sm:$0xff]   ;;  %v4775_v8 = vld [vmem:[%s6091_s1 + $0x548] sm:$0xff]  }
  0x72   :  { %4257 = vmatprep.subr.bf16.mxu1 %v4706_v9  ;;  %v4776_v9 = vld [vmem:[%s6091_s1 + $0x5c8] sm:$0xff]   ;;  %v4796_v27 = vld [vmem:[%s6091_s1 + $0x5a0] sm:$0xff]  }
  0x74   :  { %4230 = vmatpush3.bf16.msra.mxu0 %v4707_v10  ;;  %v4777_v10 = vld [vmem:[%s6091_s1 + $0x508] sm:$0xff]  }
  0x75   :  { %4258 = vmatpush3.bf16.msra.mxu1 %v4708_v11  ;;  %4231 = vmatprep.subr.bf16.mxu0 %v4709_v12  ;;  %v4778_v11 = vld [vmem:[%s6091_s1 + $0x588] sm:$0xff]   ;;  %v4779_v12 = vld [vmem:[%s6092_s0 + $0x164] ss:$144 sps:$4 sm:$0xff]  }
  0x76   :  { %4259 = vmatprep.subr.bf16.mxu1 %v4710_v13  ;;  %v4781_v13 = vld [vmem:[%s6092_s0 + $0x160] ss:$144 sps:$4 sm:$0xff]  }
  0x78   :  { %4232 = vmatpush3.bf16.msra.mxu0 %v4711_v14  ;;  %v4782_v14 = vld [vmem:[%s6091_s1 + $0x550] sm:$0xff]  }
  0x79   :  { %4260 = vmatpush3.bf16.msra.mxu1 %v4712_v15  ;;  %4233 = vmatprep.subr.bf16.mxu0 %v4713_v16  ;;  %v4783_v15 = vld [vmem:[%s6091_s1 + $0x5d0] sm:$0xff]   ;;  %v4784_v16 = vld [vmem:[%s6092_s0 + $0x16c] ss:$144 sps:$4 sm:$0xff]  }
  0x7a   :  { %4261 = vmatprep.subr.bf16.mxu1 %v4714_v17  ;;  %v4786_v17 = vld [vmem:[%s6091_s1 + $0x510] sm:$0xff]  }
  0x7c   :  { %4234 = vmatpush3.bf16.msra.mxu0 %v4715_v18  ;;  %v4787_v18 = vld [vmem:[%s6091_s1 + $0x590] sm:$0xff]  }
  0x7d   :  { %4262 = vmatpush3.bf16.msra.mxu1 %v4716_v19  ;;  %4235 = vmatprep.subr.bf16.mxu0 %v4717_v20  ;;  %v4788_v19 = vld [vmem:[%s6092_s0 + $0x168] ss:$144 sps:$4 sm:$0xff]  }
  0x7e   :  { %4263 = vmatprep.subr.bf16.mxu1 %v4718_v21  ;;  %v4789_v20 = vld [vmem:[%s6091_s1 + $0x558] sm:$0xff]  }
  0x7f   :  { %v4790_v21 = vld [vmem:[%s6091_s1 + $0x5d8] sm:$0xff]  }
  0x80   :  { %4236 = vmatpush3.bf16.msra.mxu0 %v4719_v22  ;;  %v4791_v22 = vld [vmem:[%s6091_s1 + $0x518] sm:$0xff]  }
  0x81   :  { %4264 = vmatpush3.bf16.msra.mxu1 %v4720_v23  ;;  %4277 = vmatprep.subr.bf16.mxu0 %v4727_v28  ;;  %v4792_v23 = vld [vmem:[%s6091_s1 + $0x598] sm:$0xff]   ;;  %v4797_v28 = vld [vmem:[%s6091_s1 + $0x568] sm:$0xff]  }
  0x82   :  { %4305 = vmatprep.subr.bf16.mxu1 %v4728_v29  ;;  %v4798_v29 = vld [vmem:[%s6091_s1 + $0x5e8] sm:$0xff]  }
  0x83   :  { %3075 = vmatmul.mubr.bf16.vlgmr.msra.gmra.mrb[24].mxu0 %v4721_v24  ;;  %v4793_v24 = vld [vmem:[%s6091_s1 + $0x560] sm:$0xff]  }
  0x84   :  { %3124 = vmatmul.mubr.bf16.vlgmr.msra.gmra.mrb[24].mxu1 %v4724_v26  ;;  %4278 = vmatpush3.bf16.msra.mxu0 %v4729_v30  ;;  %v4795_v26 = vld [vmem:[%s6091_s1 + $0x520] sm:$0xff]   ;;  %v4799_v30 = vld [vmem:[%s6091_s1 + $0x528] sm:$0xff]  }
  0x85   :  { %4306 = vmatpush3.bf16.msra.mxu1 %v4730_v31  ;;  %4279 = vmatprep.subr.bf16.mxu0 %v4731_v32  ;;  %v4800_v31 = vld [vmem:[%s6091_s1 + $0x5a8] sm:$0xff]   ;;  %v4801_v32 = vld [vmem:[%s6091_s1 + $0x570] sm:$0xff]  }
  0x86   :  { %4307 = vmatprep.subr.bf16.mxu1 %v4732_v33  ;;  %3082 = vmatprep.mubr.bf16.mxu0 %v4735_v36  ;;  %v4802_v33 = vld [vmem:[%s6091_s1 + $0x5f0] sm:$0xff]   ;;  %v4805_v36 = vld [vmem:[%s6091_s1 + $0x578] sm:$0xff]  }
  0x87   :  { %3131 = vmatprep.mubr.bf16.mxu1 %v4740_v40  ;;  %v4809_v40 = vld [vmem:[%s6092_s0 + $0x50] ss:$144 sps:$4 sm:$0xff]  }
  0x88   :  { %4280 = vmatpush3.bf16.msra.mxu0 %v4733_v34  ;;  %v4803_v34 = vld [vmem:[%s6091_s1 + $0x530] sm:$0xff]  }
  0x89   :  { %4308 = vmatpush3.bf16.msra.mxu1 %v4734_v35  ;;  %4281 = vmatprep.subr.bf16.mxu0 %v4738_v38  ;;  %v4804_v35 = vld [vmem:[%s6091_s1 + $0x5b0] sm:$0xff]   ;;  %v4807_v38 = vld [vmem:[%s6091_s1 + $0x538] sm:$0xff]  }
  0x8a   :  { %4309 = vmatprep.subr.bf16.mxu1 %v4739_v39  ;;  %v4808_v39 = vld [vmem:[%s6091_s1 + $0x5b8] sm:$0xff]  }
  0x8b   :  { %3083 = vmatmul.mubr.bf16.gmra.mrb[28].mxu0 %v4737_v37  ;;  %v4806_v37 = vld [vmem:[%s6091_s1 + $0x5f8] sm:$0xff]  }
  0x8c   :  { %4282 = vmatpush3.bf16.msra.mxu0 %v4742_v41  ;;  %3132 = vmatmul.mubr.bf16.gmra.mrb[28].mxu1 %v4744_v43  ;;  %v4811_v41 = vld [vmem:[%s6092_s0 + $0x54] ss:$144 sps:$4 sm:$0xff]   ;;  %v4814_v43 = vld [vmem:[%s6092_s0 + $0x5c] ss:$144 sps:$4 sm:$0xff]  }
  0x8d   :  { %4310 = vmatpush3.bf16.msra.mxu1 %v4743_v42  ;;  %4283 = vmatprep.subr.bf16.mxu0 %v4745_v44  ;;  %v4812_v42 = vld [vmem:[%s6092_s0 + $0x58] ss:$144 sps:$4 sm:$0xff]   ;;  %v4815_v44 = vld [vmem:[%s6091_s1 + $0x640] sm:$0xff]  }
  0x8e   :  { %4311 = vmatprep.subr.bf16.mxu1 %v4746_v45  ;;  %3172 = vmatprep.mubr.bf16.mxu0 %v4767_v1  ;;  %v4816_v45 = vld [vmem:[%s6091_s1 + $0x6c0] sm:$0xff]  }
  0x8f   :  { %3221 = vmatprep.mubr.bf16.mxu1 %v4770_v3  ;;  %v4838_v1 = vld [vmem:[%s6091_s1 + $0x6e0] sm:$0xff]  }
  0x90   :  { %4284 = vmatpush3.bf16.msra.mxu0 %v4747_v46  ;;  %v4817_v46 = vld [vmem:[%s6091_s1 + $0x600] sm:$0xff]  }
  0x91   :  { %4312 = vmatpush3.bf16.msra.mxu1 %v4748_v47  ;;  %4285 = vmatprep.subr.bf16.mxu0 %v4749_v48  ;;  %v4818_v47 = vld [vmem:[%s6091_s1 + $0x680] sm:$0xff]   ;;  %v4819_v48 = vld [vmem:[%s6091_s1 + $0x648] sm:$0xff]  }
  0x92   :  { %4313 = vmatprep.subr.bf16.mxu1 %v4750_v49  ;;  %v4820_v49 = vld [vmem:[%s6091_s1 + $0x6c8] sm:$0xff]   ;;  %v4840_v3 = vld [vmem:[%s6091_s1 + $0x6a0] sm:$0xff]  }
  0x94   :  { %4286 = vmatpush3.bf16.msra.mxu0 %v4751_v50  ;;  %v4821_v50 = vld [vmem:[%s6091_s1 + $0x608] sm:$0xff]  }
  0x95   :  { %4314 = vmatpush3.bf16.msra.mxu1 %v4752_v51  ;;  %4287 = vmatprep.subr.bf16.mxu0 %v4753_v52  ;;  %v4822_v51 = vld [vmem:[%s6091_s1 + $0x688] sm:$0xff]   ;;  %v4823_v52 = vld [vmem:[%s6092_s0 + $0x174] ss:$144 sps:$4 sm:$0xff]  }
  0x96   :  { %4315 = vmatprep.subr.bf16.mxu1 %v4754_v53  ;;  %v4825_v53 = vld [vmem:[%s6092_s0 + $0x170] ss:$144 sps:$4 sm:$0xff]  }
  0x98   :  { %4288 = vmatpush3.bf16.msra.mxu0 %v4755_v54  ;;  %v4826_v54 = vld [vmem:[%s6091_s1 + $0x650] sm:$0xff]  }
  0x99   :  { %4316 = vmatpush3.bf16.msra.mxu1 %v4756_v55  ;;  %4289 = vmatprep.subr.bf16.mxu0 %v4757_v56  ;;  %v4827_v55 = vld [vmem:[%s6091_s1 + $0x6d0] sm:$0xff]   ;;  %v4828_v56 = vld [vmem:[%s6092_s0 + $0x17c] ss:$144 sps:$4 sm:$0xff]  }
  0x9a   :  { %4317 = vmatprep.subr.bf16.mxu1 %v4758_v57  ;;  %v4830_v57 = vld [vmem:[%s6091_s1 + $0x610] sm:$0xff]  }
  0x9c   :  { %4290 = vmatpush3.bf16.msra.mxu0 %v4759_v58  ;;  %v4831_v58 = vld [vmem:[%s6091_s1 + $0x690] sm:$0xff]  }
  0x9d   :  { %4318 = vmatpush3.bf16.msra.mxu1 %v4760_v59  ;;  %4291 = vmatprep.subr.bf16.mxu0 %v4761_v60  ;;  %v4832_v59 = vld [vmem:[%s6092_s0 + $0x178] ss:$144 sps:$4 sm:$0xff]  }
  0x9e   :  { %4319 = vmatprep.subr.bf16.mxu1 %v4762_v61  ;;  %v4833_v60 = vld [vmem:[%s6091_s1 + $0x658] sm:$0xff]  }
  0x9f   :  { %v4834_v61 = vld [vmem:[%s6091_s1 + $0x6d8] sm:$0xff]  }
  0xa0   :  { %4292 = vmatpush3.bf16.msra.mxu0 %v4763_v62  ;;  %v4835_v62 = vld [vmem:[%s6091_s1 + $0x618] sm:$0xff]  }
  0xa1   :  { %4320 = vmatpush3.bf16.msra.mxu1 %v4764_v63  ;;  %4333 = vmatprep.subr.bf16.mxu0 %v4771_v4  ;;  %v4836_v63 = vld [vmem:[%s6091_s1 + $0x698] sm:$0xff]   ;;  %v4841_v4 = vld [vmem:[%s6091_s1 + $0x668] sm:$0xff]  }
  0xa2   :  { %4361 = vmatprep.subr.bf16.mxu1 %v4772_v5  ;;  %v4842_v5 = vld [vmem:[%s6091_s1 + $0x6e8] sm:$0xff]  }
  0xa3   :  { %3173 = vmatmul.mubr.bf16.vlgmr.msra.gmra.mrb[32].mxu0 %v4765_v0  ;;  %v4837_v0 = vld [vmem:[%s6091_s1 + $0x660] sm:$0xff]  }
  0xa4   :  { %3222 = vmatmul.mubr.bf16.vlgmr.msra.gmra.mrb[32].mxu1 %v4768_v2  ;;  %4334 = vmatpush3.bf16.msra.mxu0 %v4773_v6  ;;  %v4839_v2 = vld [vmem:[%s6091_s1 + $0x620] sm:$0xff]   ;;  %v4843_v6 = vld [vmem:[%s6091_s1 + $0x628] sm:$0xff]  }
  0xa5   :  { %4362 = vmatpush3.bf16.msra.mxu1 %v4774_v7  ;;  %4335 = vmatprep.subr.bf16.mxu0 %v4775_v8  ;;  %v4844_v7 = vld [vmem:[%s6091_s1 + $0x6a8] sm:$0xff]  }
  0xa6   :  { %4363 = vmatprep.subr.bf16.mxu1 %v4776_v9  ;;  %3180 = vmatprep.mubr.bf16.mxu0 %v4779_v12  ;;  %v4845_v9 = vld [vmem:[%s6091_s1 + $0x670] sm:$0xff]  }
  0xa7   :  { %3229 = vmatprep.mubr.bf16.mxu1 %v4784_v16  ;;  %v4848_v16 = vld [vmem:[%s6091_s1 + $0x6b0] sm:$0xff]  }
  0xa8   :  { %4336 = vmatpush3.bf16.msra.mxu0 %v4777_v10 }
  0xa9   :  { %4364 = vmatpush3.bf16.msra.mxu1 %v4778_v11  ;;  %4337 = vmatprep.subr.bf16.mxu0 %v4782_v14  ;;  %v4846_v11 = vld [vmem:[%s6091_s1 + $0x6f0] sm:$0xff]  }
  0xaa   :  { %4365 = vmatprep.subr.bf16.mxu1 %v4783_v15 }
  0xab   :  { %3181 = vmatmul.mubr.bf16.gmra.mrb[36].mxu0 %v4781_v13  ;;  %v4847_v13 = vld [vmem:[%s6091_s1 + $0x630] sm:$0xff]  }
  0xac   :  { %4338 = vmatpush3.bf16.msra.mxu0 %v4786_v17  ;;  %3230 = vmatmul.mubr.bf16.gmra.mrb[36].mxu1 %v4788_v19  ;;  %v4849_v19 = vld [vmem:[%s6091_s1 + $0x678] sm:$0xff]  }
  0xad   :  { %4366 = vmatpush3.bf16.msra.mxu1 %v4787_v18  ;;  %4339 = vmatprep.subr.bf16.mxu0 %v4789_v20 }
  0xae   :  { %4367 = vmatprep.subr.bf16.mxu1 %v4790_v21  ;;  %3270 = vmatprep.mubr.bf16.mxu0 %v4811_v41  ;;  %v4850_v21 = vld [vmem:[%s6091_s1 + $0x6f8] sm:$0xff]   ;;  %v4866_v41 = vld [vmem:[%s6091_s1 + $0x788] sm:$0xff]  }
  0xaf   :  { %3319 = vmatprep.mubr.bf16.mxu1 %v4814_v43  ;;  %v4869_v43 = vld [vmem:[%s6092_s0 + $0x180] ss:$144 sps:$4 sm:$0xff]  }
  0xb0   :  { %4340 = vmatpush3.bf16.msra.mxu0 %v4791_v22 }
  0xb1   :  { %4368 = vmatpush3.bf16.msra.mxu1 %v4792_v23  ;;  %4341 = vmatprep.subr.bf16.mxu0 %v4793_v24  ;;  %v4851_v24 = vld [vmem:[%s6091_s1 + $0x638] sm:$0xff]  }
  0xb2   :  { %4369 = vmatprep.subr.bf16.mxu1 %v4794_v25 }
  0xb4   :  { %4342 = vmatpush3.bf16.msra.mxu0 %v4795_v26 }
  0xb5   :  { %4370 = vmatpush3.bf16.msra.mxu1 %v4796_v27  ;;  %4343 = vmatprep.subr.bf16.mxu0 %v4797_v28  ;;  %v4852_v27 = vld [vmem:[%s6091_s1 + $0x6b8] sm:$0xff]  }
  0xb6   :  { %4371 = vmatprep.subr.bf16.mxu1 %v4798_v29  ;;  %v4853_v29 = vld [vmem:[%s6092_s0 + $0x60] ss:$144 sps:$4 sm:$0xff]  }
  0xb8   :  { %4344 = vmatpush3.bf16.msra.mxu0 %v4799_v30  ;;  %v4855_v30 = vld [vmem:[%s6092_s0 + $0x64] ss:$144 sps:$4 sm:$0xff]  }
  0xb9   :  { %4372 = vmatpush3.bf16.msra.mxu1 %v4800_v31  ;;  %4345 = vmatprep.subr.bf16.mxu0 %v4801_v32  ;;  %v4856_v32 = vld [vmem:[%s6092_s0 + $0x68] ss:$144 sps:$4 sm:$0xff]  }
  0xba   :  { %4373 = vmatprep.subr.bf16.mxu1 %v4802_v33  ;;  %v4858_v33 = vld [vmem:[%s6092_s0 + $0x6c] ss:$144 sps:$4 sm:$0xff]  }
  0xbc   :  { %4346 = vmatpush3.bf16.msra.mxu0 %v4803_v34  ;;  %v4859_v34 = vld [vmem:[%s6091_s1 + $0x740] sm:$0xff]  }
  0xbd   :  { %4374 = vmatpush3.bf16.msra.mxu1 %v4804_v35  ;;  %4347 = vmatprep.subr.bf16.mxu0 %v4805_v36  ;;  %v4860_v35 = vld [vmem:[%s6091_s1 + $0x7c0] sm:$0xff]  }
  0xbe   :  { %4375 = vmatprep.subr.bf16.mxu1 %v4806_v37  ;;  %v4861_v36 = vld [vmem:[%s6091_s1 + $0x700] sm:$0xff]  }
  0xbf   :  { %v4862_v37 = vld [vmem:[%s6091_s1 + $0x780] sm:$0xff]  }
  0xc0   :  { %4348 = vmatpush3.bf16.msra.mxu0 %v4807_v38  ;;  %v4863_v38 = vld [vmem:[%s6091_s1 + $0x748] sm:$0xff]  }
  0xc1   :  { %4376 = vmatpush3.bf16.msra.mxu1 %v4808_v39  ;;  %4389 = vmatprep.subr.bf16.mxu0 %v4815_v44  ;;  %v4864_v39 = vld [vmem:[%s6091_s1 + $0x7c8] sm:$0xff]   ;;  %v4870_v44 = vld [vmem:[%s6091_s1 + $0x750] sm:$0xff]  }
  0xc2   :  { %4417 = vmatprep.subr.bf16.mxu1 %v4816_v45  ;;  %v4871_v45 = vld [vmem:[%s6091_s1 + $0x7d0] sm:$0xff]  }
  0xc3   :  { %3271 = vmatmul.mubr.bf16.vlgmr.msra.gmra.mrb[40].mxu0 %v4809_v40  ;;  %v4865_v40 = vld [vmem:[%s6091_s1 + $0x708] sm:$0xff]  }
  0xc4   :  { %3320 = vmatmul.mubr.bf16.vlgmr.msra.gmra.mrb[40].mxu1 %v4812_v42  ;;  %4390 = vmatpush3.bf16.msra.mxu0 %v4817_v46  ;;  %v4867_v42 = vld [vmem:[%s6092_s0 + $0x184] ss:$144 sps:$4 sm:$0xff]   ;;  %v4872_v46 = vld [vmem:[%s6092_s0 + $0x18c] ss:$144 sps:$4 sm:$0xff]  }
  0xc5   :  { %4418 = vmatpush3.bf16.msra.mxu1 %v4818_v47  ;;  %4391 = vmatprep.subr.bf16.mxu0 %v4819_v48  ;;  %v4874_v47 = vld [vmem:[%s6091_s1 + $0x710] sm:$0xff]  }
  0xc6   :  { %4419 = vmatprep.subr.bf16.mxu1 %v4820_v49  ;;  %3278 = vmatprep.mubr.bf16.mxu0 %v4823_v52  ;;  %v4875_v48 = vld [vmem:[%s6091_s1 + $0x790] sm:$0xff]   ;;  %v4876_v49 = vld [vmem:[%s6092_s0 + $0x188] ss:$144 sps:$4 sm:$0xff]  }
  0xc7   :  { %3327 = vmatprep.mubr.bf16.mxu1 %v4828_v56  ;;  %v4878_v52 = vld [vmem:[%s6091_s1 + $0x7d8] sm:$0xff]  }
  0xc8   :  { %4392 = vmatpush3.bf16.msra.mxu0 %v4821_v50  ;;  %v4877_v50 = vld [vmem:[%s6091_s1 + $0x758] sm:$0xff]  }
  0xc9   :  { %4420 = vmatpush3.bf16.msra.mxu1 %v4822_v51  ;;  %4393 = vmatprep.subr.bf16.mxu0 %v4826_v54  ;;  %v4879_v54 = vld [vmem:[%s6091_s1 + $0x718] sm:$0xff]  }
  0xca   :  { %4421 = vmatprep.subr.bf16.mxu1 %v4827_v55  ;;  %v4880_v56 = vld [vmem:[%s6091_s1 + $0x798] sm:$0xff]  }
  0xcb   :  { %3279 = vmatmul.mubr.bf16.gmra.mrb[44].mxu0 %v4825_v53 }
  0xcc   :  { %4394 = vmatpush3.bf16.msra.mxu0 %v4830_v57  ;;  %3328 = vmatmul.mubr.bf16.gmra.mrb[44].mxu1 %v4832_v59  ;;  %v4881_v59 = vld [vmem:[%s6091_s1 + $0x760] sm:$0xff]  }
  0xcd   :  { %4422 = vmatpush3.bf16.msra.mxu1 %v4831_v58  ;;  %4395 = vmatprep.subr.bf16.mxu0 %v4833_v60 }
  0xce   :  { %4423 = vmatprep.subr.bf16.mxu1 %v4834_v61  ;;  %3368 = vmatprep.mubr.bf16.mxu0 %v4855_v30 }
  0xcf   :  { %3417 = vmatprep.mubr.bf16.mxu1 %v4858_v33 }
  0xd0   :  { %4396 = vmatpush3.bf16.msra.mxu0 %v4835_v62  ;;  %v4882_v62 = vld [vmem:[%s6091_s1 + $0x7e0] sm:$0xff]  }
  0xd1   :  { %4424 = vmatpush3.bf16.msra.mxu1 %v4836_v63  ;;  %4397 = vmatprep.subr.bf16.mxu0 %v4837_v0  ;;  %v4883_v0 = vld [vmem:[%s6091_s1 + $0x720] sm:$0xff]  }
  0xd2   :  { %4425 = vmatprep.subr.bf16.mxu1 %v4838_v1 }
  0xd4   :  { %4398 = vmatpush3.bf16.msra.mxu0 %v4839_v2 }
  0xd5   :  { %4426 = vmatpush3.bf16.msra.mxu1 %v4840_v3  ;;  %4399 = vmatprep.subr.bf16.mxu0 %v4841_v4  ;;  %v4884_v3 = vld [vmem:[%s6091_s1 + $0x7a0] sm:$0xff]  }
  0xd6   :  { %4427 = vmatprep.subr.bf16.mxu1 %v4842_v5 }
  0xd8   :  { %4400 = vmatpush3.bf16.msra.mxu0 %v4843_v6  ;;  %v4885_v6 = vld [vmem:[%s6091_s1 + $0x768] sm:$0xff]  }
  0xd9   :  { %4428 = vmatpush3.bf16.msra.mxu1 %v4844_v7  ;;  %4401 = vmatprep.subr.bf16.mxu0 %v4845_v9  ;;  %v4887_v9 = vld [vmem:[%s6091_s1 + $0x728] sm:$0xff]  }
  0xda   :  { %4429 = vmatprep.subr.bf16.mxu1 %v4846_v11 }
  0xdc   :  { %4402 = vmatpush3.bf16.msra.mxu0 %v4847_v13 }
  0xdd   :  { %4430 = vmatpush3.bf16.msra.mxu1 %v4848_v16  ;;  %4403 = vmatprep.subr.bf16.mxu0 %v4849_v19  ;;  %v4890_v16 = vld [vmem:[%s6091_s1 + $0x7f0] sm:$0xff]  }
  0xde   :  { %4431 = vmatprep.subr.bf16.mxu1 %v4850_v21  ;;  %v4891_v19 = vld [vmem:[%s6091_s1 + $0x730] sm:$0xff]  }
  0xe0   :  { %4404 = vmatpush3.bf16.msra.mxu0 %v4851_v24 }
  0xe1   :  { %4432 = vmatpush3.bf16.msra.mxu1 %v4852_v27  ;;  %4445 = vmatprep.subr.bf16.mxu0 %v4859_v34  ;;  %v4896_v34 = vld [vmem:[%s6091_s1 + $0x7b8] sm:$0xff]  }
  0xe2   :  { %4473 = vmatprep.subr.bf16.mxu1 %v4860_v35 }
  0xe3   :  { %3369 = vmatmul.mubr.bf16.vlgmr.msra.gmra.mrb[48].mxu0 %v4853_v29 }
  0xe4   :  { %3418 = vmatmul.mubr.bf16.vlgmr.msra.gmra.mrb[48].mxu1 %v4856_v32  ;;  %4446 = vmatpush3.bf16.msra.mxu0 %v4861_v36  ;;  %v4897_v36 = vld [vmem:[%s6092_s0 + $0x70] ss:$144 sps:$4 sm:$0xff]  }
  0xe5   :  { %4474 = vmatpush3.bf16.msra.mxu1 %v4862_v37  ;;  %4447 = vmatprep.subr.bf16.mxu0 %v4863_v38  ;;  %v4899_v37 = vld [vmem:[%s6092_s0 + $0x74] ss:$144 sps:$4 sm:$0xff]  }
  0xe6   :  { %4475 = vmatprep.subr.bf16.mxu1 %v4864_v39  ;;  %3376 = vmatprep.mubr.bf16.mxu0 %v4867_v42  ;;  %v4900_v39 = vld [vmem:[%s6092_s0 + $0x78] ss:$144 sps:$4 sm:$0xff]   ;;  %v4903_v42 = vld [vmem:[%s6091_s1 + $0x840] sm:$0xff]  }
  0xe7   :  { %3425 = vmatprep.mubr.bf16.mxu1 %v4872_v46 }
  0xe8   :  { %4448 = vmatpush3.bf16.msra.mxu0 %v4865_v40  ;;  %v4902_v40 = vld [vmem:[%s6092_s0 + $0x7c] ss:$144 sps:$4 sm:$0xff]  }
  0xe9   :  { %4476 = vmatpush3.bf16.msra.mxu1 %v4866_v41  ;;  %4449 = vmatprep.subr.bf16.mxu0 %v4870_v44 }
  0xea   :  { %4477 = vmatprep.subr.bf16.mxu1 %v4871_v45  ;;  %v4904_v45 = vld [vmem:[%s6091_s1 + $0x8c0] sm:$0xff]  }
  0xeb   :  { %3377 = vmatmul.mubr.bf16.gmra.mrb[52].mxu0 %v4869_v43 }
  0xec   :  { %4450 = vmatpush3.bf16.msra.mxu0 %v4874_v47  ;;  %3426 = vmatmul.mubr.bf16.gmra.mrb[52].mxu1 %v4876_v49  ;;  %v4905_v47 = vld [vmem:[%s6091_s1 + $0x800] sm:$0xff]  }
  0xed   :  { %4478 = vmatpush3.bf16.msra.mxu1 %v4875_v48  ;;  %4451 = vmatprep.subr.bf16.mxu0 %v4877_v50  ;;  %v4906_v50 = vld [vmem:[%s6091_s1 + $0x880] sm:$0xff]  }
  0xee   :  { %4479 = vmatprep.subr.bf16.mxu1 %v4878_v52  ;;  %3466 = vmatprep.mubr.bf16.mxu0 %v4899_v37 }
  0xef   :  { %3515 = vmatprep.mubr.bf16.mxu1 %v4902_v40  ;;  %v4939_v40 = vld [vmem:[%s6091_s1 + $0x838] sm:$0xff]  }
  0xf0   :  { %4452 = vmatpush3.bf16.msra.mxu0 %v4879_v54  ;;  %v4908_v54 = vld [vmem:[%s6091_s1 + $0x8c8] sm:$0xff]  }
  0xf1   :  { %4480 = vmatpush3.bf16.msra.mxu1 %v4880_v56  ;;  %4453 = vmatprep.subr.bf16.mxu0 %v4881_v59  ;;  %v4909_v56 = vld [vmem:[%s6091_s1 + $0x808] sm:$0xff]  }
  0xf2   :  { %4481 = vmatprep.subr.bf16.mxu1 %v4882_v62  ;;  %v4910_v59 = vld [vmem:[%s6091_s1 + $0x888] sm:$0xff]  }
  0xf4   :  { %4454 = vmatpush3.bf16.msra.mxu0 %v4883_v0  ;;  %v4913_v0 = vld [vmem:[%s6092_s0 + $0x190] ss:$144 sps:$4 sm:$0xff]  }
  0xf5   :  { %4482 = vmatpush3.bf16.msra.mxu1 %v4884_v3  ;;  %4455 = vmatprep.subr.bf16.mxu0 %v4885_v6  ;;  %v4915_v3 = vld [vmem:[%s6091_s1 + $0x8d0] sm:$0xff]  }
  0xf6   :  { %v4069_v8 = vpop.f32.mrb[0].mxu0  ;;  %v4919_v6 = vld [vmem:[%s6091_s1 + $0x890] sm:$0xff]  }
  0xf7   :  { %v4097_v10 = vpop.f32.mrb[0].mxu1  ;;  %v4070_v12 = vpop.f32.mrb[1].mxu0 }
  0xf8   :  { %v4071_v14 = vadd.f32 %v4070_v12, %v4069_v8  ;;  %v4098_v15 = vpop.f32.mrb[1].mxu1  ;;  %v4072_v18 = vpop.f32.mrb[2].mxu0  ;;  %v4886_v8 = vld [vmem:[%s6091_s1 + $0x7e8] sm:$0xff]   ;;  %4456 = vmatpush3.bf16.msra.mxu0 %v4887_v9  ;;  %v4922_v9 = vld [vmem:[%s6091_s1 + $0x8d8] sm:$0xff]  }
  0xf9   :  { %v4099_v17 = vadd.f32 %v4098_v15, %v4097_v10  ;;  %v4100_v20 = vpop.f32.mrb[2].mxu1  ;;  %v4073_v23 = vpop.f32.mrb[3].mxu0  ;;  %4483 = vmatprep.subr.bf16.mxu1 %v4886_v8  ;;  %v4888_v12 = vld [vmem:[%s6091_s1 + $0x7a8] sm:$0xff]   ;;  %v4921_v8 = vld [vmem:[%s6091_s1 + $0x858] sm:$0xff]  }
  0xfa   :  { %v4074_v25 = vadd.f32 %v4073_v23, %v4072_v18  ;;  %v4101_v26 = vpop.f32.mrb[3].mxu1  ;;  %4484 = vmatpush3.bf16.msra.mxu1 %v4888_v12  ;;  %v4892_v23 = vld [vmem:[%s6091_s1 + $0x7b0] sm:$0xff]   ;;  %v4925_v12 = vld [vmem:[%s6091_s1 + $0x860] sm:$0xff]  }
  0xfb   :  { %v5794_v22 = vadd.f32 %v4099_v17, %v4071_v14  ;;  %v4102_v28 = vadd.f32 %v4101_v26, %v4100_v20  ;;  %v4889_v14 = vld [vmem:[%s6091_s1 + $0x770] sm:$0xff]   ;;  %4485 = vmatprep.subr.bf16.mxu1 %v4890_v16  ;;  %v4893_v26 = vld [vmem:[%s6091_s1 + $0x778] sm:$0xff]   ;;  %v4929_v16 = vld [vmem:[%s6091_s1 + $0x868] sm:$0xff]  }
  0xfc   :  { %4457 = vmatprep.subr.bf16.mxu0 %v4889_v14  ;;  %v4927_v14 = vld [vmem:[%s6091_s1 + $0x820] sm:$0xff]  }
  0xfd   :  { %v5808_v31 = vadd.f32 %v4102_v28, %v4074_v25  ;;  %4458 = vmatpush3.bf16.msra.mxu0 %v4891_v19  ;;  %v4894_v28 = vld [vmem:[%s6091_s1 + $0x7f8] sm:$0xff]  }
  0xfe   :  { %v4075_v51 = vpop.f32.mrb[4].mxu0  ;;  %4486 = vmatpush3.bf16.msra.mxu1 %v4892_v23  ;;  %4459 = vmatprep.subr.bf16.mxu0 %v4893_v26  ;;  %v4933_v23 = vld [vmem:[%s6091_s1 + $0x870] sm:$0xff]  }
  0xff   :  { %v4103_v53 = vpop.f32.mrb[4].mxu1  ;;  %v4076_v55 = vpop.f32.mrb[5].mxu0  ;;  %4487 = vmatprep.subr.bf16.mxu1 %v4894_v28  ;;  %v4934_v26 = vld [vmem:[%s6091_s1 + $0x8f0] sm:$0xff]  }
 0x100   :  { %v4077_v57 = vadd.f32 %v4076_v55, %v4075_v51  ;;  %v4104_v58 = vpop.f32.mrb[5].mxu1  ;;  %v4078_v61 = vpop.f32.mrb[6].mxu0  ;;  %v4907_v51 = vld [vmem:[%s6091_s1 + $0x848] sm:$0xff]   ;;  %v4935_v28 = vld [vmem:[%s6091_s1 + $0x830] sm:$0xff]  }
 0x101   :  { %v4105_v60 = vadd.f32 %v4104_v58, %v4103_v53  ;;  %v4106_v63 = vpop.f32.mrb[6].mxu1  ;;  %v4079_v2 = vpop.f32.mrb[7].mxu0 }
 0x102   :  { %v4080_v4 = vadd.f32 %v4079_v2, %v4078_v61  ;;  %v4107_v5 = vpop.f32.mrb[7].mxu1  ;;  %4488 = vmatpush3.bf16.msra.mxu1 %v4896_v34  ;;  %v4911_v61 = vld [vmem:[%s6092_s0 + $0x194] ss:$144 sps:$4 sm:$0xff]  }
 0x103   :  { %v5885_v1 = vadd.f32 %v4105_v60, %v4077_v57  ;;  %v4108_v7 = vadd.f32 %v4107_v5, %v4106_v63  ;;  %4529 = vmatprep.subr.bf16.mxu1 %v4904_v45  ;;  %v4918_v5 = vld [vmem:[%s6091_s1 + $0x810] sm:$0xff]  }
 0x104   :  { %v4943_v45 = vld [vmem:[%s6092_s0 + $0x84] ss:$144 sps:$4 sm:$0xff]  }
 0x105   :  { %v2843_v10 = vadd.f32 %v4108_v7, %v4080_v4  ;;  %3516 = vmatmul.mubr.bf16.vlgmr.msra.gmra.mrb[56].mxu1 %v4900_v39  ;;  %v4916_v4 = vld [vmem:[%s6092_s0 + $0x19c] ss:$144 sps:$4 sm:$0xff]   ;;  %v4920_v7 = vld [vmem:[%s6092_s0 + $0x198] ss:$144 sps:$4 sm:$0xff]  }
 0x106   :  { %4530 = vmatpush3.bf16.msra.mxu1 %v4906_v50  ;;  %3523 = vmatprep.mubr.bf16.mxu1 %v4916_v4  ;;  %v4947_v50 = vld [vmem:[%s6092_s0 + $0x1a4] ss:$144 sps:$4 sm:$0xff]  }
 0x107   :  { %4531 = vmatprep.subr.bf16.mxu1 %v4908_v54 }
 0x10a   :  { %4532 = vmatpush3.bf16.msra.mxu1 %v4910_v59 }
 0x10b   :  { %4533 = vmatprep.subr.bf16.mxu1 %v4915_v3 }
 0x10d   :  { %3524 = vmatmul.mubr.bf16.gmra.mrb[60].mxu1 %v4920_v7 }
 0x10e   :  { %4534 = vmatpush3.bf16.msra.mxu1 %v4919_v6 }
 0x10f   :  { %4535 = vmatprep.subr.bf16.mxu1 %v4922_v9 }
 0x116   :  { %v4125_v11 = vpop.f32.mrb[8].mxu0 }
 0x117   :  { %v4153_v13 = vpop.f32.mrb[8].mxu1  ;;  %v4126_v15 = vpop.f32.mrb[9].mxu0 }
 0x118   :  { %v4127_v17 = vadd.f32 %v4126_v15, %v4125_v11  ;;  %v4154_v18 = vpop.f32.mrb[9].mxu1  ;;  %v4128_v21 = vpop.f32.mrb[10].mxu0  ;;  %v4924_v11 = vld [vmem:[%s6091_s1 + $0x898] sm:$0xff]   ;;  %v4928_v15 = vld [vmem:[%s6091_s1 + $0x8a0] sm:$0xff]  }
 0x119   :  { %v4155_v20 = vadd.f32 %v4154_v18, %v4153_v13  ;;  %v4156_v25 = vpop.f32.mrb[10].mxu1  ;;  %v4129_v27 = vpop.f32.mrb[11].mxu0  ;;  %4536 = vmatpush3.bf16.msra.mxu1 %v4924_v11  ;;  %v4926_v13 = vld [vmem:[%s6091_s1 + $0x8e0] sm:$0xff]   ;;  %v4931_v18 = vld [vmem:[%s6091_s1 + $0x828] sm:$0xff]  }
 0x11a   :  { %v2881_v24 = vadd.f32 %v4127_v17, %v5794_v22  ;;  %v4130_v30 = vadd.f32 %v4129_v27, %v4128_v21  ;;  %v4157_v32 = vpop.f32.mrb[11].mxu1  ;;  %v4895_v22 = vld [vmem:[%s6091_s1 + $0x738] sm:$0xff]   ;;  %4537 = vmatprep.subr.bf16.mxu1 %v4926_v13  ;;  %v4930_v17 = vld [vmem:[%s6091_s1 + $0x8e8] sm:$0xff]  }
 0x11b   :  { %v4158_v33 = vadd.f32 %v4157_v32, %v4156_v25  ;;  %4460 = vmatpush3.bf16.msra.mxu0 %v4895_v22 }
 0x11c   :  { %v5921_v29 = vadd.f32 %v4155_v20, %v2881_v24  ;;  %v2884_v35 = vadd.f32 %v4130_v30, %v5808_v31  ;;  %4501 = vmatprep.subr.bf16.mxu0 %v4903_v42  ;;  %v4932_v20 = vld [vmem:[%s6091_s1 + $0x8a8] sm:$0xff]   ;;  %v4940_v42 = vld [vmem:[%s6091_s1 + $0x8b8] sm:$0xff]  }
 0x11d   :  { %4538 = vmatpush3.bf16.msra.mxu1 %v4928_v15 }
 0x11e   :  { %v4131_v38 = vpop.f32.mrb[12].mxu0  ;;  %v5942_v31 = vadd.f32 %v4158_v33, %v2884_v35  ;;  %3467 = vmatmul.mubr.bf16.vlgmr.msra.gmra.mrb[56].mxu0 %v4897_v36  ;;  %4539 = vmatprep.subr.bf16.mxu1 %v4930_v17  ;;  %v4936_v33 = vld [vmem:[%s6091_s1 + $0x8b0] sm:$0xff]   ;;  %v4937_v35 = vld [vmem:[%s6091_s1 + $0x878] sm:$0xff]  }
 0x11f   :  { %v4132_v41 = vpop.f32.mrb[13].mxu0  ;;  %4502 = vmatpush3.bf16.msra.mxu0 %v4905_v47  ;;  %v4159_v52 = vpop.f32.mrb[12].mxu1  ;;  %3474 = vmatprep.mubr.bf16.mxu0 %v4911_v61 }
 0x120   :  { %v4133_v43 = vadd.f32 %v4132_v41, %v4131_v38  ;;  %v4134_v44 = vpop.f32.mrb[14].mxu0  ;;  %v4160_v55 = vpop.f32.mrb[13].mxu1  ;;  %4503 = vmatprep.subr.bf16.mxu0 %v4907_v51 }
 0x121   :  { %v4135_v46 = vpop.f32.mrb[15].mxu0  ;;  %v4161_v57 = vadd.f32 %v4160_v55, %v4159_v52  ;;  %v4162_v58 = vpop.f32.mrb[14].mxu1  ;;  %4540 = vmatpush3.bf16.msra.mxu1 %v4932_v20 }
 0x122   :  { %v2889_v48 = vadd.f32 %v4133_v43, %v5885_v1  ;;  %v4136_v49 = vadd.f32 %v4135_v46, %v4134_v44  ;;  %v4163_v60 = vpop.f32.mrb[15].mxu1  ;;  %v4914_v1 = vld [vmem:[%s6091_s1 + $0x850] sm:$0xff]   ;;  %4541 = vmatprep.subr.bf16.mxu1 %v4934_v26  ;;  %v4944_v46 = vld [vmem:[%s6092_s0 + $0x88] ss:$144 sps:$4 sm:$0xff]  }
 0x123   :  { %4504 = vmatpush3.bf16.msra.mxu0 %v4909_v56  ;;  %v4164_v63 = vadd.f32 %v4163_v60, %v4162_v58  ;;  %v4941_v44 = vld [vmem:[%s6092_s0 + $0x80] ss:$144 sps:$4 sm:$0xff]  }
 0x124   :  { %v2892_v53 = vadd.f32 %v4136_v49, %v2843_v10  ;;  %v5972_v62 = vadd.f32 %v4161_v57, %v2889_v48  ;;  %4505 = vmatprep.subr.bf16.mxu0 %v4914_v1  ;;  %v4923_v10 = vld [vmem:[%s6091_s1 + $0x818] sm:$0xff]   ;;  %v4951_v58 = vld [vmem:[%s6092_s0 + $0x1a0] ss:$144 sps:$4 sm:$0xff]  }
 0x125   :  { %4542 = vmatpush3.bf16.msra.mxu1 %v4936_v33 }
 0x126   :  { %v5980_v2 = vadd.f32 %v4164_v63, %v2892_v53  ;;  %3475 = vmatmul.mubr.bf16.gmra.mrb[60].mxu0 %v4913_v0  ;;  %v4949_v53 = vld [vmem:[%s6092_s0 + $0x1ac] ss:$144 sps:$4 sm:$0xff]   ;;  %v4952_v0 = vld [vmem:[%s6092_s0 + $0x1a8] ss:$144 sps:$4 sm:$0xff]  }
 0x127   :  { %4506 = vmatpush3.bf16.msra.mxu0 %v4918_v5  ;;  %3564 = vmatprep.mubr.bf16.mxu0 %v4943_v45 }
 0x128   :  { %4507 = vmatprep.subr.bf16.mxu0 %v4921_v8 }
 0x12b   :  { %4508 = vmatpush3.bf16.msra.mxu0 %v4923_v10 }
 0x12c   :  { %4509 = vmatprep.subr.bf16.mxu0 %v4925_v12 }
 0x12f   :  { %4510 = vmatpush3.bf16.msra.mxu0 %v4927_v14 }
 0x130   :  { %4511 = vmatprep.subr.bf16.mxu0 %v4929_v16 }
 0x133   :  { %4512 = vmatpush3.bf16.msra.mxu0 %v4931_v18 }
 0x134   :  { %4513 = vmatprep.subr.bf16.mxu0 %v4933_v23 }
 0x136   :  { %v4181_v19 = vpop.f32.mrb[16].mxu0 }
 0x137   :  { %v4182_v21 = vpop.f32.mrb[17].mxu0  ;;  %v4209_v24 = vpop.f32.mrb[16].mxu1  ;;  %4514 = vmatpush3.bf16.msra.mxu0 %v4935_v28 }
 0x138   :  { %v4183_v25 = vadd.f32 %v4182_v21, %v4181_v19  ;;  %v4210_v27 = vpop.f32.mrb[17].mxu1  ;;  %v4184_v22 = vpop.f32.mrb[18].mxu0  ;;  %4515 = vmatprep.subr.bf16.mxu0 %v4937_v35 }
 0x139   :  { %v4211_v32 = vadd.f32 %v4210_v27, %v4209_v24  ;;  %v4212_v34 = vpop.f32.mrb[18].mxu1  ;;  %v4185_v37 = vpop.f32.mrb[19].mxu0 }
 0x13a   :  { %v2979_v30 = vadd.f32 %v4183_v25, %v5921_v29  ;;  %v4938_v29 = vld [vmem:[%s6091_s1 + $0x8f8] sm:$0xff]   ;;  %v4186_v38 = vadd.f32 %v4185_v37, %v4184_v22  ;;  %v4213_v39 = vpop.f32.mrb[19].mxu1 }
 0x13b   :  { %v4214_v41 = vadd.f32 %v4213_v39, %v4212_v34  ;;  %4543 = vmatprep.subr.bf16.mxu1 %v4938_v29  ;;  %4516 = vmatpush3.bf16.msra.mxu0 %v4939_v40 }
 0x13c   :  { %v3028_v36 = vadd.f32 %v4211_v32, %v2979_v30  ;;  %v2982_v43 = vadd.f32 %v4186_v38, %v5942_v31  ;;  %4544 = vmatpush3.bf16.msra.mxu1 %v4940_v42  ;;  %v4946_v31 = vld [vmem:[%s6092_s0 + $0x8c] ss:$144 sps:$4 sm:$0xff]  }
 0x13d   :  { %3613 = vmatprep.mubr.bf16.mxu1 %v4946_v31 }
 0x13e   :  { %v3031_v47 = vadd.f32 %v4214_v41, %v2982_v43  ;;  %v4187_v48 = vpop.f32.mrb[20].mxu0  ;;  %3565 = vmatmul.mubr.bf16.vlgmr.msra.gmra.mrb[64].mxu0 %v4941_v44 }
 0x13f   :  { %v4188_v49 = vpop.f32.mrb[21].mxu0  ;;  %3614 = vmatmul.mubr.bf16.vlgmr.msra.gmra.mrb[64].mxu1 %v4944_v46  ;;  %3572 = vmatprep.mubr.bf16.mxu0 %v4947_v50  ;;  %v4215_v56 = vpop.f32.mrb[20].mxu1 }
 0x140   :  { %v4189_v51 = vadd.f32 %v4188_v49, %v4187_v48  ;;  %v4190_v52 = vpop.f32.mrb[22].mxu0  ;;  %3621 = vmatprep.mubr.bf16.mxu1 %v4949_v53  ;;  %v4216_v59 = vpop.f32.mrb[21].mxu1 }
 0x141   :  { %v4191_v55 = vpop.f32.mrb[23].mxu0  ;;  %v4217_v61 = vadd.f32 %v4216_v59, %v4215_v56  ;;  %v4218_v63 = vpop.f32.mrb[22].mxu1 }
 0x142   :  { %v2987_v54 = vadd.f32 %v4189_v51, %v5972_v62  ;;  %v4192_v57 = vadd.f32 %v4191_v55, %v4190_v52  ;;  %v4219_v1 = vpop.f32.mrb[23].mxu1 }
 0x143   :  { %v4220_v62 = vadd.f32 %v4219_v1, %v4218_v63 }
 0x144   :  { %v2990_v60 = vadd.f32 %v4192_v57, %v5980_v2  ;;  %v3036_v3 = vadd.f32 %v4217_v61, %v2987_v54 }
 0x146   :  { %3573 = vmatmul.mubr.bf16.gmra.mrb[68].mxu0 %v4951_v58  ;;  %v3039_v4 = vadd.f32 %v4220_v62, %v2990_v60 }
 0x147   :  { %3622 = vmatmul.mubr.bf16.gmra.mrb[68].mxu1 %v4952_v0 }
 0x156   :  { %v4237_v5 = vpop.f32.mrb[24].mxu0 }
 0x157   :  { %v4265_v6 = vpop.f32.mrb[24].mxu1  ;;  %v4238_v7 = vpop.f32.mrb[25].mxu0 }
 0x158   :  { %v4239_v8 = vadd.f32 %v4238_v7, %v4237_v5  ;;  %v4266_v9 = vpop.f32.mrb[25].mxu1  ;;  %v4240_v10 = vpop.f32.mrb[26].mxu0 }
 0x159   :  { %v4267_v11 = vadd.f32 %v4266_v9, %v4265_v6  ;;  %v4268_v2 = vpop.f32.mrb[26].mxu1  ;;  %v4241_v12 = vpop.f32.mrb[27].mxu0 }
 0x15a   :  { %v3077_v13 = vadd.f32 %v4239_v8, %v3028_v36  ;;  %v4242_v14 = vadd.f32 %v4241_v12, %v4240_v10  ;;  %v4269_v15 = vpop.f32.mrb[27].mxu1 }
 0x15b   :  { %v4270_v16 = vadd.f32 %v4269_v15, %v4268_v2 }
 0x15c   :  { %v3126_v17 = vadd.f32 %v4267_v11, %v3077_v13  ;;  %v3080_v18 = vadd.f32 %v4242_v14, %v3031_v47 }
 0x15e   :  { %v3129_v19 = vadd.f32 %v4270_v16, %v3080_v18  ;;  %v4243_v20 = vpop.f32.mrb[28].mxu0 }
 0x15f   :  { %v4244_v21 = vpop.f32.mrb[29].mxu0  ;;  %v4271_v28 = vpop.f32.mrb[28].mxu1 }
 0x160   :  { %v4245_v23 = vadd.f32 %v4244_v21, %v4243_v20  ;;  %v4246_v24 = vpop.f32.mrb[30].mxu0  ;;  %v4272_v32 = vpop.f32.mrb[29].mxu1 }
 0x161   :  { %v4247_v25 = vpop.f32.mrb[31].mxu0  ;;  %v4273_v22 = vadd.f32 %v4272_v32, %v4271_v28  ;;  %v4274_v33 = vpop.f32.mrb[30].mxu1 }
 0x162   :  { %v3085_v26 = vadd.f32 %v4245_v23, %v3036_v3  ;;  %v4248_v27 = vadd.f32 %v4247_v25, %v4246_v24  ;;  %v4275_v34 = vpop.f32.mrb[31].mxu1 }
 0x163   :  { %v4276_v36 = vadd.f32 %v4275_v34, %v4274_v33 }
 0x164   :  { %v3088_v30 = vadd.f32 %v4248_v27, %v3039_v4  ;;  %v3134_v35 = vadd.f32 %v4273_v22, %v3085_v26 }
 0x166   :  { %v3137_v37 = vadd.f32 %v4276_v36, %v3088_v30 }
 0x176   :  { %v4293_v29 = vpop.f32.mrb[32].mxu0 }
 0x177   :  { %v4321_v38 = vpop.f32.mrb[32].mxu1  ;;  %v4294_v39 = vpop.f32.mrb[33].mxu0 }
 0x178   :  { %v4295_v40 = vadd.f32 %v4294_v39, %v4293_v29  ;;  %v4322_v41 = vpop.f32.mrb[33].mxu1  ;;  %v4296_v42 = vpop.f32.mrb[34].mxu0 }
 0x179   :  { %v4323_v43 = vadd.f32 %v4322_v41, %v4321_v38  ;;  %v4324_v44 = vpop.f32.mrb[34].mxu1  ;;  %v4297_v45 = vpop.f32.mrb[35].mxu0 }
 0x17a   :  { %v3175_v46 = vadd.f32 %v4295_v40, %v3126_v17  ;;  %v4298_v47 = vadd.f32 %v4297_v45, %v4296_v42  ;;  %v4325_v48 = vpop.f32.mrb[35].mxu1 }
 0x17b   :  { %v4326_v31 = vadd.f32 %v4325_v48, %v4324_v44 }
 0x17c   :  { %v3224_v49 = vadd.f32 %v4323_v43, %v3175_v46  ;;  %v3178_v50 = vadd.f32 %v4298_v47, %v3129_v19 }
 0x17e   :  { %v3227_v51 = vadd.f32 %v4326_v31, %v3178_v50  ;;  %v4299_v52 = vpop.f32.mrb[36].mxu0 }
 0x17f   :  { %v4300_v53 = vpop.f32.mrb[37].mxu0  ;;  %v4327_v59 = vpop.f32.mrb[36].mxu1 }
 0x180   :  { %v4301_v54 = vadd.f32 %v4300_v53, %v4299_v52  ;;  %v4302_v55 = vpop.f32.mrb[38].mxu0  ;;  %v4328_v61 = vpop.f32.mrb[37].mxu1 }
 0x181   :  { %v4303_v56 = vpop.f32.mrb[39].mxu0  ;;  %v4329_v63 = vadd.f32 %v4328_v61, %v4327_v59  ;;  %v4330_v0 = vpop.f32.mrb[38].mxu1 }
 0x182   :  { %v3183_v57 = vadd.f32 %v4301_v54, %v3134_v35  ;;  %v4304_v58 = vadd.f32 %v4303_v56, %v4302_v55  ;;  %v4331_v1 = vpop.f32.mrb[39].mxu1 }
 0x183   :  { %v4332_v62 = vadd.f32 %v4331_v1, %v4330_v0 }
 0x184   :  { %v3186_v60 = vadd.f32 %v4304_v58, %v3137_v37  ;;  %v3232_v3 = vadd.f32 %v4329_v63, %v3183_v57 }
 0x186   :  { %v3235_v4 = vadd.f32 %v4332_v62, %v3186_v60 }
 0x196   :  { %v4349_v5 = vpop.f32.mrb[40].mxu0 }
 0x197   :  { %v4350_v6 = vpop.f32.mrb[41].mxu0  ;;  %v4377_v7 = vpop.f32.mrb[40].mxu1 }
 0x198   :  { %v4351_v8 = vadd.f32 %v4350_v6, %v4349_v5  ;;  %v4352_v9 = vpop.f32.mrb[42].mxu0  ;;  %v4378_v10 = vpop.f32.mrb[41].mxu1 }
 0x199   :  { %v4353_v11 = vpop.f32.mrb[43].mxu0  ;;  %v4379_v12 = vadd.f32 %v4378_v10, %v4377_v7  ;;  %v4380_v13 = vpop.f32.mrb[42].mxu1 }
 0x19a   :  { %v3273_v2 = vadd.f32 %v4351_v8, %v3224_v49  ;;  %v4354_v14 = vadd.f32 %v4353_v11, %v4352_v9  ;;  %v4381_v15 = vpop.f32.mrb[43].mxu1 }
 0x19b   :  { %v4382_v18 = vadd.f32 %v4381_v15, %v4380_v13 }
 0x19c   :  { %v3322_v16 = vadd.f32 %v4379_v12, %v3273_v2  ;;  %v3276_v17 = vadd.f32 %v4354_v14, %v3227_v51 }
 0x19e   :  { %v3325_v19 = vadd.f32 %v4382_v18, %v3276_v17  ;;  %v4355_v20 = vpop.f32.mrb[44].mxu0 }
 0x19f   :  { %v4356_v21 = vpop.f32.mrb[45].mxu0  ;;  %v4383_v28 = vpop.f32.mrb[44].mxu1 }
 0x1a0   :  { %v4357_v23 = vadd.f32 %v4356_v21, %v4355_v20  ;;  %v4358_v24 = vpop.f32.mrb[46].mxu0  ;;  %v4384_v32 = vpop.f32.mrb[45].mxu1 }
 0x1a1   :  { %v4359_v25 = vpop.f32.mrb[47].mxu0  ;;  %v4385_v22 = vadd.f32 %v4384_v32, %v4383_v28  ;;  %v4386_v33 = vpop.f32.mrb[46].mxu1 }
 0x1a2   :  { %v3281_v26 = vadd.f32 %v4357_v23, %v3232_v3  ;;  %v4360_v27 = vadd.f32 %v4359_v25, %v4358_v24  ;;  %v4387_v34 = vpop.f32.mrb[47].mxu1 }
 0x1a3   :  { %v4388_v36 = vadd.f32 %v4387_v34, %v4386_v33 }
 0x1a4   :  { %v3284_v30 = vadd.f32 %v4360_v27, %v3235_v4  ;;  %v3330_v35 = vadd.f32 %v4385_v22, %v3281_v26 }
 0x1a6   :  { %v3333_v37 = vadd.f32 %v4388_v36, %v3284_v30 }
 0x1b6   :  { %v4405_v29 = vpop.f32.mrb[48].mxu0 }
 0x1b7   :  { %v4433_v38 = vpop.f32.mrb[48].mxu1  ;;  %v4406_v39 = vpop.f32.mrb[49].mxu0 }
 0x1b8   :  { %v4407_v40 = vadd.f32 %v4406_v39, %v4405_v29  ;;  %v4434_v41 = vpop.f32.mrb[49].mxu1  ;;  %v4408_v42 = vpop.f32.mrb[50].mxu0 }
 0x1b9   :  { %v4435_v43 = vadd.f32 %v4434_v41, %v4433_v38  ;;  %v4436_v44 = vpop.f32.mrb[50].mxu1  ;;  %v4409_v45 = vpop.f32.mrb[51].mxu0 }
 0x1ba   :  { %v3371_v46 = vadd.f32 %v4407_v40, %v3322_v16  ;;  %v4410_v47 = vadd.f32 %v4409_v45, %v4408_v42  ;;  %v4437_v48 = vpop.f32.mrb[51].mxu1 }
 0x1bb   :  { %v4438_v31 = vadd.f32 %v4437_v48, %v4436_v44 }
 0x1bc   :  { %v3420_v49 = vadd.f32 %v4435_v43, %v3371_v46  ;;  %v3374_v50 = vadd.f32 %v4410_v47, %v3325_v19 }
 0x1be   :  { %v3423_v51 = vadd.f32 %v4438_v31, %v3374_v50  ;;  %v4411_v52 = vpop.f32.mrb[52].mxu0 }
 0x1bf   :  { %v4412_v53 = vpop.f32.mrb[53].mxu0  ;;  %v4439_v59 = vpop.f32.mrb[52].mxu1 }
 0x1c0   :  { %v4413_v54 = vadd.f32 %v4412_v53, %v4411_v52  ;;  %v4414_v55 = vpop.f32.mrb[54].mxu0  ;;  %v4440_v61 = vpop.f32.mrb[53].mxu1 }
 0x1c1   :  { %v4415_v56 = vpop.f32.mrb[55].mxu0  ;;  %v4441_v63 = vadd.f32 %v4440_v61, %v4439_v59  ;;  %v4442_v0 = vpop.f32.mrb[54].mxu1 }
 0x1c2   :  { %v3379_v57 = vadd.f32 %v4413_v54, %v3330_v35  ;;  %v4416_v58 = vadd.f32 %v4415_v56, %v4414_v55  ;;  %v4443_v1 = vpop.f32.mrb[55].mxu1 }
 0x1c3   :  { %v4444_v62 = vadd.f32 %v4443_v1, %v4442_v0 }
 0x1c4   :  { %v3382_v60 = vadd.f32 %v4416_v58, %v3333_v37  ;;  %v3428_v3 = vadd.f32 %v4441_v63, %v3379_v57 }
 0x1c6   :  { %v3431_v4 = vadd.f32 %v4444_v62, %v3382_v60 }
 0x1d8   :  { %v4489_v6 = vpop.f32.mrb[56].mxu1 }
 0x1d9   :  { %v4490_v9 = vpop.f32.mrb[57].mxu1 }
 0x1da   :  { %v4491_v11 = vadd.f32 %v4490_v9, %v4489_v6  ;;  %v4492_v2 = vpop.f32.mrb[58].mxu1 }
 0x1db   :  { %v4493_v15 = vpop.f32.mrb[59].mxu1 }
 0x1dc   :  { %v4494_v16 = vadd.f32 %v4493_v15, %v4492_v2 }
 0x1e0   :  { %v4495_v28 = vpop.f32.mrb[60].mxu1 }
 0x1e1   :  { %v4496_v32 = vpop.f32.mrb[61].mxu1 }
 0x1e2   :  { %v4497_v22 = vadd.f32 %v4496_v32, %v4495_v28  ;;  %v4498_v33 = vpop.f32.mrb[62].mxu1 }
 0x1e3   :  { %v4499_v34 = vpop.f32.mrb[63].mxu1 }
 0x1e4   :  { %v4500_v36 = vadd.f32 %v4499_v34, %v4498_v33 }
 0x1f1   :  { %v4461_v5 = vpop.f32.mrb[56].mxu0 }
 0x1f2   :  { %v4462_v7 = vpop.f32.mrb[57].mxu0 }
 0x1f3   :  { %v4463_v8 = vadd.f32 %v4462_v7, %v4461_v5  ;;  %v4464_v10 = vpop.f32.mrb[58].mxu0 }
 0x1f4   :  { %v4465_v12 = vpop.f32.mrb[59].mxu0 }
 0x1f5   :  { %v3469_v13 = vadd.f32 %v4463_v8, %v3420_v49  ;;  %v4466_v14 = vadd.f32 %v4465_v12, %v4464_v10 }
 0x1f7   :  { %v3518_v17 = vadd.f32 %v4491_v11, %v3469_v13  ;;  %v3472_v18 = vadd.f32 %v4466_v14, %v3423_v51 }
 0x1f9   :  { %v3521_v19 = vadd.f32 %v4494_v16, %v3472_v18  ;;  %v4467_v20 = vpop.f32.mrb[60].mxu0 }
 0x1fa   :  { %v4468_v21 = vpop.f32.mrb[61].mxu0 }
 0x1fb   :  { %v4469_v23 = vadd.f32 %v4468_v21, %v4467_v20  ;;  %v4470_v24 = vpop.f32.mrb[62].mxu0 }
 0x1fc   :  { %v4471_v25 = vpop.f32.mrb[63].mxu0 }
 0x1fd   :  { %v3477_v26 = vadd.f32 %v4469_v23, %v3428_v3  ;;  %v4472_v27 = vadd.f32 %v4471_v25, %v4470_v24 }
 0x1ff   :  { %v3480_v30 = vadd.f32 %v4472_v27, %v3431_v4  ;;  %v3526_v35 = vadd.f32 %v4497_v22, %v3477_v26 }
 0x201   :  { %v3529_v37 = vadd.f32 %v4500_v36, %v3480_v30 }
 0x211   :  { %v4517_v29 = vpop.f32.mrb[64].mxu0 }
 0x212   :  { %v4518_v38 = vpop.f32.mrb[65].mxu0  ;;  %v4545_v39 = vpop.f32.mrb[64].mxu1 }
 0x213   :  { %v4519_v40 = vadd.f32 %v4518_v38, %v4517_v29  ;;  %v4520_v41 = vpop.f32.mrb[66].mxu0  ;;  %v4546_v42 = vpop.f32.mrb[65].mxu1 }
 0x214   :  { %v4521_v43 = vpop.f32.mrb[67].mxu0  ;;  %v4547_v45 = vadd.f32 %v4546_v42, %v4545_v39  ;;  %v4548_v46 = vpop.f32.mrb[66].mxu1 }
 0x215   :  { %v3567_v44 = vadd.f32 %v4519_v40, %v3518_v17  ;;  %v4522_v47 = vadd.f32 %v4521_v43, %v4520_v41  ;;  %v4549_v48 = vpop.f32.mrb[67].mxu1 }
 0x216   :  { %v4550_v50 = vadd.f32 %v4549_v48, %v4548_v46 }
 0x217   :  { %v3616_v31 = vadd.f32 %v4547_v45, %v3567_v44  ;;  %v3570_v49 = vadd.f32 %v4522_v47, %v3521_v19 }
 0x219   :  { %v3630_v51 = vsub.f32 0.0, %v3616_v31  ;;  %v3619_v52 = vadd.f32 %v4550_v50, %v3570_v49  ;;  %v4523_v53 = vpop.f32.mrb[68].mxu0 }
 0x21a   :  { %v4524_v54 = vpop.f32.mrb[69].mxu0  ;;  %v4551_v57 = vpop.f32.mrb[68].mxu1 }
 0x21b   :  { %v3634_v55 = vmul.f32 1.442695, %v3630_v51  ;;  %v3631_v56 = vsub.f32 0.0, %v3619_v52  ;;  %v4525_v58 = vadd.f32 %v4524_v54, %v4523_v53  ;;  %v4526_v59 = vpop.f32.mrb[70].mxu0  ;;  %v4552_v60 = vpop.f32.mrb[69].mxu1 }
 0x21c   :  { %v4527_v61 = vpop.f32.mrb[71].mxu0  ;;  %v4553_v1 = vadd.f32 %v4552_v60, %v4551_v57  ;;  %v4554_v3 = vpop.f32.mrb[70].mxu1 }
 0x21d   :  { %4953 = vpow2.f32 %v3634_v55  ;;  %v3636_v63 = vmul.f32 1.442695, %v3631_v56  ;;  %v3575_v0 = vadd.f32 %v4525_v58, %v3526_v35  ;;  %v4528_v62 = vadd.f32 %v4527_v61, %v4526_v59  ;;  %v4555_v4 = vpop.f32.mrb[71].mxu1 }
 0x21e   :  { %v4556_v6 = vadd.f32 %v4555_v4, %v4554_v3 }
 0x21f   :  { %4955 = vpow2.f32 %v3636_v63  ;;  %v3624_v5 = vadd.f32 %v4553_v1, %v3575_v0  ;;  %v3578_v7 = vadd.f32 %v4528_v62, %v3529_v37 }
 0x221   :  { %v3632_v8 = vsub.f32 0.0, %v3624_v5  ;;  %v3627_v9 = vadd.f32 %v4556_v6, %v3578_v7 }
 0x223   :  { %v3638_v10 = vmul.f32 1.442695, %v3632_v8  ;;  %v3633_v11 = vsub.f32 0.0, %v3627_v9 }
 0x225   :  { %4957 = vpow2.f32 %v3638_v10  ;;  %v3640_v2 = vmul.f32 1.442695, %v3633_v11 }
 0x227   :  { %v4954_v12 = vpop.eup %4953  ;;  %4959 = vpow2.f32 %v3640_v2 }
 0x228   :  { %v3642_v13 = vadd.f32 1.0, %v4954_v12 }
 0x229   :  { %v4956_v14 = vpop.eup %4955 }
 0x22a   :  { %v3643_v15 = vadd.f32 1.0, %v4956_v14  ;;  %4961 = vrcp.f32 %v3642_v13 }
 0x22c   :  { %4963 = vrcp.f32 %v3643_v15 }
 0x22f   :  { %v4958_v16 = vpop.eup %4957 }
 0x230   :  { %v3644_v17 = vadd.f32 1.0, %v4958_v16 }
 0x231   :  { %v4960_v18 = vpop.eup %4959 }
 0x232   :  { %v3645_v19 = vadd.f32 1.0, %v4960_v18  ;;  %4965 = vrcp.f32 %v3644_v17 }
 0x234   :  { %v4962_v20 = vpop.eup %4961  ;;  %4967 = vrcp.f32 %v3645_v19 }
 0x236   :  { %v4964_v21 = vpop.eup %4963 }
 0x237   :  { %v4045_v23 = vpack.c.bf16 %v4964_v21, %v4962_v20 }
 0x239   :  { %4046 = vst [vmem:[%s6093_s2] sm:$0xff] %v4045_v23  }
 0x23c   :  { %v4966_v24 = vpop.eup %4965 }
 0x23e   :  { %v4968_v25 = vpop.eup %4967 }
 0x23f   :  { %v4050_v26 = vpack.c.bf16 %v4968_v25, %v4966_v24 }
 0x241   :  { %4052 = vst [vmem:[%s6093_s2 + $0x8] sm:$0xff] %v4050_v26  }

</bundles_post_ra>
